<compile_context>
chip_gen: v5e
topology: v5e:2x2
jax: 0.10.0
libtpu: 0.0.40
codegen_flags: <defaults>
</compile_context>

<pallas_src>
import math
from functools import lru_cache

import jax
import jax.numpy as jnp
from jax.experimental import pallas as pl
from jax.experimental.pallas import tpu as pltpu


# -----------------------------------------------------------------------------
# MyConv2d (stride 1, padding = K//2) — MXU matmul formulation
# -----------------------------------------------------------------------------
@lru_cache(maxsize=None)
def _make_conv2d_same(B, C_in, C_out, H, W, K, dtype_name):
    dtype = jnp.dtype(dtype_name)
    pad = K // 2
    Hp, Wp = H + 2 * pad, W + 2 * pad
    Hout = Hp - (K - 1)              # == H for odd K
    Wout = Wp - (K - 1)              # == W for odd K
    Nflat = Hout * Wp                # lane-dense flattened output (padded width)
    Lpad = Hp * Wp + K               # flat padded image + tail so every tap slice is in-bounds

    # TODO(synk): for large C_in*Hp*Wp (v7x: 64 MiB VMEM) add halo row-tiling of the
    # input block instead of pulling the whole image per grid step.

    def kernel(w_ref, b_ref, x_ref, o_ref, xp_ref):
        # w_ref : (K*K, C_out, C_in)  VMEM, taps-major weights
        # b_ref : (C_out, 1)          VMEM
        # x_ref : (1, C_in, H, W)     VMEM, one image
        # o_ref : (1, C_out, Nflat)   VMEM, lane-dense output (padded-width columns)
        # xp_ref: (C_in, Lpad)        VMEM scratch: zero-padded, width-flattened image
        xp_ref[...] = jnp.zeros_like(xp_ref)
        for h in range(H):
            xp_ref[:, pl.ds((h + pad) * Wp + pad, W)] = x_ref[0, :, h, :]

        acc = jnp.zeros((C_out, Nflat), jnp.float32)
        for kh in range(K):
            for kw in range(K):
                tap = kh * K + kw
                slab = xp_ref[:, pl.ds(kh * Wp + kw, Nflat)]      # (C_in, Nflat)
                w_tap = w_ref[tap]                                # (C_out, C_in)
                if C_in == 1:
                    # Degenerate contraction: cheaper as a VPU outer product.
                    acc = acc + w_tap * slab
                else:
                    acc = acc + jnp.dot(w_tap, slab,
                                        preferred_element_type=jnp.float32)
        o_ref[0] = (acc + b_ref[...]).astype(o_ref.dtype)

    flops = 2 * B * C_out * C_in * K * K * Nflat
    bytes_accessed = 4 * (B * C_in * H * W + K * K * C_out * C_in + C_out
                          + B * C_out * Nflat)

    conv = pl.pallas_call(
        kernel,
        out_shape=jax.ShapeDtypeStruct((B, C_out, Nflat), dtype),
        grid=(B,),
        in_specs=[
            pl.BlockSpec((K * K, C_out, C_in), lambda b: (0, 0, 0)),   # weights (VMEM)
            pl.BlockSpec((C_out, 1), lambda b: (0, 0)),                # bias    (VMEM)
            pl.BlockSpec((1, C_in, H, W), lambda b: (b, 0, 0, 0)),     # one image
        ],
        out_specs=pl.BlockSpec((1, C_out, Nflat), lambda b: (b, 0, 0)),
        scratch_shapes=[pltpu.VMEM((C_in, Lpad), dtype)],
        compiler_params=pltpu.CompilerParams(dimension_semantics=("parallel",)),
        cost_estimate=pl.CostEstimate(flops=flops, transcendentals=0,
                                      bytes_accessed=bytes_accessed),
    )
    return conv, (Hout, Wout, Wp)


def conv2d_same(x, weight, bias):
    """F.conv2d(x, weight, bias, stride=1, padding=K//2) in NCHW via Pallas."""
    B, C_in, H, W = x.shape
    C_out, _, K, _ = weight.shape
    conv, (Hout, Wout, Wp) = _make_conv2d_same(B, C_in, C_out, H, W, K, str(x.dtype))
    # taps-major layout: w_taps[kh*K + kw] == weight[:, :, kh, kw]
    w_taps = jnp.transpose(weight, (2, 3, 0, 1)).reshape(K * K, C_out, C_in)
    out_flat = conv(w_taps.astype(x.dtype),
                    bias.reshape(C_out, 1).astype(jnp.float32),
                    x)
    # Drop the K-1 wrap-around columns per row and restore NCHW.
    return out_flat.reshape(B, C_out, Hout, Wp)[:, :, :, :Wout]


# -----------------------------------------------------------------------------
# BatchNorm2d (training-mode batch statistics) fused with ReLU
# -----------------------------------------------------------------------------
@lru_cache(maxsize=None)
def _make_bn_relu(C, N, eps):
    def kernel(x_ref, g_ref, b_ref, o_ref):
        x = x_ref[...].astype(jnp.float32)
        mean = jnp.mean(x, axis=1, keepdims=True)
        xc = x - mean
        var = jnp.mean(xc * xc, axis=1, keepdims=True)      # biased var, like torch BN
        inv = jax.lax.rsqrt(var + eps)
        y = xc * inv * g_ref[...] + b_ref[...]
        o_ref[...] = jnp.maximum(y, 0.0).astype(o_ref.dtype)

    return pl.pallas_call(
        kernel, out_shape=jax.ShapeDtypeStruct((C, N), jnp.float32))


def batchnorm_relu(x, gamma, beta, eps=1e-5):
    B, C, H, W = x.shape
    x2 = jnp.transpose(x, (1, 0, 2, 3)).reshape(C, B * H * W)   # lane-dense slab
    y2 = _make_bn_relu(C, B * H * W, float(eps))(
        x2.astype(jnp.float32),
        gamma.reshape(C, 1).astype(jnp.float32),
        beta.reshape(C, 1).astype(jnp.float32))
    return jnp.transpose(y2.reshape(C, B, H, W), (1, 0, 2, 3)).astype(x.dtype)


# -----------------------------------------------------------------------------
# Pure data reshuffles (left to XLA at 4-16 px spatial sizes)
# -----------------------------------------------------------------------------
def maxpool2(x):
    # nn.MaxPool2d(2): 2x2 window, stride 2.
    B, C, H, W = x.shape
    return x.reshape(B, C, H // 2, 2, W // 2, 2).max(axis=(3, 5))


def upsample2_nearest(x):
    # nn.Upsample(scale_factor=2), default mode='nearest'.
    return jnp.repeat(jnp.repeat(x, 2, axis=2), 2, axis=3)


# -----------------------------------------------------------------------------
# CNN parameters and forward pass
# -----------------------------------------------------------------------------
def init_cnn_params(key, kernel, num_filters):
    def conv_init(k, c_in, c_out):
        stdv = 1.0 / math.sqrt(c_in * kernel * kernel)   # MyConv2d.reset_parameters
        kw_, kb_ = jax.random.split(k)
        w = jax.random.uniform(kw_, (c_out, c_in, kernel, kernel), jnp.float32, -stdv, stdv)
        b = jax.random.uniform(kb_, (c_out,), jnp.float32, -stdv, stdv)
        return w, b

    def bn_init(c):   # torch BatchNorm2d default affine init
        return jnp.ones((c,), jnp.float32), jnp.zeros((c,), jnp.float32)

    nf = num_filters
    ks = jax.random.split(key, 6)
    return {
        "conv1": conv_init(ks[0], 1, nf),          "bn1": bn_init(nf),
        "conv2": conv_init(ks[1], nf, 2 * nf),     "bn2": bn_init(2 * nf),
        "conv3": conv_init(ks[2], 2 * nf, 2 * nf), "bn3": bn_init(2 * nf),
        "conv4": conv_init(ks[3], 2 * nf, nf),     "bn4": bn_init(nf),
        "conv5": conv_init(ks[4], nf, 24),         "bn5": bn_init(24),
        "conv6": conv_init(ks[5], 24, 24),
    }


def cnn_forward(params, x, conv_fn, bn_relu_fn):
    w, b = params["conv1"]; g, s = params["bn1"]
    h = bn_relu_fn(maxpool2(conv_fn(x, w, b)), g, s)              # downconv1
    w, b = params["conv2"]; g, s = params["bn2"]
    h = bn_relu_fn(maxpool2(conv_fn(h, w, b)), g, s)              # downconv2
    w, b = params["conv3"]; g, s = params["bn3"]
    h = bn_relu_fn(conv_fn(h, w, b), g, s)                        # rfconv
    w, b = params["conv4"]; g, s = params["bn4"]
    h = bn_relu_fn(upsample2_nearest(conv_fn(h, w, b)), g, s)     # upconv1
    w, b = params["conv5"]; g, s = params["bn5"]
    h = bn_relu_fn(upsample2_nearest(conv_fn(h, w, b)), g, s)     # upconv2
    w, b = params["conv6"]
    return conv_fn(h, w, b)                                       # finalconv


# -----------------------------------------------------------------------------
# Pure-JAX reference (exact F.conv2d / BN / ReLU semantics) for the self-check
# -----------------------------------------------------------------------------
def ref_conv2d_same(x, weight, bias):
    K = weight.shape[-1]
    pad = K // 2
    y = jax.lax.conv_general_dilated(
        x, weight, window_strides=(1, 1), padding=((pad, pad), (pad, pad)),
        dimension_numbers=("NCHW", "OIHW", "NCHW"),
        precision=jax.lax.Precision.HIGHEST)
    return y + bias[None, :, None, None]


def ref_bn_relu(x, gamma, beta, eps=1e-5):
    m = jnp.mean(x, axis=(0, 2, 3), keepdims=True)
    v = jnp.mean((x - m) ** 2, axis=(0, 2, 3), keepdims=True)
    y = (x - m) * jax.lax.rsqrt(v + eps) * gamma[None, :, None, None] \
        + beta[None, :, None, None]
    return jnp.maximum(y, 0.0)


if __name__ == "__main__":
    KERNEL, NUM_FILTERS, NUM_COLORS = 3, 4, 24   # CNN(kernel=3, num_filters=4, num_colors=24)
    B, H, W = 2, 16, 16

    key = jax.random.PRNGKey(0)
    kp, kx = jax.random.split(key)
    params = init_cnn_params(kp, KERNEL, NUM_FILTERS)
    x = jax.random.normal(kx, (B, 1, H, W), jnp.float32)   # grayscale input (1 channel)

    fwd = jax.jit(lambda p, xx: cnn_forward(p, xx, conv2d_same, batchnorm_relu))
    out = jax.block_until_ready(fwd(params, x))

    ref = cnn_forward(params, x, ref_conv2d_same, ref_bn_relu)

    assert out.shape == (B, 24, H, W) == ref.shape, (out.shape, ref.shape)
    max_err = float(jnp.max(jnp.abs(out - ref)))
    assert jnp.allclose(out, ref, atol=2e-3, rtol=2e-3), max_err
    print("KERNEL_OK")
</pallas_src>

<mosaic_0001>
module attributes {stable_mosaic.version = 11 : i64} {
  func.func @kernel(%arg0: i32, %arg1: memref<9x4x1xf32, #tpu.memory_space<vmem>>, %arg2: memref<4x1xf32, #tpu.memory_space<vmem>>, %arg3: memref<1x1x16x16xf32, #tpu.memory_space<vmem>>, %arg4: memref<1x4x288xf32, #tpu.memory_space<vmem>>, %arg5: memref<1x327xf32, #tpu.memory_space<vmem>>) attributes {dimension_semantics = [#tpu.dimension_semantics<parallel>], iteration_bounds = array<i64: 2>, scalar_prefetch = 0 : i64, scratch_operands = 1 : i64, tpu.core_type = #tpu.core_type<tc>, window_params = [{pipeline_mode = #tpu.pipeline_mode<synchronous>, transform_indices = @transform_0, window_bounds = array<i64: 9, 4, 1>}, {pipeline_mode = #tpu.pipeline_mode<synchronous>, transform_indices = @transform_1, window_bounds = array<i64: 4, 1>}, {transform_indices = @transform_2, window_bounds = array<i64: 1, 1, 16, 16>}, {transform_indices = @transform_3, window_bounds = array<i64: 1, 4, 288>}]} {
    %cst = arith.constant 0.000000e+00 : f32
    %0 = vector.broadcast %cst : f32 to vector<1x327xf32>
    %c0 = arith.constant 0 : index
    %c0_0 = arith.constant 0 : index
    %1 = vector.load %arg5[%c0, %c0_0] : memref<1x327xf32, #tpu.memory_space<vmem>>, vector<1x327xf32>
    tpu.vector_store %arg5[%c0, %c0_0], %0 {strides = array<i32>} : memref<1x327xf32, #tpu.memory_space<vmem>>, vector<1x327xf32>,
    %c0_1 = arith.constant 0 : index
    %c0_2 = arith.constant 0 : index
    %c0_3 = arith.constant 0 : index
    %c0_4 = arith.constant 0 : index
    %2 = vector.load %arg3[%c0_1, %c0_2, %c0_3, %c0_4] : memref<1x1x16x16xf32, #tpu.memory_space<vmem>>, vector<1x1x1x16xf32>
    %3 = vector.shape_cast %2 : vector<1x1x1x16xf32> to vector<1x16xf32>
    %c0_5 = arith.constant 0 : index
    %c19 = arith.constant 19 : index
    %4 = vector.load %arg5[%c0_5, %c19] : memref<1x327xf32, #tpu.memory_space<vmem>>, vector<1x16xf32>
    tpu.vector_store %arg5[%c0_5, %c19], %3 {strides = array<i32>} : memref<1x327xf32, #tpu.memory_space<vmem>>, vector<1x16xf32>,
    %c0_6 = arith.constant 0 : index
    %c0_7 = arith.constant 0 : index
    %c1 = arith.constant 1 : index
    %c0_8 = arith.constant 0 : index
    %5 = vector.load %arg3[%c0_6, %c0_7, %c1, %c0_8] : memref<1x1x16x16xf32, #tpu.memory_space<vmem>>, vector<1x1x1x16xf32>
    %6 = vector.shape_cast %5 : vector<1x1x1x16xf32> to vector<1x16xf32>
    %c0_9 = arith.constant 0 : index
    %c37 = arith.constant 37 : index
    %7 = vector.load %arg5[%c0_9, %c37] : memref<1x327xf32, #tpu.memory_space<vmem>>, vector<1x16xf32>
    tpu.vector_store %arg5[%c0_9, %c37], %6 {strides = array<i32>} : memref<1x327xf32, #tpu.memory_space<vmem>>, vector<1x16xf32>,
    %c0_10 = arith.constant 0 : index
    %c0_11 = arith.constant 0 : index
    %c2 = arith.constant 2 : index
    %c0_12 = arith.constant 0 : index
    %8 = vector.load %arg3[%c0_10, %c0_11, %c2, %c0_12] : memref<1x1x16x16xf32, #tpu.memory_space<vmem>>, vector<1x1x1x16xf32>
    %9 = vector.shape_cast %8 : vector<1x1x1x16xf32> to vector<1x16xf32>
    %c0_13 = arith.constant 0 : index
    %c55 = arith.constant 55 : index
    %10 = vector.load %arg5[%c0_13, %c55] : memref<1x327xf32, #tpu.memory_space<vmem>>, vector<1x16xf32>
    tpu.vector_store %arg5[%c0_13, %c55], %9 {strides = array<i32>} : memref<1x327xf32, #tpu.memory_space<vmem>>, vector<1x16xf32>,
    %c0_14 = arith.constant 0 : index
    %c0_15 = arith.constant 0 : index
    %c3 = arith.constant 3 : index
    %c0_16 = arith.constant 0 : index
    %11 = vector.load %arg3[%c0_14, %c0_15, %c3, %c0_16] : memref<1x1x16x16xf32, #tpu.memory_space<vmem>>, vector<1x1x1x16xf32>
    %12 = vector.shape_cast %11 : vector<1x1x1x16xf32> to vector<1x16xf32>
    %c0_17 = arith.constant 0 : index
    %c73 = arith.constant 73 : index
    %13 = vector.load %arg5[%c0_17, %c73] : memref<1x327xf32, #tpu.memory_space<vmem>>, vector<1x16xf32>
    tpu.vector_store %arg5[%c0_17, %c73], %12 {strides = array<i32>} : memref<1x327xf32, #tpu.memory_space<vmem>>, vector<1x16xf32>,
    %c0_18 = arith.constant 0 : index
    %c0_19 = arith.constant 0 : index
    %c4 = arith.constant 4 : index
    %c0_20 = arith.constant 0 : index
    %14 = vector.load %arg3[%c0_18, %c0_19, %c4, %c0_20] : memref<1x1x16x16xf32, #tpu.memory_space<vmem>>, vector<1x1x1x16xf32>
    %15 = vector.shape_cast %14 : vector<1x1x1x16xf32> to vector<1x16xf32>
    %c0_21 = arith.constant 0 : index
    %c91 = arith.constant 91 : index
    %16 = vector.load %arg5[%c0_21, %c91] : memref<1x327xf32, #tpu.memory_space<vmem>>, vector<1x16xf32>
    tpu.vector_store %arg5[%c0_21, %c91], %15 {strides = array<i32>} : memref<1x327xf32, #tpu.memory_space<vmem>>, vector<1x16xf32>,
    %c0_22 = arith.constant 0 : index
    %c0_23 = arith.constant 0 : index
    %c5 = arith.constant 5 : index
    %c0_24 = arith.constant 0 : index
    %17 = vector.load %arg3[%c0_22, %c0_23, %c5, %c0_24] : memref<1x1x16x16xf32, #tpu.memory_space<vmem>>, vector<1x1x1x16xf32>
    %18 = vector.shape_cast %17 : vector<1x1x1x16xf32> to vector<1x16xf32>
    %c0_25 = arith.constant 0 : index
    %c109 = arith.constant 109 : index
    %19 = vector.load %arg5[%c0_25, %c109] : memref<1x327xf32, #tpu.memory_space<vmem>>, vector<1x16xf32>
    tpu.vector_store %arg5[%c0_25, %c109], %18 {strides = array<i32>} : memref<1x327xf32, #tpu.memory_space<vmem>>, vector<1x16xf32>,
    %c0_26 = arith.constant 0 : index
    %c0_27 = arith.constant 0 : index
    %c6 = arith.constant 6 : index
    %c0_28 = arith.constant 0 : index
    %20 = vector.load %arg3[%c0_26, %c0_27, %c6, %c0_28] : memref<1x1x16x16xf32, #tpu.memory_space<vmem>>, vector<1x1x1x16xf32>
    %21 = vector.shape_cast %20 : vector<1x1x1x16xf32> to vector<1x16xf32>
    %c0_29 = arith.constant 0 : index
    %c127 = arith.constant 127 : index
    %22 = vector.load %arg5[%c0_29, %c127] : memref<1x327xf32, #tpu.memory_space<vmem>>, vector<1x16xf32>
    tpu.vector_store %arg5[%c0_29, %c127], %21 {strides = array<i32>} : memref<1x327xf32, #tpu.memory_space<vmem>>, vector<1x16xf32>,
    %c0_30 = arith.constant 0 : index
    %c0_31 = arith.constant 0 : index
    %c7 = arith.constant 7 : index
    %c0_32 = arith.constant 0 : index
    %23 = vector.load %arg3[%c0_30, %c0_31, %c7, %c0_32] : memref<1x1x16x16xf32, #tpu.memory_space<vmem>>, vector<1x1x1x16xf32>
    %24 = vector.shape_cast %23 : vector<1x1x1x16xf32> to vector<1x16xf32>
    %c0_33 = arith.constant 0 : index
    %c145 = arith.constant 145 : index
    %25 = vector.load %arg5[%c0_33, %c145] : memref<1x327xf32, #tpu.memory_space<vmem>>, vector<1x16xf32>
    tpu.vector_store %arg5[%c0_33, %c145], %24 {strides = array<i32>} : memref<1x327xf32, #tpu.memory_space<vmem>>, vector<1x16xf32>,
    %c0_34 = arith.constant 0 : index
    %c0_35 = arith.constant 0 : index
    %c8 = arith.constant 8 : index
    %c0_36 = arith.constant 0 : index
    %26 = vector.load %arg3[%c0_34, %c0_35, %c8, %c0_36] : memref<1x1x16x16xf32, #tpu.memory_space<vmem>>, vector<1x1x1x16xf32>
    %27 = vector.shape_cast %26 : vector<1x1x1x16xf32> to vector<1x16xf32>
    %c0_37 = arith.constant 0 : index
    %c163 = arith.constant 163 : index
    %28 = vector.load %arg5[%c0_37, %c163] : memref<1x327xf32, #tpu.memory_space<vmem>>, vector<1x16xf32>
    tpu.vector_store %arg5[%c0_37, %c163], %27 {strides = array<i32>} : memref<1x327xf32, #tpu.memory_space<vmem>>, vector<1x16xf32>,
    %c0_38 = arith.constant 0 : index
    %c0_39 = arith.constant 0 : index
    %c9 = arith.constant 9 : index
    %c0_40 = arith.constant 0 : index
    %29 = vector.load %arg3[%c0_38, %c0_39, %c9, %c0_40] : memref<1x1x16x16xf32, #tpu.memory_space<vmem>>, vector<1x1x1x16xf32>
    %30 = vector.shape_cast %29 : vector<1x1x1x16xf32> to vector<1x16xf32>
    %c0_41 = arith.constant 0 : index
    %c181 = arith.constant 181 : index
    %31 = vector.load %arg5[%c0_41, %c181] : memref<1x327xf32, #tpu.memory_space<vmem>>, vector<1x16xf32>
    tpu.vector_store %arg5[%c0_41, %c181], %30 {strides = array<i32>} : memref<1x327xf32, #tpu.memory_space<vmem>>, vector<1x16xf32>,
    %c0_42 = arith.constant 0 : index
    %c0_43 = arith.constant 0 : index
    %c10 = arith.constant 10 : index
    %c0_44 = arith.constant 0 : index
    %32 = vector.load %arg3[%c0_42, %c0_43, %c10, %c0_44] : memref<1x1x16x16xf32, #tpu.memory_space<vmem>>, vector<1x1x1x16xf32>
    %33 = vector.shape_cast %32 : vector<1x1x1x16xf32> to vector<1x16xf32>
    %c0_45 = arith.constant 0 : index
    %c199 = arith.constant 199 : index
    %34 = vector.load %arg5[%c0_45, %c199] : memref<1x327xf32, #tpu.memory_space<vmem>>, vector<1x16xf32>
    tpu.vector_store %arg5[%c0_45, %c199], %33 {strides = array<i32>} : memref<1x327xf32, #tpu.memory_space<vmem>>, vector<1x16xf32>,
    %c0_46 = arith.constant 0 : index
    %c0_47 = arith.constant 0 : index
    %c11 = arith.constant 11 : index
    %c0_48 = arith.constant 0 : index
    %35 = vector.load %arg3[%c0_46, %c0_47, %c11, %c0_48] : memref<1x1x16x16xf32, #tpu.memory_space<vmem>>, vector<1x1x1x16xf32>
    %36 = vector.shape_cast %35 : vector<1x1x1x16xf32> to vector<1x16xf32>
    %c0_49 = arith.constant 0 : index
    %c217 = arith.constant 217 : index
    %37 = vector.load %arg5[%c0_49, %c217] : memref<1x327xf32, #tpu.memory_space<vmem>>, vector<1x16xf32>
    tpu.vector_store %arg5[%c0_49, %c217], %36 {strides = array<i32>} : memref<1x327xf32, #tpu.memory_space<vmem>>, vector<1x16xf32>,
    %c0_50 = arith.constant 0 : index
    %c0_51 = arith.constant 0 : index
    %c12 = arith.constant 12 : index
    %c0_52 = arith.constant 0 : index
    %38 = vector.load %arg3[%c0_50, %c0_51, %c12, %c0_52] : memref<1x1x16x16xf32, #tpu.memory_space<vmem>>, vector<1x1x1x16xf32>
    %39 = vector.shape_cast %38 : vector<1x1x1x16xf32> to vector<1x16xf32>
    %c0_53 = arith.constant 0 : index
    %c235 = arith.constant 235 : index
    %40 = vector.load %arg5[%c0_53, %c235] : memref<1x327xf32, #tpu.memory_space<vmem>>, vector<1x16xf32>
    tpu.vector_store %arg5[%c0_53, %c235], %39 {strides = array<i32>} : memref<1x327xf32, #tpu.memory_space<vmem>>, vector<1x16xf32>,
    %c0_54 = arith.constant 0 : index
    %c0_55 = arith.constant 0 : index
    %c13 = arith.constant 13 : index
    %c0_56 = arith.constant 0 : index
    %41 = vector.load %arg3[%c0_54, %c0_55, %c13, %c0_56] : memref<1x1x16x16xf32, #tpu.memory_space<vmem>>, vector<1x1x1x16xf32>
    %42 = vector.shape_cast %41 : vector<1x1x1x16xf32> to vector<1x16xf32>
    %c0_57 = arith.constant 0 : index
    %c253 = arith.constant 253 : index
    %43 = vector.load %arg5[%c0_57, %c253] : memref<1x327xf32, #tpu.memory_space<vmem>>, vector<1x16xf32>
    tpu.vector_store %arg5[%c0_57, %c253], %42 {strides = array<i32>} : memref<1x327xf32, #tpu.memory_space<vmem>>, vector<1x16xf32>,
    %c0_58 = arith.constant 0 : index
    %c0_59 = arith.constant 0 : index
    %c14 = arith.constant 14 : index
    %c0_60 = arith.constant 0 : index
    %44 = vector.load %arg3[%c0_58, %c0_59, %c14, %c0_60] : memref<1x1x16x16xf32, #tpu.memory_space<vmem>>, vector<1x1x1x16xf32>
    %45 = vector.shape_cast %44 : vector<1x1x1x16xf32> to vector<1x16xf32>
    %c0_61 = arith.constant 0 : index
    %c271 = arith.constant 271 : index
    %46 = vector.load %arg5[%c0_61, %c271] : memref<1x327xf32, #tpu.memory_space<vmem>>, vector<1x16xf32>
    tpu.vector_store %arg5[%c0_61, %c271], %45 {strides = array<i32>} : memref<1x327xf32, #tpu.memory_space<vmem>>, vector<1x16xf32>,
    %c0_62 = arith.constant 0 : index
    %c0_63 = arith.constant 0 : index
    %c15 = arith.constant 15 : index
    %c0_64 = arith.constant 0 : index
    %47 = vector.load %arg3[%c0_62, %c0_63, %c15, %c0_64] : memref<1x1x16x16xf32, #tpu.memory_space<vmem>>, vector<1x1x1x16xf32>
    %48 = vector.shape_cast %47 : vector<1x1x1x16xf32> to vector<1x16xf32>
    %c0_65 = arith.constant 0 : index
    %c289 = arith.constant 289 : index
    %49 = vector.load %arg5[%c0_65, %c289] : memref<1x327xf32, #tpu.memory_space<vmem>>, vector<1x16xf32>
    tpu.vector_store %arg5[%c0_65, %c289], %48 {strides = array<i32>} : memref<1x327xf32, #tpu.memory_space<vmem>>, vector<1x16xf32>,
    %cst_66 = arith.constant 0.000000e+00 : f32
    %50 = vector.broadcast %cst_66 : f32 to vector<4x288xf32>
    %c0_67 = arith.constant 0 : index
    %c0_68 = arith.constant 0 : index
    %51 = vector.load %arg5[%c0_67, %c0_68] : memref<1x327xf32, #tpu.memory_space<vmem>>, vector<1x288xf32>
    %c0_69 = arith.constant 0 : index
    %c0_70 = arith.constant 0 : index
    %c0_71 = arith.constant 0 : index
    %52 = vector.load %arg1[%c0_69, %c0_70, %c0_71] : memref<9x4x1xf32, #tpu.memory_space<vmem>>, vector<1x4x1xf32>
    %53 = vector.shape_cast %52 : vector<1x4x1xf32> to vector<4x1xf32>
    %54 = vector.broadcast %53 : vector<4x1xf32> to vector<4x288xf32>
    %55 = vector.broadcast %51 : vector<1x288xf32> to vector<4x288xf32>
    %56 = arith.mulf %54, %55 : vector<4x288xf32>
    %57 = arith.addf %50, %56 : vector<4x288xf32>
    %c0_72 = arith.constant 0 : index
    %c1_73 = arith.constant 1 : index
    %58 = vector.load %arg5[%c0_72, %c1_73] : memref<1x327xf32, #tpu.memory_space<vmem>>, vector<1x288xf32>
    %c1_74 = arith.constant 1 : index
    %c0_75 = arith.constant 0 : index
    %c0_76 = arith.constant 0 : index
    %59 = vector.load %arg1[%c1_74, %c0_75, %c0_76] : memref<9x4x1xf32, #tpu.memory_space<vmem>>, vector<1x4x1xf32>
    %60 = vector.shape_cast %59 : vector<1x4x1xf32> to vector<4x1xf32>
    %61 = vector.broadcast %60 : vector<4x1xf32> to vector<4x288xf32>
    %62 = vector.broadcast %58 : vector<1x288xf32> to vector<4x288xf32>
    %63 = arith.mulf %61, %62 : vector<4x288xf32>
    %64 = arith.addf %57, %63 : vector<4x288xf32>
    %c0_77 = arith.constant 0 : index
    %c2_78 = arith.constant 2 : index
    %65 = vector.load %arg5[%c0_77, %c2_78] : memref<1x327xf32, #tpu.memory_space<vmem>>, vector<1x288xf32>
    %c2_79 = arith.constant 2 : index
    %c0_80 = arith.constant 0 : index
    %c0_81 = arith.constant 0 : index
    %66 = vector.load %arg1[%c2_79, %c0_80, %c0_81] : memref<9x4x1xf32, #tpu.memory_space<vmem>>, vector<1x4x1xf32>
    %67 = vector.shape_cast %66 : vector<1x4x1xf32> to vector<4x1xf32>
    %68 = vector.broadcast %67 : vector<4x1xf32> to vector<4x288xf32>
    %69 = vector.broadcast %65 : vector<1x288xf32> to vector<4x288xf32>
    %70 = arith.mulf %68, %69 : vector<4x288xf32>
    %71 = arith.addf %64, %70 : vector<4x288xf32>
    %c0_82 = arith.constant 0 : index
    %c18 = arith.constant 18 : index
    %72 = vector.load %arg5[%c0_82, %c18] : memref<1x327xf32, #tpu.memory_space<vmem>>, vector<1x288xf32>
    %c3_83 = arith.constant 3 : index
    %c0_84 = arith.constant 0 : index
    %c0_85 = arith.constant 0 : index
    %73 = vector.load %arg1[%c3_83, %c0_84, %c0_85] : memref<9x4x1xf32, #tpu.memory_space<vmem>>, vector<1x4x1xf32>
    %74 = vector.shape_cast %73 : vector<1x4x1xf32> to vector<4x1xf32>
    %75 = vector.broadcast %74 : vector<4x1xf32> to vector<4x288xf32>
    %76 = vector.broadcast %72 : vector<1x288xf32> to vector<4x288xf32>
    %77 = arith.mulf %75, %76 : vector<4x288xf32>
    %78 = arith.addf %71, %77 : vector<4x288xf32>
    %c0_86 = arith.constant 0 : index
    %c19_87 = arith.constant 19 : index
    %79 = vector.load %arg5[%c0_86, %c19_87] : memref<1x327xf32, #tpu.memory_space<vmem>>, vector<1x288xf32>
    %c4_88 = arith.constant 4 : index
    %c0_89 = arith.constant 0 : index
    %c0_90 = arith.constant 0 : index
    %80 = vector.load %arg1[%c4_88, %c0_89, %c0_90] : memref<9x4x1xf32, #tpu.memory_space<vmem>>, vector<1x4x1xf32>
    %81 = vector.shape_cast %80 : vector<1x4x1xf32> to vector<4x1xf32>
    %82 = vector.broadcast %81 : vector<4x1xf32> to vector<4x288xf32>
    %83 = vector.broadcast %79 : vector<1x288xf32> to vector<4x288xf32>
    %84 = arith.mulf %82, %83 : vector<4x288xf32>
    %85 = arith.addf %78, %84 : vector<4x288xf32>
    %c0_91 = arith.constant 0 : index
    %c20 = arith.constant 20 : index
    %86 = vector.load %arg5[%c0_91, %c20] : memref<1x327xf32, #tpu.memory_space<vmem>>, vector<1x288xf32>
    %c5_92 = arith.constant 5 : index
    %c0_93 = arith.constant 0 : index
    %c0_94 = arith.constant 0 : index
    %87 = vector.load %arg1[%c5_92, %c0_93, %c0_94] : memref<9x4x1xf32, #tpu.memory_space<vmem>>, vector<1x4x1xf32>
    %88 = vector.shape_cast %87 : vector<1x4x1xf32> to vector<4x1xf32>
    %89 = vector.broadcast %88 : vector<4x1xf32> to vector<4x288xf32>
    %90 = vector.broadcast %86 : vector<1x288xf32> to vector<4x288xf32>
    %91 = arith.mulf %89, %90 : vector<4x288xf32>
    %92 = arith.addf %85, %91 : vector<4x288xf32>
    %c0_95 = arith.constant 0 : index
    %c36 = arith.constant 36 : index
    %93 = vector.load %arg5[%c0_95, %c36] : memref<1x327xf32, #tpu.memory_space<vmem>>, vector<1x288xf32>
    %c6_96 = arith.constant 6 : index
    %c0_97 = arith.constant 0 : index
    %c0_98 = arith.constant 0 : index
    %94 = vector.load %arg1[%c6_96, %c0_97, %c0_98] : memref<9x4x1xf32, #tpu.memory_space<vmem>>, vector<1x4x1xf32>
    %95 = vector.shape_cast %94 : vector<1x4x1xf32> to vector<4x1xf32>
    %96 = vector.broadcast %95 : vector<4x1xf32> to vector<4x288xf32>
    %97 = vector.broadcast %93 : vector<1x288xf32> to vector<4x288xf32>
    %98 = arith.mulf %96, %97 : vector<4x288xf32>
    %99 = arith.addf %92, %98 : vector<4x288xf32>
    %c0_99 = arith.constant 0 : index
    %c37_100 = arith.constant 37 : index
    %100 = vector.load %arg5[%c0_99, %c37_100] : memref<1x327xf32, #tpu.memory_space<vmem>>, vector<1x288xf32>
    %c7_101 = arith.constant 7 : index
    %c0_102 = arith.constant 0 : index
    %c0_103 = arith.constant 0 : index
    %101 = vector.load %arg1[%c7_101, %c0_102, %c0_103] : memref<9x4x1xf32, #tpu.memory_space<vmem>>, vector<1x4x1xf32>
    %102 = vector.shape_cast %101 : vector<1x4x1xf32> to vector<4x1xf32>
    %103 = vector.broadcast %102 : vector<4x1xf32> to vector<4x288xf32>
    %104 = vector.broadcast %100 : vector<1x288xf32> to vector<4x288xf32>
    %105 = arith.mulf %103, %104 : vector<4x288xf32>
    %106 = arith.addf %99, %105 : vector<4x288xf32>
    %c0_104 = arith.constant 0 : index
    %c38 = arith.constant 38 : index
    %107 = vector.load %arg5[%c0_104, %c38] : memref<1x327xf32, #tpu.memory_space<vmem>>, vector<1x288xf32>
    %c8_105 = arith.constant 8 : index
    %c0_106 = arith.constant 0 : index
    %c0_107 = arith.constant 0 : index
    %108 = vector.load %arg1[%c8_105, %c0_106, %c0_107] : memref<9x4x1xf32, #tpu.memory_space<vmem>>, vector<1x4x1xf32>
    %109 = vector.shape_cast %108 : vector<1x4x1xf32> to vector<4x1xf32>
    %110 = vector.broadcast %109 : vector<4x1xf32> to vector<4x288xf32>
    %111 = vector.broadcast %107 : vector<1x288xf32> to vector<4x288xf32>
    %112 = arith.mulf %110, %111 : vector<4x288xf32>
    %113 = arith.addf %106, %112 : vector<4x288xf32>
    %c0_108 = arith.constant 0 : index
    %c0_109 = arith.constant 0 : index
    %114 = vector.load %arg2[%c0_108, %c0_109] : memref<4x1xf32, #tpu.memory_space<vmem>>, vector<4x1xf32>
    %115 = vector.broadcast %114 : vector<4x1xf32> to vector<4x288xf32>
    %116 = arith.addf %113, %115 : vector<4x288xf32>
    %c0_110 = arith.constant 0 : index
    %c0_111 = arith.constant 0 : index
    %c0_112 = arith.constant 0 : index
    %117 = vector.load %arg4[%c0_110, %c0_111, %c0_112] : memref<1x4x288xf32, #tpu.memory_space<vmem>>, vector<1x4x288xf32>
    %118 = vector.shape_cast %117 : vector<1x4x288xf32> to vector<4x288xf32>
    %119 = vector.shape_cast %116 : vector<4x288xf32> to vector<1x4x288xf32>
    tpu.vector_store %arg4[%c0_110, %c0_111, %c0_112], %119 {strides = array<i32>} : memref<1x4x288xf32, #tpu.memory_space<vmem>>, vector<1x4x288xf32>,
    return
  }
  func.func @transform_0(%arg0: i32) -> (i32, i32, i32) {
    %c0_i32 = arith.constant 0 : i32
    %c0_i32_0 = arith.constant 0 : i32
    %c0_i32_1 = arith.constant 0 : i32
    %c0_i32_2 = arith.constant 0 : i32
    return %c0_i32, %c0_i32_0, %c0_i32_1 : i32, i32, i32
  }
  func.func @transform_1(%arg0: i32) -> (i32, i32) {
    %c0_i32 = arith.constant 0 : i32
    %c0_i32_0 = arith.constant 0 : i32
    %c0_i32_1 = arith.constant 0 : i32
    return %c0_i32, %c0_i32_0 : i32, i32
  }
  func.func @transform_2(%arg0: i32) -> (i32, i32, i32, i32) {
    %c0_i32 = arith.constant 0 : i32
    %c0_i32_0 = arith.constant 0 : i32
    %c0_i32_1 = arith.constant 0 : i32
    %c0_i32_2 = arith.constant 0 : i32
    return %arg0, %c0_i32, %c0_i32_0, %c0_i32_1 : i32, i32, i32, i32
  }
  func.func @transform_3(%arg0: i32) -> (i32, i32, i32) {
    %c0_i32 = arith.constant 0 : i32
    %c0_i32_0 = arith.constant 0 : i32
    %c0_i32_1 = arith.constant 0 : i32
    return %arg0, %c0_i32, %c0_i32_0 : i32, i32, i32
  }
}

module attributes {stable_mosaic.version = 11 : i64} {
  func.func @kernel(%arg0: memref<4x128xf32, #tpu.memory_space<vmem>>, %arg1: memref<4x1xf32, #tpu.memory_space<vmem>>, %arg2: memref<4x1xf32, #tpu.memory_space<vmem>>, %arg3: memref<4x128xf32, #tpu.memory_space<vmem>>) attributes {dimension_semantics = [], scalar_prefetch = 0 : i64, scratch_operands = 0 : i64, tpu.core_type = #tpu.core_type<tc>} {
    %c0 = arith.constant 0 : index
    %c0_0 = arith.constant 0 : index
    %0 = vector.load %arg0[%c0, %c0_0] : memref<4x128xf32, #tpu.memory_space<vmem>>, vector<4x128xf32>
    %cst = arith.constant dense<0.000000e+00> : vector<4xf32>
    %1 = vector.multi_reduction <add>, %0, %cst [1] : vector<4x128xf32> to vector<4xf32>
    %2 = vector.shape_cast %1 : vector<4xf32> to vector<4x1xf32>
    %cst_1 = arith.constant 1.280000e+02 : f32
    %3 = vector.broadcast %cst_1 : f32 to vector<4x1xf32>
    %4 = arith.divf %2, %3 : vector<4x1xf32>
    %5 = vector.broadcast %4 : vector<4x1xf32> to vector<4x128xf32>
    %6 = arith.subf %0, %5 : vector<4x128xf32>
    %7 = arith.mulf %6, %6 : vector<4x128xf32>
    %cst_2 = arith.constant dense<0.000000e+00> : vector<4xf32>
    %8 = vector.multi_reduction <add>, %7, %cst_2 [1] : vector<4x128xf32> to vector<4xf32>
    %9 = vector.shape_cast %8 : vector<4xf32> to vector<4x1xf32>
    %cst_3 = arith.constant 1.280000e+02 : f32
    %10 = vector.broadcast %cst_3 : f32 to vector<4x1xf32>
    %11 = arith.divf %9, %10 : vector<4x1xf32>
    %cst_4 = arith.constant 9.99999974E-6 : f32
    %12 = vector.broadcast %cst_4 : f32 to vector<4x1xf32>
    %13 = arith.addf %11, %12 : vector<4x1xf32>
    %14 = math.rsqrt %13 : vector<4x1xf32>
    %15 = vector.broadcast %14 : vector<4x1xf32> to vector<4x128xf32>
    %16 = arith.mulf %6, %15 : vector<4x128xf32>
    %c0_5 = arith.constant 0 : index
    %c0_6 = arith.constant 0 : index
    %17 = vector.load %arg1[%c0_5, %c0_6] : memref<4x1xf32, #tpu.memory_space<vmem>>, vector<4x1xf32>
    %18 = vector.broadcast %17 : vector<4x1xf32> to vector<4x128xf32>
    %19 = arith.mulf %16, %18 : vector<4x128xf32>
    %c0_7 = arith.constant 0 : index
    %c0_8 = arith.constant 0 : index
    %20 = vector.load %arg2[%c0_7, %c0_8] : memref<4x1xf32, #tpu.memory_space<vmem>>, vector<4x1xf32>
    %21 = vector.broadcast %20 : vector<4x1xf32> to vector<4x128xf32>
    %22 = arith.addf %19, %21 : vector<4x128xf32>
    %cst_9 = arith.constant 0.000000e+00 : f32
    %23 = vector.broadcast %cst_9 : f32 to vector<4x128xf32>
    %24 = arith.maximumf %22, %23 : vector<4x128xf32>
    %c0_10 = arith.constant 0 : index
    %c0_11 = arith.constant 0 : index
    %25 = vector.load %arg3[%c0_10, %c0_11] : memref<4x128xf32, #tpu.memory_space<vmem>>, vector<4x128xf32>
    tpu.vector_store %arg3[%c0_10, %c0_11], %24 {strides = array<i32>} : memref<4x128xf32, #tpu.memory_space<vmem>>, vector<4x128xf32>,
    return
  }
}

module attributes {stable_mosaic.version = 11 : i64} {
  func.func @kernel(%arg0: i32, %arg1: memref<9x8x4xf32, #tpu.memory_space<vmem>>, %arg2: memref<8x1xf32, #tpu.memory_space<vmem>>, %arg3: memref<1x4x8x8xf32, #tpu.memory_space<vmem>>, %arg4: memref<1x8x80xf32, #tpu.memory_space<vmem>>, %arg5: memref<4x103xf32, #tpu.memory_space<vmem>>) attributes {dimension_semantics = [#tpu.dimension_semantics<parallel>], iteration_bounds = array<i64: 2>, scalar_prefetch = 0 : i64, scratch_operands = 1 : i64, tpu.core_type = #tpu.core_type<tc>, window_params = [{pipeline_mode = #tpu.pipeline_mode<synchronous>, transform_indices = @transform_0, window_bounds = array<i64: 9, 8, 4>}, {pipeline_mode = #tpu.pipeline_mode<synchronous>, transform_indices = @transform_1, window_bounds = array<i64: 8, 1>}, {transform_indices = @transform_2, window_bounds = array<i64: 1, 4, 8, 8>}, {transform_indices = @transform_3, window_bounds = array<i64: 1, 8, 80>}]} {
    %cst = arith.constant 0.000000e+00 : f32
    %0 = vector.broadcast %cst : f32 to vector<4x103xf32>
    %c0 = arith.constant 0 : index
    %c0_0 = arith.constant 0 : index
    %1 = vector.load %arg5[%c0, %c0_0] : memref<4x103xf32, #tpu.memory_space<vmem>>, vector<4x103xf32>
    tpu.vector_store %arg5[%c0, %c0_0], %0 {strides = array<i32>} : memref<4x103xf32, #tpu.memory_space<vmem>>, vector<4x103xf32>,
    %c0_1 = arith.constant 0 : index
    %c0_2 = arith.constant 0 : index
    %c0_3 = arith.constant 0 : index
    %c0_4 = arith.constant 0 : index
    %2 = vector.load %arg3[%c0_1, %c0_2, %c0_3, %c0_4] : memref<1x4x8x8xf32, #tpu.memory_space<vmem>>, vector<1x4x1x8xf32>
    %3 = vector.shape_cast %2 : vector<1x4x1x8xf32> to vector<4x8xf32>
    %c0_5 = arith.constant 0 : index
    %c11 = arith.constant 11 : index
    %4 = vector.load %arg5[%c0_5, %c11] : memref<4x103xf32, #tpu.memory_space<vmem>>, vector<4x8xf32>
    tpu.vector_store %arg5[%c0_5, %c11], %3 {strides = array<i32>} : memref<4x103xf32, #tpu.memory_space<vmem>>, vector<4x8xf32>,
    %c0_6 = arith.constant 0 : index
    %c0_7 = arith.constant 0 : index
    %c1 = arith.constant 1 : index
    %c0_8 = arith.constant 0 : index
    %5 = vector.load %arg3[%c0_6, %c0_7, %c1, %c0_8] : memref<1x4x8x8xf32, #tpu.memory_space<vmem>>, vector<1x4x1x8xf32>
    %6 = vector.shape_cast %5 : vector<1x4x1x8xf32> to vector<4x8xf32>
    %c0_9 = arith.constant 0 : index
    %c21 = arith.constant 21 : index
    %7 = vector.load %arg5[%c0_9, %c21] : memref<4x103xf32, #tpu.memory_space<vmem>>, vector<4x8xf32>
    tpu.vector_store %arg5[%c0_9, %c21], %6 {strides = array<i32>} : memref<4x103xf32, #tpu.memory_space<vmem>>, vector<4x8xf32>,
    %c0_10 = arith.constant 0 : index
    %c0_11 = arith.constant 0 : index
    %c2 = arith.constant 2 : index
    %c0_12 = arith.constant 0 : index
    %8 = vector.load %arg3[%c0_10, %c0_11, %c2, %c0_12] : memref<1x4x8x8xf32, #tpu.memory_space<vmem>>, vector<1x4x1x8xf32>
    %9 = vector.shape_cast %8 : vector<1x4x1x8xf32> to vector<4x8xf32>
    %c0_13 = arith.constant 0 : index
    %c31 = arith.constant 31 : index
    %10 = vector.load %arg5[%c0_13, %c31] : memref<4x103xf32, #tpu.memory_space<vmem>>, vector<4x8xf32>
    tpu.vector_store %arg5[%c0_13, %c31], %9 {strides = array<i32>} : memref<4x103xf32, #tpu.memory_space<vmem>>, vector<4x8xf32>,
    %c0_14 = arith.constant 0 : index
    %c0_15 = arith.constant 0 : index
    %c3 = arith.constant 3 : index
    %c0_16 = arith.constant 0 : index
    %11 = vector.load %arg3[%c0_14, %c0_15, %c3, %c0_16] : memref<1x4x8x8xf32, #tpu.memory_space<vmem>>, vector<1x4x1x8xf32>
    %12 = vector.shape_cast %11 : vector<1x4x1x8xf32> to vector<4x8xf32>
    %c0_17 = arith.constant 0 : index
    %c41 = arith.constant 41 : index
    %13 = vector.load %arg5[%c0_17, %c41] : memref<4x103xf32, #tpu.memory_space<vmem>>, vector<4x8xf32>
    tpu.vector_store %arg5[%c0_17, %c41], %12 {strides = array<i32>} : memref<4x103xf32, #tpu.memory_space<vmem>>, vector<4x8xf32>,
    %c0_18 = arith.constant 0 : index
    %c0_19 = arith.constant 0 : index
    %c4 = arith.constant 4 : index
    %c0_20 = arith.constant 0 : index
    %14 = vector.load %arg3[%c0_18, %c0_19, %c4, %c0_20] : memref<1x4x8x8xf32, #tpu.memory_space<vmem>>, vector<1x4x1x8xf32>
    %15 = vector.shape_cast %14 : vector<1x4x1x8xf32> to vector<4x8xf32>
    %c0_21 = arith.constant 0 : index
    %c51 = arith.constant 51 : index
    %16 = vector.load %arg5[%c0_21, %c51] : memref<4x103xf32, #tpu.memory_space<vmem>>, vector<4x8xf32>
    tpu.vector_store %arg5[%c0_21, %c51], %15 {strides = array<i32>} : memref<4x103xf32, #tpu.memory_space<vmem>>, vector<4x8xf32>,
    %c0_22 = arith.constant 0 : index
    %c0_23 = arith.constant 0 : index
    %c5 = arith.constant 5 : index
    %c0_24 = arith.constant 0 : index
    %17 = vector.load %arg3[%c0_22, %c0_23, %c5, %c0_24] : memref<1x4x8x8xf32, #tpu.memory_space<vmem>>, vector<1x4x1x8xf32>
    %18 = vector.shape_cast %17 : vector<1x4x1x8xf32> to vector<4x8xf32>
    %c0_25 = arith.constant 0 : index
    %c61 = arith.constant 61 : index
    %19 = vector.load %arg5[%c0_25, %c61] : memref<4x103xf32, #tpu.memory_space<vmem>>, vector<4x8xf32>
    tpu.vector_store %arg5[%c0_25, %c61], %18 {strides = array<i32>} : memref<4x103xf32, #tpu.memory_space<vmem>>, vector<4x8xf32>,
    %c0_26 = arith.constant 0 : index
    %c0_27 = arith.constant 0 : index
    %c6 = arith.constant 6 : index
    %c0_28 = arith.constant 0 : index
    %20 = vector.load %arg3[%c0_26, %c0_27, %c6, %c0_28] : memref<1x4x8x8xf32, #tpu.memory_space<vmem>>, vector<1x4x1x8xf32>
    %21 = vector.shape_cast %20 : vector<1x4x1x8xf32> to vector<4x8xf32>
    %c0_29 = arith.constant 0 : index
    %c71 = arith.constant 71 : index
    %22 = vector.load %arg5[%c0_29, %c71] : memref<4x103xf32, #tpu.memory_space<vmem>>, vector<4x8xf32>
    tpu.vector_store %arg5[%c0_29, %c71], %21 {strides = array<i32>} : memref<4x103xf32, #tpu.memory_space<vmem>>, vector<4x8xf32>,
    %c0_30 = arith.constant 0 : index
    %c0_31 = arith.constant 0 : index
    %c7 = arith.constant 7 : index
    %c0_32 = arith.constant 0 : index
    %23 = vector.load %arg3[%c0_30, %c0_31, %c7, %c0_32] : memref<1x4x8x8xf32, #tpu.memory_space<vmem>>, vector<1x4x1x8xf32>
    %24 = vector.shape_cast %23 : vector<1x4x1x8xf32> to vector<4x8xf32>
    %c0_33 = arith.constant 0 : index
    %c81 = arith.constant 81 : index
    %25 = vector.load %arg5[%c0_33, %c81] : memref<4x103xf32, #tpu.memory_space<vmem>>, vector<4x8xf32>
    tpu.vector_store %arg5[%c0_33, %c81], %24 {strides = array<i32>} : memref<4x103xf32, #tpu.memory_space<vmem>>, vector<4x8xf32>,
    %cst_34 = arith.constant 0.000000e+00 : f32
    %26 = vector.broadcast %cst_34 : f32 to vector<8x80xf32>
    %c0_35 = arith.constant 0 : index
    %c0_36 = arith.constant 0 : index
    %27 = vector.load %arg5[%c0_35, %c0_36] : memref<4x103xf32, #tpu.memory_space<vmem>>, vector<4x80xf32>
    %c0_37 = arith.constant 0 : index
    %c0_38 = arith.constant 0 : index
    %c0_39 = arith.constant 0 : index
    %28 = vector.load %arg1[%c0_37, %c0_38, %c0_39] : memref<9x8x4xf32, #tpu.memory_space<vmem>>, vector<1x8x4xf32>
    %29 = vector.shape_cast %28 : vector<1x8x4xf32> to vector<8x4xf32>
    %cst_40 = arith.constant dense<0.000000e+00> : vector<8x80xf32>
    %30 = tpu.matmul %29, %27, %cst_40 {dimension_numbers = #tpu.dot_dimension_numbers<[1], [0], [0], [1], [0, 0, 1, 1], [], []>} : vector<8x4xf32>, vector<4x80xf32>, vector<8x80xf32> -> vector<8x80xf32>
    %31 = arith.addf %26, %30 : vector<8x80xf32>
    %c0_41 = arith.constant 0 : index
    %c1_42 = arith.constant 1 : index
    %32 = vector.load %arg5[%c0_41, %c1_42] : memref<4x103xf32, #tpu.memory_space<vmem>>, vector<4x80xf32>
    %c1_43 = arith.constant 1 : index
    %c0_44 = arith.constant 0 : index
    %c0_45 = arith.constant 0 : index
    %33 = vector.load %arg1[%c1_43, %c0_44, %c0_45] : memref<9x8x4xf32, #tpu.memory_space<vmem>>, vector<1x8x4xf32>
    %34 = vector.shape_cast %33 : vector<1x8x4xf32> to vector<8x4xf32>
    %cst_46 = arith.constant dense<0.000000e+00> : vector<8x80xf32>
    %35 = tpu.matmul %34, %32, %cst_46 {dimension_numbers = #tpu.dot_dimension_numbers<[1], [0], [0], [1], [0, 0, 1, 1], [], []>} : vector<8x4xf32>, vector<4x80xf32>, vector<8x80xf32> -> vector<8x80xf32>
    %36 = arith.addf %31, %35 : vector<8x80xf32>
    %c0_47 = arith.constant 0 : index
    %c2_48 = arith.constant 2 : index
    %37 = vector.load %arg5[%c0_47, %c2_48] : memref<4x103xf32, #tpu.memory_space<vmem>>, vector<4x80xf32>
    %c2_49 = arith.constant 2 : index
    %c0_50 = arith.constant 0 : index
    %c0_51 = arith.constant 0 : index
    %38 = vector.load %arg1[%c2_49, %c0_50, %c0_51] : memref<9x8x4xf32, #tpu.memory_space<vmem>>, vector<1x8x4xf32>
    %39 = vector.shape_cast %38 : vector<1x8x4xf32> to vector<8x4xf32>
    %cst_52 = arith.constant dense<0.000000e+00> : vector<8x80xf32>
    %40 = tpu.matmul %39, %37, %cst_52 {dimension_numbers = #tpu.dot_dimension_numbers<[1], [0], [0], [1], [0, 0, 1, 1], [], []>} : vector<8x4xf32>, vector<4x80xf32>, vector<8x80xf32> -> vector<8x80xf32>
    %41 = arith.addf %36, %40 : vector<8x80xf32>
    %c0_53 = arith.constant 0 : index
    %c10 = arith.constant 10 : index
    %42 = vector.load %arg5[%c0_53, %c10] : memref<4x103xf32, #tpu.memory_space<vmem>>, vector<4x80xf32>
    %c3_54 = arith.constant 3 : index
    %c0_55 = arith.constant 0 : index
    %c0_56 = arith.constant 0 : index
    %43 = vector.load %arg1[%c3_54, %c0_55, %c0_56] : memref<9x8x4xf32, #tpu.memory_space<vmem>>, vector<1x8x4xf32>
    %44 = vector.shape_cast %43 : vector<1x8x4xf32> to vector<8x4xf32>
    %cst_57 = arith.constant dense<0.000000e+00> : vector<8x80xf32>
    %45 = tpu.matmul %44, %42, %cst_57 {dimension_numbers = #tpu.dot_dimension_numbers<[1], [0], [0], [1], [0, 0, 1, 1], [], []>} : vector<8x4xf32>, vector<4x80xf32>, vector<8x80xf32> -> vector<8x80xf32>
    %46 = arith.addf %41, %45 : vector<8x80xf32>
    %c0_58 = arith.constant 0 : index
    %c11_59 = arith.constant 11 : index
    %47 = vector.load %arg5[%c0_58, %c11_59] : memref<4x103xf32, #tpu.memory_space<vmem>>, vector<4x80xf32>
    %c4_60 = arith.constant 4 : index
    %c0_61 = arith.constant 0 : index
    %c0_62 = arith.constant 0 : index
    %48 = vector.load %arg1[%c4_60, %c0_61, %c0_62] : memref<9x8x4xf32, #tpu.memory_space<vmem>>, vector<1x8x4xf32>
    %49 = vector.shape_cast %48 : vector<1x8x4xf32> to vector<8x4xf32>
    %cst_63 = arith.constant dense<0.000000e+00> : vector<8x80xf32>
    %50 = tpu.matmul %49, %47, %cst_63 {dimension_numbers = #tpu.dot_dimension_numbers<[1], [0], [0], [1], [0, 0, 1, 1], [], []>} : vector<8x4xf32>, vector<4x80xf32>, vector<8x80xf32> -> vector<8x80xf32>
    %51 = arith.addf %46, %50 : vector<8x80xf32>
    %c0_64 = arith.constant 0 : index
    %c12 = arith.constant 12 : index
    %52 = vector.load %arg5[%c0_64, %c12] : memref<4x103xf32, #tpu.memory_space<vmem>>, vector<4x80xf32>
    %c5_65 = arith.constant 5 : index
    %c0_66 = arith.constant 0 : index
    %c0_67 = arith.constant 0 : index
    %53 = vector.load %arg1[%c5_65, %c0_66, %c0_67] : memref<9x8x4xf32, #tpu.memory_space<vmem>>, vector<1x8x4xf32>
    %54 = vector.shape_cast %53 : vector<1x8x4xf32> to vector<8x4xf32>
    %cst_68 = arith.constant dense<0.000000e+00> : vector<8x80xf32>
    %55 = tpu.matmul %54, %52, %cst_68 {dimension_numbers = #tpu.dot_dimension_numbers<[1], [0], [0], [1], [0, 0, 1, 1], [], []>} : vector<8x4xf32>, vector<4x80xf32>, vector<8x80xf32> -> vector<8x80xf32>
    %56 = arith.addf %51, %55 : vector<8x80xf32>
    %c0_69 = arith.constant 0 : index
    %c20 = arith.constant 20 : index
    %57 = vector.load %arg5[%c0_69, %c20] : memref<4x103xf32, #tpu.memory_space<vmem>>, vector<4x80xf32>
    %c6_70 = arith.constant 6 : index
    %c0_71 = arith.constant 0 : index
    %c0_72 = arith.constant 0 : index
    %58 = vector.load %arg1[%c6_70, %c0_71, %c0_72] : memref<9x8x4xf32, #tpu.memory_space<vmem>>, vector<1x8x4xf32>
    %59 = vector.shape_cast %58 : vector<1x8x4xf32> to vector<8x4xf32>
    %cst_73 = arith.constant dense<0.000000e+00> : vector<8x80xf32>
    %60 = tpu.matmul %59, %57, %cst_73 {dimension_numbers = #tpu.dot_dimension_numbers<[1], [0], [0], [1], [0, 0, 1, 1], [], []>} : vector<8x4xf32>, vector<4x80xf32>, vector<8x80xf32> -> vector<8x80xf32>
    %61 = arith.addf %56, %60 : vector<8x80xf32>
    %c0_74 = arith.constant 0 : index
    %c21_75 = arith.constant 21 : index
    %62 = vector.load %arg5[%c0_74, %c21_75] : memref<4x103xf32, #tpu.memory_space<vmem>>, vector<4x80xf32>
    %c7_76 = arith.constant 7 : index
    %c0_77 = arith.constant 0 : index
    %c0_78 = arith.constant 0 : index
    %63 = vector.load %arg1[%c7_76, %c0_77, %c0_78] : memref<9x8x4xf32, #tpu.memory_space<vmem>>, vector<1x8x4xf32>
    %64 = vector.shape_cast %63 : vector<1x8x4xf32> to vector<8x4xf32>
    %cst_79 = arith.constant dense<0.000000e+00> : vector<8x80xf32>
    %65 = tpu.matmul %64, %62, %cst_79 {dimension_numbers = #tpu.dot_dimension_numbers<[1], [0], [0], [1], [0, 0, 1, 1], [], []>} : vector<8x4xf32>, vector<4x80xf32>, vector<8x80xf32> -> vector<8x80xf32>
    %66 = arith.addf %61, %65 : vector<8x80xf32>
    %c0_80 = arith.constant 0 : index
    %c22 = arith.constant 22 : index
    %67 = vector.load %arg5[%c0_80, %c22] : memref<4x103xf32, #tpu.memory_space<vmem>>, vector<4x80xf32>
    %c8 = arith.constant 8 : index
    %c0_81 = arith.constant 0 : index
    %c0_82 = arith.constant 0 : index
    %68 = vector.load %arg1[%c8, %c0_81, %c0_82] : memref<9x8x4xf32, #tpu.memory_space<vmem>>, vector<1x8x4xf32>
    %69 = vector.shape_cast %68 : vector<1x8x4xf32> to vector<8x4xf32>
    %cst_83 = arith.constant dense<0.000000e+00> : vector<8x80xf32>
    %70 = tpu.matmul %69, %67, %cst_83 {dimension_numbers = #tpu.dot_dimension_numbers<[1], [0], [0], [1], [0, 0, 1, 1], [], []>} : vector<8x4xf32>, vector<4x80xf32>, vector<8x80xf32> -> vector<8x80xf32>
    %71 = arith.addf %66, %70 : vector<8x80xf32>
    %c0_84 = arith.constant 0 : index
    %c0_85 = arith.constant 0 : index
    %72 = vector.load %arg2[%c0_84, %c0_85] : memref<8x1xf32, #tpu.memory_space<vmem>>, vector<8x1xf32>
    %73 = vector.broadcast %72 : vector<8x1xf32> to vector<8x80xf32>
    %74 = arith.addf %71, %73 : vector<8x80xf32>
    %c0_86 = arith.constant 0 : index
    %c0_87 = arith.constant 0 : index
    %c0_88 = arith.constant 0 : index
    %75 = vector.load %arg4[%c0_86, %c0_87, %c0_88] : memref<1x8x80xf32, #tpu.memory_space<vmem>>, vector<1x8x80xf32>
    %76 = vector.shape_cast %75 : vector<1x8x80xf32> to vector<8x80xf32>
    %77 = vector.shape_cast %74 : vector<8x80xf32> to vector<1x8x80xf32>
    tpu.vector_store %arg4[%c0_86, %c0_87, %c0_88], %77 {strides = array<i32>} : memref<1x8x80xf32, #tpu.memory_space<vmem>>, vector<1x8x80xf32>,
    return
  }
  func.func @transform_0(%arg0: i32) -> (i32, i32, i32) {
    %c0_i32 = arith.constant 0 : i32
    %c0_i32_0 = arith.constant 0 : i32
    %c0_i32_1 = arith.constant 0 : i32
    %c0_i32_2 = arith.constant 0 : i32
    return %c0_i32, %c0_i32_0, %c0_i32_1 : i32, i32, i32
  }
  func.func @transform_1(%arg0: i32) -> (i32, i32) {
    %c0_i32 = arith.constant 0 : i32
    %c0_i32_0 = arith.constant 0 : i32
    %c0_i32_1 = arith.constant 0 : i32
    return %c0_i32, %c0_i32_0 : i32, i32
  }
  func.func @transform_2(%arg0: i32) -> (i32, i32, i32, i32) {
    %c0_i32 = arith.constant 0 : i32
    %c0_i32_0 = arith.constant 0 : i32
    %c0_i32_1 = arith.constant 0 : i32
    %c0_i32_2 = arith.constant 0 : i32
    return %arg0, %c0_i32, %c0_i32_0, %c0_i32_1 : i32, i32, i32, i32
  }
  func.func @transform_3(%arg0: i32) -> (i32, i32, i32) {
    %c0_i32 = arith.constant 0 : i32
    %c0_i32_0 = arith.constant 0 : i32
    %c0_i32_1 = arith.constant 0 : i32
    return %arg0, %c0_i32, %c0_i32_0 : i32, i32, i32
  }
}

module attributes {stable_mosaic.version = 11 : i64} {
  func.func @kernel(%arg0: i32, %arg1: memref<9x8x8xf32, #tpu.memory_space<vmem>>, %arg2: memref<8x1xf32, #tpu.memory_space<vmem>>, %arg3: memref<1x8x4x4xf32, #tpu.memory_space<vmem>>, %arg4: memref<1x8x24xf32, #tpu.memory_space<vmem>>, %arg5: memref<8x39xf32, #tpu.memory_space<vmem>>) attributes {dimension_semantics = [#tpu.dimension_semantics<parallel>], iteration_bounds = array<i64: 2>, scalar_prefetch = 0 : i64, scratch_operands = 1 : i64, tpu.core_type = #tpu.core_type<tc>, window_params = [{pipeline_mode = #tpu.pipeline_mode<synchronous>, transform_indices = @transform_0, window_bounds = array<i64: 9, 8, 8>}, {pipeline_mode = #tpu.pipeline_mode<synchronous>, transform_indices = @transform_1, window_bounds = array<i64: 8, 1>}, {transform_indices = @transform_2, window_bounds = array<i64: 1, 8, 4, 4>}, {transform_indices = @transform_3, window_bounds = array<i64: 1, 8, 24>}]} {
    %cst = arith.constant 0.000000e+00 : f32
    %0 = vector.broadcast %cst : f32 to vector<8x39xf32>
    %c0 = arith.constant 0 : index
    %c0_0 = arith.constant 0 : index
    %1 = vector.load %arg5[%c0, %c0_0] : memref<8x39xf32, #tpu.memory_space<vmem>>, vector<8x39xf32>
    tpu.vector_store %arg5[%c0, %c0_0], %0 {strides = array<i32>} : memref<8x39xf32, #tpu.memory_space<vmem>>, vector<8x39xf32>,
    %c0_1 = arith.constant 0 : index
    %c0_2 = arith.constant 0 : index
    %c0_3 = arith.constant 0 : index
    %c0_4 = arith.constant 0 : index
    %2 = vector.load %arg3[%c0_1, %c0_2, %c0_3, %c0_4] : memref<1x8x4x4xf32, #tpu.memory_space<vmem>>, vector<1x8x1x4xf32>
    %3 = vector.shape_cast %2 : vector<1x8x1x4xf32> to vector<8x4xf32>
    %c0_5 = arith.constant 0 : index
    %c7 = arith.constant 7 : index
    %4 = vector.load %arg5[%c0_5, %c7] : memref<8x39xf32, #tpu.memory_space<vmem>>, vector<8x4xf32>
    tpu.vector_store %arg5[%c0_5, %c7], %3 {strides = array<i32>} : memref<8x39xf32, #tpu.memory_space<vmem>>, vector<8x4xf32>,
    %c0_6 = arith.constant 0 : index
    %c0_7 = arith.constant 0 : index
    %c1 = arith.constant 1 : index
    %c0_8 = arith.constant 0 : index
    %5 = vector.load %arg3[%c0_6, %c0_7, %c1, %c0_8] : memref<1x8x4x4xf32, #tpu.memory_space<vmem>>, vector<1x8x1x4xf32>
    %6 = vector.shape_cast %5 : vector<1x8x1x4xf32> to vector<8x4xf32>
    %c0_9 = arith.constant 0 : index
    %c13 = arith.constant 13 : index
    %7 = vector.load %arg5[%c0_9, %c13] : memref<8x39xf32, #tpu.memory_space<vmem>>, vector<8x4xf32>
    tpu.vector_store %arg5[%c0_9, %c13], %6 {strides = array<i32>} : memref<8x39xf32, #tpu.memory_space<vmem>>, vector<8x4xf32>,
    %c0_10 = arith.constant 0 : index
    %c0_11 = arith.constant 0 : index
    %c2 = arith.constant 2 : index
    %c0_12 = arith.constant 0 : index
    %8 = vector.load %arg3[%c0_10, %c0_11, %c2, %c0_12] : memref<1x8x4x4xf32, #tpu.memory_space<vmem>>, vector<1x8x1x4xf32>
    %9 = vector.shape_cast %8 : vector<1x8x1x4xf32> to vector<8x4xf32>
    %c0_13 = arith.constant 0 : index
    %c19 = arith.constant 19 : index
    %10 = vector.load %arg5[%c0_13, %c19] : memref<8x39xf32, #tpu.memory_space<vmem>>, vector<8x4xf32>
    tpu.vector_store %arg5[%c0_13, %c19], %9 {strides = array<i32>} : memref<8x39xf32, #tpu.memory_space<vmem>>, vector<8x4xf32>,
    %c0_14 = arith.constant 0 : index
    %c0_15 = arith.constant 0 : index
    %c3 = arith.constant 3 : index
    %c0_16 = arith.constant 0 : index
    %11 = vector.load %arg3[%c0_14, %c0_15, %c3, %c0_16] : memref<1x8x4x4xf32, #tpu.memory_space<vmem>>, vector<1x8x1x4xf32>
    %12 = vector.shape_cast %11 : vector<1x8x1x4xf32> to vector<8x4xf32>
    %c0_17 = arith.constant 0 : index
    %c25 = arith.constant 25 : index
    %13 = vector.load %arg5[%c0_17, %c25] : memref<8x39xf32, #tpu.memory_space<vmem>>, vector<8x4xf32>
    tpu.vector_store %arg5[%c0_17, %c25], %12 {strides = array<i32>} : memref<8x39xf32, #tpu.memory_space<vmem>>, vector<8x4xf32>,
    %cst_18 = arith.constant 0.000000e+00 : f32
    %14 = vector.broadcast %cst_18 : f32 to vector<8x24xf32>
    %c0_19 = arith.constant 0 : index
    %c0_20 = arith.constant 0 : index
    %15 = vector.load %arg5[%c0_19, %c0_20] : memref<8x39xf32, #tpu.memory_space<vmem>>, vector<8x24xf32>
    %c0_21 = arith.constant 0 : index
    %c0_22 = arith.constant 0 : index
    %c0_23 = arith.constant 0 : index
    %16 = vector.load %arg1[%c0_21, %c0_22, %c0_23] : memref<9x8x8xf32, #tpu.memory_space<vmem>>, vector<1x8x8xf32>
    %17 = vector.shape_cast %16 : vector<1x8x8xf32> to vector<8x8xf32>
    %cst_24 = arith.constant dense<0.000000e+00> : vector<8x24xf32>
    %18 = tpu.matmul %17, %15, %cst_24 {dimension_numbers = #tpu.dot_dimension_numbers<[1], [0], [0], [1], [0, 0, 1, 1], [], []>} : vector<8x8xf32>, vector<8x24xf32>, vector<8x24xf32> -> vector<8x24xf32>
    %19 = arith.addf %14, %18 : vector<8x24xf32>
    %c0_25 = arith.constant 0 : index
    %c1_26 = arith.constant 1 : index
    %20 = vector.load %arg5[%c0_25, %c1_26] : memref<8x39xf32, #tpu.memory_space<vmem>>, vector<8x24xf32>
    %c1_27 = arith.constant 1 : index
    %c0_28 = arith.constant 0 : index
    %c0_29 = arith.constant 0 : index
    %21 = vector.load %arg1[%c1_27, %c0_28, %c0_29] : memref<9x8x8xf32, #tpu.memory_space<vmem>>, vector<1x8x8xf32>
    %22 = vector.shape_cast %21 : vector<1x8x8xf32> to vector<8x8xf32>
    %cst_30 = arith.constant dense<0.000000e+00> : vector<8x24xf32>
    %23 = tpu.matmul %22, %20, %cst_30 {dimension_numbers = #tpu.dot_dimension_numbers<[1], [0], [0], [1], [0, 0, 1, 1], [], []>} : vector<8x8xf32>, vector<8x24xf32>, vector<8x24xf32> -> vector<8x24xf32>
    %24 = arith.addf %19, %23 : vector<8x24xf32>
    %c0_31 = arith.constant 0 : index
    %c2_32 = arith.constant 2 : index
    %25 = vector.load %arg5[%c0_31, %c2_32] : memref<8x39xf32, #tpu.memory_space<vmem>>, vector<8x24xf32>
    %c2_33 = arith.constant 2 : index
    %c0_34 = arith.constant 0 : index
    %c0_35 = arith.constant 0 : index
    %26 = vector.load %arg1[%c2_33, %c0_34, %c0_35] : memref<9x8x8xf32, #tpu.memory_space<vmem>>, vector<1x8x8xf32>
    %27 = vector.shape_cast %26 : vector<1x8x8xf32> to vector<8x8xf32>
    %cst_36 = arith.constant dense<0.000000e+00> : vector<8x24xf32>
    %28 = tpu.matmul %27, %25, %cst_36 {dimension_numbers = #tpu.dot_dimension_numbers<[1], [0], [0], [1], [0, 0, 1, 1], [], []>} : vector<8x8xf32>, vector<8x24xf32>, vector<8x24xf32> -> vector<8x24xf32>
    %29 = arith.addf %24, %28 : vector<8x24xf32>
    %c0_37 = arith.constant 0 : index
    %c6 = arith.constant 6 : index
    %30 = vector.load %arg5[%c0_37, %c6] : memref<8x39xf32, #tpu.memory_space<vmem>>, vector<8x24xf32>
    %c3_38 = arith.constant 3 : index
    %c0_39 = arith.constant 0 : index
    %c0_40 = arith.constant 0 : index
    %31 = vector.load %arg1[%c3_38, %c0_39, %c0_40] : memref<9x8x8xf32, #tpu.memory_space<vmem>>, vector<1x8x8xf32>
    %32 = vector.shape_cast %31 : vector<1x8x8xf32> to vector<8x8xf32>
    %cst_41 = arith.constant dense<0.000000e+00> : vector<8x24xf32>
    %33 = tpu.matmul %32, %30, %cst_41 {dimension_numbers = #tpu.dot_dimension_numbers<[1], [0], [0], [1], [0, 0, 1, 1], [], []>} : vector<8x8xf32>, vector<8x24xf32>, vector<8x24xf32> -> vector<8x24xf32>
    %34 = arith.addf %29, %33 : vector<8x24xf32>
    %c0_42 = arith.constant 0 : index
    %c7_43 = arith.constant 7 : index
    %35 = vector.load %arg5[%c0_42, %c7_43] : memref<8x39xf32, #tpu.memory_space<vmem>>, vector<8x24xf32>
    %c4 = arith.constant 4 : index
    %c0_44 = arith.constant 0 : index
    %c0_45 = arith.constant 0 : index
    %36 = vector.load %arg1[%c4, %c0_44, %c0_45] : memref<9x8x8xf32, #tpu.memory_space<vmem>>, vector<1x8x8xf32>
    %37 = vector.shape_cast %36 : vector<1x8x8xf32> to vector<8x8xf32>
    %cst_46 = arith.constant dense<0.000000e+00> : vector<8x24xf32>
    %38 = tpu.matmul %37, %35, %cst_46 {dimension_numbers = #tpu.dot_dimension_numbers<[1], [0], [0], [1], [0, 0, 1, 1], [], []>} : vector<8x8xf32>, vector<8x24xf32>, vector<8x24xf32> -> vector<8x24xf32>
    %39 = arith.addf %34, %38 : vector<8x24xf32>
    %c0_47 = arith.constant 0 : index
    %c8 = arith.constant 8 : index
    %40 = vector.load %arg5[%c0_47, %c8] : memref<8x39xf32, #tpu.memory_space<vmem>>, vector<8x24xf32>
    %c5 = arith.constant 5 : index
    %c0_48 = arith.constant 0 : index
    %c0_49 = arith.constant 0 : index
    %41 = vector.load %arg1[%c5, %c0_48, %c0_49] : memref<9x8x8xf32, #tpu.memory_space<vmem>>, vector<1x8x8xf32>
    %42 = vector.shape_cast %41 : vector<1x8x8xf32> to vector<8x8xf32>
    %cst_50 = arith.constant dense<0.000000e+00> : vector<8x24xf32>
    %43 = tpu.matmul %42, %40, %cst_50 {dimension_numbers = #tpu.dot_dimension_numbers<[1], [0], [0], [1], [0, 0, 1, 1], [], []>} : vector<8x8xf32>, vector<8x24xf32>, vector<8x24xf32> -> vector<8x24xf32>
    %44 = arith.addf %39, %43 : vector<8x24xf32>
    %c0_51 = arith.constant 0 : index
    %c12 = arith.constant 12 : index
    %45 = vector.load %arg5[%c0_51, %c12] : memref<8x39xf32, #tpu.memory_space<vmem>>, vector<8x24xf32>
    %c6_52 = arith.constant 6 : index
    %c0_53 = arith.constant 0 : index
    %c0_54 = arith.constant 0 : index
    %46 = vector.load %arg1[%c6_52, %c0_53, %c0_54] : memref<9x8x8xf32, #tpu.memory_space<vmem>>, vector<1x8x8xf32>
    %47 = vector.shape_cast %46 : vector<1x8x8xf32> to vector<8x8xf32>
    %cst_55 = arith.constant dense<0.000000e+00> : vector<8x24xf32>
    %48 = tpu.matmul %47, %45, %cst_55 {dimension_numbers = #tpu.dot_dimension_numbers<[1], [0], [0], [1], [0, 0, 1, 1], [], []>} : vector<8x8xf32>, vector<8x24xf32>, vector<8x24xf32> -> vector<8x24xf32>
    %49 = arith.addf %44, %48 : vector<8x24xf32>
    %c0_56 = arith.constant 0 : index
    %c13_57 = arith.constant 13 : index
    %50 = vector.load %arg5[%c0_56, %c13_57] : memref<8x39xf32, #tpu.memory_space<vmem>>, vector<8x24xf32>
    %c7_58 = arith.constant 7 : index
    %c0_59 = arith.constant 0 : index
    %c0_60 = arith.constant 0 : index
    %51 = vector.load %arg1[%c7_58, %c0_59, %c0_60] : memref<9x8x8xf32, #tpu.memory_space<vmem>>, vector<1x8x8xf32>
    %52 = vector.shape_cast %51 : vector<1x8x8xf32> to vector<8x8xf32>
    %cst_61 = arith.constant dense<0.000000e+00> : vector<8x24xf32>
    %53 = tpu.matmul %52, %50, %cst_61 {dimension_numbers = #tpu.dot_dimension_numbers<[1], [0], [0], [1], [0, 0, 1, 1], [], []>} : vector<8x8xf32>, vector<8x24xf32>, vector<8x24xf32> -> vector<8x24xf32>
    %54 = arith.addf %49, %53 : vector<8x24xf32>
    %c0_62 = arith.constant 0 : index
    %c14 = arith.constant 14 : index
    %55 = vector.load %arg5[%c0_62, %c14] : memref<8x39xf32, #tpu.memory_space<vmem>>, vector<8x24xf32>
    %c8_63 = arith.constant 8 : index
    %c0_64 = arith.constant 0 : index
    %c0_65 = arith.constant 0 : index
    %56 = vector.load %arg1[%c8_63, %c0_64, %c0_65] : memref<9x8x8xf32, #tpu.memory_space<vmem>>, vector<1x8x8xf32>
    %57 = vector.shape_cast %56 : vector<1x8x8xf32> to vector<8x8xf32>
    %cst_66 = arith.constant dense<0.000000e+00> : vector<8x24xf32>
    %58 = tpu.matmul %57, %55, %cst_66 {dimension_numbers = #tpu.dot_dimension_numbers<[1], [0], [0], [1], [0, 0, 1, 1], [], []>} : vector<8x8xf32>, vector<8x24xf32>, vector<8x24xf32> -> vector<8x24xf32>
    %59 = arith.addf %54, %58 : vector<8x24xf32>
    %c0_67 = arith.constant 0 : index
    %c0_68 = arith.constant 0 : index
    %60 = vector.load %arg2[%c0_67, %c0_68] : memref<8x1xf32, #tpu.memory_space<vmem>>, vector<8x1xf32>
    %61 = vector.broadcast %60 : vector<8x1xf32> to vector<8x24xf32>
    %62 = arith.addf %59, %61 : vector<8x24xf32>
    %c0_69 = arith.constant 0 : index
    %c0_70 = arith.constant 0 : index
    %c0_71 = arith.constant 0 : index
    %63 = vector.load %arg4[%c0_69, %c0_70, %c0_71] : memref<1x8x24xf32, #tpu.memory_space<vmem>>, vector<1x8x24xf32>
    %64 = vector.shape_cast %63 : vector<1x8x24xf32> to vector<8x24xf32>
    %65 = vector.shape_cast %62 : vector<8x24xf32> to vector<1x8x24xf32>
    tpu.vector_store %arg4[%c0_69, %c0_70, %c0_71], %65 {strides = array<i32>} : memref<1x8x24xf32, #tpu.memory_space<vmem>>, vector<1x8x24xf32>,
    return
  }
  func.func @transform_0(%arg0: i32) -> (i32, i32, i32) {
    %c0_i32 = arith.constant 0 : i32
    %c0_i32_0 = arith.constant 0 : i32
    %c0_i32_1 = arith.constant 0 : i32
    %c0_i32_2 = arith.constant 0 : i32
    return %c0_i32, %c0_i32_0, %c0_i32_1 : i32, i32, i32
  }
  func.func @transform_1(%arg0: i32) -> (i32, i32) {
    %c0_i32 = arith.constant 0 : i32
    %c0_i32_0 = arith.constant 0 : i32
    %c0_i32_1 = arith.constant 0 : i32
    return %c0_i32, %c0_i32_0 : i32, i32
  }
  func.func @transform_2(%arg0: i32) -> (i32, i32, i32, i32) {
    %c0_i32 = arith.constant 0 : i32
    %c0_i32_0 = arith.constant 0 : i32
    %c0_i32_1 = arith.constant 0 : i32
    %c0_i32_2 = arith.constant 0 : i32
    return %arg0, %c0_i32, %c0_i32_0, %c0_i32_1 : i32, i32, i32, i32
  }
  func.func @transform_3(%arg0: i32) -> (i32, i32, i32) {
    %c0_i32 = arith.constant 0 : i32
    %c0_i32_0 = arith.constant 0 : i32
    %c0_i32_1 = arith.constant 0 : i32
    return %arg0, %c0_i32, %c0_i32_0 : i32, i32, i32
  }
}

module attributes {stable_mosaic.version = 11 : i64} {
  func.func @kernel(%arg0: memref<8x32xf32, #tpu.memory_space<vmem>>, %arg1: memref<8x1xf32, #tpu.memory_space<vmem>>, %arg2: memref<8x1xf32, #tpu.memory_space<vmem>>, %arg3: memref<8x32xf32, #tpu.memory_space<vmem>>) attributes {dimension_semantics = [], scalar_prefetch = 0 : i64, scratch_operands = 0 : i64, tpu.core_type = #tpu.core_type<tc>} {
    %c0 = arith.constant 0 : index
    %c0_0 = arith.constant 0 : index
    %0 = vector.load %arg0[%c0, %c0_0] : memref<8x32xf32, #tpu.memory_space<vmem>>, vector<8x32xf32>
    %cst = arith.constant dense<0.000000e+00> : vector<8xf32>
    %1 = vector.multi_reduction <add>, %0, %cst [1] : vector<8x32xf32> to vector<8xf32>
    %2 = vector.shape_cast %1 : vector<8xf32> to vector<8x1xf32>
    %cst_1 = arith.constant 3.200000e+01 : f32
    %3 = vector.broadcast %cst_1 : f32 to vector<8x1xf32>
    %4 = arith.divf %2, %3 : vector<8x1xf32>
    %5 = vector.broadcast %4 : vector<8x1xf32> to vector<8x32xf32>
    %6 = arith.subf %0, %5 : vector<8x32xf32>
    %7 = arith.mulf %6, %6 : vector<8x32xf32>
    %cst_2 = arith.constant dense<0.000000e+00> : vector<8xf32>
    %8 = vector.multi_reduction <add>, %7, %cst_2 [1] : vector<8x32xf32> to vector<8xf32>
    %9 = vector.shape_cast %8 : vector<8xf32> to vector<8x1xf32>
    %cst_3 = arith.constant 3.200000e+01 : f32
    %10 = vector.broadcast %cst_3 : f32 to vector<8x1xf32>
    %11 = arith.divf %9, %10 : vector<8x1xf32>
    %cst_4 = arith.constant 9.99999974E-6 : f32
    %12 = vector.broadcast %cst_4 : f32 to vector<8x1xf32>
    %13 = arith.addf %11, %12 : vector<8x1xf32>
    %14 = math.rsqrt %13 : vector<8x1xf32>
    %15 = vector.broadcast %14 : vector<8x1xf32> to vector<8x32xf32>
    %16 = arith.mulf %6, %15 : vector<8x32xf32>
    %c0_5 = arith.constant 0 : index
    %c0_6 = arith.constant 0 : index
    %17 = vector.load %arg1[%c0_5, %c0_6] : memref<8x1xf32, #tpu.memory_space<vmem>>, vector<8x1xf32>
    %18 = vector.broadcast %17 : vector<8x1xf32> to vector<8x32xf32>
    %19 = arith.mulf %16, %18 : vector<8x32xf32>
    %c0_7 = arith.constant 0 : index
    %c0_8 = arith.constant 0 : index
    %20 = vector.load %arg2[%c0_7, %c0_8] : memref<8x1xf32, #tpu.memory_space<vmem>>, vector<8x1xf32>
    %21 = vector.broadcast %20 : vector<8x1xf32> to vector<8x32xf32>
    %22 = arith.addf %19, %21 : vector<8x32xf32>
    %cst_9 = arith.constant 0.000000e+00 : f32
    %23 = vector.broadcast %cst_9 : f32 to vector<8x32xf32>
    %24 = arith.maximumf %22, %23 : vector<8x32xf32>
    %c0_10 = arith.constant 0 : index
    %c0_11 = arith.constant 0 : index
    %25 = vector.load %arg3[%c0_10, %c0_11] : memref<8x32xf32, #tpu.memory_space<vmem>>, vector<8x32xf32>
    tpu.vector_store %arg3[%c0_10, %c0_11], %24 {strides = array<i32>} : memref<8x32xf32, #tpu.memory_space<vmem>>, vector<8x32xf32>,
    return
  }
}

module attributes {stable_mosaic.version = 11 : i64} {
  func.func @kernel(%arg0: i32, %arg1: memref<9x4x8xf32, #tpu.memory_space<vmem>>, %arg2: memref<4x1xf32, #tpu.memory_space<vmem>>, %arg3: memref<1x8x4x4xf32, #tpu.memory_space<vmem>>, %arg4: memref<1x4x24xf32, #tpu.memory_space<vmem>>, %arg5: memref<8x39xf32, #tpu.memory_space<vmem>>) attributes {dimension_semantics = [#tpu.dimension_semantics<parallel>], iteration_bounds = array<i64: 2>, scalar_prefetch = 0 : i64, scratch_operands = 1 : i64, tpu.core_type = #tpu.core_type<tc>, window_params = [{pipeline_mode = #tpu.pipeline_mode<synchronous>, transform_indices = @transform_0, window_bounds = array<i64: 9, 4, 8>}, {pipeline_mode = #tpu.pipeline_mode<synchronous>, transform_indices = @transform_1, window_bounds = array<i64: 4, 1>}, {transform_indices = @transform_2, window_bounds = array<i64: 1, 8, 4, 4>}, {transform_indices = @transform_3, window_bounds = array<i64: 1, 4, 24>}]} {
    %cst = arith.constant 0.000000e+00 : f32
    %0 = vector.broadcast %cst : f32 to vector<8x39xf32>
    %c0 = arith.constant 0 : index
    %c0_0 = arith.constant 0 : index
    %1 = vector.load %arg5[%c0, %c0_0] : memref<8x39xf32, #tpu.memory_space<vmem>>, vector<8x39xf32>
    tpu.vector_store %arg5[%c0, %c0_0], %0 {strides = array<i32>} : memref<8x39xf32, #tpu.memory_space<vmem>>, vector<8x39xf32>,
    %c0_1 = arith.constant 0 : index
    %c0_2 = arith.constant 0 : index
    %c0_3 = arith.constant 0 : index
    %c0_4 = arith.constant 0 : index
    %2 = vector.load %arg3[%c0_1, %c0_2, %c0_3, %c0_4] : memref<1x8x4x4xf32, #tpu.memory_space<vmem>>, vector<1x8x1x4xf32>
    %3 = vector.shape_cast %2 : vector<1x8x1x4xf32> to vector<8x4xf32>
    %c0_5 = arith.constant 0 : index
    %c7 = arith.constant 7 : index
    %4 = vector.load %arg5[%c0_5, %c7] : memref<8x39xf32, #tpu.memory_space<vmem>>, vector<8x4xf32>
    tpu.vector_store %arg5[%c0_5, %c7], %3 {strides = array<i32>} : memref<8x39xf32, #tpu.memory_space<vmem>>, vector<8x4xf32>,
    %c0_6 = arith.constant 0 : index
    %c0_7 = arith.constant 0 : index
    %c1 = arith.constant 1 : index
    %c0_8 = arith.constant 0 : index
    %5 = vector.load %arg3[%c0_6, %c0_7, %c1, %c0_8] : memref<1x8x4x4xf32, #tpu.memory_space<vmem>>, vector<1x8x1x4xf32>
    %6 = vector.shape_cast %5 : vector<1x8x1x4xf32> to vector<8x4xf32>
    %c0_9 = arith.constant 0 : index
    %c13 = arith.constant 13 : index
    %7 = vector.load %arg5[%c0_9, %c13] : memref<8x39xf32, #tpu.memory_space<vmem>>, vector<8x4xf32>
    tpu.vector_store %arg5[%c0_9, %c13], %6 {strides = array<i32>} : memref<8x39xf32, #tpu.memory_space<vmem>>, vector<8x4xf32>,
    %c0_10 = arith.constant 0 : index
    %c0_11 = arith.constant 0 : index
    %c2 = arith.constant 2 : index
    %c0_12 = arith.constant 0 : index
    %8 = vector.load %arg3[%c0_10, %c0_11, %c2, %c0_12] : memref<1x8x4x4xf32, #tpu.memory_space<vmem>>, vector<1x8x1x4xf32>
    %9 = vector.shape_cast %8 : vector<1x8x1x4xf32> to vector<8x4xf32>
    %c0_13 = arith.constant 0 : index
    %c19 = arith.constant 19 : index
    %10 = vector.load %arg5[%c0_13, %c19] : memref<8x39xf32, #tpu.memory_space<vmem>>, vector<8x4xf32>
    tpu.vector_store %arg5[%c0_13, %c19], %9 {strides = array<i32>} : memref<8x39xf32, #tpu.memory_space<vmem>>, vector<8x4xf32>,
    %c0_14 = arith.constant 0 : index
    %c0_15 = arith.constant 0 : index
    %c3 = arith.constant 3 : index
    %c0_16 = arith.constant 0 : index
    %11 = vector.load %arg3[%c0_14, %c0_15, %c3, %c0_16] : memref<1x8x4x4xf32, #tpu.memory_space<vmem>>, vector<1x8x1x4xf32>
    %12 = vector.shape_cast %11 : vector<1x8x1x4xf32> to vector<8x4xf32>
    %c0_17 = arith.constant 0 : index
    %c25 = arith.constant 25 : index
    %13 = vector.load %arg5[%c0_17, %c25] : memref<8x39xf32, #tpu.memory_space<vmem>>, vector<8x4xf32>
    tpu.vector_store %arg5[%c0_17, %c25], %12 {strides = array<i32>} : memref<8x39xf32, #tpu.memory_space<vmem>>, vector<8x4xf32>,
    %cst_18 = arith.constant 0.000000e+00 : f32
    %14 = vector.broadcast %cst_18 : f32 to vector<4x24xf32>
    %c0_19 = arith.constant 0 : index
    %c0_20 = arith.constant 0 : index
    %15 = vector.load %arg5[%c0_19, %c0_20] : memref<8x39xf32, #tpu.memory_space<vmem>>, vector<8x24xf32>
    %c0_21 = arith.constant 0 : index
    %c0_22 = arith.constant 0 : index
    %c0_23 = arith.constant 0 : index
    %16 = vector.load %arg1[%c0_21, %c0_22, %c0_23] : memref<9x4x8xf32, #tpu.memory_space<vmem>>, vector<1x4x8xf32>
    %17 = vector.shape_cast %16 : vector<1x4x8xf32> to vector<4x8xf32>
    %cst_24 = arith.constant dense<0.000000e+00> : vector<4x24xf32>
    %18 = tpu.matmul %17, %15, %cst_24 {dimension_numbers = #tpu.dot_dimension_numbers<[1], [0], [0], [1], [0, 0, 1, 1], [], []>} : vector<4x8xf32>, vector<8x24xf32>, vector<4x24xf32> -> vector<4x24xf32>
    %19 = arith.addf %14, %18 : vector<4x24xf32>
    %c0_25 = arith.constant 0 : index
    %c1_26 = arith.constant 1 : index
    %20 = vector.load %arg5[%c0_25, %c1_26] : memref<8x39xf32, #tpu.memory_space<vmem>>, vector<8x24xf32>
    %c1_27 = arith.constant 1 : index
    %c0_28 = arith.constant 0 : index
    %c0_29 = arith.constant 0 : index
    %21 = vector.load %arg1[%c1_27, %c0_28, %c0_29] : memref<9x4x8xf32, #tpu.memory_space<vmem>>, vector<1x4x8xf32>
    %22 = vector.shape_cast %21 : vector<1x4x8xf32> to vector<4x8xf32>
    %cst_30 = arith.constant dense<0.000000e+00> : vector<4x24xf32>
    %23 = tpu.matmul %22, %20, %cst_30 {dimension_numbers = #tpu.dot_dimension_numbers<[1], [0], [0], [1], [0, 0, 1, 1], [], []>} : vector<4x8xf32>, vector<8x24xf32>, vector<4x24xf32> -> vector<4x24xf32>
    %24 = arith.addf %19, %23 : vector<4x24xf32>
    %c0_31 = arith.constant 0 : index
    %c2_32 = arith.constant 2 : index
    %25 = vector.load %arg5[%c0_31, %c2_32] : memref<8x39xf32, #tpu.memory_space<vmem>>, vector<8x24xf32>
    %c2_33 = arith.constant 2 : index
    %c0_34 = arith.constant 0 : index
    %c0_35 = arith.constant 0 : index
    %26 = vector.load %arg1[%c2_33, %c0_34, %c0_35] : memref<9x4x8xf32, #tpu.memory_space<vmem>>, vector<1x4x8xf32>
    %27 = vector.shape_cast %26 : vector<1x4x8xf32> to vector<4x8xf32>
    %cst_36 = arith.constant dense<0.000000e+00> : vector<4x24xf32>
    %28 = tpu.matmul %27, %25, %cst_36 {dimension_numbers = #tpu.dot_dimension_numbers<[1], [0], [0], [1], [0, 0, 1, 1], [], []>} : vector<4x8xf32>, vector<8x24xf32>, vector<4x24xf32> -> vector<4x24xf32>
    %29 = arith.addf %24, %28 : vector<4x24xf32>
    %c0_37 = arith.constant 0 : index
    %c6 = arith.constant 6 : index
    %30 = vector.load %arg5[%c0_37, %c6] : memref<8x39xf32, #tpu.memory_space<vmem>>, vector<8x24xf32>
    %c3_38 = arith.constant 3 : index
    %c0_39 = arith.constant 0 : index
    %c0_40 = arith.constant 0 : index
    %31 = vector.load %arg1[%c3_38, %c0_39, %c0_40] : memref<9x4x8xf32, #tpu.memory_space<vmem>>, vector<1x4x8xf32>
    %32 = vector.shape_cast %31 : vector<1x4x8xf32> to vector<4x8xf32>
    %cst_41 = arith.constant dense<0.000000e+00> : vector<4x24xf32>
    %33 = tpu.matmul %32, %30, %cst_41 {dimension_numbers = #tpu.dot_dimension_numbers<[1], [0], [0], [1], [0, 0, 1, 1], [], []>} : vector<4x8xf32>, vector<8x24xf32>, vector<4x24xf32> -> vector<4x24xf32>
    %34 = arith.addf %29, %33 : vector<4x24xf32>
    %c0_42 = arith.constant 0 : index
    %c7_43 = arith.constant 7 : index
    %35 = vector.load %arg5[%c0_42, %c7_43] : memref<8x39xf32, #tpu.memory_space<vmem>>, vector<8x24xf32>
    %c4 = arith.constant 4 : index
    %c0_44 = arith.constant 0 : index
    %c0_45 = arith.constant 0 : index
    %36 = vector.load %arg1[%c4, %c0_44, %c0_45] : memref<9x4x8xf32, #tpu.memory_space<vmem>>, vector<1x4x8xf32>
    %37 = vector.shape_cast %36 : vector<1x4x8xf32> to vector<4x8xf32>
    %cst_46 = arith.constant dense<0.000000e+00> : vector<4x24xf32>
    %38 = tpu.matmul %37, %35, %cst_46 {dimension_numbers = #tpu.dot_dimension_numbers<[1], [0], [0], [1], [0, 0, 1, 1], [], []>} : vector<4x8xf32>, vector<8x24xf32>, vector<4x24xf32> -> vector<4x24xf32>
    %39 = arith.addf %34, %38 : vector<4x24xf32>
    %c0_47 = arith.constant 0 : index
    %c8 = arith.constant 8 : index
    %40 = vector.load %arg5[%c0_47, %c8] : memref<8x39xf32, #tpu.memory_space<vmem>>, vector<8x24xf32>
    %c5 = arith.constant 5 : index
    %c0_48 = arith.constant 0 : index
    %c0_49 = arith.constant 0 : index
    %41 = vector.load %arg1[%c5, %c0_48, %c0_49] : memref<9x4x8xf32, #tpu.memory_space<vmem>>, vector<1x4x8xf32>
    %42 = vector.shape_cast %41 : vector<1x4x8xf32> to vector<4x8xf32>
    %cst_50 = arith.constant dense<0.000000e+00> : vector<4x24xf32>
    %43 = tpu.matmul %42, %40, %cst_50 {dimension_numbers = #tpu.dot_dimension_numbers<[1], [0], [0], [1], [0, 0, 1, 1], [], []>} : vector<4x8xf32>, vector<8x24xf32>, vector<4x24xf32> -> vector<4x24xf32>
    %44 = arith.addf %39, %43 : vector<4x24xf32>
    %c0_51 = arith.constant 0 : index
    %c12 = arith.constant 12 : index
    %45 = vector.load %arg5[%c0_51, %c12] : memref<8x39xf32, #tpu.memory_space<vmem>>, vector<8x24xf32>
    %c6_52 = arith.constant 6 : index
    %c0_53 = arith.constant 0 : index
    %c0_54 = arith.constant 0 : index
    %46 = vector.load %arg1[%c6_52, %c0_53, %c0_54] : memref<9x4x8xf32, #tpu.memory_space<vmem>>, vector<1x4x8xf32>
    %47 = vector.shape_cast %46 : vector<1x4x8xf32> to vector<4x8xf32>
    %cst_55 = arith.constant dense<0.000000e+00> : vector<4x24xf32>
    %48 = tpu.matmul %47, %45, %cst_55 {dimension_numbers = #tpu.dot_dimension_numbers<[1], [0], [0], [1], [0, 0, 1, 1], [], []>} : vector<4x8xf32>, vector<8x24xf32>, vector<4x24xf32> -> vector<4x24xf32>
    %49 = arith.addf %44, %48 : vector<4x24xf32>
    %c0_56 = arith.constant 0 : index
    %c13_57 = arith.constant 13 : index
    %50 = vector.load %arg5[%c0_56, %c13_57] : memref<8x39xf32, #tpu.memory_space<vmem>>, vector<8x24xf32>
    %c7_58 = arith.constant 7 : index
    %c0_59 = arith.constant 0 : index
    %c0_60 = arith.constant 0 : index
    %51 = vector.load %arg1[%c7_58, %c0_59, %c0_60] : memref<9x4x8xf32, #tpu.memory_space<vmem>>, vector<1x4x8xf32>
    %52 = vector.shape_cast %51 : vector<1x4x8xf32> to vector<4x8xf32>
    %cst_61 = arith.constant dense<0.000000e+00> : vector<4x24xf32>
    %53 = tpu.matmul %52, %50, %cst_61 {dimension_numbers = #tpu.dot_dimension_numbers<[1], [0], [0], [1], [0, 0, 1, 1], [], []>} : vector<4x8xf32>, vector<8x24xf32>, vector<4x24xf32> -> vector<4x24xf32>
    %54 = arith.addf %49, %53 : vector<4x24xf32>
    %c0_62 = arith.constant 0 : index
    %c14 = arith.constant 14 : index
    %55 = vector.load %arg5[%c0_62, %c14] : memref<8x39xf32, #tpu.memory_space<vmem>>, vector<8x24xf32>
    %c8_63 = arith.constant 8 : index
    %c0_64 = arith.constant 0 : index
    %c0_65 = arith.constant 0 : index
    %56 = vector.load %arg1[%c8_63, %c0_64, %c0_65] : memref<9x4x8xf32, #tpu.memory_space<vmem>>, vector<1x4x8xf32>
    %57 = vector.shape_cast %56 : vector<1x4x8xf32> to vector<4x8xf32>
    %cst_66 = arith.constant dense<0.000000e+00> : vector<4x24xf32>
    %58 = tpu.matmul %57, %55, %cst_66 {dimension_numbers = #tpu.dot_dimension_numbers<[1], [0], [0], [1], [0, 0, 1, 1], [], []>} : vector<4x8xf32>, vector<8x24xf32>, vector<4x24xf32> -> vector<4x24xf32>
    %59 = arith.addf %54, %58 : vector<4x24xf32>
    %c0_67 = arith.constant 0 : index
    %c0_68 = arith.constant 0 : index
    %60 = vector.load %arg2[%c0_67, %c0_68] : memref<4x1xf32, #tpu.memory_space<vmem>>, vector<4x1xf32>
    %61 = vector.broadcast %60 : vector<4x1xf32> to vector<4x24xf32>
    %62 = arith.addf %59, %61 : vector<4x24xf32>
    %c0_69 = arith.constant 0 : index
    %c0_70 = arith.constant 0 : index
    %c0_71 = arith.constant 0 : index
    %63 = vector.load %arg4[%c0_69, %c0_70, %c0_71] : memref<1x4x24xf32, #tpu.memory_space<vmem>>, vector<1x4x24xf32>
    %64 = vector.shape_cast %63 : vector<1x4x24xf32> to vector<4x24xf32>
    %65 = vector.shape_cast %62 : vector<4x24xf32> to vector<1x4x24xf32>
    tpu.vector_store %arg4[%c0_69, %c0_70, %c0_71], %65 {strides = array<i32>} : memref<1x4x24xf32, #tpu.memory_space<vmem>>, vector<1x4x24xf32>,
    return
  }
  func.func @transform_0(%arg0: i32) -> (i32, i32, i32) {
    %c0_i32 = arith.constant 0 : i32
    %c0_i32_0 = arith.constant 0 : i32
    %c0_i32_1 = arith.constant 0 : i32
    %c0_i32_2 = arith.constant 0 : i32
    return %c0_i32, %c0_i32_0, %c0_i32_1 : i32, i32, i32
  }
  func.func @transform_1(%arg0: i32) -> (i32, i32) {
    %c0_i32 = arith.constant 0 : i32
    %c0_i32_0 = arith.constant 0 : i32
    %c0_i32_1 = arith.constant 0 : i32
    return %c0_i32, %c0_i32_0 : i32, i32
  }
  func.func @transform_2(%arg0: i32) -> (i32, i32, i32, i32) {
    %c0_i32 = arith.constant 0 : i32
    %c0_i32_0 = arith.constant 0 : i32
    %c0_i32_1 = arith.constant 0 : i32
    %c0_i32_2 = arith.constant 0 : i32
    return %arg0, %c0_i32, %c0_i32_0, %c0_i32_1 : i32, i32, i32, i32
  }
  func.func @transform_3(%arg0: i32) -> (i32, i32, i32) {
    %c0_i32 = arith.constant 0 : i32
    %c0_i32_0 = arith.constant 0 : i32
    %c0_i32_1 = arith.constant 0 : i32
    return %arg0, %c0_i32, %c0_i32_0 : i32, i32, i32
  }
}

module attributes {stable_mosaic.version = 11 : i64} {
  func.func @kernel(%arg0: i32, %arg1: memref<9x24x4xf32, #tpu.memory_space<vmem>>, %arg2: memref<24x1xf32, #tpu.memory_space<vmem>>, %arg3: memref<1x4x8x8xf32, #tpu.memory_space<vmem>>, %arg4: memref<1x24x80xf32, #tpu.memory_space<vmem>>, %arg5: memref<4x103xf32, #tpu.memory_space<vmem>>) attributes {dimension_semantics = [#tpu.dimension_semantics<parallel>], iteration_bounds = array<i64: 2>, scalar_prefetch = 0 : i64, scratch_operands = 1 : i64, tpu.core_type = #tpu.core_type<tc>, window_params = [{pipeline_mode = #tpu.pipeline_mode<synchronous>, transform_indices = @transform_0, window_bounds = array<i64: 9, 24, 4>}, {pipeline_mode = #tpu.pipeline_mode<synchronous>, transform_indices = @transform_1, window_bounds = array<i64: 24, 1>}, {transform_indices = @transform_2, window_bounds = array<i64: 1, 4, 8, 8>}, {transform_indices = @transform_3, window_bounds = array<i64: 1, 24, 80>}]} {
    %cst = arith.constant 0.000000e+00 : f32
    %0 = vector.broadcast %cst : f32 to vector<4x103xf32>
    %c0 = arith.constant 0 : index
    %c0_0 = arith.constant 0 : index
    %1 = vector.load %arg5[%c0, %c0_0] : memref<4x103xf32, #tpu.memory_space<vmem>>, vector<4x103xf32>
    tpu.vector_store %arg5[%c0, %c0_0], %0 {strides = array<i32>} : memref<4x103xf32, #tpu.memory_space<vmem>>, vector<4x103xf32>,
    %c0_1 = arith.constant 0 : index
    %c0_2 = arith.constant 0 : index
    %c0_3 = arith.constant 0 : index
    %c0_4 = arith.constant 0 : index
    %2 = vector.load %arg3[%c0_1, %c0_2, %c0_3, %c0_4] : memref<1x4x8x8xf32, #tpu.memory_space<vmem>>, vector<1x4x1x8xf32>
    %3 = vector.shape_cast %2 : vector<1x4x1x8xf32> to vector<4x8xf32>
    %c0_5 = arith.constant 0 : index
    %c11 = arith.constant 11 : index
    %4 = vector.load %arg5[%c0_5, %c11] : memref<4x103xf32, #tpu.memory_space<vmem>>, vector<4x8xf32>
    tpu.vector_store %arg5[%c0_5, %c11], %3 {strides = array<i32>} : memref<4x103xf32, #tpu.memory_space<vmem>>, vector<4x8xf32>,
    %c0_6 = arith.constant 0 : index
    %c0_7 = arith.constant 0 : index
    %c1 = arith.constant 1 : index
    %c0_8 = arith.constant 0 : index
    %5 = vector.load %arg3[%c0_6, %c0_7, %c1, %c0_8] : memref<1x4x8x8xf32, #tpu.memory_space<vmem>>, vector<1x4x1x8xf32>
    %6 = vector.shape_cast %5 : vector<1x4x1x8xf32> to vector<4x8xf32>
    %c0_9 = arith.constant 0 : index
    %c21 = arith.constant 21 : index
    %7 = vector.load %arg5[%c0_9, %c21] : memref<4x103xf32, #tpu.memory_space<vmem>>, vector<4x8xf32>
    tpu.vector_store %arg5[%c0_9, %c21], %6 {strides = array<i32>} : memref<4x103xf32, #tpu.memory_space<vmem>>, vector<4x8xf32>,
    %c0_10 = arith.constant 0 : index
    %c0_11 = arith.constant 0 : index
    %c2 = arith.constant 2 : index
    %c0_12 = arith.constant 0 : index
    %8 = vector.load %arg3[%c0_10, %c0_11, %c2, %c0_12] : memref<1x4x8x8xf32, #tpu.memory_space<vmem>>, vector<1x4x1x8xf32>
    %9 = vector.shape_cast %8 : vector<1x4x1x8xf32> to vector<4x8xf32>
    %c0_13 = arith.constant 0 : index
    %c31 = arith.constant 31 : index
    %10 = vector.load %arg5[%c0_13, %c31] : memref<4x103xf32, #tpu.memory_space<vmem>>, vector<4x8xf32>
    tpu.vector_store %arg5[%c0_13, %c31], %9 {strides = array<i32>} : memref<4x103xf32, #tpu.memory_space<vmem>>, vector<4x8xf32>,
    %c0_14 = arith.constant 0 : index
    %c0_15 = arith.constant 0 : index
    %c3 = arith.constant 3 : index
    %c0_16 = arith.constant 0 : index
    %11 = vector.load %arg3[%c0_14, %c0_15, %c3, %c0_16] : memref<1x4x8x8xf32, #tpu.memory_space<vmem>>, vector<1x4x1x8xf32>
    %12 = vector.shape_cast %11 : vector<1x4x1x8xf32> to vector<4x8xf32>
    %c0_17 = arith.constant 0 : index
    %c41 = arith.constant 41 : index
    %13 = vector.load %arg5[%c0_17, %c41] : memref<4x103xf32, #tpu.memory_space<vmem>>, vector<4x8xf32>
    tpu.vector_store %arg5[%c0_17, %c41], %12 {strides = array<i32>} : memref<4x103xf32, #tpu.memory_space<vmem>>, vector<4x8xf32>,
    %c0_18 = arith.constant 0 : index
    %c0_19 = arith.constant 0 : index
    %c4 = arith.constant 4 : index
    %c0_20 = arith.constant 0 : index
    %14 = vector.load %arg3[%c0_18, %c0_19, %c4, %c0_20] : memref<1x4x8x8xf32, #tpu.memory_space<vmem>>, vector<1x4x1x8xf32>
    %15 = vector.shape_cast %14 : vector<1x4x1x8xf32> to vector<4x8xf32>
    %c0_21 = arith.constant 0 : index
    %c51 = arith.constant 51 : index
    %16 = vector.load %arg5[%c0_21, %c51] : memref<4x103xf32, #tpu.memory_space<vmem>>, vector<4x8xf32>
    tpu.vector_store %arg5[%c0_21, %c51], %15 {strides = array<i32>} : memref<4x103xf32, #tpu.memory_space<vmem>>, vector<4x8xf32>,
    %c0_22 = arith.constant 0 : index
    %c0_23 = arith.constant 0 : index
    %c5 = arith.constant 5 : index
    %c0_24 = arith.constant 0 : index
    %17 = vector.load %arg3[%c0_22, %c0_23, %c5, %c0_24] : memref<1x4x8x8xf32, #tpu.memory_space<vmem>>, vector<1x4x1x8xf32>
    %18 = vector.shape_cast %17 : vector<1x4x1x8xf32> to vector<4x8xf32>
    %c0_25 = arith.constant 0 : index
    %c61 = arith.constant 61 : index
    %19 = vector.load %arg5[%c0_25, %c61] : memref<4x103xf32, #tpu.memory_space<vmem>>, vector<4x8xf32>
    tpu.vector_store %arg5[%c0_25, %c61], %18 {strides = array<i32>} : memref<4x103xf32, #tpu.memory_space<vmem>>, vector<4x8xf32>,
    %c0_26 = arith.constant 0 : index
    %c0_27 = arith.constant 0 : index
    %c6 = arith.constant 6 : index
    %c0_28 = arith.constant 0 : index
    %20 = vector.load %arg3[%c0_26, %c0_27, %c6, %c0_28] : memref<1x4x8x8xf32, #tpu.memory_space<vmem>>, vector<1x4x1x8xf32>
    %21 = vector.shape_cast %20 : vector<1x4x1x8xf32> to vector<4x8xf32>
    %c0_29 = arith.constant 0 : index
    %c71 = arith.constant 71 : index
    %22 = vector.load %arg5[%c0_29, %c71] : memref<4x103xf32, #tpu.memory_space<vmem>>, vector<4x8xf32>
    tpu.vector_store %arg5[%c0_29, %c71], %21 {strides = array<i32>} : memref<4x103xf32, #tpu.memory_space<vmem>>, vector<4x8xf32>,
    %c0_30 = arith.constant 0 : index
    %c0_31 = arith.constant 0 : index
    %c7 = arith.constant 7 : index
    %c0_32 = arith.constant 0 : index
    %23 = vector.load %arg3[%c0_30, %c0_31, %c7, %c0_32] : memref<1x4x8x8xf32, #tpu.memory_space<vmem>>, vector<1x4x1x8xf32>
    %24 = vector.shape_cast %23 : vector<1x4x1x8xf32> to vector<4x8xf32>
    %c0_33 = arith.constant 0 : index
    %c81 = arith.constant 81 : index
    %25 = vector.load %arg5[%c0_33, %c81] : memref<4x103xf32, #tpu.memory_space<vmem>>, vector<4x8xf32>
    tpu.vector_store %arg5[%c0_33, %c81], %24 {strides = array<i32>} : memref<4x103xf32, #tpu.memory_space<vmem>>, vector<4x8xf32>,
    %cst_34 = arith.constant 0.000000e+00 : f32
    %26 = vector.broadcast %cst_34 : f32 to vector<24x80xf32>
    %c0_35 = arith.constant 0 : index
    %c0_36 = arith.constant 0 : index
    %27 = vector.load %arg5[%c0_35, %c0_36] : memref<4x103xf32, #tpu.memory_space<vmem>>, vector<4x80xf32>
    %c0_37 = arith.constant 0 : index
    %c0_38 = arith.constant 0 : index
    %c0_39 = arith.constant 0 : index
    %28 = vector.load %arg1[%c0_37, %c0_38, %c0_39] : memref<9x24x4xf32, #tpu.memory_space<vmem>>, vector<1x24x4xf32>
    %29 = vector.shape_cast %28 : vector<1x24x4xf32> to vector<24x4xf32>
    %cst_40 = arith.constant dense<0.000000e+00> : vector<24x80xf32>
    %30 = tpu.matmul %29, %27, %cst_40 {dimension_numbers = #tpu.dot_dimension_numbers<[1], [0], [0], [1], [0, 0, 1, 1], [], []>} : vector<24x4xf32>, vector<4x80xf32>, vector<24x80xf32> -> vector<24x80xf32>
    %31 = arith.addf %26, %30 : vector<24x80xf32>
    %c0_41 = arith.constant 0 : index
    %c1_42 = arith.constant 1 : index
    %32 = vector.load %arg5[%c0_41, %c1_42] : memref<4x103xf32, #tpu.memory_space<vmem>>, vector<4x80xf32>
    %c1_43 = arith.constant 1 : index
    %c0_44 = arith.constant 0 : index
    %c0_45 = arith.constant 0 : index
    %33 = vector.load %arg1[%c1_43, %c0_44, %c0_45] : memref<9x24x4xf32, #tpu.memory_space<vmem>>, vector<1x24x4xf32>
    %34 = vector.shape_cast %33 : vector<1x24x4xf32> to vector<24x4xf32>
    %cst_46 = arith.constant dense<0.000000e+00> : vector<24x80xf32>
    %35 = tpu.matmul %34, %32, %cst_46 {dimension_numbers = #tpu.dot_dimension_numbers<[1], [0], [0], [1], [0, 0, 1, 1], [], []>} : vector<24x4xf32>, vector<4x80xf32>, vector<24x80xf32> -> vector<24x80xf32>
    %36 = arith.addf %31, %35 : vector<24x80xf32>
    %c0_47 = arith.constant 0 : index
    %c2_48 = arith.constant 2 : index
    %37 = vector.load %arg5[%c0_47, %c2_48] : memref<4x103xf32, #tpu.memory_space<vmem>>, vector<4x80xf32>
    %c2_49 = arith.constant 2 : index
    %c0_50 = arith.constant 0 : index
    %c0_51 = arith.constant 0 : index
    %38 = vector.load %arg1[%c2_49, %c0_50, %c0_51] : memref<9x24x4xf32, #tpu.memory_space<vmem>>, vector<1x24x4xf32>
    %39 = vector.shape_cast %38 : vector<1x24x4xf32> to vector<24x4xf32>
    %cst_52 = arith.constant dense<0.000000e+00> : vector<24x80xf32>
    %40 = tpu.matmul %39, %37, %cst_52 {dimension_numbers = #tpu.dot_dimension_numbers<[1], [0], [0], [1], [0, 0, 1, 1], [], []>} : vector<24x4xf32>, vector<4x80xf32>, vector<24x80xf32> -> vector<24x80xf32>
    %41 = arith.addf %36, %40 : vector<24x80xf32>
    %c0_53 = arith.constant 0 : index
    %c10 = arith.constant 10 : index
    %42 = vector.load %arg5[%c0_53, %c10] : memref<4x103xf32, #tpu.memory_space<vmem>>, vector<4x80xf32>
    %c3_54 = arith.constant 3 : index
    %c0_55 = arith.constant 0 : index
    %c0_56 = arith.constant 0 : index
    %43 = vector.load %arg1[%c3_54, %c0_55, %c0_56] : memref<9x24x4xf32, #tpu.memory_space<vmem>>, vector<1x24x4xf32>
    %44 = vector.shape_cast %43 : vector<1x24x4xf32> to vector<24x4xf32>
    %cst_57 = arith.constant dense<0.000000e+00> : vector<24x80xf32>
    %45 = tpu.matmul %44, %42, %cst_57 {dimension_numbers = #tpu.dot_dimension_numbers<[1], [0], [0], [1], [0, 0, 1, 1], [], []>} : vector<24x4xf32>, vector<4x80xf32>, vector<24x80xf32> -> vector<24x80xf32>
    %46 = arith.addf %41, %45 : vector<24x80xf32>
    %c0_58 = arith.constant 0 : index
    %c11_59 = arith.constant 11 : index
    %47 = vector.load %arg5[%c0_58, %c11_59] : memref<4x103xf32, #tpu.memory_space<vmem>>, vector<4x80xf32>
    %c4_60 = arith.constant 4 : index
    %c0_61 = arith.constant 0 : index
    %c0_62 = arith.constant 0 : index
    %48 = vector.load %arg1[%c4_60, %c0_61, %c0_62] : memref<9x24x4xf32, #tpu.memory_space<vmem>>, vector<1x24x4xf32>
    %49 = vector.shape_cast %48 : vector<1x24x4xf32> to vector<24x4xf32>
    %cst_63 = arith.constant dense<0.000000e+00> : vector<24x80xf32>
    %50 = tpu.matmul %49, %47, %cst_63 {dimension_numbers = #tpu.dot_dimension_numbers<[1], [0], [0], [1], [0, 0, 1, 1], [], []>} : vector<24x4xf32>, vector<4x80xf32>, vector<24x80xf32> -> vector<24x80xf32>
    %51 = arith.addf %46, %50 : vector<24x80xf32>
    %c0_64 = arith.constant 0 : index
    %c12 = arith.constant 12 : index
    %52 = vector.load %arg5[%c0_64, %c12] : memref<4x103xf32, #tpu.memory_space<vmem>>, vector<4x80xf32>
    %c5_65 = arith.constant 5 : index
    %c0_66 = arith.constant 0 : index
    %c0_67 = arith.constant 0 : index
    %53 = vector.load %arg1[%c5_65, %c0_66, %c0_67] : memref<9x24x4xf32, #tpu.memory_space<vmem>>, vector<1x24x4xf32>
    %54 = vector.shape_cast %53 : vector<1x24x4xf32> to vector<24x4xf32>
    %cst_68 = arith.constant dense<0.000000e+00> : vector<24x80xf32>
    %55 = tpu.matmul %54, %52, %cst_68 {dimension_numbers = #tpu.dot_dimension_numbers<[1], [0], [0], [1], [0, 0, 1, 1], [], []>} : vector<24x4xf32>, vector<4x80xf32>, vector<24x80xf32> -> vector<24x80xf32>
    %56 = arith.addf %51, %55 : vector<24x80xf32>
    %c0_69 = arith.constant 0 : index
    %c20 = arith.constant 20 : index
    %57 = vector.load %arg5[%c0_69, %c20] : memref<4x103xf32, #tpu.memory_space<vmem>>, vector<4x80xf32>
    %c6_70 = arith.constant 6 : index
    %c0_71 = arith.constant 0 : index
    %c0_72 = arith.constant 0 : index
    %58 = vector.load %arg1[%c6_70, %c0_71, %c0_72] : memref<9x24x4xf32, #tpu.memory_space<vmem>>, vector<1x24x4xf32>
    %59 = vector.shape_cast %58 : vector<1x24x4xf32> to vector<24x4xf32>
    %cst_73 = arith.constant dense<0.000000e+00> : vector<24x80xf32>
    %60 = tpu.matmul %59, %57, %cst_73 {dimension_numbers = #tpu.dot_dimension_numbers<[1], [0], [0], [1], [0, 0, 1, 1], [], []>} : vector<24x4xf32>, vector<4x80xf32>, vector<24x80xf32> -> vector<24x80xf32>
    %61 = arith.addf %56, %60 : vector<24x80xf32>
    %c0_74 = arith.constant 0 : index
    %c21_75 = arith.constant 21 : index
    %62 = vector.load %arg5[%c0_74, %c21_75] : memref<4x103xf32, #tpu.memory_space<vmem>>, vector<4x80xf32>
    %c7_76 = arith.constant 7 : index
    %c0_77 = arith.constant 0 : index
    %c0_78 = arith.constant 0 : index
    %63 = vector.load %arg1[%c7_76, %c0_77, %c0_78] : memref<9x24x4xf32, #tpu.memory_space<vmem>>, vector<1x24x4xf32>
    %64 = vector.shape_cast %63 : vector<1x24x4xf32> to vector<24x4xf32>
    %cst_79 = arith.constant dense<0.000000e+00> : vector<24x80xf32>
    %65 = tpu.matmul %64, %62, %cst_79 {dimension_numbers = #tpu.dot_dimension_numbers<[1], [0], [0], [1], [0, 0, 1, 1], [], []>} : vector<24x4xf32>, vector<4x80xf32>, vector<24x80xf32> -> vector<24x80xf32>
    %66 = arith.addf %61, %65 : vector<24x80xf32>
    %c0_80 = arith.constant 0 : index
    %c22 = arith.constant 22 : index
    %67 = vector.load %arg5[%c0_80, %c22] : memref<4x103xf32, #tpu.memory_space<vmem>>, vector<4x80xf32>
    %c8 = arith.constant 8 : index
    %c0_81 = arith.constant 0 : index
    %c0_82 = arith.constant 0 : index
    %68 = vector.load %arg1[%c8, %c0_81, %c0_82] : memref<9x24x4xf32, #tpu.memory_space<vmem>>, vector<1x24x4xf32>
    %69 = vector.shape_cast %68 : vector<1x24x4xf32> to vector<24x4xf32>
    %cst_83 = arith.constant dense<0.000000e+00> : vector<24x80xf32>
    %70 = tpu.matmul %69, %67, %cst_83 {dimension_numbers = #tpu.dot_dimension_numbers<[1], [0], [0], [1], [0, 0, 1, 1], [], []>} : vector<24x4xf32>, vector<4x80xf32>, vector<24x80xf32> -> vector<24x80xf32>
    %71 = arith.addf %66, %70 : vector<24x80xf32>
    %c0_84 = arith.constant 0 : index
    %c0_85 = arith.constant 0 : index
    %72 = vector.load %arg2[%c0_84, %c0_85] : memref<24x1xf32, #tpu.memory_space<vmem>>, vector<24x1xf32>
    %73 = vector.broadcast %72 : vector<24x1xf32> to vector<24x80xf32>
    %74 = arith.addf %71, %73 : vector<24x80xf32>
    %c0_86 = arith.constant 0 : index
    %c0_87 = arith.constant 0 : index
    %c0_88 = arith.constant 0 : index
    %75 = vector.load %arg4[%c0_86, %c0_87, %c0_88] : memref<1x24x80xf32, #tpu.memory_space<vmem>>, vector<1x24x80xf32>
    %76 = vector.shape_cast %75 : vector<1x24x80xf32> to vector<24x80xf32>
    %77 = vector.shape_cast %74 : vector<24x80xf32> to vector<1x24x80xf32>
    tpu.vector_store %arg4[%c0_86, %c0_87, %c0_88], %77 {strides = array<i32>} : memref<1x24x80xf32, #tpu.memory_space<vmem>>, vector<1x24x80xf32>,
    return
  }
  func.func @transform_0(%arg0: i32) -> (i32, i32, i32) {
    %c0_i32 = arith.constant 0 : i32
    %c0_i32_0 = arith.constant 0 : i32
    %c0_i32_1 = arith.constant 0 : i32
    %c0_i32_2 = arith.constant 0 : i32
    return %c0_i32, %c0_i32_0, %c0_i32_1 : i32, i32, i32
  }
  func.func @transform_1(%arg0: i32) -> (i32, i32) {
    %c0_i32 = arith.constant 0 : i32
    %c0_i32_0 = arith.constant 0 : i32
    %c0_i32_1 = arith.constant 0 : i32
    return %c0_i32, %c0_i32_0 : i32, i32
  }
  func.func @transform_2(%arg0: i32) -> (i32, i32, i32, i32) {
    %c0_i32 = arith.constant 0 : i32
    %c0_i32_0 = arith.constant 0 : i32
    %c0_i32_1 = arith.constant 0 : i32
    %c0_i32_2 = arith.constant 0 : i32
    return %arg0, %c0_i32, %c0_i32_0, %c0_i32_1 : i32, i32, i32, i32
  }
  func.func @transform_3(%arg0: i32) -> (i32, i32, i32) {
    %c0_i32 = arith.constant 0 : i32
    %c0_i32_0 = arith.constant 0 : i32
    %c0_i32_1 = arith.constant 0 : i32
    return %arg0, %c0_i32, %c0_i32_0 : i32, i32, i32
  }
}

module attributes {stable_mosaic.version = 11 : i64} {
  func.func @kernel(%arg0: memref<24x512xf32, #tpu.memory_space<vmem>>, %arg1: memref<24x1xf32, #tpu.memory_space<vmem>>, %arg2: memref<24x1xf32, #tpu.memory_space<vmem>>, %arg3: memref<24x512xf32, #tpu.memory_space<vmem>>) attributes {dimension_semantics = [], scalar_prefetch = 0 : i64, scratch_operands = 0 : i64, tpu.core_type = #tpu.core_type<tc>} {
    %c0 = arith.constant 0 : index
    %c0_0 = arith.constant 0 : index
    %0 = vector.load %arg0[%c0, %c0_0] : memref<24x512xf32, #tpu.memory_space<vmem>>, vector<24x512xf32>
    %cst = arith.constant dense<0.000000e+00> : vector<24xf32>
    %1 = vector.multi_reduction <add>, %0, %cst [1] : vector<24x512xf32> to vector<24xf32>
    %2 = vector.shape_cast %1 : vector<24xf32> to vector<24x1xf32>
    %cst_1 = arith.constant 5.120000e+02 : f32
    %3 = vector.broadcast %cst_1 : f32 to vector<24x1xf32>
    %4 = arith.divf %2, %3 : vector<24x1xf32>
    %5 = vector.broadcast %4 : vector<24x1xf32> to vector<24x512xf32>
    %6 = arith.subf %0, %5 : vector<24x512xf32>
    %7 = arith.mulf %6, %6 : vector<24x512xf32>
    %cst_2 = arith.constant dense<0.000000e+00> : vector<24xf32>
    %8 = vector.multi_reduction <add>, %7, %cst_2 [1] : vector<24x512xf32> to vector<24xf32>
    %9 = vector.shape_cast %8 : vector<24xf32> to vector<24x1xf32>
    %cst_3 = arith.constant 5.120000e+02 : f32
    %10 = vector.broadcast %cst_3 : f32 to vector<24x1xf32>
    %11 = arith.divf %9, %10 : vector<24x1xf32>
    %cst_4 = arith.constant 9.99999974E-6 : f32
    %12 = vector.broadcast %cst_4 : f32 to vector<24x1xf32>
    %13 = arith.addf %11, %12 : vector<24x1xf32>
    %14 = math.rsqrt %13 : vector<24x1xf32>
    %15 = vector.broadcast %14 : vector<24x1xf32> to vector<24x512xf32>
    %16 = arith.mulf %6, %15 : vector<24x512xf32>
    %c0_5 = arith.constant 0 : index
    %c0_6 = arith.constant 0 : index
    %17 = vector.load %arg1[%c0_5, %c0_6] : memref<24x1xf32, #tpu.memory_space<vmem>>, vector<24x1xf32>
    %18 = vector.broadcast %17 : vector<24x1xf32> to vector<24x512xf32>
    %19 = arith.mulf %16, %18 : vector<24x512xf32>
    %c0_7 = arith.constant 0 : index
    %c0_8 = arith.constant 0 : index
    %20 = vector.load %arg2[%c0_7, %c0_8] : memref<24x1xf32, #tpu.memory_space<vmem>>, vector<24x1xf32>
    %21 = vector.broadcast %20 : vector<24x1xf32> to vector<24x512xf32>
    %22 = arith.addf %19, %21 : vector<24x512xf32>
    %cst_9 = arith.constant 0.000000e+00 : f32
    %23 = vector.broadcast %cst_9 : f32 to vector<24x512xf32>
    %24 = arith.maximumf %22, %23 : vector<24x512xf32>
    %c0_10 = arith.constant 0 : index
    %c0_11 = arith.constant 0 : index
    %25 = vector.load %arg3[%c0_10, %c0_11] : memref<24x512xf32, #tpu.memory_space<vmem>>, vector<24x512xf32>
    tpu.vector_store %arg3[%c0_10, %c0_11], %24 {strides = array<i32>} : memref<24x512xf32, #tpu.memory_space<vmem>>, vector<24x512xf32>,
    return
  }
}

module attributes {stable_mosaic.version = 11 : i64} {
  func.func @kernel(%arg0: i32, %arg1: memref<9x24x24xf32, #tpu.memory_space<vmem>>, %arg2: memref<24x1xf32, #tpu.memory_space<vmem>>, %arg3: memref<1x24x16x16xf32, #tpu.memory_space<vmem>>, %arg4: memref<1x24x288xf32, #tpu.memory_space<vmem>>, %arg5: memref<24x327xf32, #tpu.memory_space<vmem>>) attributes {dimension_semantics = [#tpu.dimension_semantics<parallel>], iteration_bounds = array<i64: 2>, scalar_prefetch = 0 : i64, scratch_operands = 1 : i64, tpu.core_type = #tpu.core_type<tc>, window_params = [{pipeline_mode = #tpu.pipeline_mode<synchronous>, transform_indices = @transform_0, window_bounds = array<i64: 9, 24, 24>}, {pipeline_mode = #tpu.pipeline_mode<synchronous>, transform_indices = @transform_1, window_bounds = array<i64: 24, 1>}, {transform_indices = @transform_2, window_bounds = array<i64: 1, 24, 16, 16>}, {transform_indices = @transform_3, window_bounds = array<i64: 1, 24, 288>}]} {
    %cst = arith.constant 0.000000e+00 : f32
    %0 = vector.broadcast %cst : f32 to vector<24x327xf32>
    %c0 = arith.constant 0 : index
    %c0_0 = arith.constant 0 : index
    %1 = vector.load %arg5[%c0, %c0_0] : memref<24x327xf32, #tpu.memory_space<vmem>>, vector<24x327xf32>
    tpu.vector_store %arg5[%c0, %c0_0], %0 {strides = array<i32>} : memref<24x327xf32, #tpu.memory_space<vmem>>, vector<24x327xf32>,
    %c0_1 = arith.constant 0 : index
    %c0_2 = arith.constant 0 : index
    %c0_3 = arith.constant 0 : index
    %c0_4 = arith.constant 0 : index
    %2 = vector.load %arg3[%c0_1, %c0_2, %c0_3, %c0_4] : memref<1x24x16x16xf32, #tpu.memory_space<vmem>>, vector<1x24x1x16xf32>
    %3 = vector.shape_cast %2 : vector<1x24x1x16xf32> to vector<24x16xf32>
    %c0_5 = arith.constant 0 : index
    %c19 = arith.constant 19 : index
    %4 = vector.load %arg5[%c0_5, %c19] : memref<24x327xf32, #tpu.memory_space<vmem>>, vector<24x16xf32>
    tpu.vector_store %arg5[%c0_5, %c19], %3 {strides = array<i32>} : memref<24x327xf32, #tpu.memory_space<vmem>>, vector<24x16xf32>,
    %c0_6 = arith.constant 0 : index
    %c0_7 = arith.constant 0 : index
    %c1 = arith.constant 1 : index
    %c0_8 = arith.constant 0 : index
    %5 = vector.load %arg3[%c0_6, %c0_7, %c1, %c0_8] : memref<1x24x16x16xf32, #tpu.memory_space<vmem>>, vector<1x24x1x16xf32>
    %6 = vector.shape_cast %5 : vector<1x24x1x16xf32> to vector<24x16xf32>
    %c0_9 = arith.constant 0 : index
    %c37 = arith.constant 37 : index
    %7 = vector.load %arg5[%c0_9, %c37] : memref<24x327xf32, #tpu.memory_space<vmem>>, vector<24x16xf32>
    tpu.vector_store %arg5[%c0_9, %c37], %6 {strides = array<i32>} : memref<24x327xf32, #tpu.memory_space<vmem>>, vector<24x16xf32>,
    %c0_10 = arith.constant 0 : index
    %c0_11 = arith.constant 0 : index
    %c2 = arith.constant 2 : index
    %c0_12 = arith.constant 0 : index
    %8 = vector.load %arg3[%c0_10, %c0_11, %c2, %c0_12] : memref<1x24x16x16xf32, #tpu.memory_space<vmem>>, vector<1x24x1x16xf32>
    %9 = vector.shape_cast %8 : vector<1x24x1x16xf32> to vector<24x16xf32>
    %c0_13 = arith.constant 0 : index
    %c55 = arith.constant 55 : index
    %10 = vector.load %arg5[%c0_13, %c55] : memref<24x327xf32, #tpu.memory_space<vmem>>, vector<24x16xf32>
    tpu.vector_store %arg5[%c0_13, %c55], %9 {strides = array<i32>} : memref<24x327xf32, #tpu.memory_space<vmem>>, vector<24x16xf32>,
    %c0_14 = arith.constant 0 : index
    %c0_15 = arith.constant 0 : index
    %c3 = arith.constant 3 : index
    %c0_16 = arith.constant 0 : index
    %11 = vector.load %arg3[%c0_14, %c0_15, %c3, %c0_16] : memref<1x24x16x16xf32, #tpu.memory_space<vmem>>, vector<1x24x1x16xf32>
    %12 = vector.shape_cast %11 : vector<1x24x1x16xf32> to vector<24x16xf32>
    %c0_17 = arith.constant 0 : index
    %c73 = arith.constant 73 : index
    %13 = vector.load %arg5[%c0_17, %c73] : memref<24x327xf32, #tpu.memory_space<vmem>>, vector<24x16xf32>
    tpu.vector_store %arg5[%c0_17, %c73], %12 {strides = array<i32>} : memref<24x327xf32, #tpu.memory_space<vmem>>, vector<24x16xf32>,
    %c0_18 = arith.constant 0 : index
    %c0_19 = arith.constant 0 : index
    %c4 = arith.constant 4 : index
    %c0_20 = arith.constant 0 : index
    %14 = vector.load %arg3[%c0_18, %c0_19, %c4, %c0_20] : memref<1x24x16x16xf32, #tpu.memory_space<vmem>>, vector<1x24x1x16xf32>
    %15 = vector.shape_cast %14 : vector<1x24x1x16xf32> to vector<24x16xf32>
    %c0_21 = arith.constant 0 : index
    %c91 = arith.constant 91 : index
    %16 = vector.load %arg5[%c0_21, %c91] : memref<24x327xf32, #tpu.memory_space<vmem>>, vector<24x16xf32>
    tpu.vector_store %arg5[%c0_21, %c91], %15 {strides = array<i32>} : memref<24x327xf32, #tpu.memory_space<vmem>>, vector<24x16xf32>,
    %c0_22 = arith.constant 0 : index
    %c0_23 = arith.constant 0 : index
    %c5 = arith.constant 5 : index
    %c0_24 = arith.constant 0 : index
    %17 = vector.load %arg3[%c0_22, %c0_23, %c5, %c0_24] : memref<1x24x16x16xf32, #tpu.memory_space<vmem>>, vector<1x24x1x16xf32>
    %18 = vector.shape_cast %17 : vector<1x24x1x16xf32> to vector<24x16xf32>
    %c0_25 = arith.constant 0 : index
    %c109 = arith.constant 109 : index
    %19 = vector.load %arg5[%c0_25, %c109] : memref<24x327xf32, #tpu.memory_space<vmem>>, vector<24x16xf32>
    tpu.vector_store %arg5[%c0_25, %c109], %18 {strides = array<i32>} : memref<24x327xf32, #tpu.memory_space<vmem>>, vector<24x16xf32>,
    %c0_26 = arith.constant 0 : index
    %c0_27 = arith.constant 0 : index
    %c6 = arith.constant 6 : index
    %c0_28 = arith.constant 0 : index
    %20 = vector.load %arg3[%c0_26, %c0_27, %c6, %c0_28] : memref<1x24x16x16xf32, #tpu.memory_space<vmem>>, vector<1x24x1x16xf32>
    %21 = vector.shape_cast %20 : vector<1x24x1x16xf32> to vector<24x16xf32>
    %c0_29 = arith.constant 0 : index
    %c127 = arith.constant 127 : index
    %22 = vector.load %arg5[%c0_29, %c127] : memref<24x327xf32, #tpu.memory_space<vmem>>, vector<24x16xf32>
    tpu.vector_store %arg5[%c0_29, %c127], %21 {strides = array<i32>} : memref<24x327xf32, #tpu.memory_space<vmem>>, vector<24x16xf32>,
    %c0_30 = arith.constant 0 : index
    %c0_31 = arith.constant 0 : index
    %c7 = arith.constant 7 : index
    %c0_32 = arith.constant 0 : index
    %23 = vector.load %arg3[%c0_30, %c0_31, %c7, %c0_32] : memref<1x24x16x16xf32, #tpu.memory_space<vmem>>, vector<1x24x1x16xf32>
    %24 = vector.shape_cast %23 : vector<1x24x1x16xf32> to vector<24x16xf32>
    %c0_33 = arith.constant 0 : index
    %c145 = arith.constant 145 : index
    %25 = vector.load %arg5[%c0_33, %c145] : memref<24x327xf32, #tpu.memory_space<vmem>>, vector<24x16xf32>
    tpu.vector_store %arg5[%c0_33, %c145], %24 {strides = array<i32>} : memref<24x327xf32, #tpu.memory_space<vmem>>, vector<24x16xf32>,
    %c0_34 = arith.constant 0 : index
    %c0_35 = arith.constant 0 : index
    %c8 = arith.constant 8 : index
    %c0_36 = arith.constant 0 : index
    %26 = vector.load %arg3[%c0_34, %c0_35, %c8, %c0_36] : memref<1x24x16x16xf32, #tpu.memory_space<vmem>>, vector<1x24x1x16xf32>
    %27 = vector.shape_cast %26 : vector<1x24x1x16xf32> to vector<24x16xf32>
    %c0_37 = arith.constant 0 : index
    %c163 = arith.constant 163 : index
    %28 = vector.load %arg5[%c0_37, %c163] : memref<24x327xf32, #tpu.memory_space<vmem>>, vector<24x16xf32>
    tpu.vector_store %arg5[%c0_37, %c163], %27 {strides = array<i32>} : memref<24x327xf32, #tpu.memory_space<vmem>>, vector<24x16xf32>,
    %c0_38 = arith.constant 0 : index
    %c0_39 = arith.constant 0 : index
    %c9 = arith.constant 9 : index
    %c0_40 = arith.constant 0 : index
    %29 = vector.load %arg3[%c0_38, %c0_39, %c9, %c0_40] : memref<1x24x16x16xf32, #tpu.memory_space<vmem>>, vector<1x24x1x16xf32>
    %30 = vector.shape_cast %29 : vector<1x24x1x16xf32> to vector<24x16xf32>
    %c0_41 = arith.constant 0 : index
    %c181 = arith.constant 181 : index
    %31 = vector.load %arg5[%c0_41, %c181] : memref<24x327xf32, #tpu.memory_space<vmem>>, vector<24x16xf32>
    tpu.vector_store %arg5[%c0_41, %c181], %30 {strides = array<i32>} : memref<24x327xf32, #tpu.memory_space<vmem>>, vector<24x16xf32>,
    %c0_42 = arith.constant 0 : index
    %c0_43 = arith.constant 0 : index
    %c10 = arith.constant 10 : index
    %c0_44 = arith.constant 0 : index
    %32 = vector.load %arg3[%c0_42, %c0_43, %c10, %c0_44] : memref<1x24x16x16xf32, #tpu.memory_space<vmem>>, vector<1x24x1x16xf32>
    %33 = vector.shape_cast %32 : vector<1x24x1x16xf32> to vector<24x16xf32>
    %c0_45 = arith.constant 0 : index
    %c199 = arith.constant 199 : index
    %34 = vector.load %arg5[%c0_45, %c199] : memref<24x327xf32, #tpu.memory_space<vmem>>, vector<24x16xf32>
    tpu.vector_store %arg5[%c0_45, %c199], %33 {strides = array<i32>} : memref<24x327xf32, #tpu.memory_space<vmem>>, vector<24x16xf32>,
    %c0_46 = arith.constant 0 : index
    %c0_47 = arith.constant 0 : index
    %c11 = arith.constant 11 : index
    %c0_48 = arith.constant 0 : index
    %35 = vector.load %arg3[%c0_46, %c0_47, %c11, %c0_48] : memref<1x24x16x16xf32, #tpu.memory_space<vmem>>, vector<1x24x1x16xf32>
    %36 = vector.shape_cast %35 : vector<1x24x1x16xf32> to vector<24x16xf32>
    %c0_49 = arith.constant 0 : index
    %c217 = arith.constant 217 : index
    %37 = vector.load %arg5[%c0_49, %c217] : memref<24x327xf32, #tpu.memory_space<vmem>>, vector<24x16xf32>
    tpu.vector_store %arg5[%c0_49, %c217], %36 {strides = array<i32>} : memref<24x327xf32, #tpu.memory_space<vmem>>, vector<24x16xf32>,
    %c0_50 = arith.constant 0 : index
    %c0_51 = arith.constant 0 : index
    %c12 = arith.constant 12 : index
    %c0_52 = arith.constant 0 : index
    %38 = vector.load %arg3[%c0_50, %c0_51, %c12, %c0_52] : memref<1x24x16x16xf32, #tpu.memory_space<vmem>>, vector<1x24x1x16xf32>
    %39 = vector.shape_cast %38 : vector<1x24x1x16xf32> to vector<24x16xf32>
    %c0_53 = arith.constant 0 : index
    %c235 = arith.constant 235 : index
    %40 = vector.load %arg5[%c0_53, %c235] : memref<24x327xf32, #tpu.memory_space<vmem>>, vector<24x16xf32>
    tpu.vector_store %arg5[%c0_53, %c235], %39 {strides = array<i32>} : memref<24x327xf32, #tpu.memory_space<vmem>>, vector<24x16xf32>,
    %c0_54 = arith.constant 0 : index
    %c0_55 = arith.constant 0 : index
    %c13 = arith.constant 13 : index
    %c0_56 = arith.constant 0 : index
    %41 = vector.load %arg3[%c0_54, %c0_55, %c13, %c0_56] : memref<1x24x16x16xf32, #tpu.memory_space<vmem>>, vector<1x24x1x16xf32>
    %42 = vector.shape_cast %41 : vector<1x24x1x16xf32> to vector<24x16xf32>
    %c0_57 = arith.constant 0 : index
    %c253 = arith.constant 253 : index
    %43 = vector.load %arg5[%c0_57, %c253] : memref<24x327xf32, #tpu.memory_space<vmem>>, vector<24x16xf32>
    tpu.vector_store %arg5[%c0_57, %c253], %42 {strides = array<i32>} : memref<24x327xf32, #tpu.memory_space<vmem>>, vector<24x16xf32>,
    %c0_58 = arith.constant 0 : index
    %c0_59 = arith.constant 0 : index
    %c14 = arith.constant 14 : index
    %c0_60 = arith.constant 0 : index
    %44 = vector.load %arg3[%c0_58, %c0_59, %c14, %c0_60] : memref<1x24x16x16xf32, #tpu.memory_space<vmem>>, vector<1x24x1x16xf32>
    %45 = vector.shape_cast %44 : vector<1x24x1x16xf32> to vector<24x16xf32>
    %c0_61 = arith.constant 0 : index
    %c271 = arith.constant 271 : index
    %46 = vector.load %arg5[%c0_61, %c271] : memref<24x327xf32, #tpu.memory_space<vmem>>, vector<24x16xf32>
    tpu.vector_store %arg5[%c0_61, %c271], %45 {strides = array<i32>} : memref<24x327xf32, #tpu.memory_space<vmem>>, vector<24x16xf32>,
    %c0_62 = arith.constant 0 : index
    %c0_63 = arith.constant 0 : index
    %c15 = arith.constant 15 : index
    %c0_64 = arith.constant 0 : index
    %47 = vector.load %arg3[%c0_62, %c0_63, %c15, %c0_64] : memref<1x24x16x16xf32, #tpu.memory_space<vmem>>, vector<1x24x1x16xf32>
    %48 = vector.shape_cast %47 : vector<1x24x1x16xf32> to vector<24x16xf32>
    %c0_65 = arith.constant 0 : index
    %c289 = arith.constant 289 : index
    %49 = vector.load %arg5[%c0_65, %c289] : memref<24x327xf32, #tpu.memory_space<vmem>>, vector<24x16xf32>
    tpu.vector_store %arg5[%c0_65, %c289], %48 {strides = array<i32>} : memref<24x327xf32, #tpu.memory_space<vmem>>, vector<24x16xf32>,
    %cst_66 = arith.constant 0.000000e+00 : f32
    %50 = vector.broadcast %cst_66 : f32 to vector<24x288xf32>
    %c0_67 = arith.constant 0 : index
    %c0_68 = arith.constant 0 : index
    %51 = vector.load %arg5[%c0_67, %c0_68] : memref<24x327xf32, #tpu.memory_space<vmem>>, vector<24x288xf32>
    %c0_69 = arith.constant 0 : index
    %c0_70 = arith.constant 0 : index
    %c0_71 = arith.constant 0 : index
    %52 = vector.load %arg1[%c0_69, %c0_70, %c0_71] : memref<9x24x24xf32, #tpu.memory_space<vmem>>, vector<1x24x24xf32>
    %53 = vector.shape_cast %52 : vector<1x24x24xf32> to vector<24x24xf32>
    %cst_72 = arith.constant dense<0.000000e+00> : vector<24x288xf32>
    %54 = tpu.matmul %53, %51, %cst_72 {dimension_numbers = #tpu.dot_dimension_numbers<[1], [0], [0], [1], [0, 0, 1, 1], [], []>} : vector<24x24xf32>, vector<24x288xf32>, vector<24x288xf32> -> vector<24x288xf32>
    %55 = arith.addf %50, %54 : vector<24x288xf32>
    %c0_73 = arith.constant 0 : index
    %c1_74 = arith.constant 1 : index
    %56 = vector.load %arg5[%c0_73, %c1_74] : memref<24x327xf32, #tpu.memory_space<vmem>>, vector<24x288xf32>
    %c1_75 = arith.constant 1 : index
    %c0_76 = arith.constant 0 : index
    %c0_77 = arith.constant 0 : index
    %57 = vector.load %arg1[%c1_75, %c0_76, %c0_77] : memref<9x24x24xf32, #tpu.memory_space<vmem>>, vector<1x24x24xf32>
    %58 = vector.shape_cast %57 : vector<1x24x24xf32> to vector<24x24xf32>
    %cst_78 = arith.constant dense<0.000000e+00> : vector<24x288xf32>
    %59 = tpu.matmul %58, %56, %cst_78 {dimension_numbers = #tpu.dot_dimension_numbers<[1], [0], [0], [1], [0, 0, 1, 1], [], []>} : vector<24x24xf32>, vector<24x288xf32>, vector<24x288xf32> -> vector<24x288xf32>
    %60 = arith.addf %55, %59 : vector<24x288xf32>
    %c0_79 = arith.constant 0 : index
    %c2_80 = arith.constant 2 : index
    %61 = vector.load %arg5[%c0_79, %c2_80] : memref<24x327xf32, #tpu.memory_space<vmem>>, vector<24x288xf32>
    %c2_81 = arith.constant 2 : index
    %c0_82 = arith.constant 0 : index
    %c0_83 = arith.constant 0 : index
    %62 = vector.load %arg1[%c2_81, %c0_82, %c0_83] : memref<9x24x24xf32, #tpu.memory_space<vmem>>, vector<1x24x24xf32>
    %63 = vector.shape_cast %62 : vector<1x24x24xf32> to vector<24x24xf32>
    %cst_84 = arith.constant dense<0.000000e+00> : vector<24x288xf32>
    %64 = tpu.matmul %63, %61, %cst_84 {dimension_numbers = #tpu.dot_dimension_numbers<[1], [0], [0], [1], [0, 0, 1, 1], [], []>} : vector<24x24xf32>, vector<24x288xf32>, vector<24x288xf32> -> vector<24x288xf32>
    %65 = arith.addf %60, %64 : vector<24x288xf32>
    %c0_85 = arith.constant 0 : index
    %c18 = arith.constant 18 : index
    %66 = vector.load %arg5[%c0_85, %c18] : memref<24x327xf32, #tpu.memory_space<vmem>>, vector<24x288xf32>
    %c3_86 = arith.constant 3 : index
    %c0_87 = arith.constant 0 : index
    %c0_88 = arith.constant 0 : index
    %67 = vector.load %arg1[%c3_86, %c0_87, %c0_88] : memref<9x24x24xf32, #tpu.memory_space<vmem>>, vector<1x24x24xf32>
    %68 = vector.shape_cast %67 : vector<1x24x24xf32> to vector<24x24xf32>
    %cst_89 = arith.constant dense<0.000000e+00> : vector<24x288xf32>
    %69 = tpu.matmul %68, %66, %cst_89 {dimension_numbers = #tpu.dot_dimension_numbers<[1], [0], [0], [1], [0, 0, 1, 1], [], []>} : vector<24x24xf32>, vector<24x288xf32>, vector<24x288xf32> -> vector<24x288xf32>
    %70 = arith.addf %65, %69 : vector<24x288xf32>
    %c0_90 = arith.constant 0 : index
    %c19_91 = arith.constant 19 : index
    %71 = vector.load %arg5[%c0_90, %c19_91] : memref<24x327xf32, #tpu.memory_space<vmem>>, vector<24x288xf32>
    %c4_92 = arith.constant 4 : index
    %c0_93 = arith.constant 0 : index
    %c0_94 = arith.constant 0 : index
    %72 = vector.load %arg1[%c4_92, %c0_93, %c0_94] : memref<9x24x24xf32, #tpu.memory_space<vmem>>, vector<1x24x24xf32>
    %73 = vector.shape_cast %72 : vector<1x24x24xf32> to vector<24x24xf32>
    %cst_95 = arith.constant dense<0.000000e+00> : vector<24x288xf32>
    %74 = tpu.matmul %73, %71, %cst_95 {dimension_numbers = #tpu.dot_dimension_numbers<[1], [0], [0], [1], [0, 0, 1, 1], [], []>} : vector<24x24xf32>, vector<24x288xf32>, vector<24x288xf32> -> vector<24x288xf32>
    %75 = arith.addf %70, %74 : vector<24x288xf32>
    %c0_96 = arith.constant 0 : index
    %c20 = arith.constant 20 : index
    %76 = vector.load %arg5[%c0_96, %c20] : memref<24x327xf32, #tpu.memory_space<vmem>>, vector<24x288xf32>
    %c5_97 = arith.constant 5 : index
    %c0_98 = arith.constant 0 : index
    %c0_99 = arith.constant 0 : index
    %77 = vector.load %arg1[%c5_97, %c0_98, %c0_99] : memref<9x24x24xf32, #tpu.memory_space<vmem>>, vector<1x24x24xf32>
    %78 = vector.shape_cast %77 : vector<1x24x24xf32> to vector<24x24xf32>
    %cst_100 = arith.constant dense<0.000000e+00> : vector<24x288xf32>
    %79 = tpu.matmul %78, %76, %cst_100 {dimension_numbers = #tpu.dot_dimension_numbers<[1], [0], [0], [1], [0, 0, 1, 1], [], []>} : vector<24x24xf32>, vector<24x288xf32>, vector<24x288xf32> -> vector<24x288xf32>
    %80 = arith.addf %75, %79 : vector<24x288xf32>
    %c0_101 = arith.constant 0 : index
    %c36 = arith.constant 36 : index
    %81 = vector.load %arg5[%c0_101, %c36] : memref<24x327xf32, #tpu.memory_space<vmem>>, vector<24x288xf32>
    %c6_102 = arith.constant 6 : index
    %c0_103 = arith.constant 0 : index
    %c0_104 = arith.constant 0 : index
    %82 = vector.load %arg1[%c6_102, %c0_103, %c0_104] : memref<9x24x24xf32, #tpu.memory_space<vmem>>, vector<1x24x24xf32>
    %83 = vector.shape_cast %82 : vector<1x24x24xf32> to vector<24x24xf32>
    %cst_105 = arith.constant dense<0.000000e+00> : vector<24x288xf32>
    %84 = tpu.matmul %83, %81, %cst_105 {dimension_numbers = #tpu.dot_dimension_numbers<[1], [0], [0], [1], [0, 0, 1, 1], [], []>} : vector<24x24xf32>, vector<24x288xf32>, vector<24x288xf32> -> vector<24x288xf32>
    %85 = arith.addf %80, %84 : vector<24x288xf32>
    %c0_106 = arith.constant 0 : index
    %c37_107 = arith.constant 37 : index
    %86 = vector.load %arg5[%c0_106, %c37_107] : memref<24x327xf32, #tpu.memory_space<vmem>>, vector<24x288xf32>
    %c7_108 = arith.constant 7 : index
    %c0_109 = arith.constant 0 : index
    %c0_110 = arith.constant 0 : index
    %87 = vector.load %arg1[%c7_108, %c0_109, %c0_110] : memref<9x24x24xf32, #tpu.memory_space<vmem>>, vector<1x24x24xf32>
    %88 = vector.shape_cast %87 : vector<1x24x24xf32> to vector<24x24xf32>
    %cst_111 = arith.constant dense<0.000000e+00> : vector<24x288xf32>
    %89 = tpu.matmul %88, %86, %cst_111 {dimension_numbers = #tpu.dot_dimension_numbers<[1], [0], [0], [1], [0, 0, 1, 1], [], []>} : vector<24x24xf32>, vector<24x288xf32>, vector<24x288xf32> -> vector<24x288xf32>
    %90 = arith.addf %85, %89 : vector<24x288xf32>
    %c0_112 = arith.constant 0 : index
    %c38 = arith.constant 38 : index
    %91 = vector.load %arg5[%c0_112, %c38] : memref<24x327xf32, #tpu.memory_space<vmem>>, vector<24x288xf32>
    %c8_113 = arith.constant 8 : index
    %c0_114 = arith.constant 0 : index
    %c0_115 = arith.constant 0 : index
    %92 = vector.load %arg1[%c8_113, %c0_114, %c0_115] : memref<9x24x24xf32, #tpu.memory_space<vmem>>, vector<1x24x24xf32>
    %93 = vector.shape_cast %92 : vector<1x24x24xf32> to vector<24x24xf32>
    %cst_116 = arith.constant dense<0.000000e+00> : vector<24x288xf32>
    %94 = tpu.matmul %93, %91, %cst_116 {dimension_numbers = #tpu.dot_dimension_numbers<[1], [0], [0], [1], [0, 0, 1, 1], [], []>} : vector<24x24xf32>, vector<24x288xf32>, vector<24x288xf32> -> vector<24x288xf32>
    %95 = arith.addf %90, %94 : vector<24x288xf32>
    %c0_117 = arith.constant 0 : index
    %c0_118 = arith.constant 0 : index
    %96 = vector.load %arg2[%c0_117, %c0_118] : memref<24x1xf32, #tpu.memory_space<vmem>>, vector<24x1xf32>
    %97 = vector.broadcast %96 : vector<24x1xf32> to vector<24x288xf32>
    %98 = arith.addf %95, %97 : vector<24x288xf32>
    %c0_119 = arith.constant 0 : index
    %c0_120 = arith.constant 0 : index
    %c0_121 = arith.constant 0 : index
    %99 = vector.load %arg4[%c0_119, %c0_120, %c0_121] : memref<1x24x288xf32, #tpu.memory_space<vmem>>, vector<1x24x288xf32>
    %100 = vector.shape_cast %99 : vector<1x24x288xf32> to vector<24x288xf32>
    %101 = vector.shape_cast %98 : vector<24x288xf32> to vector<1x24x288xf32>
    tpu.vector_store %arg4[%c0_119, %c0_120, %c0_121], %101 {strides = array<i32>} : memref<1x24x288xf32, #tpu.memory_space<vmem>>, vector<1x24x288xf32>,
    return
  }
  func.func @transform_0(%arg0: i32) -> (i32, i32, i32) {
    %c0_i32 = arith.constant 0 : i32
    %c0_i32_0 = arith.constant 0 : i32
    %c0_i32_1 = arith.constant 0 : i32
    %c0_i32_2 = arith.constant 0 : i32
    return %c0_i32, %c0_i32_0, %c0_i32_1 : i32, i32, i32
  }
  func.func @transform_1(%arg0: i32) -> (i32, i32) {
    %c0_i32 = arith.constant 0 : i32
    %c0_i32_0 = arith.constant 0 : i32
    %c0_i32_1 = arith.constant 0 : i32
    return %c0_i32, %c0_i32_0 : i32, i32
  }
  func.func @transform_2(%arg0: i32) -> (i32, i32, i32, i32) {
    %c0_i32 = arith.constant 0 : i32
    %c0_i32_0 = arith.constant 0 : i32
    %c0_i32_1 = arith.constant 0 : i32
    %c0_i32_2 = arith.constant 0 : i32
    return %arg0, %c0_i32, %c0_i32_0, %c0_i32_1 : i32, i32, i32, i32
  }
  func.func @transform_3(%arg0: i32) -> (i32, i32, i32) {
    %c0_i32 = arith.constant 0 : i32
    %c0_i32_0 = arith.constant 0 : i32
    %c0_i32_1 = arith.constant 0 : i32
    return %arg0, %c0_i32, %c0_i32_0 : i32, i32, i32
  }
}

</mosaic_0001>

<bundles_post_ra>
// kernel: _lambda_.12
= control target key start
LH: loop header
LB: loop body
LE: loop exit
PB: predicated region body
PF: predicated region fallthrough
CT: control target
= control target key end

     0   :  { %vm15_vm0 = vcmask 1043456   ;;  %v73_v2 = vmov 128.0   ;;  %v74_v4 = vmov 0   ;;  %s109_s0 = inlined_call_operand.vmem [shape: f32[4,128], index: 0, kind: input, shape index: {}]   ;;  %s110_s1 = inlined_call_operand.vmem [shape: f32[4,1], index: 1, kind: input, shape index: {}]   ;;  %s111_s2 = inlined_call_operand.vmem [shape: f32[4,1], index: 2, kind: input, shape index: {}]   ;;  %s112_s3 = inlined_call_operand.vmem [shape: f32[4,128], index: 3, kind: output, shape index: {}]  }
   0x1   :  { %v14_v0 = vld [vmem:[%s109_s0] sm:$0xf]  ;;  %69 = vrcp.f32 %v73_v2  ;;  %67 = vset.pattern.permute.xlu1 %v74_v4  ;;  %68 = vset.pattern.permute.xlu0 %v74_v4 }
   0x2   :  { %v16_v1 = vsel %vm15_vm0, %v14_v0, 0.0  ;;  %v45_v3 = vld [vmem:[%s110_s1] sm:$0xf] }
   0x3   :  { %17 = vadd.xlane.f32.xlu0 %v16_v1  ;;  %48 = vperm.xlu1 %67, %v45_v3   ;;  %v52_v7 = vld [vmem:[%s111_s2] sm:$0xf] }
   0x7   :  { %v70_v5 = vpop.eup %69 }
   0x8   :  { %v20_v6 = vmul.f32 128.0, %v70_v5  ;;  %vm24_vm1 = vweird.f32 %v70_v5 }
   0xa   :  { %v21_v8 = vsub.f32 1.0, %v20_v6 }
   0xb   :  { %55 = vperm.xlu1 %67, %v52_v7  }
   0xc   :  { %v22_v9 = vmul.f32 %v70_v5, %v21_v8 }
   0xe   :  { %v23_v10 = vadd.f32 %v70_v5, %v22_v9 }
  0x10   :  { %v25_v11 = vsel %vm24_vm1, %v70_v5, %v23_v10 }
  0x75   :  { %v49_v24 = vpop.permute.xlu1 %48 }
  0x76   :  { %v18_v12 = vpop.xlane.xlu0 %17 }
  0x77   :  { %v26_v13 = vmul.f32 %v25_v11, %v18_v12 }
  0x79   :  { %v27_v14 = vsub.f32 %v14_v0, %v26_v13 }
  0x7b   :  { %v28_v15 = vmul.f32 %v27_v14, %v27_v14 }
  0x7d   :  { %v29_v16 = vsel %vm15_vm0, %v28_v15, 0.0  ;;  %v56_v30 = vpop.permute.xlu1 %55 }
  0x7e   :  { %30 = vadd.xlane.f32.xlu0 %v29_v16 }
  0xf1   :  { %v31_v17 = vpop.xlane.xlu0 %30 }
  0xf2   :  { %v32_v18 = vmul.f32 %v31_v17, %v25_v11 }
  0xf4   :  { %v33_v19 = vadd.f32 1e-05, %v32_v18 }
  0xf6   :  { %71 = vrsqrt.f32 %v33_v19  ;;  %vm40_vm3 = vweird.f32 %v33_v19 }
  0xfc   :  { %v72_v20 = vpop.eup %71 }
  0xfd   :  { %v35_v21 = vmul.f32 %v72_v20, %v33_v19  ;;  %vm41_vm2 = vweird.f32 %v72_v20 }
  0xfe   :  { %vm42_vm4 = vmor %vm40_vm3, %vm41_vm2 }
  0xff   :  { %v36_v22 = vmul.f32 %v72_v20, %v35_v21 }
 0x101   :  { %v37_v23 = vmul.f32 0.5, %v36_v22 }
 0x103   :  { %v38_v25 = vsub.f32 1.5, %v37_v23 }
 0x105   :  { %v39_v26 = vmul.f32 %v72_v20, %v38_v25 }
 0x107   :  { %v43_v27 = vsel %vm42_vm4, %v72_v20, %v39_v26 }
 0x108   :  { %v44_v28 = vmul.f32 %v43_v27, %v27_v14 }
 0x10a   :  { %v51_v29 = vmul.f32 %v49_v24, %v44_v28 }
 0x10c   :  { %v58_v31 = vadd.f32 %v56_v30, %v51_v29 }
 0x10e   :  { %v59_v32 = vmax.f32 %v58_v31, 0.0 }
 0x110   :  { %60 = vst [vmem:[%s112_s3] sm:$0xf] %v59_v32 }

// kernel: _lambda_.11
= control target key start
LH: loop header
LB: loop body
LE: loop exit
PB: predicated region body
PF: predicated region fallthrough
CT: control target
= control target key end

     0   :  { %s747_s12 = smov 0   ;;  %s968_s0 = inlined_call_operand.vmem [shape: f32[9,4,1], index: 0, kind: input, shape index: {}]   ;;  %s969_s1 = inlined_call_operand.vmem [shape: f32[4,1], index: 1, kind: input, shape index: {}]   ;;  %s970_s2 = inlined_call_operand.vmem [shape: f32[2,1,16,16], index: 2, kind: input, shape index: {}]   ;;  %s971_s3 = inlined_call_operand.vmem [shape: f32[2,4,288], index: 3, kind: output, shape index: {}]  }
   0x1 LB: > { %s642_s13 = sadd.s32 4294967295, %s702_s12   ;;  %p646_p0 = scmp.ge.s32.totalorder %s702_s12, 1  ;;  %s702_s12 = sphi %s747_s12, %s13_s12  }
   0x2   : > { %p137_p1 = scmp.lt.s32.totalorder %s702_s12, 3 }
   0x4   : > { %p138_p2 = pnand %p646_p0, %p137_p1 }
   0x5   : > { %p161_p3 = scmp.lt.s32.totalorder (!%p138_p2), %s642_s13, 1  ;;  %s704_s18 = smov (!%p138_p2), 55  }
   0x6   : > { %141 = sbr.rel (%p138_p2) target bundleno = 368 (0x170), region = 32  ;;  %s705_s19 = smov (!%p138_p2), 19  }
   0x7   : > { %s706_s20 = smov (!%p138_p2), 91   ;;  %s708_s21 = smov (!%p138_p2), 73  }
   0x8   : > { %s709_s22 = smov (!%p138_p2), 37   ;;  %s710_s23 = smov (!%p138_p2), 109  }
   0x9   : > { %s711_s24 = smov (!%p138_p2), 17   ;;  %s712_s25 = smov (!%p138_p2), 127  }
   0xa   : > { %s713_s26 = smov (!%p138_p2), 35   ;;  %s714_s27 = smov (!%p138_p2), 71  }
   0xb   : > { %s995_s13 = smov (!%p161_p3, %s642_s13), 1  ;;  %v707_v5 = vmov 0   ;;  %s715_s28 = smov 53   ;;  %v327_v16 = vld [vmem:[%s968_s0] sm:$0xf]  ;;  %v171_v26 = vlaneseq  ;;  %v721_v27 = vmov 0.0  }
   0xc   : > { %s660_s14 = sshll.u32 %s995_s13, 4  ;;  %693 = vset.pattern.permute.xlu1 %v707_v5  ;;  %695 = vset.pattern.permute.xlu0 %v707_v5  ;;  %s716_s29 = smov 89   ;;  %v650_v18 = vld [vmem:[%s968_s0 + $0x4] sm:$0xf]  ;;  %v654_v19 = vld [vmem:[%s968_s0 + $0x14] sm:$0xf] }
   0xd   : > { %s761_s17 = scalar_lea.vmem %s970_s2, %s660_s14  ;;  %694 = vset.pattern.permute.xlu2 %v707_v5  ;;  %s717_s30 = smov 125   ;;  %v651_v20 = vld [vmem:[%s968_s0 + $0x8] sm:$0xf]  ;;  %v652_v21 = vld [vmem:[%s968_s0 + $0xc] sm:$0xf]  ;;  %vm173_vm0 = vcmp.lt.s32.totalorder %v171_v26, 327 }
   0xe   : > { %v194_v0 = vld [vmem:[%s761_s17 + $0x2] sm:$0x1]  ;;  %v176_v1 = vld [vmem:[%s761_s17] sm:$0x1]  ;;  %v212_v2 = vld [vmem:[%s761_s17 + $0x4] sm:$0x1] }
   0xf   : > { %196 = vrot.lane.b32.xlu1 %v194_v0, %s704_s18  ;;  %178 = vrot.lane.b32.xlu0 %v176_v1, %s705_s19  ;;  %v203_v3 = vld [vmem:[%s761_s17 + $0x3] sm:$0x1]  ;;  %v185_v4 = vld [vmem:[%s761_s17 + $0x1] sm:$0x1]  ;;  %s718_s4 = smov 107   ;;  %s719_s5 = smov 15  }
  0x10   : > { %214 = vrot.lane.b32.xlu2 %v212_v2, %s706_s20  ;;  %v221_v6 = vld [vmem:[%s761_s17 + $0x5] sm:$0x1]  ;;  %v242_v7 = vld [vmem:[%s761_s17 + $0x7] sm:$0x1]  ;;  %v230_v8 = vld [vmem:[%s761_s17 + $0x6] sm:$0x1] }
  0x11   : > { %v251_v9 = vld [vmem:[%s761_s17 + $0x8] sm:$0x1]  ;;  %v269_v10 = vld [vmem:[%s761_s17 + $0xa] sm:$0x1]  ;;  %v260_v11 = vld [vmem:[%s761_s17 + $0x9] sm:$0x1] }
  0x12   : > { %v278_v12 = vld [vmem:[%s761_s17 + $0xb] sm:$0x1]  ;;  %v296_v13 = vld [vmem:[%s761_s17 + $0xd] sm:$0x1]  ;;  %v287_v14 = vld [vmem:[%s761_s17 + $0xc] sm:$0x1] }
  0x13   : > { %v308_v15 = vld [vmem:[%s761_s17 + $0xe] sm:$0x1]  ;;  %v317_v17 = vld [vmem:[%s761_s17 + $0xf] sm:$0x1]  ;;  %s720_s10 = smov 33   ;;  %vm181_vm1 = vcmp.ge.s32.totalorder %v171_v26, 19 }
  0x14   : > { %v657_v22 = vld [vmem:[%s968_s0 + $0x20] sm:$0xf]  ;;  %v653_v23 = vld [vmem:[%s968_s0 + $0x10] sm:$0xf]  ;;  %v655_v24 = vld [vmem:[%s968_s0 + $0x18] sm:$0xf] }
  0x15   : > { %v656_v25 = vld [vmem:[%s968_s0 + $0x1c] sm:$0xf]  ;;  %175 = vst.msk [vmem:[#allocation2] sm:$0x7] %vm173_vm0, %v721_v27  ;;  %vm182_vm2 = vcmp.lt.s32.totalorder %v171_v26, 35  ;;  %vm813_vm4 = vcmp.ge.s32.totalorder %v171_v26, 37 }
  0x16   : > { %vm183_vm3 = vmand %vm181_vm1, %vm182_vm2  ;;  %vm818_vm5 = vcmp.lt.s32.totalorder %v171_v26, 53  ;;  %vm823_vm6 = vcmp.ge.s32.totalorder %v171_v26, 55  ;;  %vm828_vm7 = vcmp.lt.s32.totalorder %v171_v26, 71  ;;  %vm833_vm8 = vcmp.ge.s32.totalorder %v171_v26, 73  ;;  %v569_v34 = vld [vmem:[%s969_s1] sm:$0xf] }
  0x17   : > { %205 = vrot.lane.b32.xlu1 %v203_v3, %s708_s21  ;;  %187 = vrot.lane.b32.xlu0 %v185_v4, %s709_s22  ;;  %vm209_vm9 = vcmp.lt.s32.totalorder %v171_v26, 89  ;;  %vm192_vm10 = vmand %vm813_vm4, %vm818_vm5  ;;  %vm217_vm11 = vcmp.ge.s32.totalorder %v171_v26, 91  ;;  %vm218_vm12 = vcmp.lt.s32.totalorder %v171_v26, 107  ;;  %vm226_vm14 = vcmp.ge.s32.totalorder %v171_v26, 109 }
  0x18   : > { %223 = vrot.lane.b32.xlu2 %v221_v6, %s710_s23  ;;  %vm201_vm13 = vmand %vm823_vm6, %vm828_vm7  ;;  %vm227_vm15 = vcmp.lt.s32.totalorder %v171_v26, 125  ;;  %vm858_vm4 = vcmp.lt.s32.totalorder %v171_v26, 143  ;;  %vm863_vm5 = vcmp.ge.s32.totalorder %v171_v26, 17  ;;  %vm868_vm6 = vcmp.lt.s32.totalorder %v171_v26, 33 }
  0x19   : > { %vm210_vm0 = vmand %vm833_vm8, %vm209_vm9  ;;  %vm235_vm7 = vcmask 1039360   ;;  %vm873_vm8 = vcmp.ge.s32.totalorder %v171_v26, 35  ;;  %vm257_vm9 = vcmp.lt.s32.totalorder %v171_v26, 51 }
  0x1a   : > { %vm219_vm1 = vmand %vm217_vm11, %vm218_vm12 }
  0x1b   : > { %vm228_vm2 = vmand %vm226_vm14, %vm227_vm15  ;;  %vm266_vm14 = vcmp.lt.s32.totalorder %v171_v26, 69  ;;  %vm274_vm15 = vcmp.ge.s32.totalorder %v171_v26, 71 }
  0x1c   : > { %vm249_vm11 = vmand %vm863_vm5, %vm868_vm6  ;;  %vm292_vm6 = vcmp.ge.s32.totalorder %v171_v26, 107 }
  0x1d   : > { %vm258_vm12 = vmand %vm873_vm8, %vm257_vm9  ;;  %vm293_vm8 = vcmp.lt.s32.totalorder %v171_v26, 123 }
  0x1e   : > { %vm294_vm9 = vmand %vm292_vm6, %vm293_vm8  ;;  %vm448_vm6 = vcmask 891904   ;;  %vm476_vm8 = vcmask 883712  }
  0x1f   : > { %244 = vrot.lane.b32.xlu1 %v242_v7, %s711_s24  ;;  %232 = vrot.lane.b32.xlu0 %v230_v8, %s712_s25 }
  0x20   : > { %253 = vrot.lane.b32.xlu2 %v251_v9, %s713_s26 }
  0x27   : > { %271 = vrot.lane.b32.xlu1 %v269_v10, %s714_s27  ;;  %262 = vrot.lane.b32.xlu0 %v260_v11, %s715_s28 }
  0x28   : > { %280 = vrot.lane.b32.xlu2 %v278_v12, %s716_s29 }
  0x2f   : > { %298 = vrot.lane.b32.xlu1 %v296_v13, %s717_s30  ;;  %289 = vrot.lane.b32.xlu0 %v287_v14, %s718_s4  ;;  %s722_s30 = smov 126   ;;  %s723_s4 = smov 110  }
  0x30   : > { %310 = vrot.lane.b32.xlu2 %v308_v15, %s719_s5  ;;  %s725_s5 = smov 92  }
  0x37   : > { %330 = vperm.xlu1 %693, %v327_v16   ;;  %319 = vrot.lane.b32.xlu0 %v317_v17, %s720_s10 }
  0x38   : > { %350 = vperm.xlu2 %694, %v650_v18  }
  0x3f   : > { %461 = vperm.xlu1 %693, %v654_v19   ;;  %377 = vperm.xlu0 %695, %v651_v20  }
  0x40   : > { %405 = vperm.xlu2 %694, %v652_v21  }
  0x47   : > { %545 = vperm.xlu1 %693, %v657_v22   ;;  %433 = vperm.xlu0 %695, %v653_v23  }
  0x48   : > { %489 = vperm.xlu2 %694, %v655_v24  }
  0x4f   : > { %517 = vperm.xlu0 %695, %v656_v25  }
  0x6a   : > { %v215_v28 = vpop.permute.xlu2 %214 }
  0x72   : > { %v224_v35 = vpop.permute.xlu2 %223 }
  0x7a   : > { %v254_v41 = vpop.permute.xlu2 %253 }
  0x81   : > { %v197_v29 = vpop.permute.xlu1 %196  ;;  %v179_v30 = vpop.permute.xlu0 %178 }
  0x82   : > { %184 = vst.msk [vmem:[#allocation2] sm:$0x1] %vm183_vm3, %v179_v30  ;;  %vm853_vm3 = vcmp.ge.s32.totalorder %v171_v26, 127  ;;  %v281_v51 = vpop.permute.xlu2 %280 }
  0x89   : > { %v206_v37 = vpop.permute.xlu1 %205  ;;  %v188_v38 = vpop.permute.xlu0 %187 }
  0x8a   : > { %193 = vst.msk [vmem:[#allocation2] sm:$0x1] %vm192_vm10, %v188_v38  ;;  %vm240_vm10 = vmand %vm853_vm3, %vm858_vm4  ;;  %v311_v57 = vpop.permute.xlu2 %310 }
  0x8b   : > { %202 = vst.msk [vmem:[#allocation2] sm:$0x1] %vm201_vm13, %v197_v29  ;;  %vm265_vm13 = vcmp.ge.s32.totalorder %v171_v26, 53 }
  0x8c   : > { %211 = vst.msk [vmem:[#allocation2] sm:$0x1] %vm210_vm0, %v206_v37  ;;  %vm275_vm0 = vcmp.lt.s32.totalorder %v171_v26, 87  ;;  %vm267_vm3 = vmand %vm265_vm13, %vm266_vm14  ;;  %vm314_vm13 = vcmp.lt.s32.totalorder %v171_v26, 31  ;;  %vm301_vm14 = vcmask 1022976  }
  0x8d   : > { %220 = vst.msk [vmem:[#allocation2] sm:$0x1] %vm219_vm1, %v215_v28  ;;  %vm283_vm1 = vcmp.ge.s32.totalorder %v171_v26, 89  ;;  %vm276_vm4 = vmand %vm274_vm15, %vm275_vm0 }
  0x8e   : > { %229 = vst.msk [vmem:[#allocation2] sm:$0x1] %vm228_vm2, %v224_v35  ;;  %vm284_vm2 = vcmp.lt.s32.totalorder %v171_v26, 105 }
  0x8f   : > { %vm285_vm5 = vmand %vm283_vm1, %vm284_vm2  ;;  %vm322_vm1 = vcmp.ge.s32.totalorder %v171_v26, 33  ;;  %vm323_vm2 = vcmp.lt.s32.totalorder %v171_v26, 49 }
  0x91   : > { %v245_v44 = vpop.permute.xlu1 %244  ;;  %v233_v45 = vpop.permute.xlu0 %232 }
  0x92   : > { %v234_v47 = vrot.slane %v233_v45, 7  ;;  %v351_v63 = vpop.permute.xlu2 %350 }
  0x94   : > { %v236_v48 = vsel %vm235_vm7, %v234_v47, %v233_v45 }
  0x95   : > { %241 = vst.msk [vmem:[#allocation2] sm:$0x3] %vm240_vm10, %v236_v48  ;;  %vm898_vm10 = vcmp.ge.s32.totalorder %v171_v26, 125 }
  0x96   : > { %250 = vst.msk [vmem:[#allocation2 + $0x1] sm:$0x1] %vm249_vm11, %v245_v44  ;;  %vm305_vm11 = vcmp.lt.s32.totalorder %v171_v26, 141 }
  0x97   : > { %259 = vst.msk [vmem:[#allocation2 + $0x1] sm:$0x1] %vm258_vm12, %v254_v41  ;;  %vm313_vm12 = vcmp.ge.s32.totalorder %v171_v26, 15  ;;  %vm306_vm15 = vmand %vm898_vm10, %vm305_vm11  ;;  %vm532_vm10 = vcmask 744448   ;;  %vm560_vm11 = vcmask 736256  }
  0x98   : > { %vm315_vm0 = vmand %vm313_vm12, %vm314_vm13  ;;  %vm581_vm12 = vcmask 1043456  }
  0x99   : > { %v272_v49 = vpop.permute.xlu1 %271  ;;  %v263_v50 = vpop.permute.xlu0 %262 }
  0x9a   : > { %268 = vst.msk [vmem:[#allocation2 + $0x1] sm:$0x1] %vm267_vm3, %v263_v50  ;;  %vm324_vm3 = vmand %vm322_vm1, %vm323_vm2  ;;  %v406_v8 = vpop.permute.xlu2 %405 }
  0x9b   : > { %277 = vst.msk [vmem:[#allocation2 + $0x1] sm:$0x1] %vm276_vm4, %v272_v49  ;;  %vm392_vm4 = vcmask 1031168  }
  0x9c   : > { %286 = vst.msk [vmem:[#allocation2 + $0x1] sm:$0x1] %vm285_vm5, %v281_v51  ;;  %vm420_vm5 = vcmask 900096  }
  0xa1   : > { %v299_v53 = vpop.permute.xlu1 %298  ;;  %v290_v54 = vpop.permute.xlu0 %289 }
  0xa2   : > { %v300_v55 = vrot.slane %v299_v53, 7  ;;  %295 = vst.msk [vmem:[#allocation2 + $0x1] sm:$0x1] %vm294_vm9, %v290_v54  ;;  %v490_v20 = vpop.permute.xlu2 %489  ;;  %vm504_vm9 = vcmask 752640  }
  0xa4   : > { %v302_v56 = vsel %vm301_vm14, %v300_v55, %v299_v53 }
  0xa5   : > { %307 = vst.msk [vmem:[#allocation2 + $0x1] sm:$0x3] %vm306_vm15, %v302_v56 }
  0xa6   : > { %316 = vst.msk [vmem:[#allocation2 + $0x2] sm:$0x1] %vm315_vm0, %v311_v57 }
  0xa9   : > { %v320_v58 = vpop.permute.xlu0 %319  ;;  %v331_v0 = vpop.permute.xlu1 %330 }
  0xaa   : > { %325 = vst.msk [vmem:[#allocation2 + $0x2] sm:$0x1] %vm324_vm3, %v320_v58 }
  0xb1   : > { %v326_v59 = vld [vmem:[#allocation2] sm:$0x7]  ;;  %v378_v7 = vpop.permute.xlu0 %377  ;;  %v462_v17 = vpop.permute.xlu1 %461 }
  0xb2   : > { %v909_v60 = vperm.slane %v326_v59, 0  ;;  %v335_v61 = vperm.slane %v326_v59, 1  ;;  %v336_v62 = vperm.slane %v326_v59, 2 }
  0xb4   : > { %v355_v1 = vmul.f32 %v351_v63, %v336_v62  ;;  %v354_v2 = vmul.f32 %v351_v63, %v335_v61  ;;  %v353_v3 = vmul.f32 %v351_v63, %v909_v60  ;;  %v912_v4 = vmul.f32 %v336_v62, %v331_v0 }
  0xb5   : > { %v914_v5 = vmul.f32 %v335_v61, %v331_v0  ;;  %v917_v6 = vmul.f32 %v909_v60, %v331_v0  ;;  %v380_v9 = vmul.f32 %v378_v7, %v909_v60  ;;  %v381_v10 = vmul.f32 %v378_v7, %v335_v61 }
  0xb6   : > { %363 = vrot.lane.b32.xlu2 %v355_v1, %s712_s25  ;;  %361 = vrot.lane.b32.xlu1 %v354_v2, %s712_s25  ;;  %v409_v11 = vmul.f32 %v406_v8, %v335_v61  ;;  %v408_v13 = vmul.f32 %v406_v8, %v909_v60  ;;  %v382_v14 = vmul.f32 %v378_v7, %v336_v62 }
  0xb7   : > { %359 = vrot.lane.b32.xlu0 %v353_v3, %s712_s25  ;;  %v410_v16 = vmul.f32 %v406_v8, %v336_v62  ;;  %v466_v19 = vmul.f32 %v462_v17, %v336_v62  ;;  %s724_s25 = smov 108   ;;  %v465_v21 = vmul.f32 %v462_v17, %v335_v61  ;;  %v494_v23 = vmul.f32 %v490_v20, %v336_v62 }
  0xb8   : > { %v464_v25 = vmul.f32 %v462_v17, %v909_v60  ;;  %v493_v26 = vmul.f32 %v490_v20, %v335_v61  ;;  %v492_v29 = vmul.f32 %v490_v20, %v909_v60 }
  0xb9   : > { %v434_v12 = vpop.permute.xlu0 %433  ;;  %v546_v28 = vpop.permute.xlu1 %545 }
  0xba   : > { %v438_v15 = vmul.f32 %v434_v12, %v336_v62  ;;  %v437_v18 = vmul.f32 %v434_v12, %v335_v61  ;;  %v436_v22 = vmul.f32 %v434_v12, %v909_v60  ;;  %v550_v31 = vmul.f32 %v546_v28, %v336_v62 }
  0xbb   : > { %v549_v32 = vmul.f32 %v546_v28, %v335_v61  ;;  %v548_v35 = vmul.f32 %v546_v28, %v909_v60 }
  0xbe   : > { %388 = vrot.lane.b32.xlu2 %v381_v10, %s722_s30  ;;  %386 = vrot.lane.b32.xlu1 %v380_v9, %s722_s30 }
  0xbf   : > { %416 = vrot.lane.b32.xlu0 %v409_v11, %s723_s4 }
  0xc1   : > { %v518_v24 = vpop.permute.xlu0 %517 }
  0xc2   : > { %v522_v27 = vmul.f32 %v518_v24, %v336_v62  ;;  %v521_v30 = vmul.f32 %v518_v24, %v335_v61  ;;  %v520_v33 = vmul.f32 %v518_v24, %v909_v60 }
  0xc6   : > { %414 = vrot.lane.b32.xlu2 %v408_v13, %s723_s4  ;;  %390 = vrot.lane.b32.xlu1 %v382_v14, %s722_s30 }
  0xc7   : > { %446 = vrot.lane.b32.xlu0 %v438_v15, %s710_s23 }
  0xce   : > { %418 = vrot.lane.b32.xlu1 %v410_v16, %s723_s4  ;;  %444 = vrot.lane.b32.xlu2 %v437_v18, %s710_s23 }
  0xcf   : > { %474 = vrot.lane.b32.xlu0 %v466_v19, %s724_s25 }
  0xd6   : > { %472 = vrot.lane.b32.xlu2 %v465_v21, %s724_s25  ;;  %442 = vrot.lane.b32.xlu1 %v436_v22, %s710_s23  ;;  %s726_s23 = smov 90  }
  0xd7   : > { %502 = vrot.lane.b32.xlu0 %v494_v23, %s725_s5 }
  0xde   : > { %500 = vrot.lane.b32.xlu2 %v493_v26, %s725_s5  ;;  %470 = vrot.lane.b32.xlu1 %v464_v25, %s724_s25 }
  0xdf   : > { %530 = vrot.lane.b32.xlu0 %v522_v27, %s706_s20 }
  0xe6   : > { %498 = vrot.lane.b32.xlu1 %v492_v29, %s725_s5  ;;  %528 = vrot.lane.b32.xlu2 %v521_v30, %s706_s20 }
  0xe7   : > { %558 = vrot.lane.b32.xlu0 %v550_v31, %s726_s23 }
  0xee   : > { %556 = vrot.lane.b32.xlu2 %v549_v32, %s726_s23  ;;  %526 = vrot.lane.b32.xlu1 %v520_v33, %s706_s20  ;;  %s661_s20 = smul.u32 12, %s995_s13 }
  0xf0   : > { %s951_s10 = scalar_lea.vmem %s971_s3, %s661_s20 }
  0xf6   : > { %572 = vperm.xlu2 %694, %v569_v34   ;;  %554 = vrot.lane.b32.xlu1 %v548_v35, %s726_s23 }
 0x110   : > { %v364_v36 = vpop.permute.xlu2 %363 }
 0x111   : > { %v372_v51 = vadd.f32 %v364_v36, %v912_v4 }
 0x118   : > { %v389_v37 = vpop.permute.xlu2 %388 }
 0x120   : > { %v415_v38 = vpop.permute.xlu2 %414 }
 0x128   : > { %v362_v39 = vpop.permute.xlu1 %361  ;;  %v445_v40 = vpop.permute.xlu2 %444 }
 0x129   : > { %v360_v41 = vpop.permute.xlu0 %359  ;;  %v366_v56 = vsel %vm235_vm7, %v362_v39, %v364_v36 }
 0x12a   : > { %v371_v62 = vadd.f32 %v366_v56, %v914_v5  ;;  %v365_v4 = vsel %vm235_vm7, %v360_v41, %v362_v39  ;;  %vm585_vm7 = vcmask 257024  }
 0x12b   : > { %v370_v5 = vadd.f32 %v365_v4, %v917_v6 }
 0x130   : > { %v387_v42 = vpop.permute.xlu1 %386  ;;  %v473_v44 = vpop.permute.xlu2 %472 }
 0x131   : > { %v417_v43 = vpop.permute.xlu0 %416  ;;  %v393_v9 = vsel %vm392_vm4, %v387_v42, %v389_v37 }
 0x132   : > { %v398_v15 = vadd.f32 %v393_v9, %v370_v5  ;;  %v421_v6 = vsel %vm420_vm5, %v415_v38, %v417_v43 }
 0x134   : > { %v426_v22 = vadd.f32 %v421_v6, %v398_v15 }
 0x138   : > { %v391_v45 = vpop.permute.xlu1 %390  ;;  %v501_v47 = vpop.permute.xlu2 %500 }
 0x139   : > { %v447_v46 = vpop.permute.xlu0 %446  ;;  %v400_v54 = vadd.f32 %v391_v45, %v372_v51  ;;  %v394_v59 = vsel %vm392_vm4, %v389_v37, %v391_v45 }
 0x13a   : > { %v399_v0 = vadd.f32 %v394_v59, %v371_v62  ;;  %v450_v10 = vsel %vm448_vm6, %v445_v40, %v447_v46 }
 0x140   : > { %v419_v48 = vpop.permute.xlu1 %418  ;;  %v529_v50 = vpop.permute.xlu2 %528 }
 0x141   : > { %v475_v49 = vpop.permute.xlu0 %474  ;;  %v428_v55 = vadd.f32 %v419_v48, %v400_v54  ;;  %v422_v63 = vsel %vm420_vm5, %v417_v43, %v419_v48 }
 0x142   : > { %v427_v2 = vadd.f32 %v422_v63, %v399_v0  ;;  %v478_v17 = vsel %vm476_vm8, %v473_v44, %v475_v49 }
 0x143   : > { %v456_v57 = vadd.f32 %v447_v46, %v428_v55 }
 0x144   : > { %v455_v12 = vadd.f32 %v450_v10, %v427_v2 }
 0x145   : > { %v484_v1 = vadd.f32 %v475_v49, %v456_v57 }
 0x146   : > { %v483_v19 = vadd.f32 %v478_v17, %v455_v12 }
 0x148   : > { %v443_v52 = vpop.permute.xlu1 %442  ;;  %v557_v60 = vpop.permute.xlu2 %556 }
 0x149   : > { %v503_v53 = vpop.permute.xlu0 %502  ;;  %v449_v20 = vsel %vm448_vm6, %v443_v52, %v445_v40 }
 0x14a   : > { %v512_v3 = vadd.f32 %v503_v53, %v484_v1  ;;  %v506_v18 = vsel %vm504_vm9, %v501_v47, %v503_v53  ;;  %v454_v27 = vadd.f32 %v449_v20, %v426_v22 }
 0x14b   : > { %v511_v23 = vadd.f32 %v506_v18, %v483_v19 }
 0x150   : > { %v471_v58 = vpop.permute.xlu1 %470  ;;  %v573_v14 = vpop.permute.xlu2 %572 }
 0x151   : > { %v531_v61 = vpop.permute.xlu0 %530  ;;  %v477_v25 = vsel %vm476_vm8, %v471_v58, %v473_v44 }
 0x152   : > { %v540_v7 = vadd.f32 %v531_v61, %v512_v3  ;;  %v534_v21 = vsel %vm532_vm10, %v529_v50, %v531_v61  ;;  %v482_v30 = vadd.f32 %v477_v25, %v454_v27 }
 0x153   : > { %v539_v28 = vadd.f32 %v534_v21, %v511_v23 }
 0x158   : > { %v499_v8 = vpop.permute.xlu1 %498 }
 0x159   : > { %v559_v11 = vpop.permute.xlu0 %558  ;;  %v505_v29 = vsel %vm504_vm9, %v499_v8, %v501_v47 }
 0x15a   : > { %v568_v13 = vadd.f32 %v559_v11, %v540_v7  ;;  %v562_v26 = vsel %vm560_vm11, %v557_v60, %v559_v11  ;;  %v510_v33 = vadd.f32 %v505_v29, %v482_v30 }
 0x15b   : > { %v567_v31 = vadd.f32 %v562_v26, %v539_v28 }
 0x15c   : > { %v577_v16 = vadd.f32 %v573_v14, %v568_v13 }
 0x15d   : > { %v576_v34 = vadd.f32 %v573_v14, %v567_v31 }
 0x15e   : > { %586 = vst.msk [vmem:[%s951_s10 + $0x8] sm:$0xf] %vm585_vm7, %v577_v16 }
 0x15f   : > { %v580_v39 = vrot.slane %v576_v34, 4 }
 0x160   : > { %v527_v24 = vpop.permute.xlu1 %526 }
 0x161   : > { %v533_v32 = vsel %vm532_vm10, %v527_v24, %v529_v50 }
 0x162   : > { %v538_v35 = vadd.f32 %v533_v32, %v510_v33 }
 0x168   : > { %v555_v36 = vpop.permute.xlu1 %554 }
 0x169   : > { %v561_v37 = vsel %vm560_vm11, %v555_v36, %v557_v60 }
 0x16a   : > { %v566_v38 = vadd.f32 %v561_v37, %v538_v35 }
 0x16c   : > { %v575_v40 = vadd.f32 %v573_v14, %v566_v38 }
 0x16e   : > { %v582_v41 = vsel %vm581_vm12, %v575_v40, %v580_v39 }
 0x16f   : > { %584 = vst [vmem:[%s951_s10] sm:$0xff] %v582_v41 }
 0x170 PF: > { %s13_s12 = sadd.s32 1, %s702_s12  }
 0x171   : > { %p10_p4 = scmp.ge.s32.totalorder %s13_s12, 4  }
 0x173   :  { %12 = sbr.rel (!%p10_p4) target bundleno = 1 (0x1), region = 70 }

// kernel: _lambda_.13
= control target key start
LH: loop header
LB: loop body
LE: loop exit
PB: predicated region body
PF: predicated region fallthrough
CT: control target
= control target key end

     0   :  { %s768_s12 = smov 0   ;;  %s895_s0 = inlined_call_operand.vmem [shape: f32[9,8,4], index: 0, kind: input, shape index: {}]   ;;  %s896_s1 = inlined_call_operand.vmem [shape: f32[8,1], index: 1, kind: input, shape index: {}]   ;;  %s897_s2 = inlined_call_operand.vmem [shape: f32[2,4,8,8], index: 2, kind: input, shape index: {}]   ;;  %s898_s3 = inlined_call_operand.vmem [shape: f32[2,8,80], index: 3, kind: output, shape index: {}]  }
   0x1 LB: > { %s657_s13 = sadd.s32 4294967295, %s728_s12   ;;  %p661_p0 = scmp.ge.s32.totalorder %s728_s12, 1  ;;  %s728_s12 = sphi %s768_s12, %s13_s12  }
   0x2   : > { %p137_p1 = scmp.lt.s32.totalorder %s728_s12, 3 }
   0x4   : > { %p138_p2 = pnand %p661_p0, %p137_p1 }
   0x5   : > { %p160_p3 = scmp.lt.s32.totalorder (!%p138_p2), %s657_s13, 1  ;;  %s731_s18 = smov (!%p138_p2), 11  }
   0x6   : > { %141 = sbr.rel (%p138_p2) target bundleno = 424 (0x1a8), region = 32  ;;  %s732_s19 = smov (!%p138_p2), 31  }
   0x7   : > { %s733_s20 = smov (!%p138_p2), 21   ;;  %s734_s21 = smov (!%p138_p2), 41  }
   0x8   : > { %s735_s22 = smov (!%p138_p2), 51   ;;  %s736_s23 = smov (!%p138_p2), 71  }
   0x9   : > { %s737_s24 = smov (!%p138_p2), 81   ;;  %s738_s25 = smov (!%p138_p2), 61  }
   0xa   : > { %s739_s26 = smov (!%p138_p2), 118   ;;  %s740_s27 = smov (!%p138_p2), 127  }
   0xb   : > { %vm169_vm0 = vcmask 838656   ;;  %s900_s13 = smov (!%p160_p3, %s657_s13), 1  ;;  %v730_v0 = vmov 0.0   ;;  %vm180_vm1 = vcmask 1041409   ;;  %vm183_vm2 = vcmask 1042434   ;;  %s741_s28 = smov 126  }
   0xc   : > { %170 = vst.msk [vmem:[#allocation2] sm:$0xf] %vm169_vm0, %v730_v0  ;;  %s693_s14 = sshll.u32 %s900_s13, 5  ;;  %vm186_vm3 = vcmask 1043459   ;;  %vm191_vm4 = vcmask 150616   ;;  %vm210_vm5 = vcmask 232616  }
   0xd   : > { %s782_s17 = scalar_lea.vmem %s897_s2, %s693_s14  ;;  %vm229_vm6 = vcmask 314616   ;;  %vm248_vm7 = vcmask 396616   ;;  %vm267_vm8 = vcmask 478616   ;;  %vm286_vm9 = vcmask 560616   ;;  %s742_s29 = smov 107  }
   0xe   : > { %v171_v1 = vld [vmem:[%s782_s17] sm:$0x1]  ;;  %v172_v2 = vld [vmem:[%s782_s17 + $0x8] sm:$0x1]  ;;  %v173_v3 = vld [vmem:[%s782_s17 + $0x10] sm:$0x1] }
   0xf   : > { %v174_v4 = vld [vmem:[%s782_s17 + $0x18] sm:$0x1]  ;;  %v179_v5 = vrot.slane %v172_v2, 7  ;;  %v182_v6 = vrot.slane %v173_v3, 6  ;;  %v212_v7 = vld [vmem:[%s782_s17 + $0x2] sm:$0x1] }
  0x10   : > { %v185_v8 = vrot.slane %v174_v4, 5  ;;  %v213_v9 = vld [vmem:[%s782_s17 + $0xa] sm:$0x1]  ;;  %v214_v10 = vld [vmem:[%s782_s17 + $0x12] sm:$0x1]  ;;  %vm305_vm10 = vcmask 642616  }
  0x11   : > { %v181_v11 = vsel %vm180_vm1, %v179_v5, %v171_v1  ;;  %v215_v12 = vld [vmem:[%s782_s17 + $0x1a] sm:$0x1]  ;;  %v220_v13 = vrot.slane %v213_v9, 7  ;;  %v222_v14 = vrot.slane %v214_v10, 6  ;;  %v193_v15 = vld [vmem:[%s782_s17 + $0x1] sm:$0x1] }
  0x12   : > { %v184_v16 = vsel %vm183_vm2, %v182_v6, %v181_v11  ;;  %v224_v17 = vrot.slane %v215_v12, 5  ;;  %v194_v18 = vld [vmem:[%s782_s17 + $0x9] sm:$0x1]  ;;  %v195_v19 = vld [vmem:[%s782_s17 + $0x11] sm:$0x1]  ;;  %vm324_vm11 = vcmask 724616  }
  0x13   : > { %v187_v20 = vsel %vm186_vm3, %v185_v8, %v184_v16  ;;  %v221_v21 = vsel %vm180_vm1, %v220_v13, %v212_v7  ;;  %v196_v22 = vld [vmem:[%s782_s17 + $0x19] sm:$0x1]  ;;  %v201_v23 = vrot.slane %v194_v18, 7  ;;  %v203_v24 = vrot.slane %v195_v19, 6  ;;  %v231_v25 = vld [vmem:[%s782_s17 + $0x3] sm:$0x1] }
  0x14   : > { %188 = vrot.lane.b32.xlu0 %v187_v20, %s731_s18  ;;  %v223_v26 = vsel %vm183_vm2, %v222_v14, %v221_v21  ;;  %v205_v27 = vrot.slane %v196_v22, 5  ;;  %v232_v28 = vld [vmem:[%s782_s17 + $0xb] sm:$0x1]  ;;  %v233_v29 = vld [vmem:[%s782_s17 + $0x13] sm:$0x1]  ;;  %vm337_vm12 = vcmask 1043456  }
  0x15   : > { %v225_v30 = vsel %vm186_vm3, %v224_v17, %v223_v26  ;;  %v202_v31 = vsel %vm180_vm1, %v201_v23, %v193_v15  ;;  %v234_v32 = vld [vmem:[%s782_s17 + $0x1b] sm:$0x1]  ;;  %v239_v33 = vrot.slane %v232_v28, 7  ;;  %v241_v34 = vrot.slane %v233_v29, 6  ;;  %v289_v36 = vld [vmem:[%s782_s17 + $0xe] sm:$0x1] }
  0x16   : > { %226 = vrot.lane.b32.xlu1 %v225_v30, %s732_s19  ;;  %v204_v35 = vsel %vm183_vm2, %v203_v24, %v202_v31  ;;  %v290_v37 = vld [vmem:[%s782_s17 + $0x16] sm:$0x1]  ;;  %v243_v39 = vrot.slane %v234_v32, 5  ;;  %v296_v40 = vrot.slane %v289_v36, 7  ;;  %v288_v42 = vld [vmem:[%s782_s17 + $0x6] sm:$0x1] }
  0x17   : > { %v240_v38 = vsel %vm180_vm1, %v239_v33, %v231_v25  ;;  %v291_v43 = vld [vmem:[%s782_s17 + $0x1e] sm:$0x1]  ;;  %v308_v44 = vld [vmem:[%s782_s17 + $0xf] sm:$0x1]  ;;  %v206_v45 = vsel %vm186_vm3, %v205_v27, %v204_v35  ;;  %v298_v46 = vrot.slane %v290_v37, 6  ;;  %s743_s30 = smov 117  }
  0x18   : > { %v242_v41 = vsel %vm183_vm2, %v241_v34, %v240_v38  ;;  %v307_v47 = vld [vmem:[%s782_s17 + $0x7] sm:$0x1]  ;;  %v309_v48 = vld [vmem:[%s782_s17 + $0x17] sm:$0x1]  ;;  %v315_v49 = vrot.slane %v308_v44, 7  ;;  %v297_v55 = vsel %vm180_vm1, %v296_v40, %v288_v42  ;;  %v300_v0 = vrot.slane %v291_v43, 5 }
  0x19   : > { %v310_v50 = vld [vmem:[%s782_s17 + $0x1f] sm:$0x1]  ;;  %v250_v51 = vld [vmem:[%s782_s17 + $0x4] sm:$0x1]  ;;  %v251_v52 = vld [vmem:[%s782_s17 + $0xc] sm:$0x1]  ;;  %v244_v54 = vsel %vm186_vm3, %v243_v39, %v242_v41  ;;  %v299_v4 = vsel %vm183_vm2, %v298_v46, %v297_v55 }
  0x1a   : > { %v252_v53 = vld [vmem:[%s782_s17 + $0x14] sm:$0x1]  ;;  %v253_v56 = vld [vmem:[%s782_s17 + $0x1c] sm:$0x1]  ;;  %v258_v57 = vrot.slane %v251_v52, 7  ;;  %v317_v60 = vrot.slane %v309_v48, 6  ;;  %v316_v1 = vsel %vm180_vm1, %v315_v49, %v307_v47  ;;  %v301_v12 = vsel %vm186_vm3, %v300_v0, %v299_v4 }
  0x1b   : > { %v260_v58 = vrot.slane %v252_v53, 6  ;;  %v269_v59 = vld [vmem:[%s782_s17 + $0x5] sm:$0x1]  ;;  %v262_v61 = vrot.slane %v253_v56, 5  ;;  %v270_v62 = vld [vmem:[%s782_s17 + $0xd] sm:$0x1] }
  0x1c   : > { %207 = vrot.lane.b32.xlu0 %v206_v45, %s733_s20  ;;  %v271_v63 = vld [vmem:[%s782_s17 + $0x15] sm:$0x1]  ;;  %v259_v2 = vsel %vm180_vm1, %v258_v57, %v250_v51  ;;  %v277_v3 = vrot.slane %v270_v62, 7  ;;  %v272_v6 = vld [vmem:[%s782_s17 + $0x1d] sm:$0x1]  ;;  %v319_v8 = vrot.slane %v310_v50, 5  ;;  %v318_v11 = vsel %vm183_vm2, %v317_v60, %v316_v1 }
  0x1d   : > { %v261_v5 = vsel %vm183_vm2, %v260_v58, %v259_v2  ;;  %v279_v7 = vrot.slane %v271_v63, 6  ;;  %v281_v13 = vrot.slane %v272_v6, 5  ;;  %s744_s4 = smov 108   ;;  %s745_s5 = smov 106   ;;  %vm333_vm13 = vcmask 31744   ;;  %v327_v26 = vld [vmem:[%s895_s0] sm:$0xff] }
  0x1e   : > { %245 = vrot.lane.b32.xlu1 %v244_v54, %s734_s21  ;;  %v263_v9 = vsel %vm186_vm3, %v262_v61, %v261_v5  ;;  %v278_v10 = vsel %vm180_vm1, %v277_v3, %v269_v59  ;;  %v320_v15 = vsel %vm186_vm3, %v319_v8, %v318_v11  ;;  %s746_s6 = smov 116   ;;  %v670_v27 = vld [vmem:[%s895_s0 + $0x10] sm:$0xff]  ;;  %v595_v31 = vld [vmem:[%s896_s1] sm:$0xff]  ;;  %v747_v32 = vmov 0   ;;  %v679_v33 = vld [vmem:[%s895_s0 + $0x28] sm:$0xff] }
  0x1f   : > { %264 = vrot.lane.b32.xlu2 %v263_v9, %s735_s22  ;;  %v280_v14 = vsel %vm183_vm2, %v279_v7, %v278_v10  ;;  %v682_v29 = vld [vmem:[%s895_s0 + $0x30] sm:$0xff]  ;;  %720 = vset.pattern.permute.xlu1 %v747_v32  ;;  %v665_v35 = vld [vmem:[%s895_s0 + $0x8] sm:$0xff]  ;;  %v673_v36 = vld [vmem:[%s895_s0 + $0x18] sm:$0xff]  ;;  %vm602_vm14 = vcmask 654336  }
  0x20   : > { %v282_v16 = vsel %vm186_vm3, %v281_v13, %v280_v14  ;;  %721 = vset.pattern.permute.xlu0 %v747_v32  ;;  %v676_v39 = vld [vmem:[%s895_s0 + $0x20] sm:$0xff]  ;;  %v685_v40 = vld [vmem:[%s895_s0 + $0x38] sm:$0xff] }
  0x21   : > { %v688_v43 = vld [vmem:[%s895_s0 + $0x40] sm:$0xff] }
  0x24   : > { %302 = vrot.lane.b32.xlu0 %v301_v12, %s736_s23 }
  0x26   : > { %321 = vrot.lane.b32.xlu1 %v320_v15, %s737_s24 }
  0x27   : > { %283 = vrot.lane.b32.xlu2 %v282_v16, %s738_s25 }
  0x79   : > { %v265_v18 = vpop.permute.xlu2 %264 }
  0x81   : > { %v284_v22 = vpop.permute.xlu2 %283 }
  0x86   : > { %v189_v17 = vpop.permute.xlu0 %188 }
  0x87   : > { %192 = vst.msk [vmem:[#allocation2] sm:$0xf] %vm191_vm4, %v189_v17 }
  0x88   : > { %v227_v19 = vpop.permute.xlu1 %226 }
  0x8e   : > { %v208_v20 = vpop.permute.xlu0 %207 }
  0x8f   : > { %211 = vst.msk [vmem:[#allocation2] sm:$0xf] %vm210_vm5, %v208_v20 }
  0x90   : > { %v246_v21 = vpop.permute.xlu1 %245  ;;  %230 = vst.msk [vmem:[#allocation2] sm:$0xf] %vm229_vm6, %v227_v19 }
  0x91   : > { %249 = vst.msk [vmem:[#allocation2] sm:$0xf] %vm248_vm7, %v246_v21 }
  0x92   : > { %268 = vst.msk [vmem:[#allocation2] sm:$0xf] %vm267_vm8, %v265_v18 }
  0x93   : > { %287 = vst.msk [vmem:[#allocation2] sm:$0xf] %vm286_vm9, %v284_v22 }
  0x96   : > { %v303_v23 = vpop.permute.xlu0 %302 }
  0x97   : > { %306 = vst.msk [vmem:[#allocation2] sm:$0xf] %vm305_vm10, %v303_v23 }
  0x98   : > { %v322_v24 = vpop.permute.xlu1 %321 }
  0x99   : > { %325 = vst.msk [vmem:[#allocation2] sm:$0xf] %vm324_vm11, %v322_v24 }
  0xa0   : > { %v326_v25 = vld [vmem:[#allocation2] sm:$0xf] }
  0xa1   : > { %417 = vrot.lane.b32.xlu1 %v326_v25, %s739_s26  ;;  %331 = vrot.lane.b32.xlu0 %v326_v25, %s740_s27 }
  0xa2   : > { %387 = vrot.lane.b32.xlu2 %v326_v25, %s741_s28  ;;  %668 = vmatpush.msk.msra.mxu1 %vm337_vm12, %v326_v25 }
  0xa3   : > { %669 = vmatmul.msk.f32.vlgmr.msra.gmra.mxu1 %vm333_vm13, %v327_v26 }
  0xa9   : > { %537 = vrot.lane.b32.xlu1 %v326_v25, %s742_s29  ;;  %447 = vrot.lane.b32.xlu0 %v326_v25, %s743_s30  ;;  %s664_s29 = sshll.u32 %s900_s13, 3 }
  0xaa   : > { %507 = vrot.lane.b32.xlu2 %v326_v25, %s744_s4 }
  0xb1   : > { %567 = vrot.lane.b32.xlu0 %v326_v25, %s745_s5  ;;  %598 = vperm.xlu1 %720, %v595_v31   ;;  %s168_s5 = scalar_lea.vmem %s898_s3, %s664_s29 }
  0xb2   : > { %477 = vrot.lane.b32.xlu2 %v326_v25, %s746_s6 }
  0xfc   : > { %v388_v28 = vpop.permute.xlu2 %387 }
  0xfd   : > { %671 = vmatpush.msk.msra.mxu2 %vm337_vm12, %v388_v28 }
  0xfe   : > { %672 = vmatmul.msk.f32.vlgmr.msra.gmra.mxu2 %vm333_vm13, %v670_v27 }
 0x104   : > { %v508_v30 = vpop.permute.xlu2 %507 }
 0x105   : > { %683 = vmatpush.msk.msrb.mxu2 %vm337_vm12, %v508_v30 }
 0x106   : > { %684 = vmatmul.msk.f32.vlgmr.msrb.gmra.mxu2 %vm333_vm13, %v682_v29 }
 0x10c   : > { %v478_v34 = vpop.permute.xlu2 %477 }
 0x10d   : > { %680 = vmatpush.msk.msrb.mxu1 %vm337_vm12, %v478_v34 }
 0x10e   : > { %681 = vmatmul.msk.f32.vlgmr.msrb.gmra.mxu1 %vm333_vm13, %v679_v33 }
 0x113   : > { %v418_v37 = vpop.permute.xlu1 %417  ;;  %v332_v38 = vpop.permute.xlu0 %331 }
 0x114   : > { %666 = vmatpush.msk.msra.mxu0 %vm337_vm12, %v332_v38  ;;  %674 = vmatpush.msk.msra.mxu3 %vm337_vm12, %v418_v37 }
 0x115   : > { %667 = vmatmul.msk.f32.vlgmr.msra.gmra.mxu0 %vm333_vm13, %v665_v35  ;;  %675 = vmatmul.msk.f32.vlgmr.msra.gmra.mxu3 %vm333_vm13, %v673_v36 }
 0x11b   : > { %v538_v41 = vpop.permute.xlu1 %537  ;;  %v448_v42 = vpop.permute.xlu0 %447 }
 0x11c   : > { %677 = vmatpush.msk.msrb.mxu0 %vm337_vm12, %v448_v42  ;;  %686 = vmatpush.msk.msrb.mxu3 %vm337_vm12, %v538_v41 }
 0x11d   : > { %678 = vmatmul.msk.f32.vlgmr.msrb.gmra.mxu0 %vm333_vm13, %v676_v39  ;;  %687 = vmatmul.msk.f32.vlgmr.msrb.gmra.mxu3 %vm333_vm13, %v685_v40 }
 0x120   : > { %v382_v45 = vpop.f32.mrf.mxu1 }
 0x123   : > { %v568_v44 = vpop.permute.xlu0 %567  ;;  %v599_v61 = vpop.permute.xlu1 %598 }
 0x124   : > { %689 = vmatpush.msk.msra.mxu0 %vm337_vm12, %v568_v44 }
 0x125   : > { %690 = vmatmul.msk.f32.vlgmr.msra.gmra.mxu0 %vm333_vm13, %v688_v43 }
 0x181   : > { %v411_v48 = vpop.f32.mrf.mxu2 }
 0x189   : > { %v531_v55 = vpop.f32.mrf.mxu2 }
 0x18b   : > { %v501_v53 = vpop.f32.mrf.mxu1 }
 0x192   : > { %v357_v46 = vpop.f32.mrf.mxu0 }
 0x193   : > { %v383_v47 = vadd.f32 %v382_v45, %v357_v46 }
 0x195   : > { %v414_v49 = vadd.f32 %v411_v48, %v383_v47 }
 0x198   : > { %v441_v50 = vpop.f32.mrf.mxu3 }
 0x199   : > { %v444_v51 = vadd.f32 %v441_v50, %v414_v49 }
 0x19a   : > { %v471_v52 = vpop.f32.mrf.mxu0 }
 0x19b   : > { %v474_v54 = vadd.f32 %v471_v52, %v444_v51 }
 0x19d   : > { %v504_v56 = vadd.f32 %v501_v53, %v474_v54 }
 0x19f   : > { %v534_v57 = vadd.f32 %v531_v55, %v504_v56 }
 0x1a0   : > { %v561_v58 = vpop.f32.mrf.mxu3 }
 0x1a1   : > { %v564_v59 = vadd.f32 %v561_v58, %v534_v57 }
 0x1a2   : > { %v591_v60 = vpop.f32.mrf.mxu0 }
 0x1a3   : > { %v594_v62 = vadd.f32 %v591_v60, %v564_v59 }
 0x1a5   : > { %v601_v63 = vadd.f32 %v599_v61, %v594_v62 }
 0x1a7   : > { %603 = vst.msk [vmem:[%s168_s5] sm:$0xff] %vm602_vm14, %v601_v63 }
 0x1a8 PF: > { %s13_s12 = sadd.s32 1, %s728_s12  }
 0x1a9   : > { %p10_p4 = scmp.ge.s32.totalorder %s13_s12, 4  }
 0x1ab   :  { %12 = sbr.rel (!%p10_p4) target bundleno = 1 (0x1), region = 70 }

// kernel: _lambda_.14
= control target key start
LH: loop header
LB: loop body
LE: loop exit
PB: predicated region body
PF: predicated region fallthrough
CT: control target
= control target key end

     0   :  { %vm15_vm0 = vcmask 261120   ;;  %v73_v2 = vmov 32.0   ;;  %v74_v4 = vmov 0   ;;  %s110_s0 = inlined_call_operand.vmem [shape: f32[8,32], index: 0, kind: input, shape index: {}]   ;;  %s111_s1 = inlined_call_operand.vmem [shape: f32[8,1], index: 1, kind: input, shape index: {}]   ;;  %s112_s2 = inlined_call_operand.vmem [shape: f32[8,1], index: 2, kind: input, shape index: {}]   ;;  %s113_s3 = inlined_call_operand.vmem [shape: f32[8,32], index: 3, kind: output, shape index: {}]  }
   0x1   :  { %v14_v0 = vld [vmem:[%s110_s0] sm:$0xff]  ;;  %69 = vrcp.f32 %v73_v2  ;;  %67 = vset.pattern.permute.xlu1 %v74_v4  ;;  %68 = vset.pattern.permute.xlu0 %v74_v4 }
   0x2   :  { %v16_v1 = vsel %vm15_vm0, %v14_v0, 0.0  ;;  %v45_v3 = vld [vmem:[%s111_s1] sm:$0xff] }
   0x3   :  { %17 = vadd.xlane.f32.xlu0 %v16_v1  ;;  %48 = vperm.xlu1 %67, %v45_v3   ;;  %v52_v7 = vld [vmem:[%s112_s2] sm:$0xff] }
   0x7   :  { %v70_v5 = vpop.eup %69 }
   0x8   :  { %v20_v6 = vmul.f32 32.0, %v70_v5  ;;  %vm24_vm1 = vweird.f32 %v70_v5 }
   0xa   :  { %v21_v8 = vsub.f32 1.0, %v20_v6 }
   0xb   :  { %55 = vperm.xlu1 %67, %v52_v7  }
   0xc   :  { %v22_v9 = vmul.f32 %v70_v5, %v21_v8 }
   0xe   :  { %v23_v10 = vadd.f32 %v70_v5, %v22_v9 }
  0x10   :  { %v25_v11 = vsel %vm24_vm1, %v70_v5, %v23_v10 }
  0x75   :  { %v49_v24 = vpop.permute.xlu1 %48 }
  0x76   :  { %v18_v12 = vpop.xlane.xlu0 %17 }
  0x77   :  { %v26_v13 = vmul.f32 %v25_v11, %v18_v12 }
  0x79   :  { %v27_v14 = vsub.f32 %v14_v0, %v26_v13 }
  0x7b   :  { %v28_v15 = vmul.f32 %v27_v14, %v27_v14 }
  0x7d   :  { %v29_v16 = vsel %vm15_vm0, %v28_v15, 0.0  ;;  %v56_v30 = vpop.permute.xlu1 %55 }
  0x7e   :  { %30 = vadd.xlane.f32.xlu0 %v29_v16 }
  0xf1   :  { %v31_v17 = vpop.xlane.xlu0 %30 }
  0xf2   :  { %v32_v18 = vmul.f32 %v31_v17, %v25_v11 }
  0xf4   :  { %v33_v19 = vadd.f32 1e-05, %v32_v18 }
  0xf6   :  { %71 = vrsqrt.f32 %v33_v19  ;;  %vm40_vm3 = vweird.f32 %v33_v19 }
  0xfc   :  { %v72_v20 = vpop.eup %71 }
  0xfd   :  { %v35_v21 = vmul.f32 %v72_v20, %v33_v19  ;;  %vm41_vm2 = vweird.f32 %v72_v20 }
  0xfe   :  { %vm42_vm4 = vmor %vm40_vm3, %vm41_vm2 }
  0xff   :  { %v36_v22 = vmul.f32 %v72_v20, %v35_v21 }
 0x101   :  { %v37_v23 = vmul.f32 0.5, %v36_v22 }
 0x103   :  { %v38_v25 = vsub.f32 1.5, %v37_v23 }
 0x105   :  { %v39_v26 = vmul.f32 %v72_v20, %v38_v25 }
 0x107   :  { %v43_v27 = vsel %vm42_vm4, %v72_v20, %v39_v26 }
 0x108   :  { %v44_v28 = vmul.f32 %v43_v27, %v27_v14 }
 0x10a   :  { %v51_v29 = vmul.f32 %v49_v24, %v44_v28 }
 0x10c   :  { %v58_v31 = vadd.f32 %v56_v30, %v51_v29 }
 0x10e   :  { %v59_v32 = vmax.f32 %v58_v31, 0.0 }
 0x110   :  { %60 = vst.msk [vmem:[%s113_s3] sm:$0xff] %vm15_vm0, %v59_v32 }

// kernel: _lambda_.15
= control target key start
LH: loop header
LB: loop body
LE: loop exit
PB: predicated region body
PF: predicated region fallthrough
CT: control target
= control target key end

     0   :  { %s731_s12 = smov 0   ;;  %s853_s0 = inlined_call_operand.vmem [shape: f32[9,8,8], index: 0, kind: input, shape index: {}]   ;;  %s854_s1 = inlined_call_operand.vmem [shape: f32[8,1], index: 1, kind: input, shape index: {}]   ;;  %s855_s2 = inlined_call_operand.vmem [shape: f32[2,8,4,4], index: 2, kind: input, shape index: {}]   ;;  %s856_s3 = inlined_call_operand.vmem [shape: f32[2,8,24], index: 3, kind: output, shape index: {}]  }
   0x1 LB: > { %s638_s13 = sadd.s32 4294967295, %s695_s12   ;;  %p642_p0 = scmp.ge.s32.totalorder %s695_s12, 1  ;;  %s695_s12 = sphi %s731_s12, %s13_s12  }
   0x2   : > { %p137_p1 = scmp.lt.s32.totalorder %s695_s12, 3 }
   0x4   : > { %p138_p2 = pnand %p642_p0, %p137_p1 }
   0x5   : > { %p160_p3 = scmp.lt.s32.totalorder (!%p138_p2), %s638_s13, 1  ;;  %s698_s18 = smov (!%p138_p2), 7  }
   0x6   : > { %141 = sbr.rel (%p138_p2) target bundleno = 423 (0x1a7), region = 32  ;;  %s699_s19 = smov (!%p138_p2), 19  }
   0x7   : > { %s700_s20 = smov (!%p138_p2), 13   ;;  %s701_s21 = smov (!%p138_p2), 25  }
   0x8   : > { %s702_s22 = smov (!%p138_p2), 116   ;;  %s703_s23 = smov (!%p138_p2), 122  }
   0x9   : > { %s704_s24 = smov (!%p138_p2), 126   ;;  %s705_s25 = smov (!%p138_p2), 120  }
   0xa   : > { %s706_s26 = smov (!%p138_p2), 115   ;;  %s707_s27 = smov (!%p138_p2), 127  }
   0xb   : > { %vm169_vm0 = vcmask 318464   ;;  %s858_s13 = smov (!%p160_p3, %s638_s13), 1  ;;  %v697_v0 = vmov 0.0   ;;  %vm188_vm1 = vcmask 1041409   ;;  %vm191_vm2 = vcmask 1042434   ;;  %s708_s28 = smov 121  }
   0xc   : > { %170 = vst.msk [vmem:[#allocation2] sm:$0xff] %vm169_vm0, %v697_v0  ;;  %s665_s14 = sshll.u32 %s858_s13, 5  ;;  %vm194_vm3 = vcmask 1043459   ;;  %vm197_vm4 = vcmask 1044484   ;;  %vm200_vm5 = vcmask 1045509   ;;  %vm203_vm6 = vcmask 1046534  }
   0xd   : > { %s745_s17 = scalar_lea.vmem %s855_s2, %s665_s14  ;;  %vm206_vm7 = vcmask 1047559   ;;  %vm211_vm8 = vcmask 89144   ;;  %vm246_vm9 = vcmask 138344   ;;  %vm281_vm10 = vcmask 187544   ;;  %s709_s29 = smov 114  }
   0xe   : > { %v171_v1 = vld [vmem:[%s745_s17] sm:$0x1]  ;;  %v172_v2 = vld [vmem:[%s745_s17 + $0x4] sm:$0x1]  ;;  %v173_v3 = vld [vmem:[%s745_s17 + $0x8] sm:$0x1] }
   0xf   : > { %v174_v4 = vld [vmem:[%s745_s17 + $0xc] sm:$0x1]  ;;  %v175_v5 = vld [vmem:[%s745_s17 + $0x10] sm:$0x1]  ;;  %v176_v6 = vld [vmem:[%s745_s17 + $0x14] sm:$0x1] }
  0x10   : > { %v177_v7 = vld [vmem:[%s745_s17 + $0x18] sm:$0x1]  ;;  %v178_v8 = vld [vmem:[%s745_s17 + $0x1c] sm:$0x1]  ;;  %v187_v9 = vrot.slane %v172_v2, 7  ;;  %v190_v10 = vrot.slane %v173_v3, 6 }
  0x11   : > { %v193_v11 = vrot.slane %v174_v4, 5  ;;  %v196_v12 = vrot.slane %v175_v5, 4  ;;  %v199_v13 = vrot.slane %v176_v6, 3  ;;  %v248_v14 = vld [vmem:[%s745_s17 + $0x2] sm:$0x1]  ;;  %v202_v16 = vrot.slane %v177_v7, 2 }
  0x12   : > { %v189_v15 = vsel %vm188_vm1, %v187_v9, %v171_v1  ;;  %v205_v17 = vrot.slane %v178_v8, 1  ;;  %v249_v18 = vld [vmem:[%s745_s17 + $0x6] sm:$0x1]  ;;  %v250_v19 = vld [vmem:[%s745_s17 + $0xa] sm:$0x1]  ;;  %vm316_vm11 = vcmask 236744  }
  0x13   : > { %v192_v20 = vsel %vm191_vm2, %v190_v10, %v189_v15  ;;  %v251_v21 = vld [vmem:[%s745_s17 + $0xe] sm:$0x1]  ;;  %v252_v22 = vld [vmem:[%s745_s17 + $0x12] sm:$0x1]  ;;  %v253_v23 = vld [vmem:[%s745_s17 + $0x16] sm:$0x1] }
  0x14   : > { %v195_v24 = vsel %vm194_vm3, %v193_v11, %v192_v20  ;;  %v254_v25 = vld [vmem:[%s745_s17 + $0x1a] sm:$0x1]  ;;  %v255_v26 = vld [vmem:[%s745_s17 + $0x1e] sm:$0x1]  ;;  %v264_v27 = vrot.slane %v249_v18, 7  ;;  %v266_v28 = vrot.slane %v250_v19, 6 }
  0x15   : > { %v198_v29 = vsel %vm197_vm4, %v196_v12, %v195_v24  ;;  %v268_v30 = vrot.slane %v251_v21, 5  ;;  %v270_v31 = vrot.slane %v252_v22, 4  ;;  %v272_v32 = vrot.slane %v253_v23, 3  ;;  %v213_v33 = vld [vmem:[%s745_s17 + $0x1] sm:$0x1] }
  0x16   : > { %v201_v34 = vsel %vm200_vm5, %v199_v13, %v198_v29  ;;  %v265_v35 = vsel %vm188_vm1, %v264_v27, %v248_v14  ;;  %v274_v36 = vrot.slane %v254_v25, 2  ;;  %v276_v37 = vrot.slane %v255_v26, 1  ;;  %v214_v38 = vld [vmem:[%s745_s17 + $0x5] sm:$0x1]  ;;  %v215_v39 = vld [vmem:[%s745_s17 + $0x9] sm:$0x1] }
  0x17   : > { %v204_v40 = vsel %vm203_vm6, %v202_v16, %v201_v34  ;;  %v267_v41 = vsel %vm191_vm2, %v266_v28, %v265_v35  ;;  %v216_v42 = vld [vmem:[%s745_s17 + $0xd] sm:$0x1]  ;;  %v217_v43 = vld [vmem:[%s745_s17 + $0x11] sm:$0x1]  ;;  %v218_v44 = vld [vmem:[%s745_s17 + $0x15] sm:$0x1] }
  0x18   : > { %v207_v45 = vsel %vm206_vm7, %v205_v17, %v204_v40  ;;  %v269_v46 = vsel %vm194_vm3, %v268_v30, %v267_v41  ;;  %v219_v47 = vld [vmem:[%s745_s17 + $0x19] sm:$0x1]  ;;  %v220_v48 = vld [vmem:[%s745_s17 + $0x1d] sm:$0x1]  ;;  %v229_v49 = vrot.slane %v214_v38, 7  ;;  %v231_v50 = vrot.slane %v215_v39, 6 }
  0x19   : > { %208 = vrot.lane.b32.xlu0 %v207_v45, %s698_s18  ;;  %v271_v51 = vsel %vm197_vm4, %v270_v31, %v269_v46  ;;  %v233_v52 = vrot.slane %v216_v42, 5  ;;  %v235_v53 = vrot.slane %v217_v43, 4  ;;  %v237_v54 = vrot.slane %v218_v44, 3  ;;  %v283_v55 = vld [vmem:[%s745_s17 + $0x3] sm:$0x1]  ;;  %v649_v31 = vld [vmem:[%s853_s0 + $0x10] sm:$0xff] }
  0x1a   : > { %v273_v56 = vsel %vm200_vm5, %v272_v32, %v271_v51  ;;  %v230_v57 = vsel %vm188_vm1, %v229_v49, %v213_v33  ;;  %v239_v58 = vrot.slane %v219_v47, 2  ;;  %v241_v59 = vrot.slane %v220_v48, 1  ;;  %v284_v60 = vld [vmem:[%s745_s17 + $0x7] sm:$0x1]  ;;  %v285_v61 = vld [vmem:[%s745_s17 + $0xb] sm:$0x1] }
  0x1b   : > { %v275_v62 = vsel %vm203_vm6, %v274_v36, %v273_v56  ;;  %v232_v63 = vsel %vm191_vm2, %v231_v50, %v230_v57  ;;  %v286_v0 = vld [vmem:[%s745_s17 + $0xf] sm:$0x1]  ;;  %v287_v1 = vld [vmem:[%s745_s17 + $0x13] sm:$0x1]  ;;  %v288_v2 = vld [vmem:[%s745_s17 + $0x17] sm:$0x1] }
  0x1c   : > { %v277_v3 = vsel %vm206_vm7, %v276_v37, %v275_v62  ;;  %v234_v4 = vsel %vm194_vm3, %v233_v52, %v232_v63  ;;  %v289_v5 = vld [vmem:[%s745_s17 + $0x1b] sm:$0x1]  ;;  %v299_v6 = vrot.slane %v284_v60, 7  ;;  %v301_v7 = vrot.slane %v285_v61, 6  ;;  %v290_v9 = vld [vmem:[%s745_s17 + $0x1f] sm:$0x1] }
  0x1d   : > { %278 = vrot.lane.b32.xlu1 %v277_v3, %s699_s19  ;;  %v236_v8 = vsel %vm197_vm4, %v235_v53, %v234_v4  ;;  %v303_v10 = vrot.slane %v286_v0, 5  ;;  %v305_v11 = vrot.slane %v287_v1, 4  ;;  %v307_v14 = vrot.slane %v288_v2, 3  ;;  %v319_v30 = vld [vmem:[%s853_s0] sm:$0xff]  ;;  %v646_v35 = vld [vmem:[%s853_s0 + $0x8] sm:$0xff]  ;;  %v651_v39 = vld [vmem:[%s853_s0 + $0x18] sm:$0xff] }
  0x1e   : > { %v238_v12 = vsel %vm200_vm5, %v237_v54, %v236_v8  ;;  %v300_v13 = vsel %vm188_vm1, %v299_v6, %v283_v55  ;;  %v309_v17 = vrot.slane %v289_v5, 2  ;;  %v311_v20 = vrot.slane %v290_v9, 1  ;;  %v576_v33 = vld [vmem:[%s854_s1] sm:$0xff]  ;;  %v657_v42 = vld [vmem:[%s853_s0 + $0x30] sm:$0xff]  ;;  %v659_v45 = vld [vmem:[%s853_s0 + $0x38] sm:$0xff] }
  0x1f   : > { %v240_v15 = vsel %vm203_vm6, %v239_v58, %v238_v12  ;;  %v302_v16 = vsel %vm191_vm2, %v301_v7, %v300_v13  ;;  %vm326_vm12 = vcmask 64512   ;;  %v710_v34 = vmov 0   ;;  %v653_v37 = vld [vmem:[%s853_s0 + $0x20] sm:$0xff]  ;;  %v655_v46 = vld [vmem:[%s853_s0 + $0x28] sm:$0xff] }
  0x20   : > { %v242_v18 = vsel %vm206_vm7, %v241_v59, %v240_v15  ;;  %v304_v19 = vsel %vm194_vm3, %v303_v10, %v302_v16  ;;  %688 = vset.pattern.permute.xlu0 %v710_v34  ;;  %v661_v43 = vld [vmem:[%s853_s0 + $0x40] sm:$0xff]  ;;  %vm583_vm13 = vcmask 195584  }
  0x21   : > { %243 = vrot.lane.b32.xlu0 %v242_v18, %s700_s20  ;;  %v306_v21 = vsel %vm197_vm4, %v305_v11, %v304_v19 }
  0x22   : > { %v308_v22 = vsel %vm200_vm5, %v307_v14, %v306_v21 }
  0x23   : > { %v310_v23 = vsel %vm203_vm6, %v309_v17, %v308_v22 }
  0x24   : > { %v312_v24 = vsel %vm206_vm7, %v311_v20, %v310_v23 }
  0x25   : > { %313 = vrot.lane.b32.xlu1 %v312_v24, %s701_s21 }
  0x8b   : > { %v209_v25 = vpop.permute.xlu0 %208 }
  0x8c   : > { %212 = vst.msk [vmem:[#allocation2] sm:$0xff] %vm211_vm8, %v209_v25 }
  0x8f   : > { %v279_v26 = vpop.permute.xlu1 %278 }
  0x93   : > { %v244_v27 = vpop.permute.xlu0 %243 }
  0x94   : > { %247 = vst.msk [vmem:[#allocation2] sm:$0xff] %vm246_vm9, %v244_v27 }
  0x95   : > { %282 = vst.msk [vmem:[#allocation2] sm:$0xff] %vm281_vm10, %v279_v26 }
  0x97   : > { %v314_v28 = vpop.permute.xlu1 %313 }
  0x98   : > { %317 = vst.msk [vmem:[#allocation2] sm:$0xff] %vm316_vm11, %v314_v28 }
  0x9f   : > { %v318_v29 = vld [vmem:[#allocation2] sm:$0xff] }
  0xa0   : > { %491 = vrot.lane.b32.xlu1 %v318_v29, %s702_s22  ;;  %404 = vrot.lane.b32.xlu0 %v318_v29, %s703_s23 }
  0xa1   : > { %375 = vrot.lane.b32.xlu2 %v318_v29, %s704_s24  ;;  %368 = vmatpush.msra.mxu1 %v318_v29 }
  0xa2   : > { %648 = vmatmul.msk.f32.vlgmr.msra.gmra.mxu1 %vm326_vm12, %v319_v30 }
  0xa8   : > { %462 = vrot.lane.b32.xlu1 %v318_v29, %s705_s25  ;;  %520 = vrot.lane.b32.xlu0 %v318_v29, %s706_s26  ;;  %s645_s25 = sshll.u32 %s858_s13, 3 }
  0xa9   : > { %323 = vrot.lane.b32.xlu2 %v318_v29, %s707_s27 }
  0xb0   : > { %579 = vperm.xlu0 %688, %v576_v33  }
  0xb1   : > { %433 = vrot.lane.b32.xlu2 %v318_v29, %s708_s28  ;;  %s168_s28 = scalar_lea.vmem %s856_s3, %s645_s25 }
  0xb9   : > { %549 = vrot.lane.b32.xlu2 %v318_v29, %s709_s29 }
  0xfb   : > { %v376_v32 = vpop.permute.xlu2 %375 }
  0xfc   : > { %396 = vmatpush.msra.mxu2 %v376_v32 }
  0xfd   : > { %650 = vmatmul.msk.f32.vlgmr.msra.gmra.mxu2 %vm326_vm12, %v649_v31 }
 0x103   : > { %v324_v36 = vpop.permute.xlu2 %323 }
 0x104   : > { %345 = vmatpush.msra.mxu0 %v324_v36 }
 0x105   : > { %647 = vmatmul.msk.f32.vlgmr.msra.gmra.mxu0 %vm326_vm12, %v646_v35 }
 0x10b   : > { %v434_v38 = vpop.permute.xlu2 %433 }
 0x10c   : > { %454 = vmatpush.msrb.mxu0 %v434_v38 }
 0x10d   : > { %654 = vmatmul.msk.f32.vlgmr.msrb.gmra.mxu0 %vm326_vm12, %v653_v37 }
 0x112   : > { %v492_v40 = vpop.permute.xlu1 %491  ;;  %v405_v41 = vpop.permute.xlu0 %404 }
 0x113   : > { %v550_v44 = vpop.permute.xlu2 %549  ;;  %425 = vmatpush.msra.mxu3 %v405_v41  ;;  %512 = vmatpush.msrb.mxu2 %v492_v40 }
 0x114   : > { %570 = vmatpush.msra.mxu0 %v550_v44  ;;  %652 = vmatmul.msk.f32.vlgmr.msra.gmra.mxu3 %vm326_vm12, %v651_v39 }
 0x115   : > { %658 = vmatmul.msk.f32.vlgmr.msrb.gmra.mxu2 %vm326_vm12, %v657_v42  ;;  %662 = vmatmul.msk.f32.vlgmr.msra.gmra.mxu0 %vm326_vm12, %v661_v43 }
 0x11a   : > { %v463_v47 = vpop.permute.xlu1 %462  ;;  %v521_v48 = vpop.permute.xlu0 %520 }
 0x11b   : > { %483 = vmatpush.msrb.mxu1 %v463_v47  ;;  %541 = vmatpush.msrb.mxu3 %v521_v48 }
 0x11c   : > { %660 = vmatmul.msk.f32.vlgmr.msrb.gmra.mxu3 %vm326_vm12, %v659_v45  ;;  %656 = vmatmul.msk.f32.vlgmr.msrb.gmra.mxu1 %vm326_vm12, %v655_v46 }
 0x11f   : > { %v370_v50 = vpop.f32.mrf.mxu1 }
 0x122   : > { %v580_v1 = vpop.permute.xlu0 %579 }
 0x180   : > { %v398_v52 = vpop.f32.mrf.mxu2 }
 0x182   : > { %v347_v49 = vpop.f32.mrf.mxu0 }
 0x183   : > { %v371_v51 = vadd.f32 %v370_v50, %v347_v49 }
 0x185   : > { %v401_v54 = vadd.f32 %v398_v52, %v371_v51 }
 0x18a   : > { %v456_v53 = vpop.f32.mrf.mxu0 }
 0x192   : > { %v572_v63 = vpop.f32.mrf.mxu0 }
 0x197   : > { %v427_v55 = vpop.f32.mrf.mxu3 }
 0x198   : > { %v430_v56 = vadd.f32 %v427_v55, %v401_v54  ;;  %v514_v59 = vpop.f32.mrf.mxu2 }
 0x199   : > { %v485_v57 = vpop.f32.mrf.mxu1 }
 0x19a   : > { %v459_v58 = vadd.f32 %v456_v53, %v430_v56 }
 0x19c   : > { %v488_v60 = vadd.f32 %v485_v57, %v459_v58 }
 0x19e   : > { %v517_v61 = vadd.f32 %v514_v59, %v488_v60 }
 0x19f   : > { %v543_v62 = vpop.f32.mrf.mxu3 }
 0x1a0   : > { %v546_v0 = vadd.f32 %v543_v62, %v517_v61 }
 0x1a2   : > { %v575_v2 = vadd.f32 %v572_v63, %v546_v0 }
 0x1a4   : > { %v582_v3 = vadd.f32 %v580_v1, %v575_v2 }
 0x1a6   : > { %584 = vst.msk [vmem:[%s168_s28] sm:$0xff] %vm583_vm13, %v582_v3 }
 0x1a7 PF: > { %s13_s12 = sadd.s32 1, %s695_s12  }
 0x1a8   : > { %p10_p4 = scmp.ge.s32.totalorder %s13_s12, 4  }
 0x1aa   :  { %12 = sbr.rel (!%p10_p4) target bundleno = 1 (0x1), region = 70 }

// kernel: _lambda_.17
= control target key start
LH: loop header
LB: loop body
LE: loop exit
PB: predicated region body
PF: predicated region fallthrough
CT: control target
= control target key end

     0   :  { %s731_s12 = smov 0   ;;  %s853_s0 = inlined_call_operand.vmem [shape: f32[9,4,8], index: 0, kind: input, shape index: {}]   ;;  %s854_s1 = inlined_call_operand.vmem [shape: f32[4,1], index: 1, kind: input, shape index: {}]   ;;  %s855_s2 = inlined_call_operand.vmem [shape: f32[2,8,4,4], index: 2, kind: input, shape index: {}]   ;;  %s856_s3 = inlined_call_operand.vmem [shape: f32[2,4,24], index: 3, kind: output, shape index: {}]  }
   0x1 LB: > { %s638_s13 = sadd.s32 4294967295, %s695_s12   ;;  %p642_p0 = scmp.ge.s32.totalorder %s695_s12, 1  ;;  %s695_s12 = sphi %s731_s12, %s13_s12  }
   0x2   : > { %p137_p1 = scmp.lt.s32.totalorder %s695_s12, 3 }
   0x4   : > { %p138_p2 = pnand %p642_p0, %p137_p1 }
   0x5   : > { %p160_p3 = scmp.lt.s32.totalorder (!%p138_p2), %s638_s13, 1  ;;  %s698_s18 = smov (!%p138_p2), 7  }
   0x6   : > { %141 = sbr.rel (%p138_p2) target bundleno = 423 (0x1a7), region = 32  ;;  %s699_s19 = smov (!%p138_p2), 19  }
   0x7   : > { %s700_s20 = smov (!%p138_p2), 13   ;;  %s701_s21 = smov (!%p138_p2), 25  }
   0x8   : > { %s702_s22 = smov (!%p138_p2), 116   ;;  %s703_s23 = smov (!%p138_p2), 122  }
   0x9   : > { %s704_s24 = smov (!%p138_p2), 126   ;;  %s705_s25 = smov (!%p138_p2), 120  }
   0xa   : > { %s706_s26 = smov (!%p138_p2), 115   ;;  %s707_s27 = smov (!%p138_p2), 127  }
   0xb   : > { %vm169_vm0 = vcmask 318464   ;;  %s858_s13 = smov (!%p160_p3, %s638_s13), 1  ;;  %v697_v0 = vmov 0.0   ;;  %vm188_vm1 = vcmask 1041409   ;;  %vm191_vm2 = vcmask 1042434   ;;  %s708_s28 = smov 121  }
   0xc   : > { %170 = vst.msk [vmem:[#allocation2] sm:$0xff] %vm169_vm0, %v697_v0  ;;  %s665_s14 = sshll.u32 %s858_s13, 5  ;;  %vm194_vm3 = vcmask 1043459   ;;  %vm197_vm4 = vcmask 1044484   ;;  %vm200_vm5 = vcmask 1045509   ;;  %vm203_vm6 = vcmask 1046534  }
   0xd   : > { %s745_s17 = scalar_lea.vmem %s855_s2, %s665_s14  ;;  %vm206_vm7 = vcmask 1047559   ;;  %vm211_vm8 = vcmask 89144   ;;  %vm246_vm9 = vcmask 138344   ;;  %vm281_vm10 = vcmask 187544   ;;  %s709_s29 = smov 114  }
   0xe   : > { %v171_v1 = vld [vmem:[%s745_s17] sm:$0x1]  ;;  %v172_v2 = vld [vmem:[%s745_s17 + $0x4] sm:$0x1]  ;;  %v173_v3 = vld [vmem:[%s745_s17 + $0x8] sm:$0x1] }
   0xf   : > { %v174_v4 = vld [vmem:[%s745_s17 + $0xc] sm:$0x1]  ;;  %v175_v5 = vld [vmem:[%s745_s17 + $0x10] sm:$0x1]  ;;  %v176_v6 = vld [vmem:[%s745_s17 + $0x14] sm:$0x1] }
  0x10   : > { %v177_v7 = vld [vmem:[%s745_s17 + $0x18] sm:$0x1]  ;;  %v178_v8 = vld [vmem:[%s745_s17 + $0x1c] sm:$0x1]  ;;  %v187_v9 = vrot.slane %v172_v2, 7  ;;  %v190_v10 = vrot.slane %v173_v3, 6 }
  0x11   : > { %v193_v11 = vrot.slane %v174_v4, 5  ;;  %v196_v12 = vrot.slane %v175_v5, 4  ;;  %v199_v13 = vrot.slane %v176_v6, 3  ;;  %v248_v14 = vld [vmem:[%s745_s17 + $0x2] sm:$0x1]  ;;  %v202_v16 = vrot.slane %v177_v7, 2 }
  0x12   : > { %v189_v15 = vsel %vm188_vm1, %v187_v9, %v171_v1  ;;  %v205_v17 = vrot.slane %v178_v8, 1  ;;  %v249_v18 = vld [vmem:[%s745_s17 + $0x6] sm:$0x1]  ;;  %v250_v19 = vld [vmem:[%s745_s17 + $0xa] sm:$0x1]  ;;  %vm316_vm11 = vcmask 236744  }
  0x13   : > { %v192_v20 = vsel %vm191_vm2, %v190_v10, %v189_v15  ;;  %v251_v21 = vld [vmem:[%s745_s17 + $0xe] sm:$0x1]  ;;  %v252_v22 = vld [vmem:[%s745_s17 + $0x12] sm:$0x1]  ;;  %v253_v23 = vld [vmem:[%s745_s17 + $0x16] sm:$0x1] }
  0x14   : > { %v195_v24 = vsel %vm194_vm3, %v193_v11, %v192_v20  ;;  %v254_v25 = vld [vmem:[%s745_s17 + $0x1a] sm:$0x1]  ;;  %v255_v26 = vld [vmem:[%s745_s17 + $0x1e] sm:$0x1]  ;;  %v264_v27 = vrot.slane %v249_v18, 7  ;;  %v266_v28 = vrot.slane %v250_v19, 6 }
  0x15   : > { %v198_v29 = vsel %vm197_vm4, %v196_v12, %v195_v24  ;;  %v268_v30 = vrot.slane %v251_v21, 5  ;;  %v270_v31 = vrot.slane %v252_v22, 4  ;;  %v272_v32 = vrot.slane %v253_v23, 3  ;;  %v213_v33 = vld [vmem:[%s745_s17 + $0x1] sm:$0x1] }
  0x16   : > { %v201_v34 = vsel %vm200_vm5, %v199_v13, %v198_v29  ;;  %v265_v35 = vsel %vm188_vm1, %v264_v27, %v248_v14  ;;  %v274_v36 = vrot.slane %v254_v25, 2  ;;  %v276_v37 = vrot.slane %v255_v26, 1  ;;  %v214_v38 = vld [vmem:[%s745_s17 + $0x5] sm:$0x1]  ;;  %v215_v39 = vld [vmem:[%s745_s17 + $0x9] sm:$0x1] }
  0x17   : > { %v204_v40 = vsel %vm203_vm6, %v202_v16, %v201_v34  ;;  %v267_v41 = vsel %vm191_vm2, %v266_v28, %v265_v35  ;;  %v216_v42 = vld [vmem:[%s745_s17 + $0xd] sm:$0x1]  ;;  %v217_v43 = vld [vmem:[%s745_s17 + $0x11] sm:$0x1]  ;;  %v218_v44 = vld [vmem:[%s745_s17 + $0x15] sm:$0x1] }
  0x18   : > { %v207_v45 = vsel %vm206_vm7, %v205_v17, %v204_v40  ;;  %v269_v46 = vsel %vm194_vm3, %v268_v30, %v267_v41  ;;  %v219_v47 = vld [vmem:[%s745_s17 + $0x19] sm:$0x1]  ;;  %v220_v48 = vld [vmem:[%s745_s17 + $0x1d] sm:$0x1]  ;;  %v229_v49 = vrot.slane %v214_v38, 7  ;;  %v231_v50 = vrot.slane %v215_v39, 6 }
  0x19   : > { %208 = vrot.lane.b32.xlu0 %v207_v45, %s698_s18  ;;  %v271_v51 = vsel %vm197_vm4, %v270_v31, %v269_v46  ;;  %v233_v52 = vrot.slane %v216_v42, 5  ;;  %v235_v53 = vrot.slane %v217_v43, 4  ;;  %v237_v54 = vrot.slane %v218_v44, 3  ;;  %v283_v55 = vld [vmem:[%s745_s17 + $0x3] sm:$0x1] }
  0x1a   : > { %v273_v56 = vsel %vm200_vm5, %v272_v32, %v271_v51  ;;  %v230_v57 = vsel %vm188_vm1, %v229_v49, %v213_v33  ;;  %v239_v58 = vrot.slane %v219_v47, 2  ;;  %v241_v59 = vrot.slane %v220_v48, 1  ;;  %v284_v60 = vld [vmem:[%s745_s17 + $0x7] sm:$0x1]  ;;  %v285_v61 = vld [vmem:[%s745_s17 + $0xb] sm:$0x1] }
  0x1b   : > { %v275_v62 = vsel %vm203_vm6, %v274_v36, %v273_v56  ;;  %v232_v63 = vsel %vm191_vm2, %v231_v50, %v230_v57  ;;  %v286_v0 = vld [vmem:[%s745_s17 + $0xf] sm:$0x1]  ;;  %v287_v1 = vld [vmem:[%s745_s17 + $0x13] sm:$0x1]  ;;  %v288_v2 = vld [vmem:[%s745_s17 + $0x17] sm:$0x1] }
  0x1c   : > { %v277_v3 = vsel %vm206_vm7, %v276_v37, %v275_v62  ;;  %v234_v4 = vsel %vm194_vm3, %v233_v52, %v232_v63  ;;  %v289_v5 = vld [vmem:[%s745_s17 + $0x1b] sm:$0x1]  ;;  %v299_v6 = vrot.slane %v284_v60, 7  ;;  %v301_v7 = vrot.slane %v285_v61, 6  ;;  %v290_v9 = vld [vmem:[%s745_s17 + $0x1f] sm:$0x1] }
  0x1d   : > { %278 = vrot.lane.b32.xlu1 %v277_v3, %s699_s19  ;;  %v236_v8 = vsel %vm197_vm4, %v235_v53, %v234_v4  ;;  %v303_v10 = vrot.slane %v286_v0, 5  ;;  %v305_v11 = vrot.slane %v287_v1, 4  ;;  %v307_v14 = vrot.slane %v288_v2, 3  ;;  %v319_v30 = vld [vmem:[%s853_s0] sm:$0xf] }
  0x1e   : > { %v238_v12 = vsel %vm200_vm5, %v237_v54, %v236_v8  ;;  %v300_v13 = vsel %vm188_vm1, %v299_v6, %v283_v55  ;;  %v309_v17 = vrot.slane %v289_v5, 2  ;;  %v311_v20 = vrot.slane %v290_v9, 1  ;;  %v649_v31 = vld [vmem:[%s853_s0 + $0x8] sm:$0xf]  ;;  %v576_v34 = vld [vmem:[%s854_s1] sm:$0xf] }
  0x1f   : > { %v240_v15 = vsel %vm203_vm6, %v239_v58, %v238_v12  ;;  %v302_v16 = vsel %vm191_vm2, %v301_v7, %v300_v13  ;;  %vm326_vm12 = vcmask 64512   ;;  %v710_v33 = vmov 0   ;;  %v646_v35 = vld [vmem:[%s853_s0 + $0x4] sm:$0xf]  ;;  %v653_v37 = vld [vmem:[%s853_s0 + $0x10] sm:$0xf] }
  0x20   : > { %v242_v18 = vsel %vm206_vm7, %v241_v59, %v240_v15  ;;  %v304_v19 = vsel %vm194_vm3, %v303_v10, %v302_v16  ;;  %688 = vset.pattern.permute.xlu0 %v710_v33  ;;  %v651_v39 = vld [vmem:[%s853_s0 + $0xc] sm:$0xf]  ;;  %v657_v42 = vld [vmem:[%s853_s0 + $0x18] sm:$0xf]  ;;  %v661_v43 = vld [vmem:[%s853_s0 + $0x20] sm:$0xf] }
  0x21   : > { %243 = vrot.lane.b32.xlu0 %v242_v18, %s700_s20  ;;  %v306_v21 = vsel %vm197_vm4, %v305_v11, %v304_v19  ;;  %v659_v45 = vld [vmem:[%s853_s0 + $0x1c] sm:$0xf]  ;;  %v655_v46 = vld [vmem:[%s853_s0 + $0x14] sm:$0xf]  ;;  %vm583_vm13 = vcmask 191488  }
  0x22   : > { %v308_v22 = vsel %vm200_vm5, %v307_v14, %v306_v21 }
  0x23   : > { %v310_v23 = vsel %vm203_vm6, %v309_v17, %v308_v22 }
  0x24   : > { %v312_v24 = vsel %vm206_vm7, %v311_v20, %v310_v23 }
  0x25   : > { %313 = vrot.lane.b32.xlu1 %v312_v24, %s701_s21 }
  0x8b   : > { %v209_v25 = vpop.permute.xlu0 %208 }
  0x8c   : > { %212 = vst.msk [vmem:[#allocation2] sm:$0xff] %vm211_vm8, %v209_v25 }
  0x8f   : > { %v279_v26 = vpop.permute.xlu1 %278 }
  0x93   : > { %v244_v27 = vpop.permute.xlu0 %243 }
  0x94   : > { %247 = vst.msk [vmem:[#allocation2] sm:$0xff] %vm246_vm9, %v244_v27 }
  0x95   : > { %282 = vst.msk [vmem:[#allocation2] sm:$0xff] %vm281_vm10, %v279_v26 }
  0x97   : > { %v314_v28 = vpop.permute.xlu1 %313 }
  0x98   : > { %317 = vst.msk [vmem:[#allocation2] sm:$0xff] %vm316_vm11, %v314_v28 }
  0x9f   : > { %v318_v29 = vld [vmem:[#allocation2] sm:$0xff] }
  0xa0   : > { %491 = vrot.lane.b32.xlu1 %v318_v29, %s702_s22  ;;  %404 = vrot.lane.b32.xlu0 %v318_v29, %s703_s23 }
  0xa1   : > { %375 = vrot.lane.b32.xlu2 %v318_v29, %s704_s24  ;;  %368 = vmatpush.msra.mxu1 %v318_v29 }
  0xa2   : > { %648 = vmatmul.msk.f32.vlgmr.msra.gmra.mxu1 %vm326_vm12, %v319_v30 }
  0xa8   : > { %462 = vrot.lane.b32.xlu1 %v318_v29, %s705_s25  ;;  %520 = vrot.lane.b32.xlu0 %v318_v29, %s706_s26  ;;  %s645_s25 = sshll.u32 %s858_s13, 2 }
  0xa9   : > { %323 = vrot.lane.b32.xlu2 %v318_v29, %s707_s27 }
  0xb0   : > { %579 = vperm.xlu0 %688, %v576_v34  }
  0xb1   : > { %433 = vrot.lane.b32.xlu2 %v318_v29, %s708_s28  ;;  %s168_s28 = scalar_lea.vmem %s856_s3, %s645_s25 }
  0xb9   : > { %549 = vrot.lane.b32.xlu2 %v318_v29, %s709_s29 }
  0xfb   : > { %v376_v32 = vpop.permute.xlu2 %375 }
  0xfc   : > { %396 = vmatpush.msra.mxu2 %v376_v32 }
  0xfd   : > { %650 = vmatmul.msk.f32.vlgmr.msra.gmra.mxu2 %vm326_vm12, %v649_v31 }
 0x103   : > { %v324_v36 = vpop.permute.xlu2 %323 }
 0x104   : > { %345 = vmatpush.msra.mxu0 %v324_v36 }
 0x105   : > { %647 = vmatmul.msk.f32.vlgmr.msra.gmra.mxu0 %vm326_vm12, %v646_v35 }
 0x10b   : > { %v434_v38 = vpop.permute.xlu2 %433 }
 0x10c   : > { %454 = vmatpush.msrb.mxu0 %v434_v38 }
 0x10d   : > { %654 = vmatmul.msk.f32.vlgmr.msrb.gmra.mxu0 %vm326_vm12, %v653_v37 }
 0x112   : > { %v492_v40 = vpop.permute.xlu1 %491  ;;  %v405_v41 = vpop.permute.xlu0 %404 }
 0x113   : > { %v550_v44 = vpop.permute.xlu2 %549  ;;  %425 = vmatpush.msra.mxu3 %v405_v41  ;;  %512 = vmatpush.msrb.mxu2 %v492_v40 }
 0x114   : > { %570 = vmatpush.msra.mxu0 %v550_v44  ;;  %652 = vmatmul.msk.f32.vlgmr.msra.gmra.mxu3 %vm326_vm12, %v651_v39 }
 0x115   : > { %658 = vmatmul.msk.f32.vlgmr.msrb.gmra.mxu2 %vm326_vm12, %v657_v42  ;;  %662 = vmatmul.msk.f32.vlgmr.msra.gmra.mxu0 %vm326_vm12, %v661_v43 }
 0x11a   : > { %v463_v47 = vpop.permute.xlu1 %462  ;;  %v521_v48 = vpop.permute.xlu0 %520 }
 0x11b   : > { %483 = vmatpush.msrb.mxu1 %v463_v47  ;;  %541 = vmatpush.msrb.mxu3 %v521_v48 }
 0x11c   : > { %660 = vmatmul.msk.f32.vlgmr.msrb.gmra.mxu3 %vm326_vm12, %v659_v45  ;;  %656 = vmatmul.msk.f32.vlgmr.msrb.gmra.mxu1 %vm326_vm12, %v655_v46 }
 0x11f   : > { %v370_v50 = vpop.f32.mrf.mxu1 }
 0x122   : > { %v580_v1 = vpop.permute.xlu0 %579 }
 0x180   : > { %v398_v52 = vpop.f32.mrf.mxu2 }
 0x182   : > { %v347_v49 = vpop.f32.mrf.mxu0 }
 0x183   : > { %v371_v51 = vadd.f32 %v370_v50, %v347_v49 }
 0x185   : > { %v401_v54 = vadd.f32 %v398_v52, %v371_v51 }
 0x18a   : > { %v456_v53 = vpop.f32.mrf.mxu0 }
 0x192   : > { %v572_v63 = vpop.f32.mrf.mxu0 }
 0x197   : > { %v427_v55 = vpop.f32.mrf.mxu3 }
 0x198   : > { %v430_v56 = vadd.f32 %v427_v55, %v401_v54  ;;  %v514_v59 = vpop.f32.mrf.mxu2 }
 0x199   : > { %v485_v57 = vpop.f32.mrf.mxu1 }
 0x19a   : > { %v459_v58 = vadd.f32 %v456_v53, %v430_v56 }
 0x19c   : > { %v488_v60 = vadd.f32 %v485_v57, %v459_v58 }
 0x19e   : > { %v517_v61 = vadd.f32 %v514_v59, %v488_v60 }
 0x19f   : > { %v543_v62 = vpop.f32.mrf.mxu3 }
 0x1a0   : > { %v546_v0 = vadd.f32 %v543_v62, %v517_v61 }
 0x1a2   : > { %v575_v2 = vadd.f32 %v572_v63, %v546_v0 }
 0x1a4   : > { %v582_v3 = vadd.f32 %v580_v1, %v575_v2 }
 0x1a6   : > { %584 = vst.msk [vmem:[%s168_s28] sm:$0xf] %vm583_vm13, %v582_v3 }
 0x1a7 PF: > { %s13_s12 = sadd.s32 1, %s695_s12  }
 0x1a8   : > { %p10_p4 = scmp.ge.s32.totalorder %s13_s12, 4  }
 0x1aa   :  { %12 = sbr.rel (!%p10_p4) target bundleno = 1 (0x1), region = 70 }

// kernel: _lambda_.20
= control target key start
LH: loop header
LB: loop body
LE: loop exit
PB: predicated region body
PF: predicated region fallthrough
CT: control target
= control target key end

     0   :  { %v239_v3 = vmov 0   ;;  %v240_v25 = vmov 512.0   ;;  %s431_s0 = inlined_call_operand.vmem [shape: f32[24,512], index: 0, kind: input, shape index: {}]   ;;  %s432_s1 = inlined_call_operand.vmem [shape: f32[24,1], index: 1, kind: input, shape index: {}]   ;;  %s433_s2 = inlined_call_operand.vmem [shape: f32[24,1], index: 2, kind: input, shape index: {}]   ;;  %s434_s3 = inlined_call_operand.vmem [shape: f32[24,512], index: 3, kind: output, shape index: {}]  }
   0x1   :  { %v14_v0 = vld [vmem:[%s431_s0] sm:$0xff]  ;;  %v15_v1 = vld [vmem:[%s431_s0 + $0x8] sm:$0xff]  ;;  %v16_v2 = vld [vmem:[%s431_s0 + $0x10] sm:$0xff]  ;;  %230 = vset.pattern.permute.xlu2 %v239_v3  ;;  %229 = vset.pattern.permute.xlu1 %v239_v3  ;;  %231 = vrcp.f32 %v240_v25 }
   0x2   :  { %v26_v4 = vadd.f32 %v15_v1, %v14_v0  ;;  %v18_v5 = vld [vmem:[%s431_s0 + $0x20] sm:$0xff]  ;;  %v19_v6 = vld [vmem:[%s431_s0 + $0x28] sm:$0xff]  ;;  %228 = vset.pattern.permute.xlu0 %v239_v3  ;;  %v17_v7 = vld [vmem:[%s431_s0 + $0x18] sm:$0xff] }
   0x3   :  { %v22_v8 = vld [vmem:[%s431_s0 + $0x40] sm:$0xff]  ;;  %v31_v10 = vadd.f32 %v19_v6, %v18_v5  ;;  %v23_v11 = vld [vmem:[%s431_s0 + $0x48] sm:$0xff]  ;;  %v24_v12 = vld [vmem:[%s431_s0 + $0x50] sm:$0xff] }
   0x4   :  { %v27_v9 = vadd.f32 %v26_v4, %v16_v2  ;;  %v20_v13 = vld [vmem:[%s431_s0 + $0x30] sm:$0xff]  ;;  %v36_v14 = vadd.f32 %v23_v11, %v22_v8  ;;  %v25_v17 = vld [vmem:[%s431_s0 + $0x58] sm:$0xff]  ;;  %v168_v22 = vld [vmem:[%s433_s2] sm:$0xff] }
   0x5   :  { %v140_v15 = vld [vmem:[%s432_s1 + $0x10] sm:$0xff]  ;;  %v32_v19 = vadd.f32 %v31_v10, %v20_v13  ;;  %v21_v20 = vld [vmem:[%s431_s0 + $0x38] sm:$0xff]  ;;  %v139_v24 = vld [vmem:[%s432_s1 + $0x8] sm:$0xff] }
   0x6   :  { %v28_v16 = vadd.f32 %v27_v9, %v17_v7  ;;  %153 = vperm.xlu2 %230, %v140_v15   ;;  %v37_v18 = vadd.f32 %v36_v14, %v24_v12  ;;  %v138_v31 = vld [vmem:[%s432_s1] sm:$0xff]  ;;  %v170_v9 = vld [vmem:[%s433_s2 + $0x10] sm:$0xff] }
   0x7   :  { %v33_v23 = vadd.f32 %v32_v19, %v21_v20  ;;  %v232_v26 = vpop.eup %231 }
   0x8   :  { %29 = vadd.xlane.f32.xlu0 %v28_v16  ;;  %v38_v21 = vadd.f32 %v37_v18, %v25_v17  ;;  %v42_v27 = vmul.f32 512.0, %v232_v26  ;;  %vm46_vm0 = vweird.f32 %v232_v26 }
   0xa   :  { %39 = vadd.xlane.f32.xlu1 %v38_v21  ;;  %v43_v28 = vsub.f32 1.0, %v42_v27 }
   0xc   :  { %v44_v29 = vmul.f32 %v232_v26, %v43_v28 }
   0xe   :  { %173 = vperm.xlu2 %230, %v168_v22   ;;  %v45_v30 = vadd.f32 %v232_v26, %v44_v29 }
  0x10   :  { %34 = vadd.xlane.f32.xlu0 %v33_v23  ;;  %v309_v32 = vsel %vm46_vm0, %v232_v26, %v45_v30 }
  0x23   :  { %148 = vperm.xlu1 %229, %v139_v24  }
  0x24   :  { %143 = vperm.xlu0 %228, %v138_v31  }
  0x60   :  { %v368_v10 = vpop.permute.xlu2 %153 }
  0x7b   :  { %v30_v33 = vpop.xlane.xlu0 %29 }
  0x7c   :  { %v48_v34 = vmul.f32 %v309_v32, %v30_v33 }
  0x7d   :  { %v40_v37 = vpop.xlane.xlu1 %39 }
  0x7e   :  { %v312_v35 = vsub.f32 %v14_v0, %v48_v34  ;;  %v314_v36 = vsub.f32 %v15_v1, %v48_v34  ;;  %v316_v38 = vsub.f32 %v16_v2, %v48_v34  ;;  %v318_v39 = vsub.f32 %v17_v7, %v48_v34 }
  0x7f   :  { %v50_v42 = vmul.f32 %v309_v32, %v40_v37 }
  0x80   :  { %v63_v40 = vmul.f32 %v312_v35, %v312_v35  ;;  %v64_v41 = vmul.f32 %v314_v36, %v314_v36  ;;  %v65_v43 = vmul.f32 %v316_v38, %v316_v38  ;;  %v66_v47 = vmul.f32 %v318_v39, %v318_v39 }
  0x81   :  { %v330_v49 = vsub.f32 %v22_v8, %v50_v42  ;;  %v332_v50 = vsub.f32 %v23_v11, %v50_v42  ;;  %v346_v58 = vsub.f32 %v24_v12, %v50_v42  ;;  %v356_v2 = vsub.f32 %v25_v17, %v50_v42  ;;  %v169_v8 = vld [vmem:[%s433_s2 + $0x8] sm:$0xff]  ;;  %v174_v12 = vpop.permute.xlu2 %173 }
  0x82   :  { %v75_v44 = vadd.f32 %v64_v41, %v63_v40 }
  0x83   :  { %v35_v45 = vpop.xlane.xlu0 %34  ;;  %v71_v61 = vmul.f32 %v330_v49, %v330_v49  ;;  %v72_v62 = vmul.f32 %v332_v50, %v332_v50  ;;  %v73_v3 = vmul.f32 %v346_v58, %v346_v58 }
  0x84   :  { %v49_v46 = vmul.f32 %v309_v32, %v35_v45  ;;  %v76_v48 = vadd.f32 %v75_v44, %v65_v43 }
  0x85   :  { %v85_v4 = vadd.f32 %v72_v62, %v71_v61 }
  0x86   :  { %v334_v51 = vsub.f32 %v18_v5, %v49_v46  ;;  %v336_v52 = vsub.f32 %v19_v6, %v49_v46  ;;  %v77_v53 = vadd.f32 %v76_v48, %v66_v47  ;;  %v338_v54 = vsub.f32 %v20_v13, %v49_v46 }
  0x87   :  { %v340_v55 = vsub.f32 %v21_v20, %v49_v46  ;;  %v74_v5 = vmul.f32 %v356_v2, %v356_v2  ;;  %v86_v6 = vadd.f32 %v85_v4, %v73_v3 }
  0x88   :  { %78 = vadd.xlane.f32.xlu1 %v77_v53  ;;  %v67_v56 = vmul.f32 %v334_v51, %v334_v51  ;;  %v68_v57 = vmul.f32 %v336_v52, %v336_v52  ;;  %v69_v59 = vmul.f32 %v338_v54, %v338_v54 }
  0x89   :  { %v70_v63 = vmul.f32 %v340_v55, %v340_v55  ;;  %v87_v7 = vadd.f32 %v86_v6, %v74_v5 }
  0x8a   :  { %v80_v60 = vadd.f32 %v68_v57, %v67_v56 }
  0x8c   :  { %v81_v0 = vadd.f32 %v80_v60, %v69_v59 }
  0x8e   :  { %v82_v1 = vadd.f32 %v81_v0, %v70_v63 }
  0x90   :  { %83 = vadd.xlane.f32.xlu2 %v82_v1 }
  0x95   :  { %v370_v11 = vpop.permute.xlu1 %148 }
  0x96   :  { %v144_v33 = vpop.permute.xlu0 %143 }
  0x98   :  { %88 = vadd.xlane.f32.xlu2 %v87_v7 }
  0xa1   :  { %178 = vperm.xlu1 %229, %v169_v8  }
  0xb0   :  { %183 = vperm.xlu2 %230, %v170_v9  }
  0xfb   :  { %v79_v13 = vpop.xlane.xlu1 %78 }
  0xfc   :  { %v90_v14 = vmul.f32 %v79_v13, %v309_v32 }
  0xfe   :  { %v93_v15 = vadd.f32 1e-05, %v90_v14 }
 0x100   :  { %233 = vrsqrt.f32 %v93_v15  ;;  %vm102_vm2 = vweird.f32 %v93_v15 }
 0x103   :  { %v84_v16 = vpop.xlane.xlu2 %83 }
 0x104   :  { %v91_v17 = vmul.f32 %v84_v16, %v309_v32 }
 0x106   :  { %v234_v18 = vpop.eup %233  ;;  %v94_v19 = vadd.f32 1e-05, %v91_v17 }
 0x107   :  { %v97_v20 = vmul.f32 %v234_v18, %v93_v15  ;;  %vm103_vm1 = vweird.f32 %v234_v18 }
 0x108   :  { %235 = vrsqrt.f32 %v94_v19  ;;  %vm104_vm3 = vmor %vm102_vm2, %vm103_vm1  ;;  %vm112_vm5 = vweird.f32 %v94_v19 }
 0x109   :  { %v98_v21 = vmul.f32 %v234_v18, %v97_v20 }
 0x10b   :  { %v99_v22 = vmul.f32 0.5, %v98_v21  ;;  %v89_v23 = vpop.xlane.xlu2 %88 }
 0x10c   :  { %v92_v24 = vmul.f32 %v89_v23, %v309_v32 }
 0x10d   :  { %v100_v25 = vsub.f32 1.5, %v99_v22 }
 0x10e   :  { %v236_v26 = vpop.eup %235  ;;  %v95_v27 = vadd.f32 1e-05, %v92_v24 }
 0x10f   :  { %v101_v28 = vmul.f32 %v234_v18, %v100_v25  ;;  %v107_v29 = vmul.f32 %v236_v26, %v94_v19  ;;  %vm113_vm4 = vweird.f32 %v236_v26 }
 0x110   :  { %237 = vrsqrt.f32 %v95_v27  ;;  %vm114_vm6 = vmor %vm112_vm5, %vm113_vm4  ;;  %vm122_vm8 = vweird.f32 %v95_v27 }
 0x111   :  { %v105_v30 = vsel %vm104_vm3, %v234_v18, %v101_v28  ;;  %v108_v31 = vmul.f32 %v236_v26, %v107_v29 }
 0x112   :  { %v126_v34 = vmul.f32 %v105_v30, %v312_v35  ;;  %v127_v37 = vmul.f32 %v105_v30, %v314_v36  ;;  %v128_v40 = vmul.f32 %v105_v30, %v316_v38  ;;  %v129_v32 = vmul.f32 %v105_v30, %v318_v39 }
 0x113   :  { %v109_v41 = vmul.f32 0.5, %v108_v31 }
 0x114   :  { %v156_v42 = vmul.f32 %v144_v33, %v126_v34  ;;  %v157_v43 = vmul.f32 %v144_v33, %v127_v37  ;;  %v158_v44 = vmul.f32 %v144_v33, %v128_v40  ;;  %v159_v45 = vmul.f32 %v144_v33, %v129_v32 }
 0x115   :  { %v110_v46 = vsub.f32 1.5, %v109_v41 }
 0x116   :  { %v238_v47 = vpop.eup %237  ;;  %v186_v48 = vadd.f32 %v174_v12, %v156_v42  ;;  %v187_v53 = vadd.f32 %v174_v12, %v157_v43  ;;  %v188_v56 = vadd.f32 %v174_v12, %v158_v44  ;;  %v189_v57 = vadd.f32 %v174_v12, %v159_v45 }
 0x117   :  { %v111_v59 = vmul.f32 %v236_v26, %v110_v46  ;;  %v117_v35 = vmul.f32 %v238_v47, %v95_v27  ;;  %vm123_vm7 = vweird.f32 %v238_v47 }
 0x118   :  { %v198_v36 = vmax.f32 %v186_v48, 0.0  ;;  %v199_v38 = vmax.f32 %v187_v53, 0.0  ;;  %v200_v60 = vmax.f32 %v188_v56, 0.0  ;;  %v201_v62 = vmax.f32 %v189_v57, 0.0  ;;  %vm124_vm9 = vmor %vm122_vm8, %vm123_vm7 }
 0x119   :  { %v115_v39 = vsel %vm114_vm6, %v236_v26, %v111_v59  ;;  %v118_v61 = vmul.f32 %v238_v47, %v117_v35 }
 0x11a   :  { %v130_v63 = vmul.f32 %v115_v39, %v334_v51  ;;  %v131_v0 = vmul.f32 %v115_v39, %v336_v52  ;;  %v132_v1 = vmul.f32 %v115_v39, %v338_v54  ;;  %v133_v3 = vmul.f32 %v115_v39, %v340_v55  ;;  %210 = vst [vmem:[%s434_s3] sm:$0xff] %v198_v36  ;;  %v179_v55 = vpop.permute.xlu1 %178 }
 0x11b   :  { %v119_v4 = vmul.f32 0.5, %v118_v61  ;;  %211 = vst [vmem:[%s434_s3 + $0x8] sm:$0xff] %v199_v38 }
 0x11c   :  { %v160_v5 = vmul.f32 %v370_v11, %v130_v63  ;;  %v161_v6 = vmul.f32 %v370_v11, %v131_v0  ;;  %v162_v51 = vmul.f32 %v370_v11, %v132_v1  ;;  %v163_v52 = vmul.f32 %v370_v11, %v133_v3  ;;  %212 = vst [vmem:[%s434_s3 + $0x10] sm:$0xff] %v200_v60 }
 0x11d   :  { %v120_v54 = vsub.f32 1.5, %v119_v4  ;;  %213 = vst [vmem:[%s434_s3 + $0x18] sm:$0xff] %v201_v62 }
 0x11e   :  { %v190_v7 = vadd.f32 %v179_v55, %v160_v5  ;;  %v191_v8 = vadd.f32 %v179_v55, %v161_v6  ;;  %v192_v9 = vadd.f32 %v179_v55, %v162_v51  ;;  %v193_v12 = vadd.f32 %v179_v55, %v163_v52 }
 0x11f   :  { %v121_v13 = vmul.f32 %v238_v47, %v120_v54 }
 0x120   :  { %v202_v14 = vmax.f32 %v190_v7, 0.0  ;;  %v203_v11 = vmax.f32 %v191_v8, 0.0  ;;  %v204_v15 = vmax.f32 %v192_v9, 0.0  ;;  %v205_v17 = vmax.f32 %v193_v12, 0.0 }
 0x121   :  { %v125_v16 = vsel %vm124_vm9, %v238_v47, %v121_v13 }
 0x122   :  { %214 = vst [vmem:[%s434_s3 + $0x20] sm:$0xff] %v202_v14  ;;  %v134_v18 = vmul.f32 %v125_v16, %v330_v49  ;;  %v135_v19 = vmul.f32 %v125_v16, %v332_v50  ;;  %v136_v20 = vmul.f32 %v125_v16, %v346_v58  ;;  %v137_v21 = vmul.f32 %v125_v16, %v356_v2  ;;  %v184_v58 = vpop.permute.xlu2 %183 }
 0x123   :  { %215 = vst [vmem:[%s434_s3 + $0x28] sm:$0xff] %v203_v11 }
 0x124   :  { %216 = vst [vmem:[%s434_s3 + $0x30] sm:$0xff] %v204_v15  ;;  %v164_v22 = vmul.f32 %v368_v10, %v134_v18  ;;  %v165_v23 = vmul.f32 %v368_v10, %v135_v19  ;;  %v166_v49 = vmul.f32 %v368_v10, %v136_v20  ;;  %v167_v50 = vmul.f32 %v368_v10, %v137_v21 }
 0x125   :  { %217 = vst [vmem:[%s434_s3 + $0x38] sm:$0xff] %v205_v17 }
 0x126   :  { %v194_v2 = vadd.f32 %v184_v58, %v164_v22  ;;  %v195_v24 = vadd.f32 %v184_v58, %v165_v23  ;;  %v196_v25 = vadd.f32 %v184_v58, %v166_v49  ;;  %v197_v26 = vadd.f32 %v184_v58, %v167_v50 }
 0x128   :  { %v206_v27 = vmax.f32 %v194_v2, 0.0  ;;  %v207_v28 = vmax.f32 %v195_v24, 0.0  ;;  %v208_v29 = vmax.f32 %v196_v25, 0.0  ;;  %v209_v30 = vmax.f32 %v197_v26, 0.0 }
 0x12a   :  { %218 = vst [vmem:[%s434_s3 + $0x40] sm:$0xff] %v206_v27 }
 0x12b   :  { %219 = vst [vmem:[%s434_s3 + $0x48] sm:$0xff] %v207_v28 }
 0x12c   :  { %220 = vst [vmem:[%s434_s3 + $0x50] sm:$0xff] %v208_v29 }
 0x12d   :  { %221 = vst [vmem:[%s434_s3 + $0x58] sm:$0xff] %v209_v30 }

// kernel: _lambda_.19
= control target key start
LH: loop header
LB: loop body
LE: loop exit
PB: predicated region body
PF: predicated region fallthrough
CT: control target
= control target key end

     0   :  { %s966_s12 = smov 0   ;;  %s1176_s0 = inlined_call_operand.vmem [shape: f32[9,24,4], index: 0, kind: input, shape index: {}]   ;;  %s1177_s1 = inlined_call_operand.vmem [shape: f32[24,1], index: 1, kind: input, shape index: {}]   ;;  %s1178_s2 = inlined_call_operand.vmem [shape: f32[2,4,8,8], index: 2, kind: input, shape index: {}]   ;;  %s1179_s3 = inlined_call_operand.vmem [shape: f32[2,24,80], index: 3, kind: output, shape index: {}]  }
   0x1 LB: > { %s817_s13 = sadd.s32 4294967295, %s926_s12   ;;  %p821_p0 = scmp.ge.s32.totalorder %s926_s12, 1  ;;  %s926_s12 = sphi %s966_s12, %s13_s12  }
   0x2   : > { %p137_p1 = scmp.lt.s32.totalorder %s926_s12, 3 }
   0x4   : > { %p138_p2 = pnand %p821_p0, %p137_p1 }
   0x5   : > { %p161_p3 = scmp.lt.s32.totalorder (!%p138_p2), %s817_s13, 1  ;;  %s929_s18 = smov (!%p138_p2), 11  }
   0x6   : > { %141 = sbr.rel (%p138_p2) target bundleno = 458 (0x1ca), region = 32  ;;  %s930_s19 = smov (!%p138_p2), 31  }
   0x7   : > { %s931_s20 = smov (!%p138_p2), 21   ;;  %s932_s21 = smov (!%p138_p2), 41  }
   0x8   : > { %s933_s22 = smov (!%p138_p2), 51   ;;  %s934_s23 = smov (!%p138_p2), 71  }
   0x9   : > { %s935_s24 = smov (!%p138_p2), 81   ;;  %s936_s25 = smov (!%p138_p2), 61  }
   0xa   : > { %s937_s26 = smov (!%p138_p2), 118   ;;  %s938_s27 = smov (!%p138_p2), 126  }
   0xb   : > { %vm171_vm0 = vcmask 838656   ;;  %s1181_s13 = smov (!%p161_p3, %s817_s13), 1  ;;  %v928_v0 = vmov 0.0   ;;  %vm182_vm1 = vcmask 1041409   ;;  %vm185_vm2 = vcmask 1042434   ;;  %s939_s28 = smov 127  }
   0xc   : > { %172 = vst.msk [vmem:[#allocation2] sm:$0xf] %vm171_vm0, %v928_v0  ;;  %s887_s14 = sshll.u32 %s1181_s13, 5  ;;  %vm188_vm3 = vcmask 1043459   ;;  %vm193_vm4 = vcmask 150616   ;;  %vm212_vm5 = vcmask 232616  }
   0xd   : > { %s980_s17 = scalar_lea.vmem %s1178_s2, %s887_s14  ;;  %vm231_vm6 = vcmask 314616   ;;  %vm250_vm7 = vcmask 396616   ;;  %vm269_vm8 = vcmask 478616   ;;  %vm288_vm9 = vcmask 560616   ;;  %s940_s29 = smov 107  }
   0xe   : > { %v173_v1 = vld [vmem:[%s980_s17] sm:$0x1]  ;;  %v174_v2 = vld [vmem:[%s980_s17 + $0x8] sm:$0x1]  ;;  %v175_v3 = vld [vmem:[%s980_s17 + $0x10] sm:$0x1] }
   0xf   : > { %v176_v4 = vld [vmem:[%s980_s17 + $0x18] sm:$0x1]  ;;  %v181_v5 = vrot.slane %v174_v2, 7  ;;  %v184_v6 = vrot.slane %v175_v3, 6  ;;  %v214_v7 = vld [vmem:[%s980_s17 + $0x2] sm:$0x1] }
  0x10   : > { %v187_v8 = vrot.slane %v176_v4, 5  ;;  %v215_v9 = vld [vmem:[%s980_s17 + $0xa] sm:$0x1]  ;;  %v216_v10 = vld [vmem:[%s980_s17 + $0x12] sm:$0x1]  ;;  %vm307_vm10 = vcmask 642616  }
  0x11   : > { %v183_v11 = vsel %vm182_vm1, %v181_v5, %v173_v1  ;;  %v217_v12 = vld [vmem:[%s980_s17 + $0x1a] sm:$0x1]  ;;  %v222_v13 = vrot.slane %v215_v9, 7  ;;  %v224_v14 = vrot.slane %v216_v10, 6  ;;  %v195_v15 = vld [vmem:[%s980_s17 + $0x1] sm:$0x1] }
  0x12   : > { %v186_v16 = vsel %vm185_vm2, %v184_v6, %v183_v11  ;;  %v226_v17 = vrot.slane %v217_v12, 5  ;;  %v196_v18 = vld [vmem:[%s980_s17 + $0x9] sm:$0x1]  ;;  %v197_v19 = vld [vmem:[%s980_s17 + $0x11] sm:$0x1]  ;;  %vm326_vm11 = vcmask 724616  }
  0x13   : > { %v189_v20 = vsel %vm188_vm3, %v187_v8, %v186_v16  ;;  %v223_v21 = vsel %vm182_vm1, %v222_v13, %v214_v7  ;;  %v198_v22 = vld [vmem:[%s980_s17 + $0x19] sm:$0x1]  ;;  %v203_v23 = vrot.slane %v196_v18, 7  ;;  %v205_v24 = vrot.slane %v197_v19, 6  ;;  %v233_v25 = vld [vmem:[%s980_s17 + $0x3] sm:$0x1] }
  0x14   : > { %190 = vrot.lane.b32.xlu0 %v189_v20, %s929_s18  ;;  %v225_v26 = vsel %vm185_vm2, %v224_v14, %v223_v21  ;;  %v207_v27 = vrot.slane %v198_v22, 5  ;;  %v234_v28 = vld [vmem:[%s980_s17 + $0xb] sm:$0x1]  ;;  %v235_v29 = vld [vmem:[%s980_s17 + $0x13] sm:$0x1]  ;;  %s941_s30 = smov 108  }
  0x15   : > { %v227_v30 = vsel %vm188_vm3, %v226_v17, %v225_v26  ;;  %v204_v31 = vsel %vm182_vm1, %v203_v23, %v195_v15  ;;  %v236_v32 = vld [vmem:[%s980_s17 + $0x1b] sm:$0x1]  ;;  %v241_v33 = vrot.slane %v234_v28, 7  ;;  %v243_v34 = vrot.slane %v235_v29, 6  ;;  %v291_v36 = vld [vmem:[%s980_s17 + $0xe] sm:$0x1] }
  0x16   : > { %228 = vrot.lane.b32.xlu1 %v227_v30, %s930_s19  ;;  %v206_v35 = vsel %vm185_vm2, %v205_v24, %v204_v31  ;;  %v292_v37 = vld [vmem:[%s980_s17 + $0x16] sm:$0x1]  ;;  %v245_v39 = vrot.slane %v236_v32, 5  ;;  %v298_v40 = vrot.slane %v291_v36, 7  ;;  %v290_v42 = vld [vmem:[%s980_s17 + $0x6] sm:$0x1] }
  0x17   : > { %v242_v38 = vsel %vm182_vm1, %v241_v33, %v233_v25  ;;  %v293_v43 = vld [vmem:[%s980_s17 + $0x1e] sm:$0x1]  ;;  %v310_v44 = vld [vmem:[%s980_s17 + $0xf] sm:$0x1]  ;;  %v208_v45 = vsel %vm188_vm3, %v207_v27, %v206_v35  ;;  %v300_v46 = vrot.slane %v292_v37, 6  ;;  %s942_s4 = smov 117  }
  0x18   : > { %v244_v41 = vsel %vm185_vm2, %v243_v34, %v242_v38  ;;  %v309_v47 = vld [vmem:[%s980_s17 + $0x7] sm:$0x1]  ;;  %v311_v48 = vld [vmem:[%s980_s17 + $0x17] sm:$0x1]  ;;  %v317_v49 = vrot.slane %v310_v44, 7  ;;  %v299_v55 = vsel %vm182_vm1, %v298_v40, %v290_v42  ;;  %v302_v0 = vrot.slane %v293_v43, 5 }
  0x19   : > { %v312_v50 = vld [vmem:[%s980_s17 + $0x1f] sm:$0x1]  ;;  %v252_v51 = vld [vmem:[%s980_s17 + $0x4] sm:$0x1]  ;;  %v253_v52 = vld [vmem:[%s980_s17 + $0xc] sm:$0x1]  ;;  %v246_v54 = vsel %vm188_vm3, %v245_v39, %v244_v41  ;;  %v301_v4 = vsel %vm185_vm2, %v300_v46, %v299_v55 }
  0x1a   : > { %v254_v53 = vld [vmem:[%s980_s17 + $0x14] sm:$0x1]  ;;  %v255_v56 = vld [vmem:[%s980_s17 + $0x1c] sm:$0x1]  ;;  %v260_v57 = vrot.slane %v253_v52, 7  ;;  %v319_v60 = vrot.slane %v311_v48, 6  ;;  %v318_v1 = vsel %vm182_vm1, %v317_v49, %v309_v47  ;;  %v303_v12 = vsel %vm188_vm3, %v302_v0, %v301_v4 }
  0x1b   : > { %v262_v58 = vrot.slane %v254_v53, 6  ;;  %v271_v59 = vld [vmem:[%s980_s17 + $0x5] sm:$0x1]  ;;  %v264_v61 = vrot.slane %v255_v56, 5  ;;  %v272_v62 = vld [vmem:[%s980_s17 + $0xd] sm:$0x1] }
  0x1c   : > { %209 = vrot.lane.b32.xlu0 %v208_v45, %s931_s20  ;;  %v273_v63 = vld [vmem:[%s980_s17 + $0x15] sm:$0x1]  ;;  %v261_v2 = vsel %vm182_vm1, %v260_v57, %v252_v51  ;;  %v279_v3 = vrot.slane %v272_v62, 7  ;;  %v274_v6 = vld [vmem:[%s980_s17 + $0x1d] sm:$0x1]  ;;  %v321_v8 = vrot.slane %v312_v50, 5  ;;  %v320_v11 = vsel %vm185_vm2, %v319_v60, %v318_v1 }
  0x1d   : > { %v263_v5 = vsel %vm185_vm2, %v262_v58, %v261_v2  ;;  %v281_v7 = vrot.slane %v273_v63, 6  ;;  %v283_v13 = vrot.slane %v274_v6, 5  ;;  %s943_s5 = smov 106   ;;  %s944_s6 = smov 116   ;;  %vm349_vm12 = vcmask 1043456   ;;  %v826_v27 = vld [vmem:[%s1176_s0 + $0x20] sm:$0xff] }
  0x1e   : > { %247 = vrot.lane.b32.xlu1 %v246_v54, %s932_s21  ;;  %v265_v9 = vsel %vm188_vm3, %v264_v61, %v263_v5  ;;  %v280_v10 = vsel %vm182_vm1, %v279_v3, %v271_v59  ;;  %v322_v15 = vsel %vm188_vm3, %v321_v8, %v320_v11  ;;  %vm339_vm13 = vcmask 31744   ;;  %v827_v28 = vld [vmem:[%s1176_s0 + $0x28] sm:$0xff]  ;;  %v825_v29 = vld [vmem:[%s1176_s0 + $0x18] sm:$0xff]  ;;  %v329_v31 = vld [vmem:[%s1176_s0] sm:$0xff]  ;;  %s890_s19 = smul.u32 24, %s1181_s13 }
  0x1f   : > { %266 = vrot.lane.b32.xlu2 %v265_v9, %s933_s22  ;;  %v282_v14 = vsel %vm185_vm2, %v281_v7, %v280_v10  ;;  %v850_v32 = vld [vmem:[%s1176_s0 + $0x60] sm:$0xff]  ;;  %v330_v34 = vld [vmem:[%s1176_s0 + $0x8] sm:$0xff]  ;;  %v836_v36 = vld [vmem:[%s1176_s0 + $0x30] sm:$0xff]  ;;  %v945_v48 = vmov 0   ;;  %vm758_vm14 = vcmask 654336  }
  0x20   : > { %v284_v16 = vsel %vm188_vm3, %v283_v13, %v282_v14  ;;  %v851_v35 = vld [vmem:[%s1176_s0 + $0x68] sm:$0xff]  ;;  %v331_v40 = vld [vmem:[%s1176_s0 + $0x10] sm:$0xff]  ;;  %v837_v42 = vld [vmem:[%s1176_s0 + $0x38] sm:$0xff]  ;;  %917 = vset.pattern.permute.xlu1 %v945_v48  ;;  %919 = vset.pattern.permute.xlu0 %v945_v48  ;;  %s170_s22 = scalar_lea.vmem %s1179_s3, %s890_s19 }
  0x21   : > { %v843_v37 = vld [vmem:[%s1176_s0 + $0x48] sm:$0xff]  ;;  %v852_v41 = vld [vmem:[%s1176_s0 + $0x70] sm:$0xff]  ;;  %v857_v46 = vld [vmem:[%s1176_s0 + $0x78] sm:$0xff]  ;;  %918 = vset.pattern.permute.xlu2 %v945_v48 }
  0x22   : > { %v844_v43 = vld [vmem:[%s1176_s0 + $0x50] sm:$0xff]  ;;  %v737_v47 = vld [vmem:[%s1177_s1] sm:$0xff]  ;;  %v738_v50 = vld [vmem:[%s1177_s1 + $0x8] sm:$0xff] }
  0x23   : > { %v739_v49 = vld [vmem:[%s1177_s1 + $0x10] sm:$0xff]  ;;  %v838_v51 = vld [vmem:[%s1176_s0 + $0x40] sm:$0xff]  ;;  %v845_v52 = vld [vmem:[%s1176_s0 + $0x58] sm:$0xff] }
  0x24   : > { %304 = vrot.lane.b32.xlu0 %v303_v12, %s934_s23  ;;  %v878_v54 = vld [vmem:[%s1176_s0 + $0xc0] sm:$0xff]  ;;  %v864_v56 = vld [vmem:[%s1176_s0 + $0x90] sm:$0xff]  ;;  %v871_v57 = vld [vmem:[%s1176_s0 + $0xa8] sm:$0xff] }
  0x25   : > { %v858_v55 = vld [vmem:[%s1176_s0 + $0x80] sm:$0xff]  ;;  %v879_v58 = vld [vmem:[%s1176_s0 + $0xc8] sm:$0xff]  ;;  %v865_v60 = vld [vmem:[%s1176_s0 + $0x98] sm:$0xff] }
  0x26   : > { %323 = vrot.lane.b32.xlu1 %v322_v15, %s935_s24  ;;  %v859_v59 = vld [vmem:[%s1176_s0 + $0x88] sm:$0xff]  ;;  %v872_v61 = vld [vmem:[%s1176_s0 + $0xb0] sm:$0xff]  ;;  %v866_v63 = vld [vmem:[%s1176_s0 + $0xa0] sm:$0xff] }
  0x27   : > { %285 = vrot.lane.b32.xlu2 %v284_v16, %s936_s25  ;;  %v880_v62 = vld [vmem:[%s1176_s0 + $0xd0] sm:$0xff]  ;;  %v873_v0 = vld [vmem:[%s1176_s0 + $0xb8] sm:$0xff] }
  0x79   : > { %v267_v18 = vpop.permute.xlu2 %266 }
  0x81   : > { %v286_v22 = vpop.permute.xlu2 %285 }
  0x86   : > { %v191_v17 = vpop.permute.xlu0 %190 }
  0x87   : > { %194 = vst.msk [vmem:[#allocation2] sm:$0xf] %vm193_vm4, %v191_v17 }
  0x88   : > { %v229_v19 = vpop.permute.xlu1 %228 }
  0x8e   : > { %v210_v20 = vpop.permute.xlu0 %209 }
  0x8f   : > { %213 = vst.msk [vmem:[#allocation2] sm:$0xf] %vm212_vm5, %v210_v20 }
  0x90   : > { %v248_v21 = vpop.permute.xlu1 %247  ;;  %232 = vst.msk [vmem:[#allocation2] sm:$0xf] %vm231_vm6, %v229_v19 }
  0x91   : > { %251 = vst.msk [vmem:[#allocation2] sm:$0xf] %vm250_vm7, %v248_v21 }
  0x92   : > { %270 = vst.msk [vmem:[#allocation2] sm:$0xf] %vm269_vm8, %v267_v18 }
  0x93   : > { %289 = vst.msk [vmem:[#allocation2] sm:$0xf] %vm288_vm9, %v286_v22 }
  0x96   : > { %v305_v23 = vpop.permute.xlu0 %304 }
  0x97   : > { %308 = vst.msk [vmem:[#allocation2] sm:$0xf] %vm307_vm10, %v305_v23 }
  0x98   : > { %v324_v24 = vpop.permute.xlu1 %323 }
  0x99   : > { %327 = vst.msk [vmem:[#allocation2] sm:$0xf] %vm326_vm11, %v324_v24 }
  0xa0   : > { %v328_v25 = vld [vmem:[#allocation2] sm:$0xf] }
  0xa1   : > { %465 = vrot.lane.b32.xlu1 %v328_v25, %s937_s26  ;;  %419 = vrot.lane.b32.xlu0 %v328_v25, %s938_s27 }
  0xa2   : > { %337 = vrot.lane.b32.xlu2 %v328_v25, %s939_s28 }
  0xa9   : > { %649 = vrot.lane.b32.xlu1 %v328_v25, %s940_s29  ;;  %603 = vrot.lane.b32.xlu0 %v328_v25, %s941_s30 }
  0xaa   : > { %511 = vrot.lane.b32.xlu2 %v328_v25, %s942_s4 }
  0xb1   : > { %695 = vrot.lane.b32.xlu0 %v328_v25, %s943_s5  ;;  %742 = vperm.xlu1 %917, %v737_v47  }
  0xb2   : > { %557 = vrot.lane.b32.xlu2 %v328_v25, %s944_s6 }
  0xb9   : > { %752 = vperm.xlu0 %919, %v739_v49  }
  0xba   : > { %747 = vperm.xlu2 %918, %v738_v50  }
  0xfc   : > { %v338_v26 = vpop.permute.xlu2 %337 }
  0xfd   : > { %828 = vmatpush.msk.msra.mxu0 %vm349_vm12, %v338_v26  ;;  %888 = vmatpush.msk.msra.mxu1 %vm349_vm12, %v338_v26 }
  0xfe   : > { %889 = vmatpush.msk.msra.mxu2 %vm349_vm12, %v338_v26  ;;  %830 = vmatmul.msk.f32.vlgmr.msra.gmra.mxu1 %vm339_vm13, %v826_v27 }
  0xff   : > { %832 = vmatpush.msk.msrb.mxu1 %vm349_vm12, %v328_v25  ;;  %831 = vmatmul.msk.f32.vlgmr.msra.gmra.mxu2 %vm339_vm13, %v827_v28 }
 0x100   : > { %829 = vmatmul.msk.f32.vlgmr.msra.gmra.mxu0 %vm339_vm13, %v825_v29 }
 0x104   : > { %v512_v30 = vpop.permute.xlu2 %511 }
 0x105   : > { %853 = vmatpush.msk.msrb.mxu0 %vm349_vm12, %v512_v30 }
 0x106   : > { %833 = vmatmul.msk.f32.vlgmr.msrb.gmra.mxu1 %vm339_vm13, %v329_v31 }
 0x108   : > { %854 = vmatmul.msk.f32.vlgmr.msrb.gmra.mxu0 %vm339_vm13, %v850_v32 }
 0x10c   : > { %v558_v33 = vpop.permute.xlu2 %557 }
 0x10d   : > { %860 = vmatpush.msk.msra.mxu1 %vm349_vm12, %v558_v33 }
 0x10e   : > { %834 = vmatmul.msk.f32.gmra.mxu1 %vm339_vm13, %v330_v34 }
 0x110   : > { %855 = vmatmul.msk.f32.gmra.mxu0 %vm339_vm13, %v851_v35 }
 0x113   : > { %v466_v38 = vpop.permute.xlu1 %465  ;;  %v420_v39 = vpop.permute.xlu0 %419 }
 0x114   : > { %839 = vmatpush.msk.msrb.mxu2 %vm349_vm12, %v420_v39  ;;  %846 = vmatpush.msk.msra.mxu3 %vm349_vm12, %v466_v38 }
 0x115   : > { %840 = vmatmul.msk.f32.vlgmr.msrb.gmra.mxu2 %vm339_vm13, %v836_v36  ;;  %847 = vmatmul.msk.f32.vlgmr.msra.gmra.mxu3 %vm339_vm13, %v843_v37 }
 0x116   : > { %835 = vmatmul.msk.f32.gmra.mxu1 %vm339_vm13, %v331_v40 }
 0x118   : > { %856 = vmatmul.msk.f32.gmra.mxu0 %vm339_vm13, %v852_v41 }
 0x11b   : > { %v650_v44 = vpop.permute.xlu1 %649  ;;  %v604_v45 = vpop.permute.xlu0 %603 }
 0x11c   : > { %867 = vmatpush.msk.msra.mxu2 %vm349_vm12, %v604_v45  ;;  %874 = vmatpush.msk.msrb.mxu3 %vm349_vm12, %v650_v44 }
 0x11d   : > { %841 = vmatmul.msk.f32.gmra.mxu2 %vm339_vm13, %v837_v42  ;;  %848 = vmatmul.msk.f32.gmra.mxu3 %vm339_vm13, %v844_v43 }
 0x11e   : > { %861 = vmatmul.msk.f32.vlgmr.msra.gmra.mxu1 %vm339_vm13, %v857_v46  ;;  %v748_v46 = vpop.permute.xlu2 %747 }
 0x123   : > { %v696_v53 = vpop.permute.xlu0 %695  ;;  %v743_v34 = vpop.permute.xlu1 %742 }
 0x124   : > { %881 = vmatpush.msk.msra.mxu0 %vm349_vm12, %v696_v53 }
 0x125   : > { %842 = vmatmul.msk.f32.gmra.mxu2 %vm339_vm13, %v838_v51  ;;  %849 = vmatmul.msk.f32.gmra.mxu3 %vm339_vm13, %v845_v52 }
 0x126   : > { %882 = vmatmul.msk.f32.vlgmr.msra.gmra.mxu0 %vm339_vm13, %v878_v54  ;;  %862 = vmatmul.msk.f32.gmra.mxu1 %vm339_vm13, %v858_v55 }
 0x12b   : > { %v753_v55 = vpop.permute.xlu0 %752 }
 0x12d   : > { %868 = vmatmul.msk.f32.vlgmr.msra.gmra.mxu2 %vm339_vm13, %v864_v56  ;;  %875 = vmatmul.msk.f32.vlgmr.msrb.gmra.mxu3 %vm339_vm13, %v871_v57 }
 0x12e   : > { %883 = vmatmul.msk.f32.gmra.mxu0 %vm339_vm13, %v879_v58  ;;  %863 = vmatmul.msk.f32.gmra.mxu1 %vm339_vm13, %v859_v59 }
 0x135   : > { %869 = vmatmul.msk.f32.gmra.mxu2 %vm339_vm13, %v865_v60  ;;  %876 = vmatmul.msk.f32.gmra.mxu3 %vm339_vm13, %v872_v61 }
 0x136   : > { %884 = vmatmul.msk.f32.gmra.mxu0 %vm339_vm13, %v880_v62 }
 0x13d   : > { %870 = vmatmul.msk.f32.gmra.mxu2 %vm339_vm13, %v866_v63  ;;  %877 = vmatmul.msk.f32.gmra.mxu3 %vm339_vm13, %v873_v0 }
 0x17b   : > { %v372_v1 = vpop.f32.mrf.mxu1 }
 0x17d   : > { %v369_v2 = vpop.f32.mrf.mxu0 }
 0x182   : > { %v375_v4 = vpop.f32.mrf.mxu2 }
 0x183   : > { %v406_v3 = vpop.f32.mrf.mxu1 }
 0x184   : > { %v407_v13 = vadd.f32 %v406_v3, %v369_v2 }
 0x185   : > { %v541_v5 = vpop.f32.mrf.mxu0 }
 0x18b   : > { %v409_v6 = vpop.f32.mrf.mxu1 }
 0x18c   : > { %v410_v20 = vadd.f32 %v409_v6, %v372_v1 }
 0x18d   : > { %v544_v9 = vpop.f32.mrf.mxu0 }
 0x193   : > { %v412_v10 = vpop.f32.mrf.mxu1 }
 0x194   : > { %v413_v28 = vadd.f32 %v412_v10, %v375_v4 }
 0x195   : > { %v547_v15 = vpop.f32.mrf.mxu0 }
 0x198   : > { %v449_v7 = vpop.f32.mrf.mxu2  ;;  %v495_v8 = vpop.f32.mrf.mxu3 }
 0x199   : > { %v458_v14 = vadd.f32 %v449_v7, %v407_v13 }
 0x19b   : > { %v504_v16 = vadd.f32 %v495_v8, %v458_v14  ;;  %v587_v17 = vpop.f32.mrf.mxu1 }
 0x19d   : > { %v550_v21 = vadd.f32 %v541_v5, %v504_v16 }
 0x19f   : > { %v596_v24 = vadd.f32 %v587_v17, %v550_v21 }
 0x1a0   : > { %v452_v11 = vpop.f32.mrf.mxu2  ;;  %v498_v12 = vpop.f32.mrf.mxu3 }
 0x1a1   : > { %v459_v22 = vadd.f32 %v452_v11, %v410_v20 }
 0x1a3   : > { %v725_v23 = vpop.f32.mrf.mxu0  ;;  %v505_v25 = vadd.f32 %v498_v12, %v459_v22  ;;  %v590_v30 = vpop.f32.mrf.mxu1 }
 0x1a5   : > { %v551_v31 = vadd.f32 %v544_v9, %v505_v25 }
 0x1a7   : > { %v597_v36 = vadd.f32 %v590_v30, %v551_v31 }
 0x1a8   : > { %v455_v18 = vpop.f32.mrf.mxu2  ;;  %v501_v19 = vpop.f32.mrf.mxu3 }
 0x1a9   : > { %v460_v32 = vadd.f32 %v455_v18, %v413_v28 }
 0x1ab   : > { %v506_v37 = vadd.f32 %v501_v19, %v460_v32  ;;  %v728_v39 = vpop.f32.mrf.mxu0  ;;  %v593_v45 = vpop.f32.mrf.mxu1 }
 0x1ad   : > { %v552_v43 = vadd.f32 %v547_v15, %v506_v37 }
 0x1af   : > { %v598_v48 = vadd.f32 %v593_v45, %v552_v43 }
 0x1b0   : > { %v633_v26 = vpop.f32.mrf.mxu2  ;;  %v679_v27 = vpop.f32.mrf.mxu3 }
 0x1b1   : > { %v642_v29 = vadd.f32 %v633_v26, %v596_v24 }
 0x1b3   : > { %v688_v33 = vadd.f32 %v679_v27, %v642_v29  ;;  %v731_v53 = vpop.f32.mrf.mxu0 }
 0x1b5   : > { %v734_v35 = vadd.f32 %v725_v23, %v688_v33 }
 0x1b7   : > { %v755_v38 = vadd.f32 %v743_v34, %v734_v35 }
 0x1b8   : > { %v636_v40 = vpop.f32.mrf.mxu2  ;;  %v682_v41 = vpop.f32.mrf.mxu3 }
 0x1b9   : > { %759 = vst.msk [vmem:[%s170_s22] sm:$0xff] %vm758_vm14, %v755_v38  ;;  %v643_v42 = vadd.f32 %v636_v40, %v597_v36 }
 0x1bb   : > { %v689_v44 = vadd.f32 %v682_v41, %v643_v42 }
 0x1bd   : > { %v735_v47 = vadd.f32 %v728_v39, %v689_v44 }
 0x1bf   : > { %v756_v49 = vadd.f32 %v748_v46, %v735_v47 }
 0x1c0   : > { %v639_v50 = vpop.f32.mrf.mxu2  ;;  %v685_v51 = vpop.f32.mrf.mxu3 }
 0x1c1   : > { %760 = vst.msk [vmem:[%s170_s22 + $0x8] sm:$0xff] %vm758_vm14, %v756_v49  ;;  %v644_v52 = vadd.f32 %v639_v50, %v598_v48 }
 0x1c3   : > { %v690_v54 = vadd.f32 %v685_v51, %v644_v52 }
 0x1c5   : > { %v736_v56 = vadd.f32 %v731_v53, %v690_v54 }
 0x1c7   : > { %v757_v57 = vadd.f32 %v753_v55, %v736_v56 }
 0x1c9   : > { %761 = vst.msk [vmem:[%s170_s22 + $0x10] sm:$0xff] %vm758_vm14, %v757_v57 }
 0x1ca PF: > { %s13_s12 = sadd.s32 1, %s926_s12  }
 0x1cb   : > { %p10_p4 = scmp.ge.s32.totalorder %s13_s12, 4  }
 0x1cd   :  { %12 = sbr.rel (!%p10_p4) target bundleno = 1 (0x1), region = 70 }

// kernel: _lambda_.21
= control target key start
LH: loop header
LB: loop body
LE: loop exit
PB: predicated region body
PF: predicated region fallthrough
CT: control target
= control target key end

     0   :  { %s3472_s12 = smov 0   ;;  %s4831_s0 = inlined_call_operand.vmem [shape: f32[9,24,24], index: 0, kind: input, shape index: {}]   ;;  %s4832_s1 = inlined_call_operand.vmem [shape: f32[24,1], index: 1, kind: input, shape index: {}]   ;;  %s4833_s2 = inlined_call_operand.vmem [shape: f32[2,24,16,16], index: 2, kind: input, shape index: {}]   ;;  %s4834_s3 = inlined_call_operand.vmem [shape: f32[2,24,288], index: 3, kind: output, shape index: {}]  }
   0x1 LB: > { %s3108_s13 = sadd.s32 4294967295, %s3427_s12   ;;  %p3112_p0 = scmp.ge.s32.totalorder %s3427_s12, 1  ;;  %s3427_s12 = sphi %s3472_s12, %s13_s12  }
   0x2   : > { %p137_p1 = scmp.lt.s32.totalorder %s3427_s12, 3 }
   0x4   : > { %p138_p2 = pnand %p3112_p0, %p137_p1 }
   0x5   : > { %p161_p3 = scmp.lt.s32.totalorder (!%p138_p2), %s3108_s13, 1  ;;  %s3429_s18 = smov (!%p138_p2), 127  }
   0x6   : > { %141 = sbr.rel (%p138_p2) target bundleno = 742 (0x2e6), region = 32  ;;  %s3430_s19 = smov (!%p138_p2), 19  }
   0x7   : > { %s3431_s20 = smov (!%p138_p2), 125   ;;  %s3432_s21 = smov (!%p138_p2), 17  }
   0x8   : > { %s3433_s22 = smov (!%p138_p2), 35   ;;  %s3434_s23 = smov (!%p138_p2), 15  }
   0x9   : > { %s3435_s24 = smov (!%p138_p2), 33   ;;  %s3436_s25 = smov (!%p138_p2), 37  }
   0xa   : > { %s3437_s26 = smov (!%p138_p2), 53   ;;  %s3438_s27 = smov (!%p138_p2), 73  }
   0xb   : > { %s4838_s13 = smov (!%p161_p3, %s3108_s13), 1  ;;  %vm230_vm0 = vcmask 1041409   ;;  %vm233_vm1 = vcmask 1042434   ;;  %vm236_vm2 = vcmask 1043459   ;;  %vm239_vm3 = vcmask 1044484   ;;  %s3439_s28 = smov 55  }
   0xc   : > { %s3225_s14 = smul.u32 384, %s4838_s13  ;;  %vm242_vm4 = vcmask 1045509   ;;  %vm245_vm5 = vcmask 1046534   ;;  %vm248_vm6 = vcmask 1047559   ;;  %s3440_s29 = smov 71   ;;  %vm907_vm7 = vcmask 121856  }
   0xd   : > { %s3441_s30 = smov 91   ;;  %s3442_s4 = smov 89   ;;  %vm4835_vm8 = vcmask 285848   ;;  %vm390_vm9 = vcmask 433448   ;;  %vm173_vm10 = vcmask 580608   ;;  %vm1632_vm11 = vcmask 105472  }
   0xe   : > { %s3486_s17 = scalar_lea.vmem %s4833_s2, %s3225_s14  ;;  %s3443_s5 = smov 109   ;;  %vm1012_vm12 = vcmask 269448   ;;  %vm1115_vm13 = vcmask 417048   ;;  %vm493_vm14 = vcmask 581048   ;;  %vm1737_vm15 = vcmask 253048  }
   0xf   : > { %v822_v0 = vld [vmem:[%s3486_s17 + $0x106] sm:$0x1]  ;;  %v823_v1 = vld [vmem:[%s3486_s17 + $0x116] sm:$0x1]  ;;  %v197_v13 = vld [vmem:[%s3486_s17 + $0x100] sm:$0x1] }
  0x10   : > { %v824_v2 = vld [vmem:[%s3486_s17 + $0x126] sm:$0x1]  ;;  %v825_v3 = vld [vmem:[%s3486_s17 + $0x136] sm:$0x1]  ;;  %v882_v8 = vrot.slane %v823_v1, 7  ;;  %s3444_s6 = smov 107  }
  0x11   : > { %v826_v4 = vld [vmem:[%s3486_s17 + $0x146] sm:$0x1]  ;;  %v827_v5 = vld [vmem:[%s3486_s17 + $0x156] sm:$0x1]  ;;  %v884_v9 = vrot.slane %v824_v2, 6  ;;  %v886_v10 = vrot.slane %v825_v3, 5 }
  0x12   : > { %v828_v6 = vld [vmem:[%s3486_s17 + $0x166] sm:$0x1]  ;;  %v829_v7 = vld [vmem:[%s3486_s17 + $0x176] sm:$0x1]  ;;  %v888_v11 = vrot.slane %v826_v4, 4  ;;  %v890_v12 = vrot.slane %v827_v5, 3  ;;  %v883_v14 = vsel %vm230_vm0, %v882_v8, %v822_v0 }
  0x13   : > { %v892_v15 = vrot.slane %v828_v6, 2  ;;  %v894_v16 = vrot.slane %v829_v7, 1  ;;  %v198_v17 = vld [vmem:[%s3486_s17 + $0x110] sm:$0x1]  ;;  %v199_v18 = vld [vmem:[%s3486_s17 + $0x120] sm:$0x1]  ;;  %v885_v19 = vsel %vm233_vm1, %v884_v9, %v883_v14 }
  0x14   : > { %v200_v20 = vld [vmem:[%s3486_s17 + $0x130] sm:$0x1]  ;;  %v201_v21 = vld [vmem:[%s3486_s17 + $0x140] sm:$0x1]  ;;  %v887_v23 = vsel %vm236_vm2, %v886_v10, %v885_v19  ;;  %v264_v26 = vrot.slane %v198_v17, 7  ;;  %v266_v27 = vrot.slane %v199_v18, 6 }
  0x15   : > { %v202_v22 = vld [vmem:[%s3486_s17 + $0x150] sm:$0x1]  ;;  %v203_v24 = vld [vmem:[%s3486_s17 + $0x160] sm:$0x1]  ;;  %v889_v28 = vsel %vm239_vm3, %v888_v11, %v887_v23  ;;  %v268_v29 = vrot.slane %v200_v20, 5  ;;  %v270_v30 = vrot.slane %v201_v21, 4 }
  0x16   : > { %v204_v25 = vld [vmem:[%s3486_s17 + $0x170] sm:$0x1]  ;;  %v272_v31 = vrot.slane %v202_v22, 3  ;;  %v1547_v32 = vld [vmem:[%s3486_s17 + $0x10d] sm:$0x1]  ;;  %v891_v33 = vsel %vm242_vm4, %v890_v12, %v889_v28  ;;  %v265_v34 = vsel %vm230_vm0, %v264_v26, %v197_v13  ;;  %v274_v35 = vrot.slane %v203_v24, 2 }
  0x17   : > { %v276_v36 = vrot.slane %v204_v25, 1  ;;  %v1548_v37 = vld [vmem:[%s3486_s17 + $0x11d] sm:$0x1]  ;;  %v1549_v38 = vld [vmem:[%s3486_s17 + $0x12d] sm:$0x1]  ;;  %v893_v39 = vsel %vm245_vm5, %v892_v15, %v891_v33  ;;  %v267_v40 = vsel %vm233_vm1, %v266_v27, %v265_v34  ;;  %s3446_s7 = smov 126  }
  0x18   : > { %v1550_v41 = vld [vmem:[%s3486_s17 + $0x13d] sm:$0x1]  ;;  %v1551_v42 = vld [vmem:[%s3486_s17 + $0x14d] sm:$0x1]  ;;  %v895_v44 = vsel %vm248_vm6, %v894_v16, %v893_v39  ;;  %v269_v45 = vsel %vm236_vm2, %v268_v29, %v267_v40  ;;  %v1607_v48 = vrot.slane %v1548_v37, 7  ;;  %v1609_v49 = vrot.slane %v1549_v38, 6 }
  0x19   : > { %v1552_v43 = vld [vmem:[%s3486_s17 + $0x15d] sm:$0x1]  ;;  %v1553_v46 = vld [vmem:[%s3486_s17 + $0x16d] sm:$0x1]  ;;  %900 = vrot.lane.b32.xlu0 %v895_v44, %s3429_s18  ;;  %v271_v50 = vsel %vm239_vm3, %v270_v30, %v269_v45  ;;  %v1611_v51 = vrot.slane %v1550_v41, 5  ;;  %v1613_v52 = vrot.slane %v1551_v42, 4 }
  0x1a   : > { %v1554_v47 = vld [vmem:[%s3486_s17 + $0x17d] sm:$0x1]  ;;  %v1615_v53 = vrot.slane %v1552_v43, 3  ;;  %v929_v54 = vld [vmem:[%s3486_s17 + $0x107] sm:$0x1]  ;;  %v273_v55 = vsel %vm242_vm4, %v272_v31, %v271_v50  ;;  %v1608_v56 = vsel %vm230_vm0, %v1607_v48, %v1547_v32  ;;  %v1617_v57 = vrot.slane %v1553_v46, 2 }
  0x1b   : > { %v1619_v58 = vrot.slane %v1554_v47, 1  ;;  %v930_v59 = vld [vmem:[%s3486_s17 + $0x117] sm:$0x1]  ;;  %v931_v60 = vld [vmem:[%s3486_s17 + $0x127] sm:$0x1]  ;;  %v275_v61 = vsel %vm245_vm5, %v274_v35, %v273_v55  ;;  %v1610_v62 = vsel %vm233_vm1, %v1609_v49, %v1608_v56  ;;  %s3447_s8 = smov 110  }
  0x1c   : > { %v932_v63 = vld [vmem:[%s3486_s17 + $0x137] sm:$0x1]  ;;  %v933_v0 = vld [vmem:[%s3486_s17 + $0x147] sm:$0x1]  ;;  %v277_v2 = vsel %vm248_vm6, %v276_v36, %v275_v61  ;;  %v1612_v3 = vsel %vm236_vm2, %v1611_v51, %v1610_v62  ;;  %v989_v6 = vrot.slane %v930_v59, 7  ;;  %v991_v7 = vrot.slane %v931_v60, 6 }
  0x1d   : > { %v934_v1 = vld [vmem:[%s3486_s17 + $0x157] sm:$0x1]  ;;  %v935_v4 = vld [vmem:[%s3486_s17 + $0x167] sm:$0x1]  ;;  %282 = vrot.lane.b32.xlu1 %v277_v2, %s3430_s19  ;;  %v1614_v8 = vsel %vm239_vm3, %v1613_v52, %v1612_v3  ;;  %v993_v9 = vrot.slane %v932_v63, 5  ;;  %v995_v10 = vrot.slane %v933_v0, 4 }
  0x1e   : > { %v936_v5 = vld [vmem:[%s3486_s17 + $0x177] sm:$0x1]  ;;  %v997_v11 = vrot.slane %v934_v1, 3  ;;  %v814_v12 = vld [vmem:[%s3486_s17 + $0x86] sm:$0x1]  ;;  %v1616_v13 = vsel %vm242_vm4, %v1615_v53, %v1614_v8  ;;  %v990_v14 = vsel %vm230_vm0, %v989_v6, %v929_v54  ;;  %v999_v15 = vrot.slane %v935_v4, 2 }
  0x1f   : > { %v1001_v16 = vrot.slane %v936_v5, 1  ;;  %v815_v17 = vld [vmem:[%s3486_s17 + $0x96] sm:$0x1]  ;;  %v816_v18 = vld [vmem:[%s3486_s17 + $0xa6] sm:$0x1]  ;;  %v1618_v19 = vsel %vm245_vm5, %v1617_v57, %v1616_v13  ;;  %v992_v20 = vsel %vm233_vm1, %v991_v7, %v990_v14  ;;  %s3448_s9 = smov 108  }
  0x20   : > { %v817_v21 = vld [vmem:[%s3486_s17 + $0xb6] sm:$0x1]  ;;  %v818_v22 = vld [vmem:[%s3486_s17 + $0xc6] sm:$0x1]  ;;  %v1620_v24 = vsel %vm248_vm6, %v1619_v58, %v1618_v19  ;;  %v994_v25 = vsel %vm236_vm2, %v993_v9, %v992_v20  ;;  %v868_v28 = vrot.slane %v815_v17, 7  ;;  %v870_v29 = vrot.slane %v816_v18, 6 }
  0x21   : > { %v819_v23 = vld [vmem:[%s3486_s17 + $0xd6] sm:$0x1]  ;;  %v820_v26 = vld [vmem:[%s3486_s17 + $0xe6] sm:$0x1]  ;;  %1625 = vrot.lane.b32.xlu0 %v1620_v24, %s3431_s20  ;;  %v996_v30 = vsel %vm239_vm3, %v995_v10, %v994_v25  ;;  %v872_v31 = vrot.slane %v817_v21, 5  ;;  %v874_v32 = vrot.slane %v818_v22, 4 }
  0x22   : > { %v821_v27 = vld [vmem:[%s3486_s17 + $0xf6] sm:$0x1]  ;;  %v876_v33 = vrot.slane %v819_v23, 3  ;;  %v1032_v34 = vld [vmem:[%s3486_s17 + $0x108] sm:$0x1]  ;;  %v998_v35 = vsel %vm242_vm4, %v997_v11, %v996_v30  ;;  %v869_v36 = vsel %vm230_vm0, %v868_v28, %v814_v12  ;;  %v878_v37 = vrot.slane %v820_v26, 2 }
  0x23   : > { %v880_v38 = vrot.slane %v821_v27, 1  ;;  %v1033_v39 = vld [vmem:[%s3486_s17 + $0x118] sm:$0x1]  ;;  %v1034_v40 = vld [vmem:[%s3486_s17 + $0x128] sm:$0x1]  ;;  %v1000_v41 = vsel %vm245_vm5, %v999_v15, %v998_v35  ;;  %v871_v42 = vsel %vm233_vm1, %v870_v29, %v869_v36  ;;  %s3449_s10 = smov 92  }
  0x24   : > { %v1035_v43 = vld [vmem:[%s3486_s17 + $0x138] sm:$0x1]  ;;  %v1036_v44 = vld [vmem:[%s3486_s17 + $0x148] sm:$0x1]  ;;  %v1002_v46 = vsel %vm248_vm6, %v1001_v16, %v1000_v41  ;;  %v873_v47 = vsel %vm236_vm2, %v872_v31, %v871_v42  ;;  %v1092_v50 = vrot.slane %v1033_v39, 7  ;;  %v1094_v51 = vrot.slane %v1034_v40, 6 }
  0x25   : > { %v1037_v45 = vld [vmem:[%s3486_s17 + $0x158] sm:$0x1]  ;;  %v1038_v48 = vld [vmem:[%s3486_s17 + $0x168] sm:$0x1]  ;;  %1007 = vrot.lane.b32.xlu1 %v1002_v46, %s3432_s21  ;;  %v875_v52 = vsel %vm239_vm3, %v874_v32, %v873_v47  ;;  %v1096_v53 = vrot.slane %v1035_v43, 5  ;;  %v1098_v54 = vrot.slane %v1036_v44, 4 }
  0x26   : > { %v1039_v49 = vld [vmem:[%s3486_s17 + $0x178] sm:$0x1]  ;;  %v1100_v55 = vrot.slane %v1037_v45, 3  ;;  %v1654_v56 = vld [vmem:[%s3486_s17 + $0x10e] sm:$0x1]  ;;  %v877_v57 = vsel %vm242_vm4, %v876_v33, %v875_v52  ;;  %v1093_v58 = vsel %vm230_vm0, %v1092_v50, %v1032_v34  ;;  %v1102_v59 = vrot.slane %v1038_v48, 2 }
  0x27   : > { %v1104_v60 = vrot.slane %v1039_v49, 1  ;;  %v1655_v61 = vld [vmem:[%s3486_s17 + $0x11e] sm:$0x1]  ;;  %v1656_v62 = vld [vmem:[%s3486_s17 + $0x12e] sm:$0x1]  ;;  %v879_v63 = vsel %vm245_vm5, %v878_v37, %v877_v57  ;;  %v1095_v0 = vsel %vm233_vm1, %v1094_v51, %v1093_v58  ;;  %s3450_s11 = smov 90  }
  0x28   : > { %v1657_v1 = vld [vmem:[%s3486_s17 + $0x13e] sm:$0x1]  ;;  %v1658_v2 = vld [vmem:[%s3486_s17 + $0x14e] sm:$0x1]  ;;  %v881_v4 = vsel %vm248_vm6, %v880_v38, %v879_v63  ;;  %v1097_v5 = vsel %vm236_vm2, %v1096_v53, %v1095_v0  ;;  %v1714_v8 = vrot.slane %v1655_v61, 7  ;;  %v1716_v9 = vrot.slane %v1656_v62, 6 }
  0x29   : > { %v1659_v3 = vld [vmem:[%s3486_s17 + $0x15e] sm:$0x1]  ;;  %v1660_v6 = vld [vmem:[%s3486_s17 + $0x16e] sm:$0x1]  ;;  %898 = vrot.lane.b32.xlu0 %v881_v4, %s3429_s18  ;;  %v1099_v10 = vsel %vm239_vm3, %v1098_v54, %v1097_v5  ;;  %v1718_v11 = vrot.slane %v1657_v1, 5  ;;  %v1720_v12 = vrot.slane %v1658_v2, 4 }
  0x2a   : > { %v1661_v7 = vld [vmem:[%s3486_s17 + $0x17e] sm:$0x1]  ;;  %v1722_v13 = vrot.slane %v1659_v3, 3  ;;  %v1757_v14 = vld [vmem:[%s3486_s17 + $0x10f] sm:$0x1]  ;;  %v1101_v15 = vsel %vm242_vm4, %v1100_v55, %v1099_v10  ;;  %v1715_v16 = vsel %vm230_vm0, %v1714_v8, %v1654_v56  ;;  %v1724_v17 = vrot.slane %v1660_v6, 2 }
  0x2b   : > { %v1726_v18 = vrot.slane %v1661_v7, 1  ;;  %v1758_v19 = vld [vmem:[%s3486_s17 + $0x11f] sm:$0x1]  ;;  %v1759_v20 = vld [vmem:[%s3486_s17 + $0x12f] sm:$0x1]  ;;  %v1103_v21 = vsel %vm245_vm5, %v1102_v59, %v1101_v15  ;;  %v1717_v22 = vsel %vm233_vm1, %v1716_v9, %v1715_v16 }
  0x2c   : > { %v1760_v23 = vld [vmem:[%s3486_s17 + $0x13f] sm:$0x1]  ;;  %v1761_v24 = vld [vmem:[%s3486_s17 + $0x14f] sm:$0x1]  ;;  %v1105_v26 = vsel %vm248_vm6, %v1104_v60, %v1103_v21  ;;  %v1719_v27 = vsel %vm236_vm2, %v1718_v11, %v1717_v22  ;;  %v1817_v30 = vrot.slane %v1758_v19, 7  ;;  %v1819_v31 = vrot.slane %v1759_v20, 6 }
  0x2d   : > { %v1762_v25 = vld [vmem:[%s3486_s17 + $0x15f] sm:$0x1]  ;;  %v1763_v28 = vld [vmem:[%s3486_s17 + $0x16f] sm:$0x1]  ;;  %1110 = vrot.lane.b32.xlu1 %v1105_v26, %s3433_s22  ;;  %v1721_v32 = vsel %vm239_vm3, %v1720_v12, %v1719_v27  ;;  %v1821_v33 = vrot.slane %v1760_v23, 5  ;;  %v1823_v34 = vrot.slane %v1761_v24, 4 }
  0x2e   : > { %v1764_v29 = vld [vmem:[%s3486_s17 + $0x17f] sm:$0x1]  ;;  %v1825_v35 = vrot.slane %v1762_v25, 3  ;;  %v189_v36 = vld [vmem:[%s3486_s17 + $0x80] sm:$0x1]  ;;  %v1723_v37 = vsel %vm242_vm4, %v1722_v13, %v1721_v32  ;;  %v1818_v38 = vsel %vm230_vm0, %v1817_v30, %v1757_v14  ;;  %v1827_v39 = vrot.slane %v1763_v28, 2 }
  0x2f   : > { %v1829_v40 = vrot.slane %v1764_v29, 1  ;;  %v190_v41 = vld [vmem:[%s3486_s17 + $0x90] sm:$0x1]  ;;  %v191_v42 = vld [vmem:[%s3486_s17 + $0xa0] sm:$0x1]  ;;  %v1725_v43 = vsel %vm245_vm5, %v1724_v17, %v1723_v37  ;;  %v1820_v44 = vsel %vm233_vm1, %v1819_v31, %v1818_v38 }
  0x30   : > { %v192_v45 = vld [vmem:[%s3486_s17 + $0xb0] sm:$0x1]  ;;  %v193_v46 = vld [vmem:[%s3486_s17 + $0xc0] sm:$0x1]  ;;  %v1727_v48 = vsel %vm248_vm6, %v1726_v18, %v1725_v43  ;;  %v1822_v49 = vsel %vm236_vm2, %v1821_v33, %v1820_v44  ;;  %v250_v52 = vrot.slane %v190_v41, 7  ;;  %v252_v53 = vrot.slane %v191_v42, 6 }
  0x31   : > { %v194_v47 = vld [vmem:[%s3486_s17 + $0xd0] sm:$0x1]  ;;  %v195_v50 = vld [vmem:[%s3486_s17 + $0xe0] sm:$0x1]  ;;  %1732 = vrot.lane.b32.xlu2 %v1727_v48, %s3434_s23  ;;  %v1824_v54 = vsel %vm239_vm3, %v1823_v34, %v1822_v49  ;;  %v254_v55 = vrot.slane %v192_v45, 5  ;;  %v256_v56 = vrot.slane %v193_v46, 4 }
  0x32   : > { %v196_v51 = vld [vmem:[%s3486_s17 + $0xf0] sm:$0x1]  ;;  %v258_v57 = vrot.slane %v194_v47, 3  ;;  %v307_v58 = vld [vmem:[%s3486_s17 + $0x101] sm:$0x1]  ;;  %v1826_v59 = vsel %vm242_vm4, %v1825_v35, %v1824_v54  ;;  %v251_v60 = vsel %vm230_vm0, %v250_v52, %v189_v36  ;;  %v260_v61 = vrot.slane %v195_v50, 2 }
  0x33   : > { %v262_v62 = vrot.slane %v196_v51, 1  ;;  %v308_v63 = vld [vmem:[%s3486_s17 + $0x111] sm:$0x1]  ;;  %v309_v0 = vld [vmem:[%s3486_s17 + $0x121] sm:$0x1]  ;;  %v1828_v1 = vsel %vm245_vm5, %v1827_v39, %v1826_v59  ;;  %v253_v2 = vsel %vm233_vm1, %v252_v53, %v251_v60 }
  0x34   : > { %v310_v3 = vld [vmem:[%s3486_s17 + $0x131] sm:$0x1]  ;;  %v311_v4 = vld [vmem:[%s3486_s17 + $0x141] sm:$0x1]  ;;  %v1830_v6 = vsel %vm248_vm6, %v1829_v40, %v1828_v1  ;;  %v255_v7 = vsel %vm236_vm2, %v254_v55, %v253_v2  ;;  %v367_v10 = vrot.slane %v308_v63, 7  ;;  %v369_v11 = vrot.slane %v309_v0, 6 }
  0x35   : > { %v312_v5 = vld [vmem:[%s3486_s17 + $0x151] sm:$0x1]  ;;  %v313_v8 = vld [vmem:[%s3486_s17 + $0x161] sm:$0x1]  ;;  %1835 = vrot.lane.b32.xlu0 %v1830_v6, %s3435_s24  ;;  %v257_v12 = vsel %vm239_vm3, %v256_v56, %v255_v7  ;;  %v371_v13 = vrot.slane %v310_v3, 5  ;;  %v373_v14 = vrot.slane %v311_v4, 4 }
  0x36   : > { %v314_v9 = vld [vmem:[%s3486_s17 + $0x171] sm:$0x1]  ;;  %v375_v15 = vrot.slane %v312_v5, 3  ;;  %v921_v16 = vld [vmem:[%s3486_s17 + $0x87] sm:$0x1]  ;;  %v259_v17 = vsel %vm242_vm4, %v258_v57, %v257_v12  ;;  %v368_v18 = vsel %vm230_vm0, %v367_v10, %v307_v58  ;;  %v377_v19 = vrot.slane %v313_v8, 2 }
  0x37   : > { %v379_v20 = vrot.slane %v314_v9, 1  ;;  %v922_v21 = vld [vmem:[%s3486_s17 + $0x97] sm:$0x1]  ;;  %v923_v22 = vld [vmem:[%s3486_s17 + $0xa7] sm:$0x1]  ;;  %v261_v23 = vsel %vm245_vm5, %v260_v61, %v259_v17  ;;  %v370_v24 = vsel %vm233_vm1, %v369_v11, %v368_v18 }
  0x38   : > { %v924_v25 = vld [vmem:[%s3486_s17 + $0xb7] sm:$0x1]  ;;  %v925_v26 = vld [vmem:[%s3486_s17 + $0xc7] sm:$0x1]  ;;  %v263_v28 = vsel %vm248_vm6, %v262_v62, %v261_v23  ;;  %v372_v29 = vsel %vm236_vm2, %v371_v13, %v370_v24  ;;  %v975_v32 = vrot.slane %v922_v21, 7  ;;  %v977_v33 = vrot.slane %v923_v22, 6 }
  0x39   : > { %v926_v27 = vld [vmem:[%s3486_s17 + $0xd7] sm:$0x1]  ;;  %v927_v30 = vld [vmem:[%s3486_s17 + $0xe7] sm:$0x1]  ;;  %280 = vrot.lane.b32.xlu1 %v263_v28, %s3430_s19  ;;  %v374_v34 = vsel %vm239_vm3, %v373_v14, %v372_v29  ;;  %v979_v35 = vrot.slane %v924_v25, 5  ;;  %v981_v36 = vrot.slane %v925_v26, 4 }
  0x3a   : > { %v928_v31 = vld [vmem:[%s3486_s17 + $0xf7] sm:$0x1]  ;;  %v983_v37 = vrot.slane %v926_v27, 3  ;;  %v1135_v38 = vld [vmem:[%s3486_s17 + $0x109] sm:$0x1]  ;;  %v376_v39 = vsel %vm242_vm4, %v375_v15, %v374_v34  ;;  %v976_v40 = vsel %vm230_vm0, %v975_v32, %v921_v16  ;;  %v985_v41 = vrot.slane %v927_v30, 2 }
  0x3b   : > { %v987_v42 = vrot.slane %v928_v31, 1  ;;  %v1136_v43 = vld [vmem:[%s3486_s17 + $0x119] sm:$0x1]  ;;  %v1137_v44 = vld [vmem:[%s3486_s17 + $0x129] sm:$0x1]  ;;  %v378_v45 = vsel %vm245_vm5, %v377_v19, %v376_v39  ;;  %v978_v46 = vsel %vm233_vm1, %v977_v33, %v976_v40 }
  0x3c   : > { %v1138_v47 = vld [vmem:[%s3486_s17 + $0x139] sm:$0x1]  ;;  %v1139_v48 = vld [vmem:[%s3486_s17 + $0x149] sm:$0x1]  ;;  %v380_v50 = vsel %vm248_vm6, %v379_v20, %v378_v45  ;;  %v980_v51 = vsel %vm236_vm2, %v979_v35, %v978_v46  ;;  %v1195_v54 = vrot.slane %v1136_v43, 7  ;;  %v1197_v55 = vrot.slane %v1137_v44, 6 }
  0x3d   : > { %v1140_v49 = vld [vmem:[%s3486_s17 + $0x159] sm:$0x1]  ;;  %v1141_v52 = vld [vmem:[%s3486_s17 + $0x169] sm:$0x1]  ;;  %385 = vrot.lane.b32.xlu2 %v380_v50, %s3436_s25  ;;  %v982_v56 = vsel %vm239_vm3, %v981_v36, %v980_v51  ;;  %v1199_v57 = vrot.slane %v1138_v47, 5  ;;  %v1201_v58 = vrot.slane %v1139_v48, 4 }
  0x3e   : > { %v1142_v53 = vld [vmem:[%s3486_s17 + $0x179] sm:$0x1]  ;;  %v1203_v59 = vrot.slane %v1140_v49, 3  ;;  %v1539_v60 = vld [vmem:[%s3486_s17 + $0x8d] sm:$0x1]  ;;  %v984_v61 = vsel %vm242_vm4, %v983_v37, %v982_v56  ;;  %v1196_v62 = vsel %vm230_vm0, %v1195_v54, %v1135_v38  ;;  %v1205_v63 = vrot.slane %v1141_v52, 2 }
  0x3f   : > { %v1207_v0 = vrot.slane %v1142_v53, 1  ;;  %v1540_v1 = vld [vmem:[%s3486_s17 + $0x9d] sm:$0x1]  ;;  %v1541_v2 = vld [vmem:[%s3486_s17 + $0xad] sm:$0x1]  ;;  %v986_v3 = vsel %vm245_vm5, %v985_v41, %v984_v61  ;;  %v1198_v4 = vsel %vm233_vm1, %v1197_v55, %v1196_v62 }
  0x40   : > { %v1542_v5 = vld [vmem:[%s3486_s17 + $0xbd] sm:$0x1]  ;;  %v1543_v6 = vld [vmem:[%s3486_s17 + $0xcd] sm:$0x1]  ;;  %v988_v8 = vsel %vm248_vm6, %v987_v42, %v986_v3  ;;  %v1200_v9 = vsel %vm236_vm2, %v1199_v57, %v1198_v4  ;;  %v1593_v12 = vrot.slane %v1540_v1, 7  ;;  %v1595_v13 = vrot.slane %v1541_v2, 6 }
  0x41   : > { %v1544_v7 = vld [vmem:[%s3486_s17 + $0xdd] sm:$0x1]  ;;  %v1545_v10 = vld [vmem:[%s3486_s17 + $0xed] sm:$0x1]  ;;  %1005 = vrot.lane.b32.xlu0 %v988_v8, %s3432_s21  ;;  %v1202_v14 = vsel %vm239_vm3, %v1201_v58, %v1200_v9  ;;  %v1597_v15 = vrot.slane %v1542_v5, 5  ;;  %v1599_v16 = vrot.slane %v1543_v6, 4 }
  0x42   : > { %v1546_v11 = vld [vmem:[%s3486_s17 + $0xfd] sm:$0x1]  ;;  %v1601_v17 = vrot.slane %v1544_v7, 3  ;;  %v299_v18 = vld [vmem:[%s3486_s17 + $0x81] sm:$0x1]  ;;  %v1204_v19 = vsel %vm242_vm4, %v1203_v59, %v1202_v14  ;;  %v1594_v20 = vsel %vm230_vm0, %v1593_v12, %v1539_v60  ;;  %v1603_v21 = vrot.slane %v1545_v10, 2 }
  0x43   : > { %v1605_v22 = vrot.slane %v1546_v11, 1  ;;  %v300_v23 = vld [vmem:[%s3486_s17 + $0x91] sm:$0x1]  ;;  %v301_v24 = vld [vmem:[%s3486_s17 + $0xa1] sm:$0x1]  ;;  %v1206_v25 = vsel %vm245_vm5, %v1205_v63, %v1204_v19  ;;  %v1596_v26 = vsel %vm233_vm1, %v1595_v13, %v1594_v20 }
  0x44   : > { %v302_v27 = vld [vmem:[%s3486_s17 + $0xb1] sm:$0x1]  ;;  %v303_v28 = vld [vmem:[%s3486_s17 + $0xc1] sm:$0x1]  ;;  %v1208_v30 = vsel %vm248_vm6, %v1207_v0, %v1206_v25  ;;  %v1598_v31 = vsel %vm236_vm2, %v1597_v15, %v1596_v26  ;;  %v353_v34 = vrot.slane %v300_v23, 7  ;;  %v355_v35 = vrot.slane %v301_v24, 6 }
  0x45   : > { %v304_v29 = vld [vmem:[%s3486_s17 + $0xd1] sm:$0x1]  ;;  %v305_v32 = vld [vmem:[%s3486_s17 + $0xe1] sm:$0x1]  ;;  %1213 = vrot.lane.b32.xlu1 %v1208_v30, %s3437_s26  ;;  %v1600_v36 = vsel %vm239_vm3, %v1599_v16, %v1598_v31  ;;  %v357_v37 = vrot.slane %v302_v27, 5  ;;  %v359_v38 = vrot.slane %v303_v28, 4 }
  0x46   : > { %v306_v33 = vld [vmem:[%s3486_s17 + $0xf1] sm:$0x1]  ;;  %v361_v39 = vrot.slane %v304_v29, 3  ;;  %v513_v40 = vld [vmem:[%s3486_s17 + $0x103] sm:$0x1]  ;;  %v1602_v41 = vsel %vm242_vm4, %v1601_v17, %v1600_v36  ;;  %v354_v42 = vsel %vm230_vm0, %v353_v34, %v299_v18  ;;  %v363_v43 = vrot.slane %v305_v32, 2 }
  0x47   : > { %v365_v44 = vrot.slane %v306_v33, 1  ;;  %v514_v45 = vld [vmem:[%s3486_s17 + $0x113] sm:$0x1]  ;;  %v515_v46 = vld [vmem:[%s3486_s17 + $0x123] sm:$0x1]  ;;  %v1604_v47 = vsel %vm245_vm5, %v1603_v21, %v1602_v41  ;;  %v356_v48 = vsel %vm233_vm1, %v355_v35, %v354_v42 }
  0x48   : > { %v516_v49 = vld [vmem:[%s3486_s17 + $0x133] sm:$0x1]  ;;  %v517_v50 = vld [vmem:[%s3486_s17 + $0x143] sm:$0x1]  ;;  %v1606_v52 = vsel %vm248_vm6, %v1605_v22, %v1604_v47  ;;  %v358_v53 = vsel %vm236_vm2, %v357_v37, %v356_v48  ;;  %v573_v56 = vrot.slane %v514_v45, 7  ;;  %v575_v57 = vrot.slane %v515_v46, 6 }
  0x49   : > { %v518_v51 = vld [vmem:[%s3486_s17 + $0x153] sm:$0x1]  ;;  %v519_v54 = vld [vmem:[%s3486_s17 + $0x163] sm:$0x1]  ;;  %1623 = vrot.lane.b32.xlu2 %v1606_v52, %s3431_s20  ;;  %v360_v58 = vsel %vm239_vm3, %v359_v38, %v358_v53  ;;  %v577_v59 = vrot.slane %v516_v49, 5  ;;  %v579_v60 = vrot.slane %v517_v50, 4 }
  0x4a   : > { %v520_v55 = vld [vmem:[%s3486_s17 + $0x173] sm:$0x1]  ;;  %v581_v61 = vrot.slane %v518_v51, 3  ;;  %v410_v62 = vld [vmem:[%s3486_s17 + $0x102] sm:$0x1]  ;;  %v362_v63 = vsel %vm242_vm4, %v361_v39, %v360_v58  ;;  %v574_v0 = vsel %vm230_vm0, %v573_v56, %v513_v40  ;;  %v583_v1 = vrot.slane %v519_v54, 2 }
  0x4b   : > { %v585_v2 = vrot.slane %v520_v55, 1  ;;  %v411_v3 = vld [vmem:[%s3486_s17 + $0x112] sm:$0x1]  ;;  %v412_v4 = vld [vmem:[%s3486_s17 + $0x122] sm:$0x1]  ;;  %v364_v5 = vsel %vm245_vm5, %v363_v43, %v362_v63  ;;  %v576_v6 = vsel %vm233_vm1, %v575_v57, %v574_v0 }
  0x4c   : > { %v413_v7 = vld [vmem:[%s3486_s17 + $0x132] sm:$0x1]  ;;  %v414_v8 = vld [vmem:[%s3486_s17 + $0x142] sm:$0x1]  ;;  %v366_v10 = vsel %vm248_vm6, %v365_v44, %v364_v5  ;;  %v578_v11 = vsel %vm236_vm2, %v577_v59, %v576_v6  ;;  %v470_v14 = vrot.slane %v411_v3, 7  ;;  %v472_v15 = vrot.slane %v412_v4, 6 }
  0x4d   : > { %v415_v9 = vld [vmem:[%s3486_s17 + $0x152] sm:$0x1]  ;;  %v416_v12 = vld [vmem:[%s3486_s17 + $0x162] sm:$0x1]  ;;  %383 = vrot.lane.b32.xlu0 %v366_v10, %s3436_s25  ;;  %v580_v16 = vsel %vm239_vm3, %v579_v60, %v578_v11  ;;  %v474_v17 = vrot.slane %v413_v7, 5  ;;  %v476_v18 = vrot.slane %v414_v8, 4 }
  0x4e   : > { %v417_v13 = vld [vmem:[%s3486_s17 + $0x172] sm:$0x1]  ;;  %v478_v19 = vrot.slane %v415_v9, 3  ;;  %v1024_v20 = vld [vmem:[%s3486_s17 + $0x88] sm:$0x1]  ;;  %v582_v21 = vsel %vm242_vm4, %v581_v61, %v580_v16  ;;  %v471_v22 = vsel %vm230_vm0, %v470_v14, %v410_v62  ;;  %v480_v23 = vrot.slane %v416_v12, 2 }
  0x4f   : > { %v482_v24 = vrot.slane %v417_v13, 1  ;;  %v1025_v25 = vld [vmem:[%s3486_s17 + $0x98] sm:$0x1]  ;;  %v1026_v26 = vld [vmem:[%s3486_s17 + $0xa8] sm:$0x1]  ;;  %v584_v27 = vsel %vm245_vm5, %v583_v1, %v582_v21  ;;  %v473_v28 = vsel %vm233_vm1, %v472_v15, %v471_v22 }
  0x50   : > { %v1027_v29 = vld [vmem:[%s3486_s17 + $0xb8] sm:$0x1]  ;;  %v1028_v30 = vld [vmem:[%s3486_s17 + $0xc8] sm:$0x1]  ;;  %v586_v32 = vsel %vm248_vm6, %v585_v2, %v584_v27  ;;  %v475_v33 = vsel %vm236_vm2, %v474_v17, %v473_v28  ;;  %v1078_v36 = vrot.slane %v1025_v25, 7  ;;  %v1080_v37 = vrot.slane %v1026_v26, 6 }
  0x51   : > { %v1029_v31 = vld [vmem:[%s3486_s17 + $0xd8] sm:$0x1]  ;;  %v1030_v34 = vld [vmem:[%s3486_s17 + $0xe8] sm:$0x1]  ;;  %591 = vrot.lane.b32.xlu1 %v586_v32, %s3438_s27  ;;  %v477_v38 = vsel %vm239_vm3, %v476_v18, %v475_v33  ;;  %v1082_v39 = vrot.slane %v1027_v29, 5  ;;  %v1084_v40 = vrot.slane %v1028_v30, 4 }
  0x52   : > { %v1031_v35 = vld [vmem:[%s3486_s17 + $0xf8] sm:$0x1]  ;;  %v1086_v41 = vrot.slane %v1029_v31, 3  ;;  %v1238_v42 = vld [vmem:[%s3486_s17 + $0x10a] sm:$0x1]  ;;  %v479_v43 = vsel %vm242_vm4, %v478_v19, %v477_v38  ;;  %v1079_v44 = vsel %vm230_vm0, %v1078_v36, %v1024_v20  ;;  %v1088_v45 = vrot.slane %v1030_v34, 2 }
  0x53   : > { %v1090_v46 = vrot.slane %v1031_v35, 1  ;;  %v1239_v47 = vld [vmem:[%s3486_s17 + $0x11a] sm:$0x1]  ;;  %v1240_v48 = vld [vmem:[%s3486_s17 + $0x12a] sm:$0x1]  ;;  %v481_v49 = vsel %vm245_vm5, %v480_v23, %v479_v43  ;;  %v1081_v50 = vsel %vm233_vm1, %v1080_v37, %v1079_v44 }
  0x54   : > { %v1241_v51 = vld [vmem:[%s3486_s17 + $0x13a] sm:$0x1]  ;;  %v1242_v52 = vld [vmem:[%s3486_s17 + $0x14a] sm:$0x1]  ;;  %v483_v54 = vsel %vm248_vm6, %v482_v24, %v481_v49  ;;  %v1083_v55 = vsel %vm236_vm2, %v1082_v39, %v1081_v50  ;;  %v1298_v58 = vrot.slane %v1239_v47, 7  ;;  %v1300_v59 = vrot.slane %v1240_v48, 6 }
  0x55   : > { %v1243_v53 = vld [vmem:[%s3486_s17 + $0x15a] sm:$0x1]  ;;  %v1244_v56 = vld [vmem:[%s3486_s17 + $0x16a] sm:$0x1]  ;;  %488 = vrot.lane.b32.xlu2 %v483_v54, %s3439_s28  ;;  %v1085_v60 = vsel %vm239_vm3, %v1084_v40, %v1083_v55  ;;  %v1302_v61 = vrot.slane %v1241_v51, 5  ;;  %v1304_v62 = vrot.slane %v1242_v52, 4 }
  0x56   : > { %v1245_v57 = vld [vmem:[%s3486_s17 + $0x17a] sm:$0x1]  ;;  %v1306_v63 = vrot.slane %v1243_v53, 3  ;;  %v1646_v0 = vld [vmem:[%s3486_s17 + $0x8e] sm:$0x1]  ;;  %v1087_v1 = vsel %vm242_vm4, %v1086_v41, %v1085_v60  ;;  %v1299_v2 = vsel %vm230_vm0, %v1298_v58, %v1238_v42  ;;  %v1308_v3 = vrot.slane %v1244_v56, 2 }
  0x57   : > { %v1310_v4 = vrot.slane %v1245_v57, 1  ;;  %v1647_v5 = vld [vmem:[%s3486_s17 + $0x9e] sm:$0x1]  ;;  %v1648_v6 = vld [vmem:[%s3486_s17 + $0xae] sm:$0x1]  ;;  %v1089_v7 = vsel %vm245_vm5, %v1088_v45, %v1087_v1  ;;  %v1301_v8 = vsel %vm233_vm1, %v1300_v59, %v1299_v2 }
  0x58   : > { %v1649_v9 = vld [vmem:[%s3486_s17 + $0xbe] sm:$0x1]  ;;  %v1650_v10 = vld [vmem:[%s3486_s17 + $0xce] sm:$0x1]  ;;  %v1091_v12 = vsel %vm248_vm6, %v1090_v46, %v1089_v7  ;;  %v1303_v13 = vsel %vm236_vm2, %v1302_v61, %v1301_v8  ;;  %v1700_v16 = vrot.slane %v1647_v5, 7  ;;  %v1702_v17 = vrot.slane %v1648_v6, 6 }
  0x59   : > { %v1651_v11 = vld [vmem:[%s3486_s17 + $0xde] sm:$0x1]  ;;  %v1652_v14 = vld [vmem:[%s3486_s17 + $0xee] sm:$0x1]  ;;  %1108 = vrot.lane.b32.xlu0 %v1091_v12, %s3433_s22  ;;  %v1305_v18 = vsel %vm239_vm3, %v1304_v62, %v1303_v13  ;;  %v1704_v19 = vrot.slane %v1649_v9, 5  ;;  %v1706_v20 = vrot.slane %v1650_v10, 4 }
  0x5a   : > { %v1653_v15 = vld [vmem:[%s3486_s17 + $0xfe] sm:$0x1]  ;;  %v1708_v21 = vrot.slane %v1651_v11, 3  ;;  %v1749_v22 = vld [vmem:[%s3486_s17 + $0x8f] sm:$0x1]  ;;  %v1307_v23 = vsel %vm242_vm4, %v1306_v63, %v1305_v18  ;;  %v1701_v24 = vsel %vm230_vm0, %v1700_v16, %v1646_v0  ;;  %v1710_v25 = vrot.slane %v1652_v14, 2 }
  0x5b   : > { %v1712_v26 = vrot.slane %v1653_v15, 1  ;;  %v1750_v27 = vld [vmem:[%s3486_s17 + $0x9f] sm:$0x1]  ;;  %v1751_v28 = vld [vmem:[%s3486_s17 + $0xaf] sm:$0x1]  ;;  %v1309_v29 = vsel %vm245_vm5, %v1308_v3, %v1307_v23  ;;  %v1703_v30 = vsel %vm233_vm1, %v1702_v17, %v1701_v24 }
  0x5c   : > { %v1752_v31 = vld [vmem:[%s3486_s17 + $0xbf] sm:$0x1]  ;;  %v1753_v32 = vld [vmem:[%s3486_s17 + $0xcf] sm:$0x1]  ;;  %v1311_v34 = vsel %vm248_vm6, %v1310_v4, %v1309_v29  ;;  %v1705_v35 = vsel %vm236_vm2, %v1704_v19, %v1703_v30  ;;  %v1803_v38 = vrot.slane %v1750_v27, 7  ;;  %v1805_v39 = vrot.slane %v1751_v28, 6 }
  0x5d   : > { %v1754_v33 = vld [vmem:[%s3486_s17 + $0xdf] sm:$0x1]  ;;  %v1755_v36 = vld [vmem:[%s3486_s17 + $0xef] sm:$0x1]  ;;  %1316 = vrot.lane.b32.xlu1 %v1311_v34, %s3440_s29  ;;  %v1707_v40 = vsel %vm239_vm3, %v1706_v20, %v1705_v35  ;;  %v1807_v41 = vrot.slane %v1752_v31, 5  ;;  %v1809_v42 = vrot.slane %v1753_v32, 4 }
  0x5e   : > { %v1756_v37 = vld [vmem:[%s3486_s17 + $0xff] sm:$0x1]  ;;  %v1811_v43 = vrot.slane %v1754_v33, 3  ;;  %v181_v44 = vld [vmem:[%s3486_s17] sm:$0x1]  ;;  %v1709_v45 = vsel %vm242_vm4, %v1708_v21, %v1707_v40  ;;  %v1804_v46 = vsel %vm230_vm0, %v1803_v38, %v1749_v22  ;;  %v1813_v47 = vrot.slane %v1755_v36, 2 }
  0x5f   : > { %v1815_v48 = vrot.slane %v1756_v37, 1  ;;  %v182_v49 = vld [vmem:[%s3486_s17 + $0x10] sm:$0x1]  ;;  %v183_v50 = vld [vmem:[%s3486_s17 + $0x20] sm:$0x1]  ;;  %v1711_v51 = vsel %vm245_vm5, %v1710_v25, %v1709_v45  ;;  %v1806_v52 = vsel %vm233_vm1, %v1805_v39, %v1804_v46 }
  0x60   : > { %v184_v53 = vld [vmem:[%s3486_s17 + $0x30] sm:$0x1]  ;;  %v185_v54 = vld [vmem:[%s3486_s17 + $0x40] sm:$0x1]  ;;  %v1713_v56 = vsel %vm248_vm6, %v1712_v26, %v1711_v51  ;;  %v1808_v57 = vsel %vm236_vm2, %v1807_v41, %v1806_v52  ;;  %v229_v60 = vrot.slane %v182_v49, 7  ;;  %v232_v61 = vrot.slane %v183_v50, 6 }
  0x61   : > { %v186_v55 = vld [vmem:[%s3486_s17 + $0x50] sm:$0x1]  ;;  %v187_v58 = vld [vmem:[%s3486_s17 + $0x60] sm:$0x1]  ;;  %1730 = vrot.lane.b32.xlu2 %v1713_v56, %s3434_s23  ;;  %v1810_v62 = vsel %vm239_vm3, %v1809_v42, %v1808_v57  ;;  %v235_v63 = vrot.slane %v184_v53, 5  ;;  %v238_v0 = vrot.slane %v185_v54, 4 }
  0x62   : > { %v188_v59 = vld [vmem:[%s3486_s17 + $0x70] sm:$0x1]  ;;  %v241_v1 = vrot.slane %v186_v55, 3  ;;  %v806_v2 = vld [vmem:[%s3486_s17 + $0x6] sm:$0x1]  ;;  %v1812_v3 = vsel %vm242_vm4, %v1811_v43, %v1810_v62  ;;  %v231_v4 = vsel %vm230_vm0, %v229_v60, %v181_v44  ;;  %v244_v5 = vrot.slane %v187_v58, 2 }
  0x63   : > { %v247_v6 = vrot.slane %v188_v59, 1  ;;  %v807_v7 = vld [vmem:[%s3486_s17 + $0x16] sm:$0x1]  ;;  %v808_v8 = vld [vmem:[%s3486_s17 + $0x26] sm:$0x1]  ;;  %v1814_v9 = vsel %vm245_vm5, %v1813_v47, %v1812_v3  ;;  %v234_v10 = vsel %vm233_vm1, %v232_v61, %v231_v4 }
  0x64   : > { %v809_v11 = vld [vmem:[%s3486_s17 + $0x36] sm:$0x1]  ;;  %v810_v12 = vld [vmem:[%s3486_s17 + $0x46] sm:$0x1]  ;;  %v1816_v14 = vsel %vm248_vm6, %v1815_v48, %v1814_v9  ;;  %v237_v15 = vsel %vm236_vm2, %v235_v63, %v234_v10  ;;  %v854_v18 = vrot.slane %v807_v7, 7  ;;  %v856_v19 = vrot.slane %v808_v8, 6 }
  0x65   : > { %v811_v13 = vld [vmem:[%s3486_s17 + $0x56] sm:$0x1]  ;;  %v812_v16 = vld [vmem:[%s3486_s17 + $0x66] sm:$0x1]  ;;  %1833 = vrot.lane.b32.xlu0 %v1816_v14, %s3435_s24  ;;  %v240_v20 = vsel %vm239_vm3, %v238_v0, %v237_v15  ;;  %v858_v21 = vrot.slane %v809_v11, 5  ;;  %v860_v22 = vrot.slane %v810_v12, 4 }
  0x66   : > { %v813_v17 = vld [vmem:[%s3486_s17 + $0x76] sm:$0x1]  ;;  %v862_v23 = vrot.slane %v811_v13, 3  ;;  %v616_v24 = vld [vmem:[%s3486_s17 + $0x104] sm:$0x1]  ;;  %v243_v25 = vsel %vm242_vm4, %v241_v1, %v240_v20  ;;  %v855_v26 = vsel %vm230_vm0, %v854_v18, %v806_v2  ;;  %v864_v27 = vrot.slane %v812_v16, 2 }
  0x67   : > { %v866_v28 = vrot.slane %v813_v17, 1  ;;  %v617_v29 = vld [vmem:[%s3486_s17 + $0x114] sm:$0x1]  ;;  %v618_v30 = vld [vmem:[%s3486_s17 + $0x124] sm:$0x1]  ;;  %v246_v31 = vsel %vm245_vm5, %v244_v5, %v243_v25  ;;  %v857_v32 = vsel %vm233_vm1, %v856_v19, %v855_v26 }
  0x68   : > { %v619_v33 = vld [vmem:[%s3486_s17 + $0x134] sm:$0x1]  ;;  %v620_v34 = vld [vmem:[%s3486_s17 + $0x144] sm:$0x1]  ;;  %v249_v36 = vsel %vm248_vm6, %v247_v6, %v246_v31  ;;  %v859_v37 = vsel %vm236_vm2, %v858_v21, %v857_v32  ;;  %v676_v40 = vrot.slane %v617_v29, 7  ;;  %v678_v41 = vrot.slane %v618_v30, 6 }
  0x69   : > { %v621_v35 = vld [vmem:[%s3486_s17 + $0x154] sm:$0x1]  ;;  %v622_v38 = vld [vmem:[%s3486_s17 + $0x164] sm:$0x1]  ;;  %278 = vrot.lane.b32.xlu1 %v249_v36, %s3430_s19  ;;  %v861_v42 = vsel %vm239_vm3, %v860_v22, %v859_v37  ;;  %v680_v43 = vrot.slane %v619_v33, 5  ;;  %v682_v44 = vrot.slane %v620_v34, 4 }
  0x6a   : > { %v623_v39 = vld [vmem:[%s3486_s17 + $0x174] sm:$0x1]  ;;  %v684_v45 = vrot.slane %v621_v35, 3  ;;  %v913_v46 = vld [vmem:[%s3486_s17 + $0x7] sm:$0x1]  ;;  %v863_v47 = vsel %vm242_vm4, %v862_v23, %v861_v42  ;;  %v677_v48 = vsel %vm230_vm0, %v676_v40, %v616_v24  ;;  %v686_v49 = vrot.slane %v622_v38, 2 }
  0x6b   : > { %v688_v50 = vrot.slane %v623_v39, 1  ;;  %v914_v51 = vld [vmem:[%s3486_s17 + $0x17] sm:$0x1]  ;;  %v915_v52 = vld [vmem:[%s3486_s17 + $0x27] sm:$0x1]  ;;  %v865_v53 = vsel %vm245_vm5, %v864_v27, %v863_v47  ;;  %v679_v54 = vsel %vm233_vm1, %v678_v41, %v677_v48 }
  0x6c   : > { %v916_v55 = vld [vmem:[%s3486_s17 + $0x37] sm:$0x1]  ;;  %v917_v56 = vld [vmem:[%s3486_s17 + $0x47] sm:$0x1]  ;;  %v867_v58 = vsel %vm248_vm6, %v866_v28, %v865_v53  ;;  %v681_v59 = vsel %vm236_vm2, %v680_v43, %v679_v54  ;;  %v961_v62 = vrot.slane %v914_v51, 7  ;;  %v963_v63 = vrot.slane %v915_v52, 6 }
  0x6d   : > { %v918_v57 = vld [vmem:[%s3486_s17 + $0x57] sm:$0x1]  ;;  %v919_v60 = vld [vmem:[%s3486_s17 + $0x67] sm:$0x1]  ;;  %896 = vrot.lane.b32.xlu2 %v867_v58, %s3429_s18  ;;  %v683_v0 = vsel %vm239_vm3, %v682_v44, %v681_v59  ;;  %v965_v1 = vrot.slane %v916_v55, 5  ;;  %v967_v2 = vrot.slane %v917_v56, 4 }
  0x6e   : > { %v920_v61 = vld [vmem:[%s3486_s17 + $0x77] sm:$0x1]  ;;  %v969_v3 = vrot.slane %v918_v57, 3  ;;  %v1531_v4 = vld [vmem:[%s3486_s17 + $0xd] sm:$0x1]  ;;  %v685_v5 = vsel %vm242_vm4, %v684_v45, %v683_v0  ;;  %v962_v6 = vsel %vm230_vm0, %v961_v62, %v913_v46  ;;  %v971_v7 = vrot.slane %v919_v60, 2 }
  0x6f   : > { %v973_v8 = vrot.slane %v920_v61, 1  ;;  %v1532_v9 = vld [vmem:[%s3486_s17 + $0x1d] sm:$0x1]  ;;  %v1533_v10 = vld [vmem:[%s3486_s17 + $0x2d] sm:$0x1]  ;;  %v687_v11 = vsel %vm245_vm5, %v686_v49, %v685_v5  ;;  %v964_v12 = vsel %vm233_vm1, %v963_v63, %v962_v6 }
  0x70   : > { %v1534_v13 = vld [vmem:[%s3486_s17 + $0x3d] sm:$0x1]  ;;  %v1535_v14 = vld [vmem:[%s3486_s17 + $0x4d] sm:$0x1]  ;;  %v689_v16 = vsel %vm248_vm6, %v688_v50, %v687_v11  ;;  %v966_v17 = vsel %vm236_vm2, %v965_v1, %v964_v12  ;;  %v1579_v20 = vrot.slane %v1532_v9, 7  ;;  %v1581_v21 = vrot.slane %v1533_v10, 6 }
  0x71   : > { %v1536_v15 = vld [vmem:[%s3486_s17 + $0x5d] sm:$0x1]  ;;  %v1537_v18 = vld [vmem:[%s3486_s17 + $0x6d] sm:$0x1]  ;;  %694 = vrot.lane.b32.xlu0 %v689_v16, %s3441_s30  ;;  %v968_v22 = vsel %vm239_vm3, %v967_v2, %v966_v17  ;;  %v1583_v23 = vrot.slane %v1534_v13, 5  ;;  %v1585_v24 = vrot.slane %v1535_v14, 4 }
  0x72   : > { %v1538_v19 = vld [vmem:[%s3486_s17 + $0x7d] sm:$0x1]  ;;  %v1587_v25 = vrot.slane %v1536_v15, 3  ;;  %v1341_v26 = vld [vmem:[%s3486_s17 + $0x10b] sm:$0x1]  ;;  %v970_v27 = vsel %vm242_vm4, %v969_v3, %v968_v22  ;;  %v1580_v28 = vsel %vm230_vm0, %v1579_v20, %v1531_v4  ;;  %v1589_v29 = vrot.slane %v1537_v18, 2 }
  0x73   : > { %v1591_v30 = vrot.slane %v1538_v19, 1  ;;  %v1342_v31 = vld [vmem:[%s3486_s17 + $0x11b] sm:$0x1]  ;;  %v1343_v32 = vld [vmem:[%s3486_s17 + $0x12b] sm:$0x1]  ;;  %v972_v33 = vsel %vm245_vm5, %v971_v7, %v970_v27  ;;  %v1582_v34 = vsel %vm233_vm1, %v1581_v21, %v1580_v28 }
  0x74   : > { %v1344_v35 = vld [vmem:[%s3486_s17 + $0x13b] sm:$0x1]  ;;  %v1345_v36 = vld [vmem:[%s3486_s17 + $0x14b] sm:$0x1]  ;;  %v974_v38 = vsel %vm248_vm6, %v973_v8, %v972_v33  ;;  %v1584_v39 = vsel %vm236_vm2, %v1583_v23, %v1582_v34  ;;  %v1401_v42 = vrot.slane %v1342_v31, 7  ;;  %v1403_v43 = vrot.slane %v1343_v32, 6 }
  0x75   : > { %v1346_v37 = vld [vmem:[%s3486_s17 + $0x15b] sm:$0x1]  ;;  %v1347_v40 = vld [vmem:[%s3486_s17 + $0x16b] sm:$0x1]  ;;  %1003 = vrot.lane.b32.xlu1 %v974_v38, %s3432_s21  ;;  %v1586_v44 = vsel %vm239_vm3, %v1585_v24, %v1584_v39  ;;  %v1405_v45 = vrot.slane %v1344_v35, 5  ;;  %v1407_v46 = vrot.slane %v1345_v36, 4 }
  0x76   : > { %v1348_v41 = vld [vmem:[%s3486_s17 + $0x17b] sm:$0x1]  ;;  %v1409_v47 = vrot.slane %v1346_v37, 3  ;;  %v1638_v48 = vld [vmem:[%s3486_s17 + $0xe] sm:$0x1]  ;;  %v1588_v49 = vsel %vm242_vm4, %v1587_v25, %v1586_v44  ;;  %v1402_v50 = vsel %vm230_vm0, %v1401_v42, %v1341_v26  ;;  %v1411_v51 = vrot.slane %v1347_v40, 2 }
  0x77   : > { %v1413_v52 = vrot.slane %v1348_v41, 1  ;;  %v1639_v53 = vld [vmem:[%s3486_s17 + $0x1e] sm:$0x1]  ;;  %v1640_v54 = vld [vmem:[%s3486_s17 + $0x2e] sm:$0x1]  ;;  %v1590_v55 = vsel %vm245_vm5, %v1589_v29, %v1588_v49  ;;  %v1404_v56 = vsel %vm233_vm1, %v1403_v43, %v1402_v50 }
  0x78   : > { %v1641_v57 = vld [vmem:[%s3486_s17 + $0x3e] sm:$0x1]  ;;  %v1642_v58 = vld [vmem:[%s3486_s17 + $0x4e] sm:$0x1]  ;;  %v1592_v60 = vsel %vm248_vm6, %v1591_v30, %v1590_v55  ;;  %v1406_v61 = vsel %vm236_vm2, %v1405_v45, %v1404_v56  ;;  %v1686_v0 = vrot.slane %v1639_v53, 7  ;;  %v1688_v1 = vrot.slane %v1640_v54, 6 }
  0x79   : > { %v1643_v59 = vld [vmem:[%s3486_s17 + $0x5e] sm:$0x1]  ;;  %v1644_v62 = vld [vmem:[%s3486_s17 + $0x6e] sm:$0x1]  ;;  %1621 = vrot.lane.b32.xlu2 %v1592_v60, %s3431_s20  ;;  %v1408_v2 = vsel %vm239_vm3, %v1407_v46, %v1406_v61  ;;  %v1690_v3 = vrot.slane %v1641_v57, 5  ;;  %v1692_v4 = vrot.slane %v1642_v58, 4 }
  0x7a   : > { %v1645_v63 = vld [vmem:[%s3486_s17 + $0x7e] sm:$0x1]  ;;  %v1694_v5 = vrot.slane %v1643_v59, 3  ;;  %v402_v6 = vld [vmem:[%s3486_s17 + $0x82] sm:$0x1]  ;;  %v1410_v7 = vsel %vm242_vm4, %v1409_v47, %v1408_v2  ;;  %v1687_v8 = vsel %vm230_vm0, %v1686_v0, %v1638_v48  ;;  %v1696_v9 = vrot.slane %v1644_v62, 2 }
  0x7b   : > { %v1698_v10 = vrot.slane %v1645_v63, 1  ;;  %v403_v11 = vld [vmem:[%s3486_s17 + $0x92] sm:$0x1]  ;;  %v404_v12 = vld [vmem:[%s3486_s17 + $0xa2] sm:$0x1]  ;;  %v1412_v13 = vsel %vm245_vm5, %v1411_v51, %v1410_v7  ;;  %v1689_v14 = vsel %vm233_vm1, %v1688_v1, %v1687_v8 }
  0x7c   : > { %v405_v15 = vld [vmem:[%s3486_s17 + $0xb2] sm:$0x1]  ;;  %v406_v16 = vld [vmem:[%s3486_s17 + $0xc2] sm:$0x1]  ;;  %v1414_v18 = vsel %vm248_vm6, %v1413_v52, %v1412_v13  ;;  %v1691_v19 = vsel %vm236_vm2, %v1690_v3, %v1689_v14  ;;  %v456_v22 = vrot.slane %v403_v11, 7  ;;  %v458_v23 = vrot.slane %v404_v12, 6 }
  0x7d   : > { %v407_v17 = vld [vmem:[%s3486_s17 + $0xd2] sm:$0x1]  ;;  %v408_v20 = vld [vmem:[%s3486_s17 + $0xe2] sm:$0x1]  ;;  %1419 = vrot.lane.b32.xlu0 %v1414_v18, %s3442_s4  ;;  %v1693_v24 = vsel %vm239_vm3, %v1692_v4, %v1691_v19  ;;  %v460_v25 = vrot.slane %v405_v15, 5  ;;  %v462_v26 = vrot.slane %v406_v16, 4 }
  0x7e   : > { %v409_v21 = vld [vmem:[%s3486_s17 + $0xf2] sm:$0x1]  ;;  %v464_v27 = vrot.slane %v407_v17, 3  ;;  %v505_v28 = vld [vmem:[%s3486_s17 + $0x83] sm:$0x1]  ;;  %v1695_v29 = vsel %vm242_vm4, %v1694_v5, %v1693_v24  ;;  %v457_v30 = vsel %vm230_vm0, %v456_v22, %v402_v6  ;;  %v466_v31 = vrot.slane %v408_v20, 2 }
  0x7f   : > { %v468_v32 = vrot.slane %v409_v21, 1  ;;  %v506_v33 = vld [vmem:[%s3486_s17 + $0x93] sm:$0x1]  ;;  %v507_v34 = vld [vmem:[%s3486_s17 + $0xa3] sm:$0x1]  ;;  %v1697_v35 = vsel %vm245_vm5, %v1696_v9, %v1695_v29  ;;  %v459_v36 = vsel %vm233_vm1, %v458_v23, %v457_v30 }
  0x80   : > { %v508_v37 = vld [vmem:[%s3486_s17 + $0xb3] sm:$0x1]  ;;  %v509_v38 = vld [vmem:[%s3486_s17 + $0xc3] sm:$0x1]  ;;  %v1699_v40 = vsel %vm248_vm6, %v1698_v10, %v1697_v35  ;;  %v461_v41 = vsel %vm236_vm2, %v460_v25, %v459_v36  ;;  %v559_v44 = vrot.slane %v506_v33, 7  ;;  %v561_v45 = vrot.slane %v507_v34, 6 }
  0x81   : > { %v510_v39 = vld [vmem:[%s3486_s17 + $0xd3] sm:$0x1]  ;;  %v511_v42 = vld [vmem:[%s3486_s17 + $0xe3] sm:$0x1]  ;;  %1728 = vrot.lane.b32.xlu1 %v1699_v40, %s3434_s23  ;;  %v463_v46 = vsel %vm239_vm3, %v462_v26, %v461_v41  ;;  %v563_v47 = vrot.slane %v508_v37, 5  ;;  %v565_v48 = vrot.slane %v509_v38, 4 }
  0x82   : > { %v512_v43 = vld [vmem:[%s3486_s17 + $0xf3] sm:$0x1]  ;;  %v567_v49 = vrot.slane %v510_v39, 3  ;;  %v719_v50 = vld [vmem:[%s3486_s17 + $0x105] sm:$0x1]  ;;  %v465_v51 = vsel %vm242_vm4, %v464_v27, %v463_v46  ;;  %v560_v52 = vsel %vm230_vm0, %v559_v44, %v505_v28  ;;  %v569_v53 = vrot.slane %v511_v42, 2 }
  0x83   : > { %v571_v54 = vrot.slane %v512_v43, 1  ;;  %v720_v55 = vld [vmem:[%s3486_s17 + $0x115] sm:$0x1]  ;;  %v721_v56 = vld [vmem:[%s3486_s17 + $0x125] sm:$0x1]  ;;  %v467_v57 = vsel %vm245_vm5, %v466_v31, %v465_v51  ;;  %v562_v58 = vsel %vm233_vm1, %v561_v45, %v560_v52 }
  0x84   : > { %v722_v59 = vld [vmem:[%s3486_s17 + $0x135] sm:$0x1]  ;;  %v723_v60 = vld [vmem:[%s3486_s17 + $0x145] sm:$0x1]  ;;  %v469_v62 = vsel %vm248_vm6, %v468_v32, %v467_v57  ;;  %v564_v63 = vsel %vm236_vm2, %v563_v47, %v562_v58  ;;  %v779_v2 = vrot.slane %v720_v55, 7  ;;  %v781_v3 = vrot.slane %v721_v56, 6 }
  0x85   : > { %v724_v61 = vld [vmem:[%s3486_s17 + $0x155] sm:$0x1]  ;;  %v725_v0 = vld [vmem:[%s3486_s17 + $0x165] sm:$0x1]  ;;  %486 = vrot.lane.b32.xlu2 %v469_v62, %s3439_s28  ;;  %v566_v4 = vsel %vm239_vm3, %v565_v48, %v564_v63  ;;  %v783_v5 = vrot.slane %v722_v59, 5  ;;  %v785_v6 = vrot.slane %v723_v60, 4 }
  0x86   : > { %v726_v1 = vld [vmem:[%s3486_s17 + $0x175] sm:$0x1]  ;;  %v787_v7 = vrot.slane %v724_v61, 3  ;;  %v1127_v8 = vld [vmem:[%s3486_s17 + $0x89] sm:$0x1]  ;;  %v568_v9 = vsel %vm242_vm4, %v567_v49, %v566_v4  ;;  %v780_v10 = vsel %vm230_vm0, %v779_v2, %v719_v50  ;;  %v789_v11 = vrot.slane %v725_v0, 2 }
  0x87   : > { %v791_v12 = vrot.slane %v726_v1, 1  ;;  %v1128_v13 = vld [vmem:[%s3486_s17 + $0x99] sm:$0x1]  ;;  %v1129_v14 = vld [vmem:[%s3486_s17 + $0xa9] sm:$0x1]  ;;  %v570_v15 = vsel %vm245_vm5, %v569_v53, %v568_v9  ;;  %v782_v16 = vsel %vm233_vm1, %v781_v3, %v780_v10 }
  0x88   : > { %v1130_v17 = vld [vmem:[%s3486_s17 + $0xb9] sm:$0x1]  ;;  %v1131_v18 = vld [vmem:[%s3486_s17 + $0xc9] sm:$0x1]  ;;  %v572_v20 = vsel %vm248_vm6, %v571_v54, %v570_v15  ;;  %v784_v21 = vsel %vm236_vm2, %v783_v5, %v782_v16  ;;  %v1181_v24 = vrot.slane %v1128_v13, 7  ;;  %v1183_v25 = vrot.slane %v1129_v14, 6 }
  0x89   : > { %v1132_v19 = vld [vmem:[%s3486_s17 + $0xd9] sm:$0x1]  ;;  %v1133_v22 = vld [vmem:[%s3486_s17 + $0xe9] sm:$0x1]  ;;  %589 = vrot.lane.b32.xlu0 %v572_v20, %s3438_s27  ;;  %v786_v26 = vsel %vm239_vm3, %v785_v6, %v784_v21  ;;  %v1185_v27 = vrot.slane %v1130_v17, 5  ;;  %v1187_v28 = vrot.slane %v1131_v18, 4 }
  0x8a   : > { %v1134_v23 = vld [vmem:[%s3486_s17 + $0xf9] sm:$0x1]  ;;  %v1189_v29 = vrot.slane %v1132_v19, 3  ;;  %v1230_v30 = vld [vmem:[%s3486_s17 + $0x8a] sm:$0x1]  ;;  %v788_v31 = vsel %vm242_vm4, %v787_v7, %v786_v26  ;;  %v1182_v32 = vsel %vm230_vm0, %v1181_v24, %v1127_v8  ;;  %v1191_v33 = vrot.slane %v1133_v22, 2 }
  0x8b   : > { %v1193_v34 = vrot.slane %v1134_v23, 1  ;;  %v1231_v35 = vld [vmem:[%s3486_s17 + $0x9a] sm:$0x1]  ;;  %v1232_v36 = vld [vmem:[%s3486_s17 + $0xaa] sm:$0x1]  ;;  %v790_v37 = vsel %vm245_vm5, %v789_v11, %v788_v31  ;;  %v1184_v38 = vsel %vm233_vm1, %v1183_v25, %v1182_v32 }
  0x8c   : > { %v1233_v39 = vld [vmem:[%s3486_s17 + $0xba] sm:$0x1]  ;;  %v1234_v40 = vld [vmem:[%s3486_s17 + $0xca] sm:$0x1]  ;;  %v792_v42 = vsel %vm248_vm6, %v791_v12, %v790_v37  ;;  %v1186_v43 = vsel %vm236_vm2, %v1185_v27, %v1184_v38  ;;  %v1284_v46 = vrot.slane %v1231_v35, 7  ;;  %v1286_v47 = vrot.slane %v1232_v36, 6 }
  0x8d   : > { %v1235_v41 = vld [vmem:[%s3486_s17 + $0xda] sm:$0x1]  ;;  %v1236_v44 = vld [vmem:[%s3486_s17 + $0xea] sm:$0x1]  ;;  %797 = vrot.lane.b32.xlu1 %v792_v42, %s3443_s5  ;;  %v1188_v48 = vsel %vm239_vm3, %v1187_v28, %v1186_v43  ;;  %v1288_v49 = vrot.slane %v1233_v39, 5  ;;  %v1290_v50 = vrot.slane %v1234_v40, 4 }
  0x8e   : > { %v1237_v45 = vld [vmem:[%s3486_s17 + $0xfa] sm:$0x1]  ;;  %v1292_v51 = vrot.slane %v1235_v41, 3  ;;  %v1444_v52 = vld [vmem:[%s3486_s17 + $0x10c] sm:$0x1]  ;;  %v1190_v53 = vsel %vm242_vm4, %v1189_v29, %v1188_v48  ;;  %v1285_v54 = vsel %vm230_vm0, %v1284_v46, %v1230_v30  ;;  %v1294_v55 = vrot.slane %v1236_v44, 2 }
  0x8f   : > { %v1296_v56 = vrot.slane %v1237_v45, 1  ;;  %v1445_v57 = vld [vmem:[%s3486_s17 + $0x11c] sm:$0x1]  ;;  %v1446_v58 = vld [vmem:[%s3486_s17 + $0x12c] sm:$0x1]  ;;  %v1192_v59 = vsel %vm245_vm5, %v1191_v33, %v1190_v53  ;;  %v1287_v60 = vsel %vm233_vm1, %v1286_v47, %v1285_v54 }
  0x90   : > { %v1447_v61 = vld [vmem:[%s3486_s17 + $0x13c] sm:$0x1]  ;;  %v1448_v62 = vld [vmem:[%s3486_s17 + $0x14c] sm:$0x1]  ;;  %v1194_v0 = vsel %vm248_vm6, %v1193_v34, %v1192_v59  ;;  %v1289_v1 = vsel %vm236_vm2, %v1288_v49, %v1287_v60  ;;  %v1504_v4 = vrot.slane %v1445_v57, 7  ;;  %v1506_v5 = vrot.slane %v1446_v58, 6 }
  0x91   : > { %v1449_v63 = vld [vmem:[%s3486_s17 + $0x15c] sm:$0x1]  ;;  %v1450_v2 = vld [vmem:[%s3486_s17 + $0x16c] sm:$0x1]  ;;  %1211 = vrot.lane.b32.xlu2 %v1194_v0, %s3437_s26  ;;  %v1291_v6 = vsel %vm239_vm3, %v1290_v50, %v1289_v1  ;;  %v1508_v7 = vrot.slane %v1447_v61, 5  ;;  %v1510_v8 = vrot.slane %v1448_v62, 4 }
  0x92   : > { %v1451_v3 = vld [vmem:[%s3486_s17 + $0x17c] sm:$0x1]  ;;  %v1512_v9 = vrot.slane %v1449_v63, 3  ;;  %v291_v10 = vld [vmem:[%s3486_s17 + $0x1] sm:$0x1]  ;;  %v1293_v11 = vsel %vm242_vm4, %v1292_v51, %v1291_v6  ;;  %v1505_v12 = vsel %vm230_vm0, %v1504_v4, %v1444_v52  ;;  %v1514_v13 = vrot.slane %v1450_v2, 2 }
  0x93   : > { %v1516_v14 = vrot.slane %v1451_v3, 1  ;;  %v292_v15 = vld [vmem:[%s3486_s17 + $0x11] sm:$0x1]  ;;  %v293_v16 = vld [vmem:[%s3486_s17 + $0x21] sm:$0x1]  ;;  %v1295_v17 = vsel %vm245_vm5, %v1294_v55, %v1293_v11  ;;  %v1507_v18 = vsel %vm233_vm1, %v1506_v5, %v1505_v12 }
  0x94   : > { %v294_v19 = vld [vmem:[%s3486_s17 + $0x31] sm:$0x1]  ;;  %v295_v20 = vld [vmem:[%s3486_s17 + $0x41] sm:$0x1]  ;;  %v1297_v22 = vsel %vm248_vm6, %v1296_v56, %v1295_v17  ;;  %v1509_v23 = vsel %vm236_vm2, %v1508_v7, %v1507_v18  ;;  %v339_v26 = vrot.slane %v292_v15, 7  ;;  %v341_v27 = vrot.slane %v293_v16, 6 }
  0x95   : > { %v296_v21 = vld [vmem:[%s3486_s17 + $0x51] sm:$0x1]  ;;  %v297_v24 = vld [vmem:[%s3486_s17 + $0x61] sm:$0x1]  ;;  %1314 = vrot.lane.b32.xlu0 %v1297_v22, %s3440_s29  ;;  %v1511_v28 = vsel %vm239_vm3, %v1510_v8, %v1509_v23  ;;  %v343_v29 = vrot.slane %v294_v19, 5  ;;  %v345_v30 = vrot.slane %v295_v20, 4  ;;  %v4050_v8 = vpop.permute.xlu2 %1732 }
  0x96   : > { %v298_v25 = vld [vmem:[%s3486_s17 + $0x71] sm:$0x1]  ;;  %v347_v31 = vrot.slane %v296_v21, 3  ;;  %v394_v32 = vld [vmem:[%s3486_s17 + $0x2] sm:$0x1]  ;;  %v1513_v33 = vsel %vm242_vm4, %v1512_v9, %v1511_v28  ;;  %v340_v34 = vsel %vm230_vm0, %v339_v26, %v291_v10  ;;  %v349_v35 = vrot.slane %v297_v24, 2 }
  0x97   : > { %v351_v36 = vrot.slane %v298_v25, 1  ;;  %v395_v37 = vld [vmem:[%s3486_s17 + $0x12] sm:$0x1]  ;;  %v396_v38 = vld [vmem:[%s3486_s17 + $0x22] sm:$0x1]  ;;  %v1515_v39 = vsel %vm245_vm5, %v1514_v13, %v1513_v33  ;;  %v342_v40 = vsel %vm233_vm1, %v341_v27, %v340_v34 }
  0x98   : > { %v397_v41 = vld [vmem:[%s3486_s17 + $0x32] sm:$0x1]  ;;  %v398_v42 = vld [vmem:[%s3486_s17 + $0x42] sm:$0x1]  ;;  %v1517_v44 = vsel %vm248_vm6, %v1516_v14, %v1515_v39  ;;  %v344_v45 = vsel %vm236_vm2, %v343_v29, %v342_v40  ;;  %v442_v48 = vrot.slane %v395_v37, 7  ;;  %v444_v49 = vrot.slane %v396_v38, 6 }
  0x99   : > { %v399_v43 = vld [vmem:[%s3486_s17 + $0x52] sm:$0x1]  ;;  %v400_v46 = vld [vmem:[%s3486_s17 + $0x62] sm:$0x1]  ;;  %1522 = vrot.lane.b32.xlu1 %v1517_v44, %s3444_s6  ;;  %v346_v50 = vsel %vm239_vm3, %v345_v30, %v344_v45  ;;  %v446_v51 = vrot.slane %v397_v41, 5  ;;  %v448_v52 = vrot.slane %v398_v42, 4 }
  0x9a   : > { %v401_v47 = vld [vmem:[%s3486_s17 + $0x72] sm:$0x1]  ;;  %v450_v53 = vrot.slane %v399_v43, 3  ;;  %v608_v54 = vld [vmem:[%s3486_s17 + $0x84] sm:$0x1]  ;;  %v348_v55 = vsel %vm242_vm4, %v347_v31, %v346_v50  ;;  %v443_v56 = vsel %vm230_vm0, %v442_v48, %v394_v32  ;;  %v452_v57 = vrot.slane %v400_v46, 2 }
  0x9b   : > { %v454_v58 = vrot.slane %v401_v47, 1  ;;  %v609_v59 = vld [vmem:[%s3486_s17 + $0x94] sm:$0x1]  ;;  %v610_v60 = vld [vmem:[%s3486_s17 + $0xa4] sm:$0x1]  ;;  %v350_v61 = vsel %vm245_vm5, %v349_v35, %v348_v55  ;;  %v445_v62 = vsel %vm233_vm1, %v444_v49, %v443_v56 }
  0x9c   : > { %v611_v63 = vld [vmem:[%s3486_s17 + $0xb4] sm:$0x1]  ;;  %v612_v0 = vld [vmem:[%s3486_s17 + $0xc4] sm:$0x1]  ;;  %v352_v2 = vsel %vm248_vm6, %v351_v36, %v350_v61  ;;  %v447_v3 = vsel %vm236_vm2, %v446_v51, %v445_v62  ;;  %v662_v6 = vrot.slane %v609_v59, 7  ;;  %v664_v7 = vrot.slane %v610_v60, 6  ;;  %v4089_v59 = vpop.permute.xlu1 %282 }
  0x9d   : > { %v613_v1 = vld [vmem:[%s3486_s17 + $0xd4] sm:$0x1]  ;;  %v614_v4 = vld [vmem:[%s3486_s17 + $0xe4] sm:$0x1]  ;;  %381 = vrot.lane.b32.xlu2 %v352_v2, %s3436_s25  ;;  %v449_v9 = vsel %vm239_vm3, %v448_v52, %v447_v3  ;;  %v666_v10 = vrot.slane %v611_v63, 5  ;;  %v668_v11 = vrot.slane %v612_v0, 4  ;;  %v4095_v2 = vpop.permute.xlu2 %385 }
  0x9e   : > { %v615_v5 = vld [vmem:[%s3486_s17 + $0xf4] sm:$0x1]  ;;  %v670_v12 = vrot.slane %v613_v1, 3  ;;  %v1016_v13 = vld [vmem:[%s3486_s17 + $0x8] sm:$0x1]  ;;  %v451_v14 = vsel %vm242_vm4, %v450_v53, %v449_v9  ;;  %v663_v15 = vsel %vm230_vm0, %v662_v6, %v608_v54  ;;  %v672_v16 = vrot.slane %v614_v4, 2 }
  0x9f   : > { %v674_v17 = vrot.slane %v615_v5, 1  ;;  %v1017_v18 = vld [vmem:[%s3486_s17 + $0x18] sm:$0x1]  ;;  %v1018_v19 = vld [vmem:[%s3486_s17 + $0x28] sm:$0x1]  ;;  %v453_v20 = vsel %vm245_vm5, %v452_v57, %v451_v14  ;;  %v665_v21 = vsel %vm233_vm1, %v664_v7, %v663_v15 }
  0xa0   : > { %v1019_v22 = vld [vmem:[%s3486_s17 + $0x38] sm:$0x1]  ;;  %v1020_v23 = vld [vmem:[%s3486_s17 + $0x48] sm:$0x1]  ;;  %v455_v25 = vsel %vm248_vm6, %v454_v58, %v453_v20  ;;  %v667_v26 = vsel %vm236_vm2, %v666_v10, %v665_v21  ;;  %v1064_v29 = vrot.slane %v1017_v18, 7  ;;  %v1066_v30 = vrot.slane %v1018_v19, 6  ;;  %v4087_v58 = vpop.permute.xlu0 %900 }
  0xa1   : > { %v1021_v24 = vld [vmem:[%s3486_s17 + $0x58] sm:$0x1]  ;;  %v1022_v27 = vld [vmem:[%s3486_s17 + $0x68] sm:$0x1]  ;;  %484 = vrot.lane.b32.xlu0 %v455_v25, %s3439_s28  ;;  %v669_v31 = vsel %vm239_vm3, %v668_v11, %v667_v26  ;;  %v1068_v32 = vrot.slane %v1019_v22, 5  ;;  %v1070_v33 = vrot.slane %v1020_v23, 4 }
  0xa2   : > { %v1023_v28 = vld [vmem:[%s3486_s17 + $0x78] sm:$0x1]  ;;  %v1072_v34 = vrot.slane %v1021_v24, 3  ;;  %v1333_v35 = vld [vmem:[%s3486_s17 + $0x8b] sm:$0x1]  ;;  %v671_v36 = vsel %vm242_vm4, %v670_v12, %v669_v31  ;;  %v1065_v37 = vsel %vm230_vm0, %v1064_v29, %v1016_v13  ;;  %v1074_v38 = vrot.slane %v1022_v27, 2 }
  0xa3   : > { %v1076_v39 = vrot.slane %v1023_v28, 1  ;;  %v1334_v40 = vld [vmem:[%s3486_s17 + $0x9b] sm:$0x1]  ;;  %v1335_v41 = vld [vmem:[%s3486_s17 + $0xab] sm:$0x1]  ;;  %v673_v42 = vsel %vm245_vm5, %v672_v16, %v671_v36  ;;  %v1067_v43 = vsel %vm233_vm1, %v1066_v30, %v1065_v37 }
  0xa4   : > { %v1336_v44 = vld [vmem:[%s3486_s17 + $0xbb] sm:$0x1]  ;;  %v1337_v45 = vld [vmem:[%s3486_s17 + $0xcb] sm:$0x1]  ;;  %v675_v47 = vsel %vm248_vm6, %v674_v17, %v673_v42  ;;  %v1069_v48 = vsel %vm236_vm2, %v1068_v32, %v1067_v43  ;;  %v1387_v51 = vrot.slane %v1334_v40, 7  ;;  %v1389_v52 = vrot.slane %v1335_v41, 6 }
  0xa5   : > { %v1338_v46 = vld [vmem:[%s3486_s17 + $0xdb] sm:$0x1]  ;;  %v1339_v49 = vld [vmem:[%s3486_s17 + $0xeb] sm:$0x1]  ;;  %692 = vrot.lane.b32.xlu1 %v675_v47, %s3441_s30  ;;  %v1071_v53 = vsel %vm239_vm3, %v1070_v33, %v1069_v48  ;;  %v1391_v54 = vrot.slane %v1336_v44, 5  ;;  %v1393_v55 = vrot.slane %v1337_v45, 4 }
  0xa6   : > { %v1340_v50 = vld [vmem:[%s3486_s17 + $0xfb] sm:$0x1]  ;;  %v1395_v56 = vrot.slane %v1338_v46, 3  ;;  %v497_v57 = vld [vmem:[%s3486_s17 + $0x3] sm:$0x1]  ;;  %v1073_v60 = vsel %vm242_vm4, %v1072_v34, %v1071_v53  ;;  %v1388_v61 = vsel %vm230_vm0, %v1387_v51, %v1333_v35  ;;  %v1397_v62 = vrot.slane %v1339_v49, 2 }
  0xa7   : > { %v1399_v63 = vrot.slane %v1340_v50, 1  ;;  %v498_v0 = vld [vmem:[%s3486_s17 + $0x13] sm:$0x1]  ;;  %v499_v1 = vld [vmem:[%s3486_s17 + $0x23] sm:$0x1]  ;;  %v1075_v3 = vsel %vm245_vm5, %v1074_v38, %v1073_v60  ;;  %v1390_v4 = vsel %vm233_vm1, %v1389_v52, %v1388_v61 }
  0xa8   : > { %v500_v5 = vld [vmem:[%s3486_s17 + $0x33] sm:$0x1]  ;;  %v501_v6 = vld [vmem:[%s3486_s17 + $0x43] sm:$0x1]  ;;  %v1077_v9 = vsel %vm248_vm6, %v1076_v39, %v1075_v3  ;;  %v1392_v10 = vsel %vm236_vm2, %v1391_v54, %v1390_v4  ;;  %v545_v13 = vrot.slane %v498_v0, 7  ;;  %v547_v14 = vrot.slane %v499_v1, 6  ;;  %v4134_v53 = vpop.permute.xlu0 %1625  ;;  %v4136_v54 = vpop.permute.xlu1 %1007 }
  0xa9   : > { %v502_v7 = vld [vmem:[%s3486_s17 + $0x53] sm:$0x1]  ;;  %v503_v11 = vld [vmem:[%s3486_s17 + $0x63] sm:$0x1]  ;;  %1106 = vrot.lane.b32.xlu2 %v1077_v9, %s3433_s22  ;;  %v1394_v15 = vsel %vm239_vm3, %v1393_v55, %v1392_v10  ;;  %v549_v16 = vrot.slane %v500_v5, 5  ;;  %v551_v17 = vrot.slane %v501_v6, 4 }
  0xaa   : > { %v504_v12 = vld [vmem:[%s3486_s17 + $0x73] sm:$0x1]  ;;  %v553_v18 = vrot.slane %v502_v7, 3  ;;  %v1741_v19 = vld [vmem:[%s3486_s17 + $0xf] sm:$0x1]  ;;  %v1396_v20 = vsel %vm242_vm4, %v1395_v56, %v1394_v15  ;;  %v546_v21 = vsel %vm230_vm0, %v545_v13, %v497_v57  ;;  %v555_v22 = vrot.slane %v503_v11, 2 }
  0xab   : > { %v557_v23 = vrot.slane %v504_v12, 1  ;;  %v1742_v24 = vld [vmem:[%s3486_s17 + $0x1f] sm:$0x1]  ;;  %v1743_v25 = vld [vmem:[%s3486_s17 + $0x2f] sm:$0x1]  ;;  %v1398_v26 = vsel %vm245_vm5, %v1397_v62, %v1396_v20  ;;  %v548_v27 = vsel %vm233_vm1, %v547_v14, %v546_v21 }
  0xac   : > { %v1744_v28 = vld [vmem:[%s3486_s17 + $0x3f] sm:$0x1]  ;;  %v1745_v29 = vld [vmem:[%s3486_s17 + $0x4f] sm:$0x1]  ;;  %v1400_v31 = vsel %vm248_vm6, %v1399_v63, %v1398_v26  ;;  %v550_v32 = vsel %vm236_vm2, %v549_v16, %v548_v27  ;;  %v1789_v35 = vrot.slane %v1742_v24, 7  ;;  %v1791_v36 = vrot.slane %v1743_v25, 6  ;;  %v4142_v63 = vpop.permute.xlu2 %1623 }
  0xad   : > { %v1746_v30 = vld [vmem:[%s3486_s17 + $0x5f] sm:$0x1]  ;;  %v1747_v33 = vld [vmem:[%s3486_s17 + $0x6f] sm:$0x1]  ;;  %1417 = vrot.lane.b32.xlu0 %v1400_v31, %s3442_s4  ;;  %v552_v37 = vsel %vm239_vm3, %v551_v17, %v550_v32  ;;  %v1793_v38 = vrot.slane %v1744_v28, 5  ;;  %v1795_v39 = vrot.slane %v1745_v29, 4 }
  0xae   : > { %v1748_v34 = vld [vmem:[%s3486_s17 + $0x7f] sm:$0x1]  ;;  %v1797_v40 = vrot.slane %v1746_v30, 3  ;;  %v1222_v41 = vld [vmem:[%s3486_s17 + $0xa] sm:$0x1]  ;;  %v554_v42 = vsel %vm242_vm4, %v553_v18, %v552_v37  ;;  %v1790_v43 = vsel %vm230_vm0, %v1789_v35, %v1741_v19  ;;  %v1799_v44 = vrot.slane %v1747_v33, 2 }
  0xaf   : > { %v1801_v45 = vrot.slane %v1748_v34, 1  ;;  %v1223_v46 = vld [vmem:[%s3486_s17 + $0x1a] sm:$0x1]  ;;  %v1224_v47 = vld [vmem:[%s3486_s17 + $0x2a] sm:$0x1]  ;;  %v556_v48 = vsel %vm245_vm5, %v555_v22, %v554_v42  ;;  %v1792_v49 = vsel %vm233_vm1, %v1791_v36, %v1790_v43 }
  0xb0   : > { %v1225_v50 = vld [vmem:[%s3486_s17 + $0x3a] sm:$0x1]  ;;  %v1226_v51 = vld [vmem:[%s3486_s17 + $0x4a] sm:$0x1]  ;;  %v558_v55 = vsel %vm248_vm6, %v557_v23, %v556_v48  ;;  %v1794_v56 = vsel %vm236_vm2, %v1793_v38, %v1792_v49  ;;  %v1270_v61 = vrot.slane %v1223_v46, 7  ;;  %v1272_v62 = vrot.slane %v1224_v47, 6 }
  0xb1   : > { %v1227_v52 = vld [vmem:[%s3486_s17 + $0x5a] sm:$0x1]  ;;  %v1228_v57 = vld [vmem:[%s3486_s17 + $0x6a] sm:$0x1]  ;;  %587 = vrot.lane.b32.xlu1 %v558_v55, %s3438_s27  ;;  %v1796_v0 = vsel %vm239_vm3, %v1795_v39, %v1794_v56  ;;  %v1274_v1 = vrot.slane %v1225_v50, 5  ;;  %v1276_v3 = vrot.slane %v1226_v51, 4 }
  0xb2   : > { %v1229_v60 = vld [vmem:[%s3486_s17 + $0x7a] sm:$0x1]  ;;  %v1278_v4 = vrot.slane %v1227_v52, 3  ;;  %v1436_v5 = vld [vmem:[%s3486_s17 + $0x8c] sm:$0x1]  ;;  %v1798_v6 = vsel %vm242_vm4, %v1797_v40, %v1796_v0  ;;  %v1271_v7 = vsel %vm230_vm0, %v1270_v61, %v1222_v41  ;;  %v1280_v9 = vrot.slane %v1228_v57, 2  ;;  %v4172_v40 = vpop.permute.xlu0 %898  ;;  %v4174_v41 = vpop.permute.xlu1 %1110 }
  0xb3   : > { %v1282_v10 = vrot.slane %v1229_v60, 1  ;;  %v1437_v11 = vld [vmem:[%s3486_s17 + $0x9c] sm:$0x1]  ;;  %v1438_v12 = vld [vmem:[%s3486_s17 + $0xac] sm:$0x1]  ;;  %v1800_v13 = vsel %vm245_vm5, %v1799_v44, %v1798_v6  ;;  %v1273_v14 = vsel %vm233_vm1, %v1272_v62, %v1271_v7 }
  0xb4   : > { %v1439_v15 = vld [vmem:[%s3486_s17 + $0xbc] sm:$0x1]  ;;  %v1440_v16 = vld [vmem:[%s3486_s17 + $0xcc] sm:$0x1]  ;;  %v1802_v18 = vsel %vm248_vm6, %v1801_v45, %v1800_v13  ;;  %v1275_v19 = vsel %vm236_vm2, %v1274_v1, %v1273_v14  ;;  %v1490_v22 = vrot.slane %v1437_v11, 7  ;;  %v1492_v23 = vrot.slane %v1438_v12, 6  ;;  %v4180_v48 = vpop.permute.xlu2 %488 }
  0xb5   : > { %v1441_v17 = vld [vmem:[%s3486_s17 + $0xdc] sm:$0x1]  ;;  %v1442_v20 = vld [vmem:[%s3486_s17 + $0xec] sm:$0x1]  ;;  %1831 = vrot.lane.b32.xlu2 %v1802_v18, %s3435_s24  ;;  %v1277_v24 = vsel %vm239_vm3, %v1276_v3, %v1275_v19  ;;  %v1494_v25 = vrot.slane %v1439_v15, 5  ;;  %v1496_v26 = vrot.slane %v1440_v16, 4 }
  0xb6   : > { %v1443_v21 = vld [vmem:[%s3486_s17 + $0xfc] sm:$0x1]  ;;  %v1498_v27 = vrot.slane %v1441_v17, 3  ;;  %v1119_v28 = vld [vmem:[%s3486_s17 + $0x9] sm:$0x1]  ;;  %v1279_v29 = vsel %vm242_vm4, %v1278_v4, %v1277_v24  ;;  %v1491_v30 = vsel %vm230_vm0, %v1490_v22, %v1436_v5  ;;  %v1500_v31 = vrot.slane %v1442_v20, 2 }
  0xb7   : > { %v1502_v32 = vrot.slane %v1443_v21, 1  ;;  %v1120_v33 = vld [vmem:[%s3486_s17 + $0x19] sm:$0x1]  ;;  %v1121_v34 = vld [vmem:[%s3486_s17 + $0x29] sm:$0x1]  ;;  %v1281_v35 = vsel %vm245_vm5, %v1280_v9, %v1279_v29  ;;  %v1493_v36 = vsel %vm233_vm1, %v1492_v23, %v1491_v30  ;;  %v3445_v9 = vmov 0.0  }
  0xb8   : > { %v1122_v37 = vld [vmem:[%s3486_s17 + $0x39] sm:$0x1]  ;;  %v1123_v38 = vld [vmem:[%s3486_s17 + $0x49] sm:$0x1]  ;;  %v1283_v42 = vsel %vm248_vm6, %v1282_v10, %v1281_v35  ;;  %v1495_v43 = vsel %vm236_vm2, %v1494_v25, %v1493_v36  ;;  %v1167_v46 = vrot.slane %v1120_v33, 7  ;;  %v1169_v47 = vrot.slane %v1121_v34, 6 }
  0xb9   : > { %v1124_v39 = vld [vmem:[%s3486_s17 + $0x59] sm:$0x1]  ;;  %v1125_v44 = vld [vmem:[%s3486_s17 + $0x69] sm:$0x1]  ;;  %1312 = vrot.lane.b32.xlu0 %v1283_v42, %s3440_s29  ;;  %v1497_v49 = vsel %vm239_vm3, %v1496_v26, %v1495_v43  ;;  %v1171_v50 = vrot.slane %v1122_v37, 5  ;;  %v1173_v51 = vrot.slane %v1123_v38, 4 }
  0xba   : > { %v1126_v45 = vld [vmem:[%s3486_s17 + $0x79] sm:$0x1]  ;;  %v1175_v52 = vrot.slane %v1124_v39, 3  ;;  %v1499_v55 = vsel %vm242_vm4, %v1498_v27, %v1497_v49  ;;  %v1168_v56 = vsel %vm230_vm0, %v1167_v46, %v1119_v28  ;;  %v1177_v57 = vrot.slane %v1125_v44, 2  ;;  %v1325_v61 = vld [vmem:[%s3486_s17 + $0xb] sm:$0x1]  ;;  %v4210_v25 = vpop.permute.xlu0 %1835  ;;  %v281_v26 = vpop.permute.xlu1 %280 }
  0xbb   : > { %v1179_v60 = vrot.slane %v1126_v45, 1  ;;  %v1326_v62 = vld [vmem:[%s3486_s17 + $0x1b] sm:$0x1]  ;;  %v1327_v0 = vld [vmem:[%s3486_s17 + $0x2b] sm:$0x1]  ;;  %v1501_v1 = vsel %vm245_vm5, %v1500_v31, %v1499_v55  ;;  %v1170_v3 = vsel %vm233_vm1, %v1169_v47, %v1168_v56  ;;  %179 = vst [vmem:[#allocation2 + $0x38] sm:$0xff] %v3445_v9 }
  0xbc   : > { %v1328_v4 = vld [vmem:[%s3486_s17 + $0x3b] sm:$0x1]  ;;  %v1329_v5 = vld [vmem:[%s3486_s17 + $0x4b] sm:$0x1]  ;;  %v1503_v6 = vsel %vm248_vm6, %v1502_v32, %v1501_v1  ;;  %v1172_v7 = vsel %vm236_vm2, %v1171_v50, %v1170_v3  ;;  %912 = vst.msk [vmem:[#allocation2 + $0x38] sm:$0xff] %vm907_vm7, %v4087_v58  ;;  %v1373_v14 = vrot.slane %v1326_v62, 7  ;;  %v4222_v36 = vpop.permute.xlu2 %1730 }
  0xbd   : > { %v1330_v10 = vld [vmem:[%s3486_s17 + $0x5b] sm:$0x1]  ;;  %1520 = vrot.lane.b32.xlu1 %v1503_v6, %s3444_s6  ;;  %v1174_v11 = vsel %vm239_vm3, %v1173_v51, %v1172_v7  ;;  %v1331_v12 = vld [vmem:[%s3486_s17 + $0x6b] sm:$0x1]  ;;  %171 = vst [vmem:[#allocation2] sm:$0xff] %v3445_v9  ;;  %v1375_v16 = vrot.slane %v1327_v0, 6 }
  0xbe   : > { %v1332_v13 = vld [vmem:[%s3486_s17 + $0x7b] sm:$0x1]  ;;  %v1176_v15 = vsel %vm242_vm4, %v1175_v52, %v1174_v11  ;;  %v1377_v17 = vrot.slane %v1328_v4, 5  ;;  %v1379_v18 = vrot.slane %v1329_v5, 4  ;;  %v703_v19 = vld [vmem:[%s3486_s17 + $0x5] sm:$0x1]  ;;  %v1374_v21 = vsel %vm230_vm0, %v1373_v14, %v1325_v61 }
  0xbf   : > { %v1178_v20 = vsel %vm245_vm5, %v1177_v57, %v1176_v15  ;;  %172 = vst [vmem:[#allocation2 + $0x8] sm:$0xff] %v3445_v9  ;;  %v1381_v22 = vrot.slane %v1330_v10, 3  ;;  %v1383_v23 = vrot.slane %v1331_v12, 2  ;;  %v704_v24 = vld [vmem:[%s3486_s17 + $0x15] sm:$0x1]  ;;  %v1376_v28 = vsel %vm233_vm1, %v1375_v16, %v1374_v21  ;;  %s3226_s24 = smul.u32 72, %s4838_s13 }
  0xc0   : > { %v1180_v27 = vsel %vm248_vm6, %v1179_v60, %v1178_v20  ;;  %175 = vst [vmem:[#allocation2 + $0x18] sm:$0xff] %v3445_v9  ;;  %v1385_v29 = vrot.slane %v1332_v13, 1  ;;  %v705_v30 = vld [vmem:[%s3486_s17 + $0x25] sm:$0x1]  ;;  %v706_v31 = vld [vmem:[%s3486_s17 + $0x35] sm:$0x1]  ;;  %v1378_v32 = vsel %vm236_vm2, %v1377_v17, %v1376_v28 }
  0xc1   : > { %1209 = vrot.lane.b32.xlu2 %v1180_v27, %s3437_s26  ;;  %176 = vst [vmem:[#allocation2 + $0x20] sm:$0xff] %v3445_v9  ;;  %v707_v33 = vld [vmem:[%s3486_s17 + $0x45] sm:$0x1]  ;;  %v708_v34 = vld [vmem:[%s3486_s17 + $0x55] sm:$0x1]  ;;  %v751_v35 = vrot.slane %v704_v24, 7  ;;  %v1380_v37 = vsel %vm239_vm3, %v1379_v18, %v1378_v32  ;;  %s4808_s27 = scalar_lea.vmem %s4834_s3, %s3226_s24 }
  0xc2   : > { %178 = vst [vmem:[#allocation2 + $0x30] sm:$0xff] %v3445_v9  ;;  %v709_v38 = vld [vmem:[%s3486_s17 + $0x65] sm:$0x1]  ;;  %v710_v39 = vld [vmem:[%s3486_s17 + $0x75] sm:$0x1]  ;;  %v753_v42 = vrot.slane %v705_v30, 6  ;;  %v1382_v43 = vsel %vm242_vm4, %v1381_v22, %v1380_v37  ;;  %v4252_v11 = vpop.permute.xlu0 %1005  ;;  %v4254_v12 = vpop.permute.xlu1 %1213 }
  0xc3   : > { %290 = vst.msk [vmem:[#allocation2 + $0x30] sm:$0xff] %vm4835_vm8, %v4089_v59  ;;  %v752_v44 = vsel %vm230_vm0, %v751_v35, %v703_v19  ;;  %v755_v45 = vrot.slane %v706_v31, 5  ;;  %v757_v46 = vrot.slane %v707_v33, 4  ;;  %v711_v47 = vld [vmem:[%s3486_s17 + $0x85] sm:$0x1]  ;;  %v1384_v49 = vsel %vm245_vm5, %v1383_v23, %v1382_v43 }
  0xc4   : > { %393 = vst.msk [vmem:[#allocation2 + $0x30] sm:$0xff] %vm390_vm9, %v4095_v2  ;;  %v754_v50 = vsel %vm233_vm1, %v753_v42, %v752_v44  ;;  %v759_v59 = vrot.slane %v708_v34, 3  ;;  %v761_v51 = vrot.slane %v709_v38, 2  ;;  %v712_v52 = vld [vmem:[%s3486_s17 + $0x95] sm:$0x1]  ;;  %v1386_v55 = vsel %vm248_vm6, %v1385_v29, %v1384_v49 }
  0xc5   : > { %v756_v56 = vsel %vm236_vm2, %v755_v45, %v754_v50  ;;  %v763_v57 = vrot.slane %v710_v39, 1  ;;  %v713_v60 = vld [vmem:[%s3486_s17 + $0xa5] sm:$0x1]  ;;  %v714_v61 = vld [vmem:[%s3486_s17 + $0xb5] sm:$0x1]  ;;  %v765_v62 = vrot.slane %v712_v52, 7  ;;  %1415 = vrot.lane.b32.xlu0 %v1386_v55, %s3442_s4 }
  0xc6   : > { %v758_v2 = vsel %vm239_vm3, %v757_v46, %v756_v56  ;;  %v715_v0 = vld [vmem:[%s3486_s17 + $0xc5] sm:$0x1]  ;;  %v716_v1 = vld [vmem:[%s3486_s17 + $0xd5] sm:$0x1]  ;;  %v767_v7 = vrot.slane %v713_v60, 6  ;;  %v769_v10 = vrot.slane %v714_v61, 5 }
  0xc7   : > { %v717_v3 = vld [vmem:[%s3486_s17 + $0xe5] sm:$0x1]  ;;  %v760_v4 = vsel %vm242_vm4, %v759_v59, %v758_v2  ;;  %v718_v5 = vld [vmem:[%s3486_s17 + $0xf5] sm:$0x1]  ;;  %v766_v6 = vsel %vm230_vm0, %v765_v62, %v711_v47  ;;  %910 = vst.msk [vmem:[#allocation2 + $0x20] sm:$0xff] %vm907_vm7, %v4172_v40  ;;  %v771_v14 = vrot.slane %v715_v0, 4  ;;  %v4273_v29 = vpop.permute.xlu2 %896 }
  0xc8   : > { %v762_v13 = vsel %vm245_vm5, %v761_v51, %v760_v4  ;;  %v773_v15 = vrot.slane %v716_v1, 3  ;;  %v775_v16 = vrot.slane %v717_v3, 2  ;;  %289 = vst.msk [vmem:[#allocation2 + $0x18] sm:$0xff] %vm4835_vm8, %v281_v26  ;;  %v768_v18 = vsel %vm233_vm1, %v767_v7, %v766_v6  ;;  %v600_v20 = vld [vmem:[%s3486_s17 + $0x4] sm:$0x1] }
  0xc9   : > { %v764_v17 = vsel %vm248_vm6, %v763_v57, %v762_v13  ;;  %v777_v19 = vrot.slane %v718_v5, 1  ;;  %v601_v21 = vld [vmem:[%s3486_s17 + $0x14] sm:$0x1]  ;;  %v602_v22 = vld [vmem:[%s3486_s17 + $0x24] sm:$0x1]  ;;  %v770_v23 = vsel %vm236_vm2, %v769_v10, %v768_v18  ;;  %180 = vst.msk [vmem:[#allocation2 + $0x40] sm:$0xff] %vm173_vm10, %v3445_v9 }
  0xca   : > { %793 = vrot.lane.b32.xlu1 %v764_v17, %s3443_s5  ;;  %v603_v24 = vld [vmem:[%s3486_s17 + $0x34] sm:$0x1]  ;;  %v772_v26 = vsel %vm239_vm3, %v771_v14, %v770_v23  ;;  %1637 = vst.msk [vmem:[#allocation2 + $0x40] sm:$0xff] %vm1632_vm11, %v4134_v53  ;;  %v604_v27 = vld [vmem:[%s3486_s17 + $0x44] sm:$0x1]  ;;  %v648_v33 = vrot.slane %v601_v21, 7  ;;  %v384_v49 = vpop.permute.xlu0 %383  ;;  %v592_v50 = vpop.permute.xlu1 %591 }
  0xcb   : > { %v605_v28 = vld [vmem:[%s3486_s17 + $0x54] sm:$0x1]  ;;  %v774_v30 = vsel %vm242_vm4, %v773_v15, %v772_v26  ;;  %174 = vst.msk [vmem:[#allocation2 + $0x10] sm:$0xff] %vm173_vm10, %v3445_v9  ;;  %v606_v31 = vld [vmem:[%s3486_s17 + $0x64] sm:$0x1]  ;;  %v650_v35 = vrot.slane %v602_v22, 6 }
  0xcc   : > { %v607_v32 = vld [vmem:[%s3486_s17 + $0x74] sm:$0x1]  ;;  %v776_v34 = vsel %vm245_vm5, %v775_v16, %v774_v30  ;;  %177 = vst.msk [vmem:[#allocation2 + $0x28] sm:$0xff] %vm173_vm10, %v3445_v9  ;;  %v652_v37 = vrot.slane %v603_v24, 5  ;;  %v654_v38 = vrot.slane %v604_v27, 4  ;;  %v649_v43 = vsel %vm230_vm0, %v648_v33, %v600_v20 }
  0xcd   : > { %v1428_v39 = vld [vmem:[%s3486_s17 + $0xc] sm:$0x1]  ;;  %v778_v42 = vsel %vm248_vm6, %v777_v19, %v776_v34  ;;  %1015 = vst.msk [vmem:[#allocation2 + $0x38] sm:$0xff] %vm1012_vm12, %v4136_v54  ;;  %v656_v44 = vrot.slane %v605_v28, 3  ;;  %v658_v45 = vrot.slane %v606_v31, 2  ;;  %v651_v9 = vsel %vm233_vm1, %v650_v35, %v649_v43 }
  0xce   : > { %v1429_v46 = vld [vmem:[%s3486_s17 + $0x1c] sm:$0x1]  ;;  %795 = vrot.lane.b32.xlu2 %v778_v42, %s3443_s5  ;;  %1635 = vst.msk [vmem:[#allocation2 + $0x28] sm:$0xff] %vm1632_vm11, %v4142_v63  ;;  %v660_v47 = vrot.slane %v607_v32, 1  ;;  %vm1840_vm10 = vcmask 400648   ;;  %v653_v59 = vsel %vm236_vm2, %v652_v37, %v651_v9  ;;  %vm1218_vm8 = vcmask 564648  }
  0xcf   : > { %v1430_v54 = vld [vmem:[%s3486_s17 + $0x2c] sm:$0x1]  ;;  %1118 = vst.msk [vmem:[#allocation2 + $0x38] sm:$0xff] %vm1115_vm13, %v4174_v41  ;;  %v1431_v51 = vld [vmem:[%s3486_s17 + $0x3c] sm:$0x1]  ;;  %v1476_v55 = vrot.slane %v1429_v46, 7  ;;  %v655_v56 = vsel %vm239_vm3, %v654_v38, %v653_v59 }
  0xd0   : > { %v1432_v52 = vld [vmem:[%s3486_s17 + $0x4c] sm:$0x1]  ;;  %496 = vst.msk [vmem:[#allocation2 + $0x30] sm:$0xff] %vm493_vm14, %v4180_v48  ;;  %v1433_v57 = vld [vmem:[%s3486_s17 + $0x5c] sm:$0x1]  ;;  %v1478_v60 = vrot.slane %v1430_v54, 6  ;;  %v657_v61 = vsel %vm242_vm4, %v656_v44, %v655_v56 }
  0xd1   : > { %1740 = vst.msk [vmem:[#allocation2 + $0x40] sm:$0xff] %vm1737_vm15, %v4050_v8  ;;  %v1434_v62 = vld [vmem:[%s3486_s17 + $0x6c] sm:$0x1]  ;;  %v1477_v41 = vsel %vm230_vm0, %v1476_v55, %v1428_v39  ;;  %v1480_v2 = vrot.slane %v1431_v51, 5  ;;  %v1482_v0 = vrot.slane %v1432_v52, 4  ;;  %v659_v1 = vsel %vm245_vm5, %v658_v45, %v657_v61 }
  0xd2   : > { %1843 = vst.msk [vmem:[#allocation2 + $0x40] sm:$0xff] %vm1840_vm10, %v4210_v25  ;;  %v1479_v48 = vsel %vm233_vm1, %v1478_v60, %v1477_v41  ;;  %v1484_v3 = vrot.slane %v1433_v57, 3  ;;  %v661_v4 = vsel %vm248_vm6, %v660_v47, %v659_v1  ;;  %v1435_v5 = vld [vmem:[%s3486_s17 + $0x7c] sm:$0x1]  ;;  %v1486_v7 = vrot.slane %v1434_v62, 2  ;;  %v1317_v13 = vpop.permute.xlu1 %1316 }
  0xd3   : > { %1739 = vst.msk [vmem:[#allocation2 + $0x28] sm:$0xff] %vm1737_vm15, %v4222_v36  ;;  %v1481_v8 = vsel %vm236_vm2, %v1480_v2, %v1479_v48  ;;  %v4320_v10 = vpop.permute.xlu2 %1621  ;;  %vm596_vm0 = vcmask 728648   ;;  %v1109_v36 = vpop.permute.xlu0 %1108  ;;  %v1488_v14 = vrot.slane %v1435_v5, 1  ;;  %vm1321_vm1 = vcmask 712248   ;;  %v3115_v5 = vld [vmem:[%s4831_s0 + $0x18] sm:$0xff] }
  0xd4   : > { %v1483_v6 = vsel %vm239_vm3, %v1482_v0, %v1481_v8  ;;  %1014 = vst.msk [vmem:[#allocation2 + $0x20] sm:$0xff] %vm1012_vm12, %v4252_v11  ;;  %vm4836_vm2 = vcmask 285848   ;;  %vm699_vm3 = vcmask 876248  }
  0xd5   : > { %v1485_v25 = vsel %vm242_vm4, %v1484_v3, %v1483_v6  ;;  %1221 = vst.msk [vmem:[#allocation2 + $0x38] sm:$0xff] %vm1218_vm8, %v4254_v12  ;;  %vm1424_vm4 = vcmask 859848  }
  0xd6   : > { %690 = vrot.lane.b32.xlu2 %v661_v4, %s3441_s30  ;;  %908 = vst.msk [vmem:[#allocation2 + $0x8] sm:$0xff] %vm907_vm7, %v4273_v29  ;;  %v1487_v11 = vsel %vm245_vm5, %v1486_v7, %v1485_v25  ;;  %vm802_vm5 = vcmask 1023848   ;;  %vm1527_vm7 = vcmask 1007448  }
  0xd7   : > { %392 = vst.msk [vmem:[#allocation2 + $0x18] sm:$0xff] %vm390_vm9, %v384_v49  ;;  %v1489_v12 = vsel %vm248_vm6, %v1488_v14, %v1487_v11  ;;  %vm905_vm6 = vcmask 1048568   ;;  %v3116_v14 = vld [vmem:[%s4831_s0 + $0x20] sm:$0xff] }
  0xd8   : > { %599 = vst.msk [vmem:[#allocation2 + $0x30] sm:$0xff] %vm596_vm0, %v592_v50 }
  0xd9   : > { %1633 = vst.msk [vmem:[#allocation2 + $0x10] sm:$0xff] %vm1632_vm11, %v4320_v10  ;;  %v4343_v21 = vld [vmem:[#allocation2 + $0x40] sm:$0xff]  ;;  %vm1630_vm11 = vcmask 1048552  }
  0xda   : > { %1117 = vst.msk [vmem:[#allocation2 + $0x20] sm:$0xff] %vm1115_vm13, %v1109_v36 }
  0xdb   : > { %1324 = vst.msk [vmem:[#allocation2 + $0x38] sm:$0xff] %vm1321_vm1, %v1317_v13  ;;  %v1834_v16 = vpop.permute.xlu0 %1833  ;;  %v279_v17 = vpop.permute.xlu1 %278 }
  0xdc   : > { %1842 = vst.msk [vmem:[#allocation2 + $0x28] sm:$0xff] %vm1840_vm10, %v1834_v16 }
  0xdd   : > { %288 = vst.msk [vmem:[#allocation2] sm:$0xff] %vm4836_vm2, %v279_v17  ;;  %vm3045_vm2 = vcmask 261120  }
  0xde   : > { %1518 = vrot.lane.b32.xlu2 %v1489_v12, %s3444_s6  ;;  %v4480_v12 = vld [vmem:[%s4831_s0 + $0x28] sm:$0xff] }
  0xdf   : > { %v487_v15 = vpop.permute.xlu2 %486 }
  0xe0   : > { %495 = vst.msk [vmem:[#allocation2 + $0x18] sm:$0xff] %vm493_vm14, %v487_v15 }
  0xe3   : > { %v695_v18 = vpop.permute.xlu0 %694  ;;  %v4341_v20 = vld [vmem:[#allocation2 + $0x28] sm:$0xff] }
  0xe4   : > { %702 = vst.msk [vmem:[#allocation2 + $0x30] sm:$0xff] %vm699_vm3, %v695_v18  ;;  %v4348_v22 = vpack.i.bf16 %v4341_v20, %v4343_v21 }
  0xe6   : > { %3259 = vrot.lane.b32.xlu0 %v4348_v22, %s3429_s18 }
  0xe7   : > { %v1004_v19 = vpop.permute.xlu1 %1003 }
  0xe8   : > { %1013 = vst.msk [vmem:[#allocation2 + $0x8] sm:$0xff] %vm1012_vm12, %v1004_v19  ;;  %vm2100_vm12 = vcmask 1031168  }
  0xeb   : > { %v1212_v23 = vpop.permute.xlu2 %1211 }
  0xec   : > { %1220 = vst.msk [vmem:[#allocation2 + $0x20] sm:$0xff] %vm1218_vm8, %v1212_v23 }
  0xef   : > { %v1420_v24 = vpop.permute.xlu0 %1419 }
  0xf0   : > { %1427 = vst.msk [vmem:[#allocation2 + $0x38] sm:$0xff] %vm1424_vm4, %v1420_v24 }
  0xf3   : > { %v1729_v26 = vpop.permute.xlu1 %1728 }
  0xf4   : > { %1738 = vst.msk [vmem:[#allocation2 + $0x10] sm:$0xff] %vm1737_vm15, %v1729_v26  ;;  %vm2636_vm15 = vcmask 752640  }
  0xf7   : > { %v382_v27 = vpop.permute.xlu2 %381 }
  0xf8   : > { %391 = vst.msk [vmem:[#allocation2] sm:$0xff] %vm390_vm9, %v382_v27  ;;  %vm1903_vm9 = vcmask 195584  }
  0xfb   : > { %v590_v28 = vpop.permute.xlu0 %589 }
  0xfc   : > { %598 = vst.msk [vmem:[#allocation2 + $0x18] sm:$0xff] %vm596_vm0, %v590_v28 }
  0xff   : > { %v798_v30 = vpop.permute.xlu1 %797 }
 0x100   : > { %805 = vst.msk [vmem:[#allocation2 + $0x30] sm:$0xff] %vm802_vm5, %v798_v30 }
 0x101   : > { %911 = vst.msk [vmem:[#allocation2 + $0x30] sm:$0xff] %vm905_vm6, %v4087_v58 }
 0x103   : > { %v1107_v31 = vpop.permute.xlu2 %1106 }
 0x104   : > { %1116 = vst.msk [vmem:[#allocation2 + $0x8] sm:$0xff] %vm1115_vm13, %v1107_v31  ;;  %vm2234_vm13 = vcmask 900096  }
 0x107   : > { %v1315_v32 = vpop.permute.xlu0 %1314 }
 0x108   : > { %1323 = vst.msk [vmem:[#allocation2 + $0x20] sm:$0xff] %vm1321_vm1, %v1315_v32  ;;  %v4367_v58 = vld [vmem:[#allocation2 + $0x30] sm:$0xff] }
 0x10b   : > { %v1523_v33 = vpop.permute.xlu1 %1522 }
 0x10c   : > { %1530 = vst.msk [vmem:[#allocation2 + $0x38] sm:$0xff] %vm1527_vm7, %v1523_v33 }
 0x10d   : > { %1636 = vst.msk [vmem:[#allocation2 + $0x38] sm:$0xff] %vm1630_vm11, %v4134_v53 }
 0x10f   : > { %v1832_v34 = vpop.permute.xlu2 %1831 }
 0x110   : > { %1841 = vst.msk [vmem:[#allocation2 + $0x10] sm:$0xff] %vm1840_vm10, %v1832_v34  ;;  %vm2502_vm10 = vcmask 883712  }
 0x113   : > { %v485_v35 = vpop.permute.xlu0 %484 }
 0x114   : > { %494 = vst.msk [vmem:[#allocation2] sm:$0xff] %vm493_vm14, %v485_v35  ;;  %v4390_v54 = vld [vmem:[#allocation2 + $0x38] sm:$0xff]  ;;  %vm2368_vm14 = vcmask 891904  }
 0x115   : > { %v3298_v61 = vpack.i.bf16 %v4343_v21, %v4390_v54 }
 0x117   : > { %v4369_v37 = vld [vmem:[#allocation2 + $0x10] sm:$0xff]  ;;  %v693_v38 = vpop.permute.xlu1 %692 }
 0x118   : > { %v4373_v39 = vpack.i.bf16 %v4367_v58, %v4369_v37  ;;  %701 = vst.msk [vmem:[#allocation2 + $0x18] sm:$0xff] %vm699_vm3, %v693_v38 }
 0x11a   : > { %3264 = vrot.lane.b32.xlu1 %v4373_v39, %s3429_s18 }
 0x11b   : > { %v1210_v53 = vpop.permute.xlu2 %1209 }
 0x11c   : > { %1219 = vst.msk [vmem:[#allocation2 + $0x8] sm:$0xff] %vm1218_vm8, %v1210_v53  ;;  %vm1887_vm8 = vcmask 1039360  }
 0x11f   : > { %v1418_v42 = vpop.permute.xlu0 %1417 }
 0x120   : > { %1426 = vst.msk [vmem:[#allocation2 + $0x20] sm:$0xff] %vm1424_vm4, %v1418_v42 }
 0x123   : > { %v588_v43 = vpop.permute.xlu1 %587 }
 0x124   : > { %597 = vst.msk [vmem:[#allocation2] sm:$0xff] %vm596_vm0, %v588_v43  ;;  %vm2770_vm0 = vcmask 744448  }
 0x128   : > { %v796_v44 = vpop.permute.xlu2 %795 }
 0x129   : > { %804 = vst.msk [vmem:[#allocation2 + $0x18] sm:$0xff] %vm802_vm5, %v796_v44 }
 0x12a   : > { %909 = vst.msk [vmem:[#allocation2 + $0x18] sm:$0xff] %vm905_vm6, %v4172_v40 }
 0x12b   : > { %v1313_v45 = vpop.permute.xlu0 %1312 }
 0x12c   : > { %1322 = vst.msk [vmem:[#allocation2 + $0x8] sm:$0xff] %vm1321_vm1, %v1313_v45  ;;  %vm2904_vm1 = vcmask 736256  }
 0x12f   : > { %v1521_v46 = vpop.permute.xlu1 %1520 }
 0x130   : > { %1529 = vst.msk [vmem:[#allocation2 + $0x20] sm:$0xff] %vm1527_vm7, %v1521_v46  ;;  %v691_v9 = vpop.permute.xlu2 %690  ;;  %v4520_v46 = vld [vmem:[%s4831_s0 + $0x30] sm:$0xff] }
 0x131   : > { %1634 = vst.msk [vmem:[#allocation2 + $0x20] sm:$0xff] %vm1630_vm11, %v4142_v63  ;;  %v4388_v47 = vld [vmem:[#allocation2 + $0x18] sm:$0xff]  ;;  %v3278_v63 = vpack.i.bf16 %v4390_v54, %v4367_v58 }
 0x132   : > { %700 = vst.msk [vmem:[#allocation2] sm:$0xff] %vm699_vm3, %v691_v9  ;;  %v4395_v49 = vpack.i.bf16 %v4388_v47, %v4390_v54  ;;  %v3313_v62 = vpack.i.bf16 %v4388_v47, %v4367_v58 }
 0x134   : > { %3269 = vrot.lane.b32.xlu2 %v4395_v49, %s3429_s18 }
 0x137   : > { %v1416_v40 = vpop.permute.xlu0 %1415 }
 0x138   : > { %1425 = vst.msk [vmem:[#allocation2 + $0x8] sm:$0xff] %vm1424_vm4, %v1416_v40  ;;  %v1519_v50 = vpop.permute.xlu2 %1518  ;;  %v4415_v55 = vld [vmem:[#allocation2 + $0x20] sm:$0xff] }
 0x139   : > { %1528 = vst.msk [vmem:[#allocation2 + $0x8] sm:$0xff] %vm1527_vm7, %v1519_v50  ;;  %v3283_v60 = vpack.i.bf16 %v4415_v55, %v4388_v47 }
 0x13a   : > { %1631 = vst.msk [vmem:[#allocation2 + $0x8] sm:$0xff] %vm1630_vm11, %v4320_v10 }
 0x13c   : > { %v794_v59 = vpop.permute.xlu1 %793  ;;  %3279 = vrot.lane.b32.xlu2 %v3278_v63, %s3446_s7 }
 0x13d   : > { %803 = vst.msk [vmem:[#allocation2] sm:$0xff] %vm802_vm5, %v794_v59 }
 0x13e   : > { %906 = vst.msk [vmem:[#allocation2] sm:$0xff] %vm905_vm6, %v4273_v29  ;;  %v3303_v29 = vpack.i.bf16 %v4341_v20, %v4415_v55 }
 0x141   : > { %v4408_v51 = vld [vmem:[#allocation2 + $0x8] sm:$0xff] }
 0x142   : > { %1871 = vrot.lane.b32.xlu1 %v4408_v51, %s3429_s18  ;;  %v3308_v2 = vpack.i.bf16 %v4369_v37, %v4408_v51 }
 0x144   : > { %3294 = vrot.lane.b32.xlu2 %v4348_v22, %s3446_s7 }
 0x145   : > { %v4413_v52 = vld [vmem:[#allocation2] sm:$0xff] }
 0x146   : > { %v3273_v56 = vpack.i.bf16 %v4413_v52, %v4415_v55  ;;  %v3288_v57 = vpack.i.bf16 %v4408_v51, %v4413_v52 }
 0x148   : > { %3274 = vrot.lane.b32.xlu0 %v3273_v56, %s3429_s18 }
 0x14a   : > { %3289 = vrot.lane.b32.xlu1 %v3288_v57, %s3446_s7 }
 0x14c   : > { %3304 = vrot.lane.b32.xlu2 %v3303_v29, %s3447_s8 }
 0x150   : > { %3284 = vrot.lane.b32.xlu0 %v3283_v60, %s3446_s7 }
 0x152   : > { %2086 = vrot.lane.b32.xlu1 %v4369_v37, %s3446_s7 }
 0x154   : > { %2216 = vrot.lane.b32.xlu2 %v4413_v52, %s3447_s8 }
 0x158   : > { %3299 = vrot.lane.b32.xlu0 %v3298_v61, %s3447_s8  ;;  %v4434_v41 = vpop.permute.xlu0 %3259 }
 0x159   : > { %v3261_v0 = vunpack.i.l.bf16 %v4434_v41  ;;  %v3262_v1 = vunpack.i.h.bf16 %v4434_v41 }
 0x15a   : > { %3314 = vrot.lane.b32.xlu1 %v3313_v62, %s3447_s8 }
 0x15b   : > { %1978 = vmatpush.msra.mxu2 %v3261_v0 }
 0x15c   : > { %3329 = vrot.lane.b32.xlu2 %v4395_v49, %s3443_s5 }
 0x15d   : > { %1979 = vmatpush.msra.mxu2 %v3262_v1 }
 0x160   : > { %3309 = vrot.lane.b32.xlu0 %v3308_v2, %s3447_s8 }
 0x162   : > { %3324 = vrot.lane.b32.xlu1 %v4373_v39, %s3443_s5 }
 0x164   : > { %3339 = vrot.lane.b32.xlu2 %v3278_v63, %s3448_s9 }
 0x168   : > { %3319 = vrot.lane.b32.xlu0 %v4348_v22, %s3443_s5 }
 0x16a   : > { %2352 = vrot.lane.b32.xlu1 %v4408_v51, %s3443_s5 }
 0x16c   : > { %3354 = vrot.lane.b32.xlu2 %v3288_v57, %s3448_s9 }
 0x170   : > { %3334 = vrot.lane.b32.xlu0 %v3273_v56, %s3443_s5 }
 0x172   : > { %3349 = vrot.lane.b32.xlu1 %v3278_v63, %s3449_s10 }
 0x174   : > { %3369 = vrot.lane.b32.xlu2 %v4348_v22, %s3448_s9 }
 0x178   : > { %3344 = vrot.lane.b32.xlu0 %v3283_v60, %s3448_s9 }
 0x17a   : > { %3364 = vrot.lane.b32.xlu1 %v3288_v57, %s3449_s10  ;;  %v1854_v57 = vld [vmem:[%s4831_s0 + $0x8] sm:$0xff] }
 0x17c   : > { %3379 = vrot.lane.b32.xlu2 %v3298_v61, %s3441_s30 }
 0x180   : > { %3359 = vrot.lane.b32.xlu0 %v3283_v60, %s3449_s10 }
 0x182   : > { %3374 = vrot.lane.b32.xlu1 %v4348_v22, %s3449_s10 }
 0x184   : > { %3389 = vrot.lane.b32.xlu2 %v3308_v2, %s3441_s30 }
 0x188   : > { %2488 = vrot.lane.b32.xlu0 %v4369_v37, %s3448_s9 }
 0x18a   : > { %3384 = vrot.lane.b32.xlu1 %v3303_v29, %s3441_s30  ;;  %v4542_v29 = vld [vmem:[%s4831_s0 + $0x38] sm:$0xff] }
 0x18c   : > { %v3265_v48 = vpop.permute.xlu1 %3264  ;;  %3399 = vrot.lane.b32.xlu2 %v4348_v22, %s3450_s11 }
 0x18d   : > { %v3266_v3 = vunpack.i.l.bf16 %v3265_v48  ;;  %v3267_v4 = vunpack.i.h.bf16 %v3265_v48 }
 0x18e   : > { %v3270_v8 = vpop.permute.xlu2 %3269 }
 0x18f   : > { %1980 = vmatpush.msra.mxu2 %v3266_v3  ;;  %v3271_v6 = vunpack.i.l.bf16 %v3270_v8  ;;  %v3272_v22 = vunpack.i.h.bf16 %v3270_v8 }
 0x190   : > { %2622 = vrot.lane.b32.xlu0 %v4369_v37, %s3449_s10  ;;  %3124 = vmatmul.msk.f32.vlgmr.msra.gmra.mxu2 %vm1903_vm9, %v3115_v5 }
 0x191   : > { %v1893_v7 = vsel %vm1887_vm8, %v3271_v6, %v3261_v0  ;;  %v1892_v10 = vsel %vm1887_vm8, %v3267_v4, %v3271_v6  ;;  %v4564_v6 = vld [vmem:[%s4831_s0 + $0x40] sm:$0xff] }
 0x192   : > { %1952 = vmatpush.msra.mxu1 %v1893_v7  ;;  %1926 = vmatpush.msra.mxu0 %v1892_v10 }
 0x193   : > { %3222 = vmatpush.msra.mxu3 %v1892_v10  ;;  %2752 = vrot.lane.b32.xlu1 %v4413_v52, %s3441_s30 }
 0x194   : > { %3414 = vrot.lane.b32.xlu2 %v3273_v56, %s3450_s11 }
 0x196   : > { %v3280_v25 = vpop.permute.xlu2 %3279 }
 0x197   : > { %v3282_v36 = vunpack.i.h.bf16 %v3280_v25  ;;  %v3281_v13 = vunpack.i.l.bf16 %v3280_v25 }
 0x198   : > { %3394 = vrot.lane.b32.xlu0 %v3313_v62, %s3441_s30  ;;  %3125 = vmatmul.msk.f32.gmra.mxu2 %vm1903_vm9, %v3116_v14 }
 0x199   : > { %v2105_v11 = vsel %vm2100_vm12, %v3281_v13, %v3282_v36 }
 0x19a   : > { %2138 = vmatpush.msrb.mxu2 %v2105_v11 }
 0x19b   : > { %3409 = vrot.lane.b32.xlu1 %v4395_v49, %s3450_s11 }
 0x19e   : > { %v3295_v15 = vpop.permute.xlu2 %3294 }
 0x19f   : > { %v3296_v33 = vunpack.i.l.bf16 %v3295_v15  ;;  %v3297_v44 = vunpack.i.h.bf16 %v3295_v15 }
 0x1a0   : > { %3404 = vrot.lane.b32.xlu0 %v4373_v39, %s3450_s11  ;;  %3126 = vmatmul.msk.f32.gmra.mxu2 %vm1903_vm9, %v4480_v12 }
 0x1a6   : > { %v4486_v16 = vpop.permute.xlu2 %3304 }
 0x1a8   : > { %2888 = vrot.lane.b32.xlu0 %v4408_v51, %s3450_s11 }
 0x1ae   : > { %v4488_v18 = vpop.permute.xlu2 %2216 }
 0x1b4   : > { %v1872_v17 = vpop.permute.xlu1 %1871 }
 0x1b5   : > { %v1889_v31 = vsel %vm1887_vm8, %v1872_v17, %v3266_v3 }
 0x1b6   : > { %v4499_v34 = vpop.permute.xlu2 %3329 }
 0x1b7   : > { %v3331_v48 = vunpack.i.l.bf16 %v4499_v34 }
 0x1ba   : > { %v3275_v19 = vpop.permute.xlu0 %3274 }
 0x1bb   : > { %v3277_v23 = vunpack.i.h.bf16 %v3275_v19  ;;  %v3276_v24 = vunpack.i.l.bf16 %v3275_v19 }
 0x1bc   : > { %v3290_v28 = vpop.permute.xlu1 %3289 }
 0x1bd   : > { %v1890_v26 = vsel %vm1887_vm8, %v3272_v22, %v3276_v24  ;;  %v1891_v27 = vsel %vm1887_vm8, %v3276_v24, %v3262_v1  ;;  %v1888_v30 = vsel %vm1887_vm8, %v3277_v23, %v1872_v17  ;;  %v3292_v39 = vunpack.i.h.bf16 %v3290_v28 }
 0x1be   : > { %1927 = vmatpush.msra.mxu0 %v1890_v26  ;;  %3223 = vmatpush.msra.mxu3 %v1890_v26  ;;  %v3291_v53 = vunpack.i.l.bf16 %v3290_v28  ;;  %v4531_v50 = vpop.permute.xlu2 %3339 }
 0x1bf   : > { %1953 = vmatpush.msra.mxu1 %v1891_v27  ;;  %v3342_v26 = vunpack.i.h.bf16 %v4531_v50 }
 0x1c0   : > { %1928 = vmatpush.msra.mxu0 %v1888_v30  ;;  %3224 = vmatpush.msra.mxu3 %v1888_v30 }
 0x1c1   : > { %1954 = vmatpush.msra.mxu1 %v1889_v31  ;;  %3118 = vmatmul.msk.f32.vlgmr.msra.gmra.mxu0 %vm1903_vm9, %v3115_v5 }
 0x1c2   : > { %3119 = vmatmul.msk.f32.vlgmr.msra.gmra.mxu3 %vm1903_vm9, %v3116_v14  ;;  %3121 = vmatmul.msk.f32.vlgmr.msra.gmra.mxu1 %vm1903_vm9, %v3115_v5  ;;  %v3285_v32 = vpop.permute.xlu0 %3284  ;;  %v1855_v5 = vld [vmem:[%s4831_s0 + $0x10] sm:$0xff] }
 0x1c3   : > { %2013 = vmatpush.msrb.mxu3 %v4367_v58  ;;  %2039 = vmatpush.msrb.mxu0 %v4390_v54  ;;  %v3287_v35 = vunpack.i.h.bf16 %v3285_v32  ;;  %v3286_v38 = vunpack.i.l.bf16 %v3285_v32  ;;  %v2106_v58 = vsel %vm2100_vm12, %v3282_v36, %v3296_v33  ;;  %v3306_v54 = vunpack.i.l.bf16 %v4486_v16 }
 0x1c4   : > { %2065 = vmatpush.msrb.mxu1 %v4343_v21  ;;  %v2087_v43 = vpop.permute.xlu1 %2086  ;;  %v2101_v21 = vsel %vm2100_vm12, %v3291_v53, %v3292_v39  ;;  %v3341_v32 = vunpack.i.l.bf16 %v4531_v50 }
 0x1c5   : > { %2014 = vmatpush.msrb.mxu3 %v4388_v47  ;;  %2040 = vmatpush.msrb.mxu0 %v4415_v55  ;;  %v2103_v42 = vsel %vm2100_vm12, %v3286_v38, %v3287_v35  ;;  %v2104_v45 = vsel %vm2100_vm12, %v3287_v35, %v3297_v44  ;;  %v2102_v9 = vsel %vm2100_vm12, %v3292_v39, %v2087_v43  ;;  %v3307_v47 = vunpack.i.h.bf16 %v4486_v16  ;;  %v4604_v35 = vld [vmem:[%s4831_s0 + $0x50] sm:$0xff] }
 0x1c6   : > { %2066 = vmatpush.msrb.mxu1 %v4341_v20  ;;  %2139 = vmatpush.msrb.mxu2 %v2103_v42  ;;  %v1853_v20 = vld [vmem:[%s4831_s0] sm:$0xff]  ;;  %v4555_v4 = vpop.permute.xlu2 %3354  ;;  %v3332_v16 = vunpack.i.h.bf16 %v4499_v34 }
 0x1c7   : > { %2015 = vmatpush.msrb.mxu3 %v4413_v52  ;;  %2041 = vmatpush.msrb.mxu0 %v4408_v51  ;;  %v2238_v55 = vsel %vm2234_vm13, %v3306_v54, %v3307_v47 }
 0x1c8   : > { %2067 = vmatpush.msrb.mxu1 %v4369_v37  ;;  %2140 = vmatpush.msrb.mxu2 %v2101_v21 }
 0x1c9   : > { %2164 = vmatpush.msra.mxu3 %v2106_v58  ;;  %2190 = vmatpush.msra.mxu0 %v3296_v33  ;;  %v2507_v58 = vsel %vm2502_vm10, %v3341_v32, %v3342_v26 }
 0x1ca   : > { %3122 = vmatmul.msk.f32.gmra.mxu1 %vm1903_vm9, %v3116_v14  ;;  %v3300_v37 = vpop.permute.xlu0 %3299  ;;  %3120 = vmatmul.msk.f32.gmra.mxu3 %vm1903_vm9, %v4480_v12 }
 0x1cb   : > { %2165 = vmatpush.msra.mxu3 %v2104_v45  ;;  %2191 = vmatpush.msra.mxu0 %v3297_v44  ;;  %v3302_v49 = vunpack.i.h.bf16 %v3300_v37  ;;  %v3301_v40 = vunpack.i.l.bf16 %v3300_v37  ;;  %v3356_v44 = vunpack.i.l.bf16 %v4555_v4  ;;  %v4625_v37 = vld [vmem:[%s4831_s0 + $0x58] sm:$0xff] }
 0x1cc   : > { %3130 = vmatmul.msk.f32.vlgmr.msrb.gmra.mxu0 %vm1903_vm9, %v1853_v20  ;;  %3139 = vmatmul.msk.f32.vlgmr.msrb.gmra.mxu2 %vm1903_vm9, %v4520_v46  ;;  %v3315_v59 = vpop.permute.xlu1 %3314 }
 0x1cd   : > { %2192 = vmatpush.msra.mxu0 %v2087_v43  ;;  %2166 = vmatpush.msra.mxu3 %v2102_v9  ;;  %v2240_v63 = vsel %vm2234_vm13, %v3301_v40, %v3302_v49  ;;  %v3317_v51 = vunpack.i.h.bf16 %v3315_v59  ;;  %v3316_v52 = vunpack.i.l.bf16 %v3315_v59  ;;  %v3357_v43 = vunpack.i.h.bf16 %v4555_v4 }
 0x1ce   : > { %2298 = vmatpush.msra.mxu2 %v2240_v63  ;;  %v4572_v11 = vpop.permute.xlu2 %3369 }
 0x1cf   : > { %v2239_v56 = vsel %vm2234_vm13, %v3316_v52, %v3301_v40  ;;  %v2237_v61 = vsel %vm2234_vm13, %v3317_v51, %v3306_v54  ;;  %v3371_v19 = vunpack.i.l.bf16 %v4572_v11  ;;  %v3372_v39 = vunpack.i.h.bf16 %v4572_v11 }
 0x1d0   : > { %2299 = vmatpush.msra.mxu2 %v2238_v55  ;;  %2272 = vmatpush.msra.mxu1 %v2239_v56  ;;  %v3160_v56 = vld [vmem:[%s4831_s0 + $0x60] sm:$0xff] }
 0x1d1   : > { %v2508_v33 = vsel %vm2502_vm10, %v3342_v26, %v3371_v19 }
 0x1d2   : > { %3123 = vmatmul.msk.f32.gmra.mxu1 %vm1903_vm9, %v4480_v12  ;;  %v3310_v60 = vpop.permute.xlu0 %3309  ;;  %3127 = vmatmul.msk.f32.vlgmr.msrb.gmra.mxu3 %vm1903_vm9, %v1853_v20  ;;  %v4577_v12 = vld [vmem:[%s4831_s0 + $0x48] sm:$0xff] }
 0x1d3   : > { %v3312_v62 = vunpack.i.h.bf16 %v3310_v60  ;;  %v3311_v41 = vunpack.i.l.bf16 %v3310_v60  ;;  %2273 = vmatpush.msra.mxu1 %v2237_v61  ;;  %2324 = vmatpush.msrb.mxu3 %v3302_v49 }
 0x1d4   : > { %3131 = vmatmul.msk.f32.gmra.mxu0 %vm1903_vm9, %v1854_v57  ;;  %3140 = vmatmul.msk.f32.gmra.mxu2 %vm1903_vm9, %v4542_v29  ;;  %v3325_v0 = vpop.permute.xlu1 %3324 }
 0x1d5   : > { %v2236_v2 = vsel %vm2234_vm13, %v3311_v41, %v3312_v62  ;;  %v2235_v1 = vsel %vm2234_vm13, %v4488_v18, %v3311_v41  ;;  %v3327_v3 = vunpack.i.h.bf16 %v3325_v0  ;;  %2325 = vmatpush.msrb.mxu3 %v3307_v47  ;;  %v3326_v14 = vunpack.i.l.bf16 %v3325_v0 }
 0x1d6   : > { %2300 = vmatpush.msra.mxu2 %v2236_v2  ;;  %2274 = vmatpush.msra.mxu1 %v2235_v1  ;;  %v4629_v47 = vpop.permute.xlu2 %3379 }
 0x1d7   : > { %v2373_v8 = vsel %vm2368_vm14, %v3327_v3, %v3331_v48  ;;  %2326 = vmatpush.msrb.mxu3 %v3312_v62  ;;  %v3382_v52 = vunpack.i.h.bf16 %v4629_v47  ;;  %v3381_v55 = vunpack.i.l.bf16 %v4629_v47  ;;  %v3451_v47 = vmov 0  }
 0x1d8   : > { %2406 = vmatpush.msrb.mxu0 %v2373_v8  ;;  %v3161_v8 = vld [vmem:[%s4831_s0 + $0x68] sm:$0xff]  ;;  %3418 = vset.pattern.permute.xlu1 %v3451_v47 }
 0x1d9   : > { %v2776_v61 = vsel %vm2770_vm0, %v3381_v55, %v3382_v52  ;;  %3420 = vset.pattern.permute.xlu0 %v3451_v47  ;;  %3419 = vset.pattern.permute.xlu2 %v3451_v47 }
 0x1da   : > { %3133 = vmatmul.msk.f32.vlgmr.msrb.gmra.mxu1 %vm1903_vm9, %v1853_v20  ;;  %v3320_v7 = vpop.permute.xlu0 %3319  ;;  %3128 = vmatmul.msk.f32.gmra.mxu3 %vm1903_vm9, %v1854_v57 }
 0x1db   : > { %v3321_v10 = vunpack.i.l.bf16 %v3320_v7  ;;  %v3322_v25 = vunpack.i.h.bf16 %v3320_v7 }
 0x1dc   : > { %3132 = vmatmul.msk.f32.gmra.mxu0 %vm1903_vm9, %v1855_v5  ;;  %3141 = vmatmul.msk.f32.gmra.mxu2 %vm1903_vm9, %v4564_v6  ;;  %v2353_v13 = vpop.permute.xlu1 %2352 }
 0x1dd   : > { %2458 = vmatpush.msrb.mxu2 %v3321_v10  ;;  %v2374_v36 = vsel %vm2368_vm14, %v3331_v48, %v3321_v10  ;;  %v2370_v31 = vsel %vm2368_vm14, %v2353_v13, %v3326_v14 }
 0x1de   : > { %2432 = vmatpush.msrb.mxu1 %v2374_v36  ;;  %v4656_v62 = vpop.permute.xlu2 %3389 }
 0x1df   : > { %2459 = vmatpush.msrb.mxu2 %v3322_v25  ;;  %v3392_v48 = vunpack.i.h.bf16 %v4656_v62  ;;  %v3391_v3 = vunpack.i.l.bf16 %v4656_v62 }
 0x1e1   : > { %2460 = vmatpush.msrb.mxu2 %v3326_v14  ;;  %v2772_v7 = vsel %vm2770_vm0, %v3391_v3, %v3392_v48  ;;  %v3162_v14 = vld [vmem:[%s4831_s0 + $0x70] sm:$0xff] }
 0x1e2   : > { %3134 = vmatmul.msk.f32.gmra.mxu1 %vm1903_vm9, %v1854_v57  ;;  %v3335_v15 = vpop.permute.xlu0 %3334  ;;  %3129 = vmatmul.msk.f32.gmra.mxu3 %vm1903_vm9, %v1855_v5 }
 0x1e3   : > { %v3337_v17 = vunpack.i.h.bf16 %v3335_v15  ;;  %v3336_v18 = vunpack.i.l.bf16 %v3335_v15 }
 0x1e4   : > { %3145 = vmatmul.msk.f32.vlgmr.msra.gmra.mxu0 %vm1903_vm9, %v4520_v46  ;;  %3154 = vmatmul.msk.f32.vlgmr.msra.gmra.mxu2 %vm1903_vm9, %v4577_v12  ;;  %v4589_v24 = vpop.permute.xlu1 %3349 }
 0x1e5   : > { %v2371_v22 = vsel %vm2368_vm14, %v3332_v16, %v3336_v18  ;;  %v2372_v23 = vsel %vm2368_vm14, %v3336_v18, %v3322_v25  ;;  %v3352_v27 = vunpack.i.h.bf16 %v4589_v24  ;;  %v3351_v28 = vunpack.i.l.bf16 %v4589_v24 }
 0x1e6   : > { %2407 = vmatpush.msrb.mxu0 %v2371_v22  ;;  %2433 = vmatpush.msrb.mxu1 %v2372_v23  ;;  %v2369_v30 = vsel %vm2368_vm14, %v3337_v17, %v2353_v13  ;;  %v3400_v13 = vpop.permute.xlu2 %3399  ;;  %v3172_v22 = vld [vmem:[%s4831_s0 + $0x78] sm:$0xff]  ;;  %v3184_v23 = vld [vmem:[%s4831_s0 + $0x90] sm:$0xff] }
 0x1e7   : > { %v2641_v34 = vsel %vm2636_vm15, %v3351_v28, %v3352_v27  ;;  %v3401_v28 = vunpack.i.l.bf16 %v3400_v13  ;;  %v3402_v32 = vunpack.i.h.bf16 %v3400_v13 }
 0x1e8   : > { %2408 = vmatpush.msrb.mxu0 %v2369_v30  ;;  %2434 = vmatpush.msrb.mxu1 %v2370_v31 }
 0x1e9   : > { %2674 = vmatpush.msra.mxu2 %v2641_v34 }
 0x1ea   : > { %2566 = vmatpush.msra.mxu0 %v2508_v33  ;;  %3135 = vmatmul.msk.f32.gmra.mxu1 %vm1903_vm9, %v1855_v5  ;;  %v3345_v38 = vpop.permute.xlu0 %3344 }
 0x1eb   : > { %3142 = vmatmul.msk.f32.vlgmr.msra.gmra.mxu3 %vm1903_vm9, %v4520_v46  ;;  %v3347_v53 = vunpack.i.h.bf16 %v3345_v38  ;;  %v3346_v42 = vunpack.i.l.bf16 %v3345_v38  ;;  %v2503_v46 = vsel %vm2502_vm10, %v3356_v44, %v3357_v43 }
 0x1ec   : > { %3146 = vmatmul.msk.f32.gmra.mxu0 %vm1903_vm9, %v4542_v29  ;;  %3155 = vmatmul.msk.f32.gmra.mxu2 %vm1903_vm9, %v4604_v35  ;;  %v4619_v20 = vpop.permute.xlu1 %3364 }
 0x1ed   : > { %2540 = vmatpush.msra.mxu3 %v2507_v58  ;;  %v2505_v21 = vsel %vm2502_vm10, %v3346_v42, %v3347_v53  ;;  %v2506_v45 = vsel %vm2502_vm10, %v3347_v53, %v3372_v39  ;;  %v3367_v54 = vunpack.i.h.bf16 %v4619_v20  ;;  %v3366_v49 = vunpack.i.l.bf16 %v4619_v20  ;;  %v3173_v53 = vld [vmem:[%s4831_s0 + $0x80] sm:$0xff]  ;;  %v3174_v58 = vld [vmem:[%s4831_s0 + $0x88] sm:$0xff] }
 0x1ee   : > { %2567 = vmatpush.msra.mxu0 %v2506_v45  ;;  %v3415_v24 = vpop.permute.xlu2 %3414  ;;  %v3186_v45 = vld [vmem:[%s4831_s0 + $0xa0] sm:$0xff] }
 0x1ef   : > { %2541 = vmatpush.msra.mxu3 %v2505_v21  ;;  %v2637_v51 = vsel %vm2636_vm15, %v3366_v49, %v3367_v54  ;;  %v3416_v33 = vunpack.i.l.bf16 %v3415_v24  ;;  %v3197_v49 = vld [vmem:[%s4831_s0 + $0xb0] sm:$0xff] }
 0x1f1   : > { %2542 = vmatpush.msra.mxu3 %v2503_v46  ;;  %v2908_v20 = vsel %vm2904_vm1, %v3416_v33, %v3402_v32 }
 0x1f2   : > { %3151 = vmatmul.msk.f32.vlgmr.msra.gmra.mxu1 %vm1903_vm9, %v4577_v12  ;;  %v3360_v9 = vpop.permute.xlu0 %3359 }
 0x1f3   : > { %3143 = vmatmul.msk.f32.gmra.mxu3 %vm1903_vm9, %v4542_v29  ;;  %2592 = vmatpush.msra.mxu1 %v3371_v19  ;;  %v3362_v40 = vunpack.i.h.bf16 %v3360_v9  ;;  %v3361_v50 = vunpack.i.l.bf16 %v3360_v9  ;;  %v3016_v9 = vld [vmem:[%s4832_s1] sm:$0xff] }
 0x1f4   : > { %3147 = vmatmul.msk.f32.gmra.mxu0 %vm1903_vm9, %v4564_v6  ;;  %3156 = vmatmul.msk.f32.gmra.mxu2 %vm1903_vm9, %v4625_v37  ;;  %v3375_v59 = vpop.permute.xlu1 %3374 }
 0x1f5   : > { %2593 = vmatpush.msra.mxu1 %v3372_v39  ;;  %v2639_v63 = vsel %vm2636_vm15, %v3361_v50, %v3362_v40  ;;  %v3376_v57 = vunpack.i.l.bf16 %v3375_v59  ;;  %v3377_v2 = vunpack.i.h.bf16 %v3375_v59  ;;  %v3417_v39 = vunpack.i.h.bf16 %v3415_v24  ;;  %3021 = vperm.xlu1 %3418, %v3016_v9  }
 0x1f6   : > { %2675 = vmatpush.msra.mxu2 %v2639_v63 }
 0x1f7   : > { %v2640_v10 = vsel %vm2636_vm15, %v3362_v40, %v3377_v2  ;;  %v3198_v40 = vld [vmem:[%s4831_s0 + $0xb8] sm:$0xff] }
 0x1f8   : > { %2676 = vmatpush.msra.mxu2 %v2637_v51  ;;  %v3018_v51 = vld [vmem:[%s4832_s1 + $0x10] sm:$0xff] }
 0x1f9   : > { %3031 = vperm.xlu0 %3420, %v3018_v51  }
 0x1fa   : > { %3152 = vmatmul.msk.f32.gmra.mxu1 %vm1903_vm9, %v4604_v35  ;;  %v2489_v29 = vpop.permute.xlu0 %2488 }
 0x1fb   : > { %3144 = vmatmul.msk.f32.gmra.mxu3 %vm1903_vm9, %v4564_v6  ;;  %2594 = vmatpush.msra.mxu1 %v2489_v29  ;;  %v2504_v60 = vsel %vm2502_vm10, %v3357_v43, %v2489_v29  ;;  %v2642_v6 = vsel %vm2636_vm15, %v3352_v27, %v3376_v57  ;;  %v3185_v43 = vld [vmem:[%s4831_s0 + $0x98] sm:$0xff] }
 0x1fc   : > { %3163 = vmatmul.msk.f32.vlgmr.msrb.gmra.mxu0 %vm1903_vm9, %v3160_v56  ;;  %3169 = vmatmul.msk.f32.vlgmr.msrb.gmra.mxu2 %vm1903_vm9, %v3160_v56  ;;  %v4658_v41 = vpop.permute.xlu1 %3384 }
 0x1fd   : > { %2834 = vmatpush.msrb.mxu2 %v2776_v61  ;;  %2568 = vmatpush.msra.mxu0 %v2504_v60  ;;  %v3387_v0 = vunpack.i.h.bf16 %v4658_v41  ;;  %v3386_v1 = vunpack.i.l.bf16 %v4658_v41  ;;  %v3209_v60 = vld [vmem:[%s4831_s0 + $0xc8] sm:$0xff] }
 0x1ff   : > { %2726 = vmatpush.msrb.mxu0 %v3376_v57  ;;  %v2774_v4 = vsel %vm2770_vm0, %v3386_v1, %v3387_v0 }
 0x200   : > { %2835 = vmatpush.msrb.mxu2 %v2774_v4 }
 0x201   : > { %2727 = vmatpush.msrb.mxu0 %v3377_v2 }
 0x202   : > { %3153 = vmatmul.msk.f32.gmra.mxu1 %vm1903_vm9, %v4625_v37  ;;  %v2623_v5 = vpop.permute.xlu0 %2622  ;;  %2836 = vmatpush.msrb.mxu2 %v2772_v7 }
 0x203   : > { %3157 = vmatmul.msk.f32.vlgmr.msrb.gmra.mxu3 %vm1903_vm9, %v4577_v12  ;;  %2728 = vmatpush.msrb.mxu0 %v2623_v5  ;;  %v2638_v25 = vsel %vm2636_vm15, %v3367_v54, %v2623_v5 }
 0x204   : > { %3164 = vmatmul.msk.f32.gmra.mxu0 %vm1903_vm9, %v3161_v8  ;;  %3170 = vmatmul.msk.f32.gmra.mxu2 %vm1903_vm9, %v3161_v8 }
 0x205   : > { %2700 = vmatpush.msrb.mxu3 %v2642_v6  ;;  %v2753_v36 = vpop.permute.xlu1 %2752 }
 0x206   : > { %v2771_v27 = vsel %vm2770_vm0, %v2753_v36, %v3391_v3 }
 0x207   : > { %2701 = vmatpush.msrb.mxu3 %v2640_v10 }
 0x209   : > { %2702 = vmatpush.msrb.mxu3 %v2638_v25 }
 0x20a   : > { %3166 = vmatmul.msk.f32.vlgmr.msrb.gmra.mxu1 %vm1903_vm9, %v3160_v56  ;;  %v3395_v11 = vpop.permute.xlu0 %3394 }
 0x20b   : > { %3158 = vmatmul.msk.f32.gmra.mxu3 %vm1903_vm9, %v4604_v35  ;;  %v3397_v12 = vunpack.i.h.bf16 %v3395_v11  ;;  %v3396_v15 = vunpack.i.l.bf16 %v3395_v11 }
 0x20c   : > { %3165 = vmatmul.msk.f32.gmra.mxu0 %vm1903_vm9, %v3162_v14  ;;  %3171 = vmatmul.msk.f32.gmra.mxu2 %vm1903_vm9, %v3162_v14 }
 0x20d   : > { %v2775_v16 = vsel %vm2770_vm0, %v3396_v15, %v3381_v55  ;;  %v3410_v17 = vpop.permute.xlu1 %3409  ;;  %v2773_v18 = vsel %vm2770_vm0, %v3397_v12, %v3386_v1 }
 0x20e   : > { %2808 = vmatpush.msrb.mxu1 %v2775_v16  ;;  %v3411_v19 = vunpack.i.l.bf16 %v3410_v17  ;;  %v3412_v30 = vunpack.i.h.bf16 %v3410_v17 }
 0x210   : > { %2809 = vmatpush.msrb.mxu1 %v2773_v18  ;;  %v2907_v38 = vsel %vm2904_vm1, %v3412_v30, %v3416_v33  ;;  %v2910_v21 = vsel %vm2904_vm1, %v3411_v19, %v3401_v28 }
 0x212   : > { %3167 = vmatmul.msk.f32.gmra.mxu1 %vm1903_vm9, %v3161_v8  ;;  %v3405_v26 = vpop.permute.xlu0 %3404 }
 0x213   : > { %3159 = vmatmul.msk.f32.gmra.mxu3 %vm1903_vm9, %v4625_v37  ;;  %v3407_v31 = vunpack.i.h.bf16 %v3405_v26  ;;  %2810 = vmatpush.msrb.mxu1 %v2771_v27  ;;  %v3406_v34 = vunpack.i.l.bf16 %v3405_v26  ;;  %v3196_v37 = vld [vmem:[%s4831_s0 + $0xa8] sm:$0xff]  ;;  %v1982_v54 = vpop.f32.mrf.mxu2 }
 0x214   : > { %3178 = vmatmul.msk.f32.vlgmr.msra.gmra.mxu0 %vm1903_vm9, %v3172_v22  ;;  %3187 = vmatmul.msk.f32.vlgmr.msra.gmra.mxu2 %vm1903_vm9, %v3184_v23 }
 0x215   : > { %2994 = vmatpush.msra.mxu2 %v3401_v28  ;;  %v2909_v35 = vsel %vm2904_vm1, %v3407_v31, %v3411_v19 }
 0x216   : > { %2942 = vmatpush.msra.mxu0 %v2909_v35 }
 0x217   : > { %2995 = vmatpush.msra.mxu2 %v3402_v32 }
 0x218   : > { %2943 = vmatpush.msra.mxu0 %v2907_v38 }
 0x219   : > { %2996 = vmatpush.msra.mxu2 %v3406_v34 }
 0x21a   : > { %3168 = vmatmul.msk.f32.gmra.mxu1 %vm1903_vm9, %v3162_v14  ;;  %v2889_v42 = vpop.permute.xlu0 %2888 }
 0x21b   : > { %3175 = vmatmul.msk.f32.vlgmr.msra.gmra.mxu3 %vm1903_vm9, %v3172_v22  ;;  %v2905_v44 = vsel %vm2904_vm1, %v3417_v39, %v2889_v42  ;;  %v2906_v46 = vsel %vm2904_vm1, %v2889_v42, %v3406_v34  ;;  %v1985_v50 = vpop.f32.mrf.mxu2 }
 0x21c   : > { %3179 = vmatmul.msk.f32.gmra.mxu0 %vm1903_vm9, %v3173_v53  ;;  %2860 = vmatpush.msra.mxu3 %v3382_v52  ;;  %v3208_v52 = vld [vmem:[%s4831_s0 + $0xc0] sm:$0xff] }
 0x21d   : > { %2944 = vmatpush.msra.mxu0 %v2905_v44  ;;  %3188 = vmatmul.msk.f32.gmra.mxu2 %vm1903_vm9, %v3185_v43 }
 0x21e   : > { %2861 = vmatpush.msra.mxu3 %v3387_v0  ;;  %v3017_v0 = vld [vmem:[%s4832_s1 + $0x8] sm:$0xff] }
 0x21f   : > { %3026 = vperm.xlu2 %3419, %v3017_v0  }
 0x220   : > { %2862 = vmatpush.msra.mxu3 %v3392_v48  ;;  %v3210_v48 = vld [vmem:[%s4831_s0 + $0xd0] sm:$0xff] }
 0x222   : > { %3181 = vmatmul.msk.f32.vlgmr.msra.gmra.mxu1 %vm1903_vm9, %v3172_v22 }
 0x223   : > { %3176 = vmatmul.msk.f32.gmra.mxu3 %vm1903_vm9, %v3173_v53  ;;  %2968 = vmatpush.msra.mxu1 %v2910_v21  ;;  %v1988_v56 = vpop.f32.mrf.mxu2 }
 0x224   : > { %3180 = vmatmul.msk.f32.gmra.mxu0 %vm1903_vm9, %v3174_v58 }
 0x225   : > { %2969 = vmatpush.msra.mxu1 %v2908_v20  ;;  %3189 = vmatmul.msk.f32.gmra.mxu2 %vm1903_vm9, %v3186_v45 }
 0x227   : > { %2970 = vmatpush.msra.mxu1 %v2906_v46 }
 0x22a   : > { %3182 = vmatmul.msk.f32.gmra.mxu1 %vm1903_vm9, %v3173_v53 }
 0x22b   : > { %3177 = vmatmul.msk.f32.gmra.mxu3 %vm1903_vm9, %v3174_v58 }
 0x22c   : > { %3193 = vmatmul.msk.f32.vlgmr.msrb.gmra.mxu0 %vm1903_vm9, %v3184_v23 }
 0x22d   : > { %3202 = vmatmul.msk.f32.vlgmr.msrb.gmra.mxu2 %vm1903_vm9, %v3196_v37 }
 0x232   : > { %3183 = vmatmul.msk.f32.gmra.mxu1 %vm1903_vm9, %v3174_v58 }
 0x233   : > { %3190 = vmatmul.msk.f32.vlgmr.msrb.gmra.mxu3 %vm1903_vm9, %v3184_v23 }
 0x234   : > { %3194 = vmatmul.msk.f32.gmra.mxu0 %vm1903_vm9, %v3185_v43 }
 0x235   : > { %3203 = vmatmul.msk.f32.gmra.mxu2 %vm1903_vm9, %v3197_v49 }
 0x23a   : > { %3199 = vmatmul.msk.f32.vlgmr.msrb.gmra.mxu1 %vm1903_vm9, %v3196_v37 }
 0x23b   : > { %3191 = vmatmul.msk.f32.gmra.mxu3 %vm1903_vm9, %v3185_v43 }
 0x23c   : > { %3195 = vmatmul.msk.f32.gmra.mxu0 %vm1903_vm9, %v3186_v45 }
 0x23d   : > { %3204 = vmatmul.msk.f32.gmra.mxu2 %vm1903_vm9, %v3198_v40 }
 0x23e   : > { %v1930_v63 = vpop.f32.mrf.mxu0 }
 0x23f   : > { %v1956_v59 = vpop.f32.mrf.mxu1 }
 0x242   : > { %3200 = vmatmul.msk.f32.gmra.mxu1 %vm1903_vm9, %v3197_v49 }
 0x243   : > { %3192 = vmatmul.msk.f32.gmra.mxu3 %vm1903_vm9, %v3186_v45 }
 0x244   : > { %3211 = vmatmul.msk.f32.vlgmr.msra.gmra.mxu0 %vm1903_vm9, %v3208_v52 }
 0x245   : > { %v1933_v55 = vpop.f32.mrf.mxu3  ;;  %3217 = vmatmul.msk.f32.vlgmr.msra.gmra.mxu2 %vm1903_vm9, %v3208_v52 }
 0x247   : > { %v1959_v57 = vpop.f32.mrf.mxu1 }
 0x249   : > { %v2043_v29 = vpop.f32.mrf.mxu0 }
 0x24a   : > { %v2044_v61 = vadd.f32 %v2043_v29, %v1956_v59  ;;  %3201 = vmatmul.msk.f32.gmra.mxu1 %vm1903_vm9, %v3198_v40 }
 0x24b   : > { %3205 = vmatmul.msk.f32.vlgmr.msra.gmra.mxu3 %vm1903_vm9, %v3196_v37 }
 0x24c   : > { %3212 = vmatmul.msk.f32.gmra.mxu0 %vm1903_vm9, %v3209_v60 }
 0x24d   : > { %3218 = vmatmul.msk.f32.gmra.mxu2 %vm1903_vm9, %v3209_v60  ;;  %v1936_v62 = vpop.f32.mrf.mxu3 }
 0x24f   : > { %v1962_v41 = vpop.f32.mrf.mxu1  ;;  %v2142_v2 = vpop.f32.mrf.mxu2 }
 0x251   : > { %v2046_v1 = vpop.f32.mrf.mxu0 }
 0x252   : > { %v2047_v3 = vadd.f32 %v2046_v1, %v1959_v57  ;;  %3214 = vmatmul.msk.f32.vlgmr.msra.gmra.mxu1 %vm1903_vm9, %v3208_v52 }
 0x253   : > { %3206 = vmatmul.msk.f32.gmra.mxu3 %vm1903_vm9, %v3197_v49 }
 0x254   : > { %3213 = vmatmul.msk.f32.gmra.mxu0 %vm1903_vm9, %v3210_v48 }
 0x255   : > { %3219 = vmatmul.msk.f32.gmra.mxu2 %vm1903_vm9, %v3210_v48  ;;  %v2017_v4 = vpop.f32.mrf.mxu3 }
 0x256   : > { %v2018_v8 = vadd.f32 %v2017_v4, %v1930_v63 }
 0x257   : > { %v2069_v5 = vpop.f32.mrf.mxu1  ;;  %v2145_v6 = vpop.f32.mrf.mxu2 }
 0x258   : > { %v2070_v7 = vadd.f32 %v2069_v5, %v1982_v54  ;;  %v2203_v25 = vadd.f32 %v2142_v2, %v2018_v8 }
 0x259   : > { %v2049_v10 = vpop.f32.mrf.mxu0 }
 0x25a   : > { %v2050_v36 = vadd.f32 %v2049_v10, %v1962_v41  ;;  %3215 = vmatmul.msk.f32.gmra.mxu1 %vm1903_vm9, %v3209_v60 }
 0x25b   : > { %3207 = vmatmul.msk.f32.gmra.mxu3 %vm1903_vm9, %v3198_v40 }
 0x25d   : > { %v2020_v13 = vpop.f32.mrf.mxu3 }
 0x25e   : > { %v2021_v14 = vadd.f32 %v2020_v13, %v1933_v55 }
 0x25f   : > { %v2072_v11 = vpop.f32.mrf.mxu1  ;;  %v2148_v12 = vpop.f32.mrf.mxu2 }
 0x260   : > { %v2073_v15 = vadd.f32 %v2072_v11, %v1985_v50  ;;  %v2206_v16 = vadd.f32 %v2145_v6, %v2021_v14 }
 0x261   : > { %v2194_v17 = vpop.f32.mrf.mxu0 }
 0x262   : > { %v2205_v18 = vadd.f32 %v2194_v17, %v2070_v7  ;;  %3216 = vmatmul.msk.f32.gmra.mxu1 %vm1903_vm9, %v3210_v48 }
 0x265   : > { %v2023_v19 = vpop.f32.mrf.mxu3 }
 0x266   : > { %v2024_v22 = vadd.f32 %v2023_v19, %v1936_v62 }
 0x267   : > { %v2075_v23 = vpop.f32.mrf.mxu1  ;;  %v2302_v24 = vpop.f32.mrf.mxu2 }
 0x268   : > { %v2076_v26 = vadd.f32 %v2075_v23, %v1988_v56  ;;  %v2209_v27 = vadd.f32 %v2148_v12, %v2024_v22 }
 0x269   : > { %v2197_v28 = vpop.f32.mrf.mxu0 }
 0x26a   : > { %v2208_v30 = vadd.f32 %v2197_v28, %v2073_v15 }
 0x26e   : > { %v2168_v31 = vpop.f32.mrf.mxu3 }
 0x26f   : > { %v2204_v32 = vadd.f32 %v2168_v31, %v2044_v61  ;;  %v2276_v33 = vpop.f32.mrf.mxu1  ;;  %v2305_v34 = vpop.f32.mrf.mxu2 }
 0x270   : > { %v2337_v35 = vadd.f32 %v2276_v33, %v2203_v25 }
 0x271   : > { %v2200_v38 = vpop.f32.mrf.mxu0  ;;  %v2338_v39 = vadd.f32 %v2302_v24, %v2204_v32 }
 0x272   : > { %v2211_v53 = vadd.f32 %v2200_v38, %v2076_v26  ;;  %v3022_v38 = vpop.permute.xlu1 %3021 }
 0x276   : > { %v2171_v42 = vpop.f32.mrf.mxu3 }
 0x277   : > { %v2207_v43 = vadd.f32 %v2171_v42, %v2047_v3  ;;  %v2279_v44 = vpop.f32.mrf.mxu1  ;;  %v2308_v58 = vpop.f32.mrf.mxu2 }
 0x278   : > { %v2340_v21 = vadd.f32 %v2279_v44, %v2206_v16 }
 0x279   : > { %v2341_v45 = vadd.f32 %v2305_v34, %v2207_v43  ;;  %v2410_v20 = vpop.f32.mrf.mxu0 }
 0x27a   : > { %v2471_v46 = vadd.f32 %v2410_v20, %v2337_v35 }
 0x27e   : > { %v2174_v37 = vpop.f32.mrf.mxu3 }
 0x27f   : > { %v2210_v9 = vadd.f32 %v2174_v37, %v2050_v36  ;;  %v2282_v47 = vpop.f32.mrf.mxu1  ;;  %v2462_v54 = vpop.f32.mrf.mxu2 }
 0x280   : > { %v2343_v49 = vadd.f32 %v2282_v47, %v2209_v27 }
 0x281   : > { %v2344_v40 = vadd.f32 %v2308_v58, %v2210_v9  ;;  %v2413_v50 = vpop.f32.mrf.mxu0 }
 0x282   : > { %v2474_v63 = vadd.f32 %v2413_v50, %v2340_v21 }
 0x286   : > { %v2328_v59 = vpop.f32.mrf.mxu3 }
 0x287   : > { %v2339_v51 = vadd.f32 %v2328_v59, %v2205_v18  ;;  %v2436_v52 = vpop.f32.mrf.mxu1  ;;  %v2465_v55 = vpop.f32.mrf.mxu2 }
 0x288   : > { %v2472_v56 = vadd.f32 %v2436_v52, %v2338_v39 }
 0x289   : > { %v2416_v57 = vpop.f32.mrf.mxu0  ;;  %v2473_v29 = vadd.f32 %v2462_v54, %v2339_v51 }
 0x28a   : > { %v2477_v60 = vadd.f32 %v2416_v57, %v2343_v49 }
 0x28e   : > { %v2331_v61 = vpop.f32.mrf.mxu3 }
 0x28f   : > { %v2342_v62 = vadd.f32 %v2331_v61, %v2208_v30  ;;  %v2439_v41 = vpop.f32.mrf.mxu1  ;;  %v2468_v2 = vpop.f32.mrf.mxu2 }
 0x290   : > { %v2475_v0 = vadd.f32 %v2439_v41, %v2341_v45  ;;  %v3032_v41 = vpop.permute.xlu0 %3031 }
 0x291   : > { %v4792_v1 = vadd.f32 %v2465_v55, %v2342_v62  ;;  %v2570_v48 = vpop.f32.mrf.mxu0 }
 0x292   : > { %v2606_v21 = vadd.f32 %v2570_v48, %v2472_v56 }
 0x296   : > { %v2334_v3 = vpop.f32.mrf.mxu3 }
 0x297   : > { %v2345_v4 = vadd.f32 %v2334_v3, %v2211_v53  ;;  %v2442_v8 = vpop.f32.mrf.mxu1  ;;  %v2678_v5 = vpop.f32.mrf.mxu2 }
 0x298   : > { %v4794_v6 = vadd.f32 %v2442_v8, %v2344_v40 }
 0x299   : > { %v4796_v7 = vadd.f32 %v2468_v2, %v2345_v4  ;;  %v2573_v10 = vpop.f32.mrf.mxu0 }
 0x29a   : > { %v2609_v57 = vadd.f32 %v2573_v10, %v2475_v0 }
 0x29e   : > { %v2544_v25 = vpop.f32.mrf.mxu3 }
 0x29f   : > { %v2596_v36 = vpop.f32.mrf.mxu1  ;;  %v2605_v28 = vadd.f32 %v2544_v25, %v2471_v46  ;;  %v3027_v46 = vpop.permute.xlu2 %3026 }
 0x2a0   : > { %v2681_v13 = vpop.f32.mrf.mxu2  ;;  %v2607_v49 = vadd.f32 %v2596_v36, %v2473_v29 }
 0x2a1   : > { %v4798_v14 = vpop.f32.mrf.mxu0  ;;  %v2739_v30 = vadd.f32 %v2678_v5, %v2605_v28 }
 0x2a6   : > { %v2547_v11 = vpop.f32.mrf.mxu3 }
 0x2a7   : > { %v2599_v12 = vpop.f32.mrf.mxu1  ;;  %v2608_v39 = vadd.f32 %v2547_v11, %v2474_v63  ;;  %v2612_v11 = vadd.f32 %v4798_v14, %v4794_v6 }
 0x2a8   : > { %v2684_v15 = vpop.f32.mrf.mxu2  ;;  %v2610_v3 = vadd.f32 %v2599_v12, %v4792_v1 }
 0x2a9   : > { %v2730_v16 = vpop.f32.mrf.mxu0  ;;  %v2742_v43 = vadd.f32 %v2681_v13, %v2608_v39 }
 0x2aa   : > { %v2741_v50 = vadd.f32 %v2730_v16, %v2607_v49 }
 0x2ae   : > { %v2550_v17 = vpop.f32.mrf.mxu3 }
 0x2af   : > { %v4800_v18 = vpop.f32.mrf.mxu1  ;;  %v2611_v37 = vadd.f32 %v2550_v17, %v2477_v60 }
 0x2b0   : > { %v2838_v19 = vpop.f32.mrf.mxu2  ;;  %v2613_v17 = vadd.f32 %v4800_v18, %v4796_v7 }
 0x2b1   : > { %v2733_v22 = vpop.f32.mrf.mxu0  ;;  %v2745_v63 = vadd.f32 %v2684_v15, %v2611_v37 }
 0x2b2   : > { %v2744_v25 = vadd.f32 %v2733_v22, %v2610_v3 }
 0x2b6   : > { %v2704_v23 = vpop.f32.mrf.mxu3 }
 0x2b7   : > { %v2812_v24 = vpop.f32.mrf.mxu1  ;;  %v2740_v9 = vadd.f32 %v2704_v23, %v2606_v21 }
 0x2b8   : > { %v2841_v26 = vpop.f32.mrf.mxu2  ;;  %v2873_v33 = vadd.f32 %v2812_v24, %v2739_v30 }
 0x2b9   : > { %v4802_v27 = vpop.f32.mrf.mxu0  ;;  %v2874_v59 = vadd.f32 %v2838_v19, %v2740_v9 }
 0x2ba   : > { %v2747_v22 = vadd.f32 %v4802_v27, %v2613_v17 }
 0x2be   : > { %v2707_v31 = vpop.f32.mrf.mxu3 }
 0x2bf   : > { %v2815_v32 = vpop.f32.mrf.mxu1  ;;  %v2743_v2 = vadd.f32 %v2707_v31, %v2609_v57 }
 0x2c0   : > { %v2844_v34 = vpop.f32.mrf.mxu2  ;;  %v2876_v45 = vadd.f32 %v2815_v32, %v2742_v43 }
 0x2c1   : > { %v2946_v35 = vpop.f32.mrf.mxu0  ;;  %v2877_v0 = vadd.f32 %v2841_v26, %v2743_v2 }
 0x2c2   : > { %v3007_v53 = vadd.f32 %v2946_v35, %v2873_v33 }
 0x2c4   : > { %v3034_v42 = vadd.f32 %v3022_v38, %v3007_v53 }
 0x2c6   : > { %3043 = vst [vmem:[%s4808_s27] sm:$0xff] %v3034_v42  ;;  %v2710_v44 = vpop.f32.mrf.mxu3 }
 0x2c7   : > { %v2818_v58 = vpop.f32.mrf.mxu1  ;;  %v2746_v1 = vadd.f32 %v2710_v44, %v2612_v11 }
 0x2c8   : > { %v2998_v54 = vpop.f32.mrf.mxu2  ;;  %v2879_v56 = vadd.f32 %v2818_v58, %v2745_v63 }
 0x2c9   : > { %v2949_v20 = vpop.f32.mrf.mxu0  ;;  %v2880_v23 = vadd.f32 %v2844_v34, %v2746_v1 }
 0x2ca   : > { %v3010_v47 = vadd.f32 %v2949_v20, %v2876_v45 }
 0x2cc   : > { %v3037_v40 = vadd.f32 %v3027_v46, %v3010_v47 }
 0x2ce   : > { %3047 = vst [vmem:[%s4808_s27 + $0x18] sm:$0xff] %v3037_v40  ;;  %v2864_v51 = vpop.f32.mrf.mxu3 }
 0x2cf   : > { %v2875_v52 = vadd.f32 %v2864_v51, %v2741_v50  ;;  %v2972_v55 = vpop.f32.mrf.mxu1 }
 0x2d0   : > { %v3008_v61 = vadd.f32 %v2972_v55, %v2874_v59  ;;  %v3001_v5 = vpop.f32.mrf.mxu2 }
 0x2d1   : > { %v2952_v62 = vpop.f32.mrf.mxu0  ;;  %v3009_v60 = vadd.f32 %v2998_v54, %v2875_v52 }
 0x2d2   : > { %v3013_v48 = vadd.f32 %v2952_v62, %v2879_v56  ;;  %v3035_v29 = vadd.f32 %v3022_v38, %v3008_v61 }
 0x2d3   : > { %v3036_v4 = vadd.f32 %v3022_v38, %v3009_v60 }
 0x2d4   : > { %3044 = vst [vmem:[%s4808_s27 + $0x8] sm:$0xff] %v3035_v29  ;;  %v3040_v8 = vadd.f32 %v3032_v41, %v3013_v48 }
 0x2d5   : > { %3046 = vst.msk [vmem:[%s4808_s27 + $0x10] sm:$0xff] %vm3045_vm2, %v3036_v4 }
 0x2d6   : > { %3050 = vst [vmem:[%s4808_s27 + $0x30] sm:$0xff] %v3040_v8  ;;  %v2867_v10 = vpop.f32.mrf.mxu3 }
 0x2d7   : > { %v2878_v36 = vadd.f32 %v2867_v10, %v2744_v25  ;;  %v2975_v13 = vpop.f32.mrf.mxu1 }
 0x2d8   : > { %v3011_v15 = vadd.f32 %v2975_v13, %v2877_v0  ;;  %v3004_v26 = vpop.f32.mrf.mxu2 }
 0x2d9   : > { %v3012_v16 = vadd.f32 %v3001_v5, %v2878_v36 }
 0x2da   : > { %v3038_v12 = vadd.f32 %v3027_v46, %v3011_v15 }
 0x2db   : > { %v3039_v19 = vadd.f32 %v3027_v46, %v3012_v16 }
 0x2dc   : > { %3048 = vst [vmem:[%s4808_s27 + $0x20] sm:$0xff] %v3038_v12 }
 0x2dd   : > { %3049 = vst.msk [vmem:[%s4808_s27 + $0x28] sm:$0xff] %vm3045_vm2, %v3039_v19 }
 0x2de   : > { %v2870_v24 = vpop.f32.mrf.mxu3 }
 0x2df   : > { %v2881_v28 = vadd.f32 %v2870_v24, %v2747_v22  ;;  %v2978_v6 = vpop.f32.mrf.mxu1 }
 0x2e0   : > { %v3014_v14 = vadd.f32 %v2978_v6, %v2880_v23 }
 0x2e1   : > { %v3015_v30 = vadd.f32 %v3004_v26, %v2881_v28 }
 0x2e2   : > { %v3041_v31 = vadd.f32 %v3032_v41, %v3014_v14 }
 0x2e3   : > { %v3042_v32 = vadd.f32 %v3032_v41, %v3015_v30 }
 0x2e4   : > { %3051 = vst [vmem:[%s4808_s27 + $0x38] sm:$0xff] %v3041_v31 }
 0x2e5   : > { %3052 = vst.msk [vmem:[%s4808_s27 + $0x40] sm:$0xff] %vm3045_vm2, %v3042_v32 }
 0x2e6 PF: > { %s13_s12 = sadd.s32 1, %s3427_s12  }
 0x2e7   : > { %p10_p4 = scmp.ge.s32.totalorder %s13_s12, 4  }
 0x2e9   :  { %12 = sbr.rel (!%p10_p4) target bundleno = 1 (0x1), region = 70 }

</bundles_post_ra>
